<compile_context>
chip_gen: v6e
topology: v6e:2x2x1
jax: 0.10.0
libtpu: 0.0.40
codegen_flags: <defaults>
</compile_context>

<pallas_src>
import math

import jax
import jax.numpy as jnp
from jax.experimental import pallas as pl
from jax.experimental.pallas import tpu as pltpu

ODE_UNFOLDS = 6  # LTCCell default ode_solver_unfolds


# -----------------------------------------------------------------------------
# Kernel: one grid step == one (batch block, time block).
#   1) vectorized sensory pre-pass over the whole block -> wns/wds stashes
#   2) serial time loop carrying the recurrent state (ODE unroll only)
#   3) one batched fc_out matmul + one slab store
# -----------------------------------------------------------------------------
def _ltc_block_kernel(x_ref, input_w_ref, input_b_ref,
                      smu_ref, ssig_ref, sW_ref, serev_ref,
                      mu_ref, sig_ref, W_ref, erev_ref,
                      vleak_ref, gleak_ref, cm_ref,
                      fcW_ref, fcb_ref,
                      out_ref, state_ref, vstash_ref, wns_ref, wds_ref):
    tb = pl.program_id(1)  # time-block index (MUST be the innermost grid axis)

    # h0 = zeros for every batch block (matches torch.zeros(batch, hidden)).
    @pl.when(tb == 0)
    def _():
        state_ref[...] = jnp.zeros_like(state_ref)

    TT, BB, I = x_ref.shape
    H = state_ref.shape[-1]
    O = out_ref.shape[-1]

    def _sig(z):
        # sigmoid(z) == 0.5*(tanh(0.5*z)+1): one EUP op instead of exp+divide.
        return 0.5 * (jnp.tanh(0.5 * z) + 1.0)

    # ---- hoisted sensory pre-pass over the whole (TT, BB) block -------------
    input_w = input_w_ref[...]   # (1, I)
    input_b = input_b_ref[...]   # (1, I)
    smu = smu_ref[...]           # (I, H)
    ssig = ssig_ref[...]         # (I, H)
    sW = sW_ref[...]             # (I, H)
    serev = serev_ref[...]       # (I, H)

    x_all = x_ref[...] * input_w + input_b                     # (TT, BB, I)
    x2 = x_all.reshape(TT * BB, I)                             # (TT*BB, I)
    s_act = sW * _sig(ssig * (x2[:, :, None] - smu))           # (TT*BB, I, H)
    wns_ref[...] = jnp.sum(s_act * serev, axis=1).reshape(TT, BB, H)
    wds_ref[...] = jnp.sum(s_act, axis=1).reshape(TT, BB, H)

    # ---- hoist loop-invariant recurrent parameters ---------------------------
    mu = mu_ref[...]             # (H, H)
    sigma = sig_ref[...]         # (H, H)
    W = W_ref[...]               # (H, H)
    erev = erev_ref[...]         # (H, H)
    vleak = vleak_ref[...]       # (1, H)
    gleak = gleak_ref[...]       # (1, H)
    cm_t = cm_ref[...]           # (1, H)
    gl_vl = gleak * vleak        # loop-invariant
    cm_gl = cm_t + gleak         # loop-invariant

    def time_body(i, v):
        wns = wns_ref[i]                                        # (BB, H)
        wds = wds_ref[i]                                        # (BB, H)

        # ---- semi-implicit (hybrid Euler) ODE unroll --------------------------
        def ode_body(_, vv):
            w_act = W * _sig(sigma * (vv[:, :, None] - mu))     # (BB, H, H)
            wn = jnp.sum(w_act * erev, axis=1) + wns
            wd = jnp.sum(w_act, axis=1) + wds
            num = cm_t * vv + gl_vl + wn
            den = cm_gl + wd
            # Exact divide kept for 1e-4 parity with the reference.
            return num / den

        v = jax.lax.fori_loop(0, ODE_UNFOLDS, ode_body, v, unroll=True)
        vstash_ref[i] = v                                       # stash for fc_out
        return v

    v_final = jax.lax.fori_loop(0, TT, time_body, state_ref[...])
    state_ref[...] = v_final  # carry recurrent state to the next time block

    # ---- fc_out: one (TT*BB, H) @ (H, O) matmul + one slab store -------------
    fcW = fcW_ref[...]            # (H, O)
    fcb = fcb_ref[...]            # (1, O)
    v2 = vstash_ref[...].reshape(TT * BB, H)
    y = jnp.dot(v2, fcW, preferred_element_type=jnp.float32) + fcb
    out_ref[...] = y.reshape(TT, BB, O).astype(out_ref.dtype)


# -----------------------------------------------------------------------------
# Hidden-dim padding: pad H up to a multiple of 128 lanes with *inert* units.
# Padded units: zero W / sensory_W / fc_w coupling, cm=gleak=1, vleak=0, so
# their state stays exactly 0 and they contribute exactly 0 to real units.
# -----------------------------------------------------------------------------
def _pad_hidden(params, H, Hp):
    if Hp == H:
        return params
    ph = Hp - H
    p = dict(params)
    pad_c = lambda a, val: jnp.pad(a, ((0, 0), (0, ph)), constant_values=val)
    p["sensory_mu"] = pad_c(p["sensory_mu"], 0.5)
    p["sensory_sigma"] = pad_c(p["sensory_sigma"], 1.0)
    p["sensory_W"] = pad_c(p["sensory_W"], 0.0)
    p["sensory_erev"] = pad_c(p["sensory_erev"], 0.0)
    p["mu"] = jnp.pad(p["mu"], ((0, ph), (0, ph)), constant_values=0.5)
    p["sigma"] = jnp.pad(p["sigma"], ((0, ph), (0, ph)), constant_values=1.0)
    p["W"] = jnp.pad(p["W"], ((0, ph), (0, ph)), constant_values=0.0)
    p["erev"] = jnp.pad(p["erev"], ((0, ph), (0, ph)), constant_values=0.0)
    p["vleak"] = pad_c(p["vleak"], 0.0)
    p["gleak"] = pad_c(p["gleak"], 1.0)
    p["cm_t"] = pad_c(p["cm_t"], 1.0)
    p["fc_w"] = jnp.pad(p["fc_w"], ((0, ph), (0, 0)), constant_values=0.0)
    return p


# -----------------------------------------------------------------------------
# Wrapper
# -----------------------------------------------------------------------------
def ltc_model_forward(x_bti, params, block_t=None, block_b=None):
    """x_bti: [B, T, I] float32 -> [B, T, O] float32."""
    B, T, I = x_bti.shape
    H = params["W"].shape[0]
    O = params["fc_w"].shape[1]

    # Lane-pad the hidden dimension (padded units are inert; see _pad_hidden).
    Hp = ((H + 127) // 128) * 128
    p = _pad_hidden(params, H, Hp)

    if block_b is None:
        # TODO(synk): on v7x pass block_b = B // 2 so the "parallel" batch axis
        #             actually shards across the 2 TensorCores.
        block_b = B
    if block_t is None:
        # Largest divisor of T that is <= 128.
        # TODO(synk): pad T in the wrapper for prime/odd T instead of falling
        #             back to tiny time blocks.
        block_t = max(d for d in range(1, min(T, 128) + 1) if T % d == 0)
    assert T % block_t == 0, "block_t must divide T"
    assert B % block_b == 0, "block_b must divide B"

    # Time-major so per-timestep access inside the kernel is a cheap
    # leading-axis dynamic index.
    x_tbi = jnp.transpose(x_bti, (1, 0, 2))       # (T, B, I)

    n_bb = B // block_b
    n_tb = T // block_t

    def rep(shape):  # parameter: full block, constant block index
        return pl.BlockSpec(shape, lambda bb, tb, _n=len(shape): (0,) * _n)

    in_specs = [
        pl.BlockSpec((block_t, block_b, I), lambda bb, tb: (tb, bb, 0)),  # x block
        rep((1, I)), rep((1, I)),                     # input_w, input_b
        rep((I, Hp)), rep((I, Hp)),                   # sensory_mu, sensory_sigma
        rep((I, Hp)), rep((I, Hp)),                   # sensory_W, sensory_erev
        rep((Hp, Hp)), rep((Hp, Hp)),                 # mu, sigma
        rep((Hp, Hp)), rep((Hp, Hp)),                 # W, erev
        rep((1, Hp)), rep((1, Hp)), rep((1, Hp)),     # vleak, gleak, cm_t
        rep((Hp, O)), rep((1, O)),                    # fc_w, fc_b
    ]

    # NOTE: grid order is (batch blocks, time blocks): time MUST stay the last
    # (innermost-iterating) axis and "arbitrary" so the state scratch carries
    # the recurrence correctly.
    out_tbo = pl.pallas_call(
        _ltc_block_kernel,
        out_shape=jax.ShapeDtypeStruct((T, B, O), jnp.float32),
        grid_spec=pltpu.PrefetchScalarGridSpec(
            num_scalar_prefetch=0,
            grid=(n_bb, n_tb),
            in_specs=in_specs,
            out_specs=pl.BlockSpec((block_t, block_b, O), lambda bb, tb: (tb, bb, 0)),
            scratch_shapes=[
                pltpu.VMEM((block_b, Hp), jnp.float32),           # recurrent state
                pltpu.VMEM((block_t, block_b, Hp), jnp.float32),  # per-block v stash
                pltpu.VMEM((block_t, block_b, Hp), jnp.float32),  # wns stash
                pltpu.VMEM((block_t, block_b, Hp), jnp.float32),  # wds stash
            ],
        ),
        compiler_params=pltpu.CompilerParams(
            dimension_semantics=("parallel", "arbitrary")),       # time is a recurrence
    )(x_tbi,
      p["input_w"], p["input_b"],
      p["sensory_mu"], p["sensory_sigma"],
      p["sensory_W"], p["sensory_erev"],
      p["mu"], p["sigma"], p["W"], p["erev"],
      p["vleak"], p["gleak"], p["cm_t"],
      p["fc_w"], p["fc_b"])

    return jnp.transpose(out_tbo, (1, 0, 2))         # back to [B, T, O]


# -----------------------------------------------------------------------------
# Deterministic parameter initialization (mirrors LTCCell._build_parameters
# init ranges; synthetic weights, no checkpoint load).
# -----------------------------------------------------------------------------
def init_params(key, input_size, hidden_size, output_size):
    ks = jax.random.split(key, 12)
    I, H, O = input_size, hidden_size, output_size
    u = lambda k, shape, lo, hi: jax.random.uniform(
        k, shape, jnp.float32, minval=lo, maxval=hi)
    pm1 = lambda k, shape: (2.0 * jax.random.randint(k, shape, 0, 2) - 1.0
                            ).astype(jnp.float32)
    bound = 1.0 / math.sqrt(H)
    return {
        "input_w": jnp.ones((1, I), jnp.float32),          # Affine mapping init
        "input_b": jnp.zeros((1, I), jnp.float32),
        "sensory_mu": u(ks[0], (I, H), 0.3, 0.8),
        "sensory_sigma": u(ks[1], (I, H), 3.0, 8.0),
        "sensory_W": u(ks[2], (I, H), 0.01, 1.0),
        "sensory_erev": pm1(ks[3], (I, H)),
        "mu": u(ks[4], (H, H), 0.3, 0.8),
        "sigma": u(ks[5], (H, H), 3.0, 8.0),
        "W": u(ks[6], (H, H), 0.01, 1.0),
        "erev": pm1(ks[7], (H, H)),
        "vleak": u(ks[8], (1, H), -0.2, 0.2),
        "gleak": jnp.ones((1, H), jnp.float32),             # gleak_init_min == max == 1
        "cm_t": jnp.full((1, H), 0.5, jnp.float32),         # cm_init_min == max == 0.5
        "fc_w": u(ks[9], (H, O), -bound, bound),            # nn.Linear-style init
        "fc_b": u(ks[10], (1, O), -bound, bound),
    }


# -----------------------------------------------------------------------------
# Pure-JAX reference (mirrors the PyTorch module) for a sanity check.
# -----------------------------------------------------------------------------
def ltc_reference(x_bti, p):
    B, T, I = x_bti.shape
    H = p["W"].shape[0]
    h = jnp.zeros((B, H), jnp.float32)
    outs = []
    for t in range(T):
        x = x_bti[:, t, :] * p["input_w"] + p["input_b"]
        s_act = p["sensory_W"] * jax.nn.sigmoid(
            p["sensory_sigma"] * (x[:, :, None] - p["sensory_mu"]))
        wns = jnp.sum(s_act * p["sensory_erev"], axis=1)
        wds = jnp.sum(s_act, axis=1)
        v = h
        for _ in range(ODE_UNFOLDS):
            w_act = p["W"] * jax.nn.sigmoid(p["sigma"] * (v[:, :, None] - p["mu"]))
            wn = jnp.sum(w_act * p["erev"], axis=1) + wns
            wd = jnp.sum(w_act, axis=1) + wds
            v = (p["cm_t"] * v + p["gleak"] * p["vleak"] + wn) / (
                p["cm_t"] + p["gleak"] + wd)
        h = v
        outs.append(v @ p["fc_w"] + p["fc_b"])
    return jnp.stack(outs, axis=1)


if __name__ == "__main__":
    B, T, I, H, O = 2, 32, 4, 32, 8
    key = jax.random.PRNGKey(0)
    k_x, k_p = jax.random.split(key)
    x = jax.random.normal(k_x, (B, T, I), jnp.float32)
    params = init_params(k_p, I, H, O)

    # block_t=16 -> 2 time blocks, so state carry across grid steps is exercised.
    y = ltc_model_forward(x, params, block_t=16)
    y = jax.block_until_ready(y)

    y_ref = ltc_reference(x, params)
    assert y.shape == (B, T, O)
    assert jnp.allclose(y, y_ref, atol=1e-4, rtol=1e-4), "mismatch vs reference"

    print("KERNEL_OK")
</pallas_src>

<mosaic_0001>
module attributes {stable_mosaic.version = 11 : i64} {
  func.func @_ltc_block_kernel(%arg0: i32, %arg1: i32, %arg2: memref<16x2x4xf32, #tpu.memory_space<vmem>>, %arg3: memref<1x4xf32, #tpu.memory_space<vmem>>, %arg4: memref<1x4xf32, #tpu.memory_space<vmem>>, %arg5: memref<4x128xf32, #tpu.memory_space<vmem>>, %arg6: memref<4x128xf32, #tpu.memory_space<vmem>>, %arg7: memref<4x128xf32, #tpu.memory_space<vmem>>, %arg8: memref<4x128xf32, #tpu.memory_space<vmem>>, %arg9: memref<128x128xf32, #tpu.memory_space<vmem>>, %arg10: memref<128x128xf32, #tpu.memory_space<vmem>>, %arg11: memref<128x128xf32, #tpu.memory_space<vmem>>, %arg12: memref<128x128xf32, #tpu.memory_space<vmem>>, %arg13: memref<1x128xf32, #tpu.memory_space<vmem>>, %arg14: memref<1x128xf32, #tpu.memory_space<vmem>>, %arg15: memref<1x128xf32, #tpu.memory_space<vmem>>, %arg16: memref<128x8xf32, #tpu.memory_space<vmem>>, %arg17: memref<1x8xf32, #tpu.memory_space<vmem>>, %arg18: memref<16x2x8xf32, #tpu.memory_space<vmem>>, %arg19: memref<2x128xf32, #tpu.memory_space<vmem>>, %arg20: memref<16x2x128xf32, #tpu.memory_space<vmem>>, %arg21: memref<16x2x128xf32, #tpu.memory_space<vmem>>, %arg22: memref<16x2x128xf32, #tpu.memory_space<vmem>>) attributes {dimension_semantics = [#tpu.dimension_semantics<parallel>, #tpu.dimension_semantics<arbitrary>], iteration_bounds = array<i64: 1, 2>, scalar_prefetch = 0 : i64, scratch_operands = 4 : i64, tpu.core_type = #tpu.core_type<tc>, window_params = [{transform_indices = @transform_0, window_bounds = array<i64: 16, 2, 4>}, {pipeline_mode = #tpu.pipeline_mode<synchronous>, transform_indices = @transform_1, window_bounds = array<i64: 1, 4>}, {pipeline_mode = #tpu.pipeline_mode<synchronous>, transform_indices = @transform_2, window_bounds = array<i64: 1, 4>}, {pipeline_mode = #tpu.pipeline_mode<synchronous>, transform_indices = @transform_3, window_bounds = array<i64: 4, 128>}, {pipeline_mode = #tpu.pipeline_mode<synchronous>, transform_indices = @transform_4, window_bounds = array<i64: 4, 128>}, {pipeline_mode = #tpu.pipeline_mode<synchronous>, transform_indices = @transform_5, window_bounds = array<i64: 4, 128>}, {pipeline_mode = #tpu.pipeline_mode<synchronous>, transform_indices = @transform_6, window_bounds = array<i64: 4, 128>}, {pipeline_mode = #tpu.pipeline_mode<synchronous>, transform_indices = @transform_7, window_bounds = array<i64: 128, 128>}, {pipeline_mode = #tpu.pipeline_mode<synchronous>, transform_indices = @transform_8, window_bounds = array<i64: 128, 128>}, {pipeline_mode = #tpu.pipeline_mode<synchronous>, transform_indices = @transform_9, window_bounds = array<i64: 128, 128>}, {pipeline_mode = #tpu.pipeline_mode<synchronous>, transform_indices = @transform_10, window_bounds = array<i64: 128, 128>}, {pipeline_mode = #tpu.pipeline_mode<synchronous>, transform_indices = @transform_11, window_bounds = array<i64: 1, 128>}, {pipeline_mode = #tpu.pipeline_mode<synchronous>, transform_indices = @transform_12, window_bounds = array<i64: 1, 128>}, {pipeline_mode = #tpu.pipeline_mode<synchronous>, transform_indices = @transform_13, window_bounds = array<i64: 1, 128>}, {pipeline_mode = #tpu.pipeline_mode<synchronous>, transform_indices = @transform_14, window_bounds = array<i64: 128, 8>}, {pipeline_mode = #tpu.pipeline_mode<synchronous>, transform_indices = @transform_15, window_bounds = array<i64: 1, 8>}, {transform_indices = @transform_16, window_bounds = array<i64: 16, 2, 8>}]} {
    %c0_i32 = arith.constant 0 : i32
    %0 = arith.cmpi eq, %arg1, %c0_i32 : i32
    %1 = arith.extui %0 : i1 to i32
    %c0_i32_0 = arith.constant 0 : i32
    %2 = arith.cmpi ne, %1, %c0_i32_0 : i32
    scf.if %2 {
      %cst_56 = arith.constant 0.000000e+00 : f32
      %66 = vector.broadcast %cst_56 : f32 to vector<2x128xf32>
      %c0_57 = arith.constant 0 : index
      %c0_58 = arith.constant 0 : index
      %67 = vector.load %arg19[%c0_57, %c0_58] : memref<2x128xf32, #tpu.memory_space<vmem>>, vector<2x128xf32>
      tpu.vector_store %arg19[%c0_57, %c0_58], %66 {strides = array<i32>} : memref<2x128xf32, #tpu.memory_space<vmem>>, vector<2x128xf32>,
    } else {
    }
    %c0 = arith.constant 0 : index
    %c0_1 = arith.constant 0 : index
    %3 = vector.load %arg3[%c0, %c0_1] : memref<1x4xf32, #tpu.memory_space<vmem>>, vector<1x4xf32>
    %c0_2 = arith.constant 0 : index
    %c0_3 = arith.constant 0 : index
    %4 = vector.load %arg4[%c0_2, %c0_3] : memref<1x4xf32, #tpu.memory_space<vmem>>, vector<1x4xf32>
    %c0_4 = arith.constant 0 : index
    %c0_5 = arith.constant 0 : index
    %5 = vector.load %arg5[%c0_4, %c0_5] : memref<4x128xf32, #tpu.memory_space<vmem>>, vector<4x128xf32>
    %c0_6 = arith.constant 0 : index
    %c0_7 = arith.constant 0 : index
    %6 = vector.load %arg6[%c0_6, %c0_7] : memref<4x128xf32, #tpu.memory_space<vmem>>, vector<4x128xf32>
    %c0_8 = arith.constant 0 : index
    %c0_9 = arith.constant 0 : index
    %7 = vector.load %arg7[%c0_8, %c0_9] : memref<4x128xf32, #tpu.memory_space<vmem>>, vector<4x128xf32>
    %c0_10 = arith.constant 0 : index
    %c0_11 = arith.constant 0 : index
    %8 = vector.load %arg8[%c0_10, %c0_11] : memref<4x128xf32, #tpu.memory_space<vmem>>, vector<4x128xf32>
    %c0_12 = arith.constant 0 : index
    %c0_13 = arith.constant 0 : index
    %c0_14 = arith.constant 0 : index
    %9 = vector.load %arg2[%c0_12, %c0_13, %c0_14] : memref<16x2x4xf32, #tpu.memory_space<vmem>>, vector<16x2x4xf32>
    %10 = vector.shape_cast %3 : vector<1x4xf32> to vector<1x1x4xf32>
    %11 = vector.broadcast %10 : vector<1x1x4xf32> to vector<16x2x4xf32>
    %12 = arith.mulf %9, %11 : vector<16x2x4xf32>
    %13 = vector.shape_cast %4 : vector<1x4xf32> to vector<1x1x4xf32>
    %14 = vector.broadcast %13 : vector<1x1x4xf32> to vector<16x2x4xf32>
    %15 = arith.addf %12, %14 : vector<16x2x4xf32>
    %16 = vector.shape_cast %15 : vector<16x2x4xf32> to vector<32x4xf32>
    %17 = vector.shape_cast %16 : vector<32x4xf32> to vector<32x4x1xf32>
    %18 = vector.shape_cast %5 : vector<4x128xf32> to vector<1x4x128xf32>
    %19 = vector.broadcast %17 : vector<32x4x1xf32> to vector<32x4x128xf32>
    %20 = vector.broadcast %18 : vector<1x4x128xf32> to vector<32x4x128xf32>
    %21 = arith.subf %19, %20 : vector<32x4x128xf32>
    %22 = vector.shape_cast %6 : vector<4x128xf32> to vector<1x4x128xf32>
    %23 = vector.broadcast %22 : vector<1x4x128xf32> to vector<32x4x128xf32>
    %24 = arith.mulf %23, %21 : vector<32x4x128xf32>
    %cst = arith.constant 5.000000e-01 : f32
    %25 = vector.broadcast %cst : f32 to vector<32x4x128xf32>
    %26 = arith.mulf %25, %24 : vector<32x4x128xf32>
    %27 = math.tanh %26 : vector<32x4x128xf32>
    %cst_15 = arith.constant 1.000000e+00 : f32
    %28 = vector.broadcast %cst_15 : f32 to vector<32x4x128xf32>
    %29 = arith.addf %27, %28 : vector<32x4x128xf32>
    %cst_16 = arith.constant 5.000000e-01 : f32
    %30 = vector.broadcast %cst_16 : f32 to vector<32x4x128xf32>
    %31 = arith.mulf %30, %29 : vector<32x4x128xf32>
    %32 = vector.shape_cast %7 : vector<4x128xf32> to vector<1x4x128xf32>
    %33 = vector.broadcast %32 : vector<1x4x128xf32> to vector<32x4x128xf32>
    %34 = arith.mulf %33, %31 : vector<32x4x128xf32>
    %35 = vector.shape_cast %8 : vector<4x128xf32> to vector<1x4x128xf32>
    %36 = vector.broadcast %35 : vector<1x4x128xf32> to vector<32x4x128xf32>
    %37 = arith.mulf %34, %36 : vector<32x4x128xf32>
    %cst_17 = arith.constant dense<0.000000e+00> : vector<32x128xf32>
    %38 = vector.multi_reduction <add>, %37, %cst_17 [1] : vector<32x4x128xf32> to vector<32x128xf32>
    %39 = vector.shape_cast %38 : vector<32x128xf32> to vector<16x2x128xf32>
    %c0_18 = arith.constant 0 : index
    %c0_19 = arith.constant 0 : index
    %c0_20 = arith.constant 0 : index
    %40 = vector.load %arg21[%c0_18, %c0_19, %c0_20] : memref<16x2x128xf32, #tpu.memory_space<vmem>>, vector<16x2x128xf32>
    tpu.vector_store %arg21[%c0_18, %c0_19, %c0_20], %39 {strides = array<i32>} : memref<16x2x128xf32, #tpu.memory_space<vmem>>, vector<16x2x128xf32>,
    %cst_21 = arith.constant dense<0.000000e+00> : vector<32x128xf32>
    %41 = vector.multi_reduction <add>, %34, %cst_21 [1] : vector<32x4x128xf32> to vector<32x128xf32>
    %42 = vector.shape_cast %41 : vector<32x128xf32> to vector<16x2x128xf32>
    %c0_22 = arith.constant 0 : index
    %c0_23 = arith.constant 0 : index
    %c0_24 = arith.constant 0 : index
    %43 = vector.load %arg22[%c0_22, %c0_23, %c0_24] : memref<16x2x128xf32, #tpu.memory_space<vmem>>, vector<16x2x128xf32>
    tpu.vector_store %arg22[%c0_22, %c0_23, %c0_24], %42 {strides = array<i32>} : memref<16x2x128xf32, #tpu.memory_space<vmem>>, vector<16x2x128xf32>,
    %c0_25 = arith.constant 0 : index
    %c0_26 = arith.constant 0 : index
    %44 = vector.load %arg9[%c0_25, %c0_26] : memref<128x128xf32, #tpu.memory_space<vmem>>, vector<128x128xf32>
    %c0_27 = arith.constant 0 : index
    %c0_28 = arith.constant 0 : index
    %45 = vector.load %arg10[%c0_27, %c0_28] : memref<128x128xf32, #tpu.memory_space<vmem>>, vector<128x128xf32>
    %c0_29 = arith.constant 0 : index
    %c0_30 = arith.constant 0 : index
    %46 = vector.load %arg11[%c0_29, %c0_30] : memref<128x128xf32, #tpu.memory_space<vmem>>, vector<128x128xf32>
    %c0_31 = arith.constant 0 : index
    %c0_32 = arith.constant 0 : index
    %47 = vector.load %arg12[%c0_31, %c0_32] : memref<128x128xf32, #tpu.memory_space<vmem>>, vector<128x128xf32>
    %c0_33 = arith.constant 0 : index
    %c0_34 = arith.constant 0 : index
    %48 = vector.load %arg13[%c0_33, %c0_34] : memref<1x128xf32, #tpu.memory_space<vmem>>, vector<1x128xf32>
    %c0_35 = arith.constant 0 : index
    %c0_36 = arith.constant 0 : index
    %49 = vector.load %arg14[%c0_35, %c0_36] : memref<1x128xf32, #tpu.memory_space<vmem>>, vector<1x128xf32>
    %c0_37 = arith.constant 0 : index
    %c0_38 = arith.constant 0 : index
    %50 = vector.load %arg15[%c0_37, %c0_38] : memref<1x128xf32, #tpu.memory_space<vmem>>, vector<1x128xf32>
    %51 = arith.mulf %49, %48 : vector<1x128xf32>
    %52 = arith.addf %50, %49 : vector<1x128xf32>
    %c0_39 = arith.constant 0 : index
    %c0_40 = arith.constant 0 : index
    %53 = vector.load %arg19[%c0_39, %c0_40] : memref<2x128xf32, #tpu.memory_space<vmem>>, vector<2x128xf32>
    %c0_i32_41 = arith.constant 0 : i32
    %c16_i32 = arith.constant 16 : i32
    %54 = arith.addi %c0_i32_41, %c16_i32 : i32
    %c1_i32 = arith.constant 1 : i32
    %55 = scf.for %arg23 = %c0_i32_41 to %54 step %c1_i32 iter_args(%arg24 = %53) -> (vector<2x128xf32>)  : i32 {
      %66 = arith.index_cast %arg23 : i32 to index
      %c0_56 = arith.constant 0 : index
      %c0_57 = arith.constant 0 : index
      %67 = vector.load %arg21[%66, %c0_56, %c0_57] : memref<16x2x128xf32, #tpu.memory_space<vmem>>, vector<1x2x128xf32>
      %68 = vector.shape_cast %67 : vector<1x2x128xf32> to vector<2x128xf32>
      %69 = arith.index_cast %arg23 : i32 to index
      %c0_58 = arith.constant 0 : index
      %c0_59 = arith.constant 0 : index
      %70 = vector.load %arg22[%69, %c0_58, %c0_59] : memref<16x2x128xf32, #tpu.memory_space<vmem>>, vector<1x2x128xf32>
      %71 = vector.shape_cast %70 : vector<1x2x128xf32> to vector<2x128xf32>
      %c0_i32_60 = arith.constant 0 : i32
      %72 = vector.shape_cast %arg24 : vector<2x128xf32> to vector<2x128x1xf32>
      %73 = vector.shape_cast %44 : vector<128x128xf32> to vector<1x128x128xf32>
      %74 = vector.broadcast %72 : vector<2x128x1xf32> to vector<2x128x128xf32>
      %75 = vector.broadcast %73 : vector<1x128x128xf32> to vector<2x128x128xf32>
      %76 = arith.subf %74, %75 : vector<2x128x128xf32>
      %77 = vector.shape_cast %45 : vector<128x128xf32> to vector<1x128x128xf32>
      %78 = vector.broadcast %77 : vector<1x128x128xf32> to vector<2x128x128xf32>
      %79 = arith.mulf %78, %76 : vector<2x128x128xf32>
      %cst_61 = arith.constant 5.000000e-01 : f32
      %80 = vector.broadcast %cst_61 : f32 to vector<2x128x128xf32>
      %81 = arith.mulf %80, %79 : vector<2x128x128xf32>
      %82 = math.tanh %81 : vector<2x128x128xf32>
      %cst_62 = arith.constant 1.000000e+00 : f32
      %83 = vector.broadcast %cst_62 : f32 to vector<2x128x128xf32>
      %84 = arith.addf %82, %83 : vector<2x128x128xf32>
      %cst_63 = arith.constant 5.000000e-01 : f32
      %85 = vector.broadcast %cst_63 : f32 to vector<2x128x128xf32>
      %86 = arith.mulf %85, %84 : vector<2x128x128xf32>
      %87 = vector.shape_cast %46 : vector<128x128xf32> to vector<1x128x128xf32>
      %88 = vector.broadcast %87 : vector<1x128x128xf32> to vector<2x128x128xf32>
      %89 = arith.mulf %88, %86 : vector<2x128x128xf32>
      %90 = vector.shape_cast %47 : vector<128x128xf32> to vector<1x128x128xf32>
      %91 = vector.broadcast %90 : vector<1x128x128xf32> to vector<2x128x128xf32>
      %92 = arith.mulf %89, %91 : vector<2x128x128xf32>
      %cst_64 = arith.constant dense<0.000000e+00> : vector<2x128xf32>
      %93 = vector.multi_reduction <add>, %92, %cst_64 [1] : vector<2x128x128xf32> to vector<2x128xf32>
      %94 = arith.addf %93, %68 : vector<2x128xf32>
      %cst_65 = arith.constant dense<0.000000e+00> : vector<2x128xf32>
      %95 = vector.multi_reduction <add>, %89, %cst_65 [1] : vector<2x128x128xf32> to vector<2x128xf32>
      %96 = arith.addf %95, %71 : vector<2x128xf32>
      %97 = vector.broadcast %50 : vector<1x128xf32> to vector<2x128xf32>
      %98 = arith.mulf %97, %arg24 : vector<2x128xf32>
      %99 = vector.broadcast %51 : vector<1x128xf32> to vector<2x128xf32>
      %100 = arith.addf %98, %99 : vector<2x128xf32>
      %101 = arith.addf %100, %94 : vector<2x128xf32>
      %102 = vector.broadcast %52 : vector<1x128xf32> to vector<2x128xf32>
      %103 = arith.addf %102, %96 : vector<2x128xf32>
      %104 = arith.divf %101, %103 : vector<2x128xf32>
      %c1_i32_66 = arith.constant 1 : i32
      %105 = vector.shape_cast %104 : vector<2x128xf32> to vector<2x128x1xf32>
      %106 = vector.shape_cast %44 : vector<128x128xf32> to vector<1x128x128xf32>
      %107 = vector.broadcast %105 : vector<2x128x1xf32> to vector<2x128x128xf32>
      %108 = vector.broadcast %106 : vector<1x128x128xf32> to vector<2x128x128xf32>
      %109 = arith.subf %107, %108 : vector<2x128x128xf32>
      %110 = vector.shape_cast %45 : vector<128x128xf32> to vector<1x128x128xf32>
      %111 = vector.broadcast %110 : vector<1x128x128xf32> to vector<2x128x128xf32>
      %112 = arith.mulf %111, %109 : vector<2x128x128xf32>
      %cst_67 = arith.constant 5.000000e-01 : f32
      %113 = vector.broadcast %cst_67 : f32 to vector<2x128x128xf32>
      %114 = arith.mulf %113, %112 : vector<2x128x128xf32>
      %115 = math.tanh %114 : vector<2x128x128xf32>
      %cst_68 = arith.constant 1.000000e+00 : f32
      %116 = vector.broadcast %cst_68 : f32 to vector<2x128x128xf32>
      %117 = arith.addf %115, %116 : vector<2x128x128xf32>
      %cst_69 = arith.constant 5.000000e-01 : f32
      %118 = vector.broadcast %cst_69 : f32 to vector<2x128x128xf32>
      %119 = arith.mulf %118, %117 : vector<2x128x128xf32>
      %120 = vector.shape_cast %46 : vector<128x128xf32> to vector<1x128x128xf32>
      %121 = vector.broadcast %120 : vector<1x128x128xf32> to vector<2x128x128xf32>
      %122 = arith.mulf %121, %119 : vector<2x128x128xf32>
      %123 = vector.shape_cast %47 : vector<128x128xf32> to vector<1x128x128xf32>
      %124 = vector.broadcast %123 : vector<1x128x128xf32> to vector<2x128x128xf32>
      %125 = arith.mulf %122, %124 : vector<2x128x128xf32>
      %cst_70 = arith.constant dense<0.000000e+00> : vector<2x128xf32>
      %126 = vector.multi_reduction <add>, %125, %cst_70 [1] : vector<2x128x128xf32> to vector<2x128xf32>
      %127 = arith.addf %126, %68 : vector<2x128xf32>
      %cst_71 = arith.constant dense<0.000000e+00> : vector<2x128xf32>
      %128 = vector.multi_reduction <add>, %122, %cst_71 [1] : vector<2x128x128xf32> to vector<2x128xf32>
      %129 = arith.addf %128, %71 : vector<2x128xf32>
      %130 = vector.broadcast %50 : vector<1x128xf32> to vector<2x128xf32>
      %131 = arith.mulf %130, %104 : vector<2x128xf32>
      %132 = vector.broadcast %51 : vector<1x128xf32> to vector<2x128xf32>
      %133 = arith.addf %131, %132 : vector<2x128xf32>
      %134 = arith.addf %133, %127 : vector<2x128xf32>
      %135 = vector.broadcast %52 : vector<1x128xf32> to vector<2x128xf32>
      %136 = arith.addf %135, %129 : vector<2x128xf32>
      %137 = arith.divf %134, %136 : vector<2x128xf32>
      %c2_i32 = arith.constant 2 : i32
      %138 = vector.shape_cast %137 : vector<2x128xf32> to vector<2x128x1xf32>
      %139 = vector.shape_cast %44 : vector<128x128xf32> to vector<1x128x128xf32>
      %140 = vector.broadcast %138 : vector<2x128x1xf32> to vector<2x128x128xf32>
      %141 = vector.broadcast %139 : vector<1x128x128xf32> to vector<2x128x128xf32>
      %142 = arith.subf %140, %141 : vector<2x128x128xf32>
      %143 = vector.shape_cast %45 : vector<128x128xf32> to vector<1x128x128xf32>
      %144 = vector.broadcast %143 : vector<1x128x128xf32> to vector<2x128x128xf32>
      %145 = arith.mulf %144, %142 : vector<2x128x128xf32>
      %cst_72 = arith.constant 5.000000e-01 : f32
      %146 = vector.broadcast %cst_72 : f32 to vector<2x128x128xf32>
      %147 = arith.mulf %146, %145 : vector<2x128x128xf32>
      %148 = math.tanh %147 : vector<2x128x128xf32>
      %cst_73 = arith.constant 1.000000e+00 : f32
      %149 = vector.broadcast %cst_73 : f32 to vector<2x128x128xf32>
      %150 = arith.addf %148, %149 : vector<2x128x128xf32>
      %cst_74 = arith.constant 5.000000e-01 : f32
      %151 = vector.broadcast %cst_74 : f32 to vector<2x128x128xf32>
      %152 = arith.mulf %151, %150 : vector<2x128x128xf32>
      %153 = vector.shape_cast %46 : vector<128x128xf32> to vector<1x128x128xf32>
      %154 = vector.broadcast %153 : vector<1x128x128xf32> to vector<2x128x128xf32>
      %155 = arith.mulf %154, %152 : vector<2x128x128xf32>
      %156 = vector.shape_cast %47 : vector<128x128xf32> to vector<1x128x128xf32>
      %157 = vector.broadcast %156 : vector<1x128x128xf32> to vector<2x128x128xf32>
      %158 = arith.mulf %155, %157 : vector<2x128x128xf32>
      %cst_75 = arith.constant dense<0.000000e+00> : vector<2x128xf32>
      %159 = vector.multi_reduction <add>, %158, %cst_75 [1] : vector<2x128x128xf32> to vector<2x128xf32>
      %160 = arith.addf %159, %68 : vector<2x128xf32>
      %cst_76 = arith.constant dense<0.000000e+00> : vector<2x128xf32>
      %161 = vector.multi_reduction <add>, %155, %cst_76 [1] : vector<2x128x128xf32> to vector<2x128xf32>
      %162 = arith.addf %161, %71 : vector<2x128xf32>
      %163 = vector.broadcast %50 : vector<1x128xf32> to vector<2x128xf32>
      %164 = arith.mulf %163, %137 : vector<2x128xf32>
      %165 = vector.broadcast %51 : vector<1x128xf32> to vector<2x128xf32>
      %166 = arith.addf %164, %165 : vector<2x128xf32>
      %167 = arith.addf %166, %160 : vector<2x128xf32>
      %168 = vector.broadcast %52 : vector<1x128xf32> to vector<2x128xf32>
      %169 = arith.addf %168, %162 : vector<2x128xf32>
      %170 = arith.divf %167, %169 : vector<2x128xf32>
      %c3_i32 = arith.constant 3 : i32
      %171 = vector.shape_cast %170 : vector<2x128xf32> to vector<2x128x1xf32>
      %172 = vector.shape_cast %44 : vector<128x128xf32> to vector<1x128x128xf32>
      %173 = vector.broadcast %171 : vector<2x128x1xf32> to vector<2x128x128xf32>
      %174 = vector.broadcast %172 : vector<1x128x128xf32> to vector<2x128x128xf32>
      %175 = arith.subf %173, %174 : vector<2x128x128xf32>
      %176 = vector.shape_cast %45 : vector<128x128xf32> to vector<1x128x128xf32>
      %177 = vector.broadcast %176 : vector<1x128x128xf32> to vector<2x128x128xf32>
      %178 = arith.mulf %177, %175 : vector<2x128x128xf32>
      %cst_77 = arith.constant 5.000000e-01 : f32
      %179 = vector.broadcast %cst_77 : f32 to vector<2x128x128xf32>
      %180 = arith.mulf %179, %178 : vector<2x128x128xf32>
      %181 = math.tanh %180 : vector<2x128x128xf32>
      %cst_78 = arith.constant 1.000000e+00 : f32
      %182 = vector.broadcast %cst_78 : f32 to vector<2x128x128xf32>
      %183 = arith.addf %181, %182 : vector<2x128x128xf32>
      %cst_79 = arith.constant 5.000000e-01 : f32
      %184 = vector.broadcast %cst_79 : f32 to vector<2x128x128xf32>
      %185 = arith.mulf %184, %183 : vector<2x128x128xf32>
      %186 = vector.shape_cast %46 : vector<128x128xf32> to vector<1x128x128xf32>
      %187 = vector.broadcast %186 : vector<1x128x128xf32> to vector<2x128x128xf32>
      %188 = arith.mulf %187, %185 : vector<2x128x128xf32>
      %189 = vector.shape_cast %47 : vector<128x128xf32> to vector<1x128x128xf32>
      %190 = vector.broadcast %189 : vector<1x128x128xf32> to vector<2x128x128xf32>
      %191 = arith.mulf %188, %190 : vector<2x128x128xf32>
      %cst_80 = arith.constant dense<0.000000e+00> : vector<2x128xf32>
      %192 = vector.multi_reduction <add>, %191, %cst_80 [1] : vector<2x128x128xf32> to vector<2x128xf32>
      %193 = arith.addf %192, %68 : vector<2x128xf32>
      %cst_81 = arith.constant dense<0.000000e+00> : vector<2x128xf32>
      %194 = vector.multi_reduction <add>, %188, %cst_81 [1] : vector<2x128x128xf32> to vector<2x128xf32>
      %195 = arith.addf %194, %71 : vector<2x128xf32>
      %196 = vector.broadcast %50 : vector<1x128xf32> to vector<2x128xf32>
      %197 = arith.mulf %196, %170 : vector<2x128xf32>
      %198 = vector.broadcast %51 : vector<1x128xf32> to vector<2x128xf32>
      %199 = arith.addf %197, %198 : vector<2x128xf32>
      %200 = arith.addf %199, %193 : vector<2x128xf32>
      %201 = vector.broadcast %52 : vector<1x128xf32> to vector<2x128xf32>
      %202 = arith.addf %201, %195 : vector<2x128xf32>
      %203 = arith.divf %200, %202 : vector<2x128xf32>
      %c4_i32 = arith.constant 4 : i32
      %204 = vector.shape_cast %203 : vector<2x128xf32> to vector<2x128x1xf32>
      %205 = vector.shape_cast %44 : vector<128x128xf32> to vector<1x128x128xf32>
      %206 = vector.broadcast %204 : vector<2x128x1xf32> to vector<2x128x128xf32>
      %207 = vector.broadcast %205 : vector<1x128x128xf32> to vector<2x128x128xf32>
      %208 = arith.subf %206, %207 : vector<2x128x128xf32>
      %209 = vector.shape_cast %45 : vector<128x128xf32> to vector<1x128x128xf32>
      %210 = vector.broadcast %209 : vector<1x128x128xf32> to vector<2x128x128xf32>
      %211 = arith.mulf %210, %208 : vector<2x128x128xf32>
      %cst_82 = arith.constant 5.000000e-01 : f32
      %212 = vector.broadcast %cst_82 : f32 to vector<2x128x128xf32>
      %213 = arith.mulf %212, %211 : vector<2x128x128xf32>
      %214 = math.tanh %213 : vector<2x128x128xf32>
      %cst_83 = arith.constant 1.000000e+00 : f32
      %215 = vector.broadcast %cst_83 : f32 to vector<2x128x128xf32>
      %216 = arith.addf %214, %215 : vector<2x128x128xf32>
      %cst_84 = arith.constant 5.000000e-01 : f32
      %217 = vector.broadcast %cst_84 : f32 to vector<2x128x128xf32>
      %218 = arith.mulf %217, %216 : vector<2x128x128xf32>
      %219 = vector.shape_cast %46 : vector<128x128xf32> to vector<1x128x128xf32>
      %220 = vector.broadcast %219 : vector<1x128x128xf32> to vector<2x128x128xf32>
      %221 = arith.mulf %220, %218 : vector<2x128x128xf32>
      %222 = vector.shape_cast %47 : vector<128x128xf32> to vector<1x128x128xf32>
      %223 = vector.broadcast %222 : vector<1x128x128xf32> to vector<2x128x128xf32>
      %224 = arith.mulf %221, %223 : vector<2x128x128xf32>
      %cst_85 = arith.constant dense<0.000000e+00> : vector<2x128xf32>
      %225 = vector.multi_reduction <add>, %224, %cst_85 [1] : vector<2x128x128xf32> to vector<2x128xf32>
      %226 = arith.addf %225, %68 : vector<2x128xf32>
      %cst_86 = arith.constant dense<0.000000e+00> : vector<2x128xf32>
      %227 = vector.multi_reduction <add>, %221, %cst_86 [1] : vector<2x128x128xf32> to vector<2x128xf32>
      %228 = arith.addf %227, %71 : vector<2x128xf32>
      %229 = vector.broadcast %50 : vector<1x128xf32> to vector<2x128xf32>
      %230 = arith.mulf %229, %203 : vector<2x128xf32>
      %231 = vector.broadcast %51 : vector<1x128xf32> to vector<2x128xf32>
      %232 = arith.addf %230, %231 : vector<2x128xf32>
      %233 = arith.addf %232, %226 : vector<2x128xf32>
      %234 = vector.broadcast %52 : vector<1x128xf32> to vector<2x128xf32>
      %235 = arith.addf %234, %228 : vector<2x128xf32>
      %236 = arith.divf %233, %235 : vector<2x128xf32>
      %c5_i32 = arith.constant 5 : i32
      %237 = vector.shape_cast %236 : vector<2x128xf32> to vector<2x128x1xf32>
      %238 = vector.shape_cast %44 : vector<128x128xf32> to vector<1x128x128xf32>
      %239 = vector.broadcast %237 : vector<2x128x1xf32> to vector<2x128x128xf32>
      %240 = vector.broadcast %238 : vector<1x128x128xf32> to vector<2x128x128xf32>
      %241 = arith.subf %239, %240 : vector<2x128x128xf32>
      %242 = vector.shape_cast %45 : vector<128x128xf32> to vector<1x128x128xf32>
      %243 = vector.broadcast %242 : vector<1x128x128xf32> to vector<2x128x128xf32>
      %244 = arith.mulf %243, %241 : vector<2x128x128xf32>
      %cst_87 = arith.constant 5.000000e-01 : f32
      %245 = vector.broadcast %cst_87 : f32 to vector<2x128x128xf32>
      %246 = arith.mulf %245, %244 : vector<2x128x128xf32>
      %247 = math.tanh %246 : vector<2x128x128xf32>
      %cst_88 = arith.constant 1.000000e+00 : f32
      %248 = vector.broadcast %cst_88 : f32 to vector<2x128x128xf32>
      %249 = arith.addf %247, %248 : vector<2x128x128xf32>
      %cst_89 = arith.constant 5.000000e-01 : f32
      %250 = vector.broadcast %cst_89 : f32 to vector<2x128x128xf32>
      %251 = arith.mulf %250, %249 : vector<2x128x128xf32>
      %252 = vector.shape_cast %46 : vector<128x128xf32> to vector<1x128x128xf32>
      %253 = vector.broadcast %252 : vector<1x128x128xf32> to vector<2x128x128xf32>
      %254 = arith.mulf %253, %251 : vector<2x128x128xf32>
      %255 = vector.shape_cast %47 : vector<128x128xf32> to vector<1x128x128xf32>
      %256 = vector.broadcast %255 : vector<1x128x128xf32> to vector<2x128x128xf32>
      %257 = arith.mulf %254, %256 : vector<2x128x128xf32>
      %cst_90 = arith.constant dense<0.000000e+00> : vector<2x128xf32>
      %258 = vector.multi_reduction <add>, %257, %cst_90 [1] : vector<2x128x128xf32> to vector<2x128xf32>
      %259 = arith.addf %258, %68 : vector<2x128xf32>
      %cst_91 = arith.constant dense<0.000000e+00> : vector<2x128xf32>
      %260 = vector.multi_reduction <add>, %254, %cst_91 [1] : vector<2x128x128xf32> to vector<2x128xf32>
      %261 = arith.addf %260, %71 : vector<2x128xf32>
      %262 = vector.broadcast %50 : vector<1x128xf32> to vector<2x128xf32>
      %263 = arith.mulf %262, %236 : vector<2x128xf32>
      %264 = vector.broadcast %51 : vector<1x128xf32> to vector<2x128xf32>
      %265 = arith.addf %263, %264 : vector<2x128xf32>
      %266 = arith.addf %265, %259 : vector<2x128xf32>
      %267 = vector.broadcast %52 : vector<1x128xf32> to vector<2x128xf32>
      %268 = arith.addf %267, %261 : vector<2x128xf32>
      %269 = arith.divf %266, %268 : vector<2x128xf32>
      %270 = arith.index_cast %arg23 : i32 to index
      %c0_92 = arith.constant 0 : index
      %c0_93 = arith.constant 0 : index
      %271 = vector.load %arg20[%270, %c0_92, %c0_93] : memref<16x2x128xf32, #tpu.memory_space<vmem>>, vector<1x2x128xf32>
      %272 = vector.shape_cast %271 : vector<1x2x128xf32> to vector<2x128xf32>
      %273 = vector.shape_cast %269 : vector<2x128xf32> to vector<1x2x128xf32>
      tpu.vector_store %arg20[%270, %c0_92, %c0_93], %273 {strides = array<i32>} : memref<16x2x128xf32, #tpu.memory_space<vmem>>, vector<1x2x128xf32>,
      scf.yield %269 : vector<2x128xf32>
    }
    %c16_i32_42 = arith.constant 16 : i32
    %c0_43 = arith.constant 0 : index
    %c0_44 = arith.constant 0 : index
    %56 = vector.load %arg19[%c0_43, %c0_44] : memref<2x128xf32, #tpu.memory_space<vmem>>, vector<2x128xf32>
    tpu.vector_store %arg19[%c0_43, %c0_44], %55 {strides = array<i32>} : memref<2x128xf32, #tpu.memory_space<vmem>>, vector<2x128xf32>,
    %c0_45 = arith.constant 0 : index
    %c0_46 = arith.constant 0 : index
    %57 = vector.load %arg16[%c0_45, %c0_46] : memref<128x8xf32, #tpu.memory_space<vmem>>, vector<128x8xf32>
    %c0_47 = arith.constant 0 : index
    %c0_48 = arith.constant 0 : index
    %58 = vector.load %arg17[%c0_47, %c0_48] : memref<1x8xf32, #tpu.memory_space<vmem>>, vector<1x8xf32>
    %c0_49 = arith.constant 0 : index
    %c0_50 = arith.constant 0 : index
    %c0_51 = arith.constant 0 : index
    %59 = vector.load %arg20[%c0_49, %c0_50, %c0_51] : memref<16x2x128xf32, #tpu.memory_space<vmem>>, vector<16x2x128xf32>
    %60 = vector.shape_cast %59 : vector<16x2x128xf32> to vector<32x128xf32>
    %cst_52 = arith.constant dense<0.000000e+00> : vector<32x8xf32>
    %61 = tpu.matmul %60, %57, %cst_52 {dimension_numbers = #tpu.dot_dimension_numbers<[1], [0], [0], [1], [0, 0, 1, 1], [], []>} : vector<32x128xf32>, vector<128x8xf32>, vector<32x8xf32> -> vector<32x8xf32>
    %62 = vector.broadcast %58 : vector<1x8xf32> to vector<32x8xf32>
    %63 = arith.addf %61, %62 : vector<32x8xf32>
    %64 = vector.shape_cast %63 : vector<32x8xf32> to vector<16x2x8xf32>
    %c0_53 = arith.constant 0 : index
    %c0_54 = arith.constant 0 : index
    %c0_55 = arith.constant 0 : index
    %65 = vector.load %arg18[%c0_53, %c0_54, %c0_55] : memref<16x2x8xf32, #tpu.memory_space<vmem>>, vector<16x2x8xf32>
    tpu.vector_store %arg18[%c0_53, %c0_54, %c0_55], %64 {strides = array<i32>} : memref<16x2x8xf32, #tpu.memory_space<vmem>>, vector<16x2x8xf32>,
    return
  }
  func.func @transform_0(%arg0: i32, %arg1: i32) -> (i32, i32, i32) {
    %c0_i32 = arith.constant 0 : i32
    %c0_i32_0 = arith.constant 0 : i32
    return %arg1, %arg0, %c0_i32 : i32, i32, i32
  }
  func.func @transform_1(%arg0: i32, %arg1: i32) -> (i32, i32) {
    %c0_i32 = arith.constant 0 : i32
    %c0_i32_0 = arith.constant 0 : i32
    %c0_i32_1 = arith.constant 0 : i32
    return %c0_i32, %c0_i32_0 : i32, i32
  }
  func.func @transform_2(%arg0: i32, %arg1: i32) -> (i32, i32) {
    %c0_i32 = arith.constant 0 : i32
    %c0_i32_0 = arith.constant 0 : i32
    %c0_i32_1 = arith.constant 0 : i32
    return %c0_i32, %c0_i32_0 : i32, i32
  }
  func.func @transform_3(%arg0: i32, %arg1: i32) -> (i32, i32) {
    %c0_i32 = arith.constant 0 : i32
    %c0_i32_0 = arith.constant 0 : i32
    %c0_i32_1 = arith.constant 0 : i32
    return %c0_i32, %c0_i32_0 : i32, i32
  }
  func.func @transform_4(%arg0: i32, %arg1: i32) -> (i32, i32) {
    %c0_i32 = arith.constant 0 : i32
    %c0_i32_0 = arith.constant 0 : i32
    %c0_i32_1 = arith.constant 0 : i32
    return %c0_i32, %c0_i32_0 : i32, i32
  }
  func.func @transform_5(%arg0: i32, %arg1: i32) -> (i32, i32) {
    %c0_i32 = arith.constant 0 : i32
    %c0_i32_0 = arith.constant 0 : i32
    %c0_i32_1 = arith.constant 0 : i32
    return %c0_i32, %c0_i32_0 : i32, i32
  }
  func.func @transform_6(%arg0: i32, %arg1: i32) -> (i32, i32) {
    %c0_i32 = arith.constant 0 : i32
    %c0_i32_0 = arith.constant 0 : i32
    %c0_i32_1 = arith.constant 0 : i32
    return %c0_i32, %c0_i32_0 : i32, i32
  }
  func.func @transform_7(%arg0: i32, %arg1: i32) -> (i32, i32) {
    %c0_i32 = arith.constant 0 : i32
    %c0_i32_0 = arith.constant 0 : i32
    %c0_i32_1 = arith.constant 0 : i32
    return %c0_i32, %c0_i32_0 : i32, i32
  }
  func.func @transform_8(%arg0: i32, %arg1: i32) -> (i32, i32) {
    %c0_i32 = arith.constant 0 : i32
    %c0_i32_0 = arith.constant 0 : i32
    %c0_i32_1 = arith.constant 0 : i32
    return %c0_i32, %c0_i32_0 : i32, i32
  }
  func.func @transform_9(%arg0: i32, %arg1: i32) -> (i32, i32) {
    %c0_i32 = arith.constant 0 : i32
    %c0_i32_0 = arith.constant 0 : i32
    %c0_i32_1 = arith.constant 0 : i32
    return %c0_i32, %c0_i32_0 : i32, i32
  }
  func.func @transform_10(%arg0: i32, %arg1: i32) -> (i32, i32) {
    %c0_i32 = arith.constant 0 : i32
    %c0_i32_0 = arith.constant 0 : i32
    %c0_i32_1 = arith.constant 0 : i32
    return %c0_i32, %c0_i32_0 : i32, i32
  }
  func.func @transform_11(%arg0: i32, %arg1: i32) -> (i32, i32) {
    %c0_i32 = arith.constant 0 : i32
    %c0_i32_0 = arith.constant 0 : i32
    %c0_i32_1 = arith.constant 0 : i32
    return %c0_i32, %c0_i32_0 : i32, i32
  }
  func.func @transform_12(%arg0: i32, %arg1: i32) -> (i32, i32) {
    %c0_i32 = arith.constant 0 : i32
    %c0_i32_0 = arith.constant 0 : i32
    %c0_i32_1 = arith.constant 0 : i32
    return %c0_i32, %c0_i32_0 : i32, i32
  }
  func.func @transform_13(%arg0: i32, %arg1: i32) -> (i32, i32) {
    %c0_i32 = arith.constant 0 : i32
    %c0_i32_0 = arith.constant 0 : i32
    %c0_i32_1 = arith.constant 0 : i32
    return %c0_i32, %c0_i32_0 : i32, i32
  }
  func.func @transform_14(%arg0: i32, %arg1: i32) -> (i32, i32) {
    %c0_i32 = arith.constant 0 : i32
    %c0_i32_0 = arith.constant 0 : i32
    %c0_i32_1 = arith.constant 0 : i32
    return %c0_i32, %c0_i32_0 : i32, i32
  }
  func.func @transform_15(%arg0: i32, %arg1: i32) -> (i32, i32) {
    %c0_i32 = arith.constant 0 : i32
    %c0_i32_0 = arith.constant 0 : i32
    %c0_i32_1 = arith.constant 0 : i32
    return %c0_i32, %c0_i32_0 : i32, i32
  }
  func.func @transform_16(%arg0: i32, %arg1: i32) -> (i32, i32, i32) {
    %c0_i32 = arith.constant 0 : i32
    %c0_i32_0 = arith.constant 0 : i32
    return %arg1, %arg0, %c0_i32 : i32, i32, i32
  }
}

</mosaic_0001>

<bundles_post_ra>
// kernel: tpu_custom_call.1
= control target key start
LH: loop header
LB: loop body
LE: loop exit
PB: predicated region body
PF: predicated region fallthrough
CT: control target
= control target key end

     0   :  { %s7975_s0 = inlined_call_operand.vmem [shape: f32[32,2,4], index: 0, kind: input, shape index: {}]   ;;  %s7976_s1 = inlined_call_operand.vmem [shape: f32[1,4], index: 1, kind: input, shape index: {}]   ;;  %s7977_s2 = inlined_call_operand.vmem [shape: f32[1,4], index: 2, kind: input, shape index: {}]   ;;  %s7978_s3 = inlined_call_operand.vmem [shape: f32[4,128], index: 3, kind: input, shape index: {}]   ;;  %s7979_s4 = inlined_call_operand.vmem [shape: f32[4,128], index: 4, kind: input, shape index: {}]   ;;  %s7980_s5 = inlined_call_operand.vmem [shape: f32[4,128], index: 5, kind: input, shape index: {}]   ;;  %s7981_s6 = inlined_call_operand.vmem [shape: f32[4,128], index: 6, kind: input, shape index: {}]   ;;  %s7982_s7 = inlined_call_operand.vmem [shape: f32[128,128], index: 7, kind: input, shape index: {}]   ;;  %s7983_s8 = inlined_call_operand.hbm [shape: f32[128,128], index: 8, kind: input, shape index: {}]   ;;  %s7984_s9 = inlined_call_operand.hbm [shape: f32[128,128], index: 9, kind: input, shape index: {}]   ;;  %s7985_s10 = inlined_call_operand.hbm [shape: f32[128,128], index: 10, kind: input, shape index: {}]   ;;  %s7986_s11 = inlined_call_operand.vmem [shape: f32[1,128], index: 11, kind: input, shape index: {}]   ;;  %s7987_s12 = inlined_call_operand.vmem [shape: f32[1,128], index: 12, kind: input, shape index: {}]   ;;  %s7988_s13 = inlined_call_operand.vmem [shape: f32[1,128], index: 13, kind: input, shape index: {}]   ;;  %s7989_s14 = inlined_call_operand.vmem [shape: f32[128,8], index: 14, kind: input, shape index: {}]   ;;  %s7990_s15 = inlined_call_operand.vmem [shape: f32[1,8], index: 15, kind: input, shape index: {}]   ;;  %s7991_s16 = inlined_call_operand.vmem [shape: f32[32,2,8], index: 16, kind: output, shape index: {}]  }
   0x1   :  { %8285 = sst [smem:[#allocation91_spill]] %s7975_s0 }
   0x2   :  { %8286 = sst [smem:[#allocation92_spill]] %s7984_s9 }
   0x3   :  { %21 = vsyncpa [#allocation7], 0 }
   0x4   :  { %22 = vsyncpa [#allocation9], 0  ;;  %s6149_s21 = smov 0   ;;  %s6151_s22 = smov 0  }
   0x5   :  { %s6153_s23 = smov 0  }
   0x6 LB: > { %s5276_s24 = sadd.s32 4294967295, %s6047_s23   ;;  %p5278_p0 = scmp.ge.s32.totalorder %s6047_s23, 1  ;;  %s6047_s23 = sphi %s6153_s23, %s28_s23   ;;  %s6043_s22 = sphi %s6151_s22, %s8665_s22   ;;  %s6039_s21 = sphi %s6149_s21, %s8664_s21  }
   0x7   : > { %p416_p1 = scmp.lt.s32.totalorder %s6047_s23, 3  ;;  %p6167_p2 = scmp.eq.s32.totalorder %s5276_s24, 0 }
   0x8   : > { %s6057_s27 = smov [#allocation8]   ;;  %s37_s30 = sadd.s32 1, %s6043_s22 }
   0x9   : > { %p6171_p3 = pnand %p5278_p0, %p416_p1  ;;  %s462_s28 = sshll.u32 %s6057_s27, 4  ;;  %s463_s28 = int_to_ptr.vmem [resolvable:$true] %s462_s28 }
   0xa   : > { %p6184_p6 = scmp.ge.s32.totalorder %s37_s30, 2  ;;  %s6058_s17 = smov [#allocation6]  }
   0xb   : > { %p5400_p4 = pneg %p6171_p3  ;;  %s449_s18 = sshll.u32 %s6058_s17, 4  ;;  %s450_s18 = int_to_ptr.vmem [resolvable:$true] %s449_s18 }
   0xc   : > { %s5942_s19 = scalar_lea.vmem %s463_s28, 2048  ;;  %p5950_p11 = scmp.lt.s32.totalorder %s463_s28, %s463_s28 }
   0xd   : > { %p6179_p5 = pnand %p6167_p2, %p5400_p4  ;;  %p5943_p8 = scmp.ne.s32.totalorder %s463_s28, %s5942_s19 }
   0xe   : > { %p5951_p12 = scmp.lt.s32.totalorder %s5942_s19, %s5942_s19 }
   0xf   : > { %p5933_p7 = pneg %p6179_p5 }
  0x10   : > { %p5952_p13 = por %p5951_p12, %p5950_p11 }
  0x11   : > { %p5945_p9 = pnand %p5943_p8, %p5933_p7 }
  0x13   : > { %p5946_p10 = pneg %p5945_p9 }
  0x15   : > { %p5953_p0 = pnand %p5952_p13, %p5946_p10 }
  0x17   : > { %5956 = shalt.err (!%p5953_p0)
}
  0x18   : > { %s6059_s20 = smov 128   ;;  %s6060_s24 = smov 8  }
  0x19   : > { %s8291_s9 = sld [smem:[#allocation92_spill]]  ;;  %s8667_s30 = smov (%p6184_p6, %s37_s30), 0 }
  0x1a   : > { %s5968_s19 = scalar_lea.vmem %s450_s18, 2048  ;;  %p5976_p9 = scmp.lt.s32.totalorder %s450_s18, %s450_s18 }
  0x1b   : > { %p5969_p1 = scmp.ne.s32.totalorder %s450_s18, %s5968_s19  ;;  %p5977_p10 = scmp.lt.s32.totalorder %s5968_s19, %s5968_s19 }
  0x1d   : > { %p5971_p4 = pnand %p5969_p1, %p5933_p7  ;;  %p5978_p11 = por %p5977_p10, %p5976_p9 }
  0x1f   : > { %5406 = dma.hbm_to_vmem [thread:$0]  (!%p6179_p5), %s8291_s9, 2048, %s463_s28, [#allocation9], %s6059_s20, %s6059_s20, %s6060_s24  }
  0x20   : > { %p5972_p8 = pneg %p5971_p4 }
  0x22   : > { %p5979_p12 = pnand %p5978_p11, %p5972_p8 }
  0x24   : > { %5982 = shalt.err (!%p5979_p12)
}
  0x25   : > { %5403 = dma.hbm_to_vmem [thread:$0]  (!%p6179_p5), %s7983_s8, 2048, %s450_s18, [#allocation7], %s6059_s20, %s6059_s20, %s6060_s24  }
  0x26   : > { %s6061_s27 = smov [#allocation10]  }
  0x27   : > { %s475_s17 = sshll.u32 %s6061_s27, 4  ;;  %s476_s17 = int_to_ptr.vmem [resolvable:$true] %s475_s17 }
  0x28   : > { %s5994_s9 = scalar_lea.vmem %s476_s17, 2048  ;;  %p6002_p1 = scmp.lt.s32.totalorder %s476_s17, %s476_s17 }
  0x29   : > { %p5995_p6 = scmp.ne.s32.totalorder %s476_s17, %s5994_s9  ;;  %p6003_p4 = scmp.lt.s32.totalorder %s5994_s9, %s5994_s9 }
  0x2b   : > { %p5997_p13 = pnand %p5995_p6, %p5933_p7  ;;  %p6004_p8 = por %p6003_p4, %p6002_p1 }
  0x2d   : > { %p5998_p0 = pneg %p5997_p13 }
  0x2f   : > { %p6005_p9 = pnand %p6004_p8, %p5998_p0 }
  0x31   : > { %6008 = shalt.err (!%p6005_p9)
}
  0x32   : > { %5409 = dma.hbm_to_vmem [thread:$0]  (!%p6179_p5), %s7985_s10, 2048, %s476_s17, [#allocation9], %s6059_s20, %s6059_s20, %s6060_s24  }
  0x33   : > { %518 = sbr.rel (%p6171_p3) target bundleno = 2103 (0x837), region = 84 }
  0x38   : > { %6030 = dma.done.wait (%p6167_p2), [#allocation7], 2048  }
  0x39   : > { %6032 = vsyncadd (%p6167_p2), [#allocation7], 4294965248 }
  0x3a   : > { %6034 = dma.done.wait (%p6167_p2), [#allocation9], 4096  }
  0x3b   : > { %6036 = vsyncadd (%p6167_p2), [#allocation9], 4294963200  ;;  %s5287_s9 = sshll.u32 %s6039_s21, 4  ;;  %s8292_s24 = sld [smem:[#allocation91_spill]] }
  0x3c   : > { %p583_p7 = scmp.lt.s32.totalorder %s5287_s9, 31  ;;  %p5291_p3 = scmp.ne.s32.totalorder %s6039_s21, 0 }
  0x3e   : > { %s8669_s9 = smov (!%p583_p7, %s5287_s9), 31  ;;  %603 = sbr.rel (%p5291_p3) target bundleno = 69 (0x45), region = 100 }
  0x3f   : > { %s5288_s29 = sshll.u32 %s8669_s9, 1 }
  0x40   : > { %s6246_s17 = scalar_lea.vmem %s7991_s16, %s5288_s29 }
  0x41   : > { %s6241_s28 = scalar_lea.vmem %s8292_s24, %s5288_s29 }
  0x43   : > { %v6062_v0 = vmov 0.0  }
  0x44   : > { %604 = vst [vmem:[#allocation2] sm:$0x3] %v6062_v0 }
  0x45 PF: > { %v6252_v1 = vld [vmem:[%s7976_s1] ss:$0 sm:$0xff]  ;;  %v612_v3 = vld [vmem:[%s6241_s28 + $0x2] sm:$0x3]  ;;  %v671_v4 = vlaneseq  ;;  %v613_v7 = vld [vmem:[%s6241_s28 + $0x4] sm:$0x3] }
  0x46   : > { %v6257_v2 = vld [vmem:[%s7977_s2] ss:$0 sm:$0xff]  ;;  %v634_v5 = vmul.f32 %v6252_v1, %v612_v3  ;;  %v635_v14 = vmul.f32 %v6252_v1, %v613_v7  ;;  %v614_v15 = vld [vmem:[%s6241_s28 + $0x6] sm:$0x3]  ;;  %v615_v22 = vld [vmem:[%s6241_s28 + $0x8] sm:$0x3] }
  0x47   : > { %v611_v6 = vld [vmem:[%s6241_s28] sm:$0x3]  ;;  %v6263_v8 = vshrl.u32 %v671_v4, 7  ;;  %v636_v18 = vmul.f32 %v6252_v1, %v614_v15  ;;  %v637_v23 = vmul.f32 %v6252_v1, %v615_v22  ;;  %v616_v27 = vld [vmem:[%s6241_s28 + $0xa] sm:$0x3]  ;;  %vm1151_vm0 = vcmask 1043456  }
  0x48   : > { %v633_v9 = vmul.f32 %v6252_v1, %v611_v6  ;;  %v656_v10 = vadd.f32 %v6257_v2, %v634_v5  ;;  %v657_v21 = vadd.f32 %v6257_v2, %v635_v14  ;;  %v638_v28 = vmul.f32 %v6252_v1, %v616_v27  ;;  %v617_v32 = vld [vmem:[%s6241_s28 + $0xc] sm:$0x3]  ;;  %v618_v37 = vld [vmem:[%s6241_s28 + $0xe] sm:$0x3]  ;;  %v619_v42 = vld [vmem:[%s6241_s28 + $0x10] sm:$0x3] }
  0x49   : > { %8293 = vst [vmem:[#allocation13_spill] sm:$0xff] %v6263_v8  ;;  %v6268_v11 = vsub.s32 0, %v6263_v8  ;;  %v6272_v13 = vsub.s32 1, %v6263_v8  ;;  %v658_v26 = vadd.f32 %v6257_v2, %v636_v18  ;;  %v659_v31 = vadd.f32 %v6257_v2, %v637_v23  ;;  %v620_v47 = vld [vmem:[%s6241_s28 + $0x12] sm:$0x3]  ;;  %s6889_s0 = smov 0  }
  0x4a   : > { %v655_v12 = vadd.f32 %v6257_v2, %v633_v9  ;;  %v660_v33 = vadd.f32 %v6257_v2, %v638_v28  ;;  %v639_v36 = vmul.f32 %v6252_v1, %v617_v32  ;;  %v640_v41 = vmul.f32 %v6252_v1, %v618_v37  ;;  %v621_v52 = vld [vmem:[%s6241_s28 + $0x14] sm:$0x3]  ;;  %v622_v57 = vld [vmem:[%s6241_s28 + $0x16] sm:$0x3]  ;;  %v623_v62 = vld [vmem:[%s6241_s28 + $0x18] sm:$0x3] }
  0x4b   : > { %8294 = vst [vmem:[#allocation14_spill] sm:$0xff] %v6268_v11  ;;  %8295 = vst [vmem:[#allocation15_spill] sm:$0xff] %v6272_v13  ;;  %v688_v16 = vrot.slane %v656_v10, %v6268_v11  ;;  %v695_v19 = vrot.slane %v656_v10, %v6272_v13  ;;  %v709_v24 = vrot.slane %v657_v21, %v6272_v13  ;;  %v624_v5 = vld [vmem:[%s6241_s28 + $0x1a] sm:$0x3]  ;;  %v626_v18 = vld [vmem:[%s6241_s28 + $0x1e] sm:$0x3] }
  0x4c   : > { %v674_v17 = vrot.slane %v655_v12, %v6268_v11  ;;  %v681_v20 = vrot.slane %v655_v12, %v6272_v13  ;;  %v702_v25 = vrot.slane %v657_v21, %v6268_v11  ;;  %v723_v29 = vrot.slane %v658_v26, %v6272_v13  ;;  %v625_v12 = vld [vmem:[%s6241_s28 + $0x1c] sm:$0x3]  ;;  %v6350_v27 = vld [vmem:[%s7978_s3] sm:$0xf]  ;;  %v6669_v8 = vld [vmem:[#allocation8 + $0x30] sm:$0xff] }
  0x4d   : > { %690 = vbcast.lane.b32.xlu1 %v688_v16, 256  ;;  %v716_v30 = vrot.slane %v658_v26, %v6268_v11  ;;  %v737_v34 = vrot.slane %v659_v31, %v6272_v13  ;;  %v730_v35 = vrot.slane %v659_v31, %v6268_v11  ;;  %v751_v38 = vrot.slane %v660_v33, %v6272_v13  ;;  %v6355_v28 = vld [vmem:[%s7979_s4] sm:$0xf] }
  0x4e   : > { %676 = vbcast.lane.b32.xlu0 %v674_v17, 256  ;;  %v744_v39 = vrot.slane %v660_v33, %v6268_v11  ;;  %v661_v40 = vadd.f32 %v6257_v2, %v639_v36  ;;  %v641_v43 = vmul.f32 %v6252_v1, %v619_v42  ;;  %v662_v46 = vadd.f32 %v6257_v2, %v640_v41 }
  0x4f   : > { %v642_v48 = vmul.f32 %v6252_v1, %v620_v47  ;;  %v643_v53 = vmul.f32 %v6252_v1, %v621_v52  ;;  %v644_v58 = vmul.f32 %v6252_v1, %v622_v57  ;;  %v645_v4 = vmul.f32 %v6252_v1, %v623_v62  ;;  %8334 = vst [vmem:[#allocation54_spill] sm:$0xff] %v6669_v8  ;;  %v6700_v8 = vld [vmem:[#allocation10 + $0x8] sm:$0xff] }
  0x50   : > { %v765_v44 = vrot.slane %v661_v40, %v6272_v13  ;;  %v758_v45 = vrot.slane %v661_v40, %v6268_v11  ;;  %v779_v49 = vrot.slane %v662_v46, %v6272_v13  ;;  %v772_v50 = vrot.slane %v662_v46, %v6268_v11  ;;  %8345 = vst [vmem:[#allocation65_spill] sm:$0xff] %v6700_v8 }
  0x51   : > { %697 = vbcast.lane.b32.xlu1 %v695_v19, 256  ;;  %v663_v51 = vadd.f32 %v6257_v2, %v641_v43  ;;  %v664_v56 = vadd.f32 %v6257_v2, %v642_v48  ;;  %v665_v61 = vadd.f32 %v6257_v2, %v643_v53  ;;  %v666_v63 = vadd.f32 %v6257_v2, %v644_v58 }
  0x52   : > { %683 = vbcast.lane.b32.xlu0 %v681_v20, 256  ;;  %v667_v9 = vadd.f32 %v6257_v2, %v645_v4  ;;  %v646_v10 = vmul.f32 %v6252_v1, %v624_v5  ;;  %v647_v14 = vmul.f32 %v6252_v1, %v625_v12  ;;  %v648_v19 = vmul.f32 %v6252_v1, %v626_v18 }
  0x53   : > { %v793_v54 = vrot.slane %v663_v51, %v6272_v13  ;;  %v786_v55 = vrot.slane %v663_v51, %v6268_v11  ;;  %v807_v59 = vrot.slane %v664_v56, %v6272_v13  ;;  %v800_v60 = vrot.slane %v664_v56, %v6268_v11 }
  0x54   : > { %v821_v0 = vrot.slane %v665_v61, %v6272_v13  ;;  %v814_v3 = vrot.slane %v665_v61, %v6268_v11  ;;  %v835_v6 = vrot.slane %v666_v63, %v6272_v13  ;;  %v828_v7 = vrot.slane %v666_v63, %v6268_v11 }
  0x55   : > { %711 = vbcast.lane.b32.xlu1 %v709_v24, 256  ;;  %v849_v15 = vrot.slane %v667_v9, %v6272_v13  ;;  %v842_v16 = vrot.slane %v667_v9, %v6268_v11  ;;  %v668_v17 = vadd.f32 %v6257_v2, %v646_v10  ;;  %v669_v22 = vadd.f32 %v6257_v2, %v647_v14 }
  0x56   : > { %704 = vbcast.lane.b32.xlu0 %v702_v25, 256  ;;  %v670_v25 = vadd.f32 %v6257_v2, %v648_v19  ;;  %vm1408_vm1 = vcmask 1041409  }
  0x57   : > { %v863_v20 = vrot.slane %v668_v17, %v6272_v13  ;;  %v856_v21 = vrot.slane %v668_v17, %v6268_v11  ;;  %v877_v23 = vrot.slane %v669_v22, %v6272_v13  ;;  %v870_v24 = vrot.slane %v669_v22, %v6268_v11 }
  0x58   : > { %v891_v1 = vrot.slane %v670_v25, %v6272_v13  ;;  %v884_v26 = vrot.slane %v670_v25, %v6268_v11 }
  0x59   : > { %725 = vbcast.lane.b32.xlu1 %v723_v29, 256 }
  0x5a   : > { %718 = vbcast.lane.b32.xlu0 %v716_v30, 256 }
  0x5d   : > { %739 = vbcast.lane.b32.xlu1 %v737_v34, 256 }
  0x5e   : > { %732 = vbcast.lane.b32.xlu0 %v730_v35, 256 }
  0x61   : > { %753 = vbcast.lane.b32.xlu1 %v751_v38, 256 }
  0x62   : > { %746 = vbcast.lane.b32.xlu0 %v744_v39, 256 }
  0x65   : > { %767 = vbcast.lane.b32.xlu1 %v765_v44, 256 }
  0x66   : > { %760 = vbcast.lane.b32.xlu0 %v758_v45, 256 }
  0x69   : > { %781 = vbcast.lane.b32.xlu1 %v779_v49, 256 }
  0x6a   : > { %774 = vbcast.lane.b32.xlu0 %v772_v50, 256 }
  0x6d   : > { %795 = vbcast.lane.b32.xlu1 %v793_v54, 256 }
  0x6e   : > { %788 = vbcast.lane.b32.xlu0 %v786_v55, 256 }
  0x71   : > { %809 = vbcast.lane.b32.xlu1 %v807_v59, 256 }
  0x72   : > { %802 = vbcast.lane.b32.xlu0 %v800_v60, 256 }
  0x75   : > { %823 = vbcast.lane.b32.xlu1 %v821_v0, 256 }
  0x76   : > { %816 = vbcast.lane.b32.xlu0 %v814_v3, 256 }
  0x79   : > { %837 = vbcast.lane.b32.xlu1 %v835_v6, 256 }
  0x7a   : > { %830 = vbcast.lane.b32.xlu0 %v828_v7, 256 }
  0x7d   : > { %851 = vbcast.lane.b32.xlu1 %v849_v15, 256  ;;  %v6381_v15 = vld [vmem:[%s7980_s5] sm:$0xf] }
  0x7e   : > { %844 = vbcast.lane.b32.xlu0 %v842_v16, 256 }
  0x81   : > { %865 = vbcast.lane.b32.xlu1 %v863_v20, 256 }
  0x82   : > { %858 = vbcast.lane.b32.xlu0 %v856_v21, 256  ;;  %v6388_v21 = vld [vmem:[%s7981_s6] sm:$0xf] }
  0x85   : > { %879 = vbcast.lane.b32.xlu1 %v877_v23, 256 }
  0x86   : > { %872 = vbcast.lane.b32.xlu0 %v870_v24, 256 }
  0x89   : > { %893 = vbcast.lane.b32.xlu1 %v891_v1, 256 }
  0x8a   : > { %886 = vbcast.lane.b32.xlu0 %v884_v26, 256 }
  0xbf   : > { %v691_v29 = vpop.permute.xlu1 %690 }
  0xc0   : > { %v677_v2 = vpop.permute.xlu0 %676  ;;  %v897_v30 = vsub.f32 %v691_v29, %v6350_v27 }
  0xc1   : > { %v895_v31 = vsub.f32 %v677_v2, %v6350_v27 }
  0xc2   : > { %v929_v32 = vmul.f32 %v897_v30, %v6355_v28 }
  0xc3   : > { %v927_v33 = vmul.f32 %v895_v31, %v6355_v28  ;;  %v698_v34 = vpop.permute.xlu1 %697 }
  0xc4   : > { %v684_v35 = vpop.permute.xlu0 %683  ;;  %v961_v36 = vmul.f32 0.5, %v929_v32  ;;  %v898_v38 = vsub.f32 %v698_v34, %v6350_v27 }
  0xc5   : > { %v959_v37 = vmul.f32 0.5, %v927_v33  ;;  %v896_v39 = vsub.f32 %v684_v35, %v6350_v27 }
  0xc6   : > { %5463 = vtanh.f32 %v961_v36  ;;  %v930_v40 = vmul.f32 %v898_v38, %v6355_v28 }
  0xc7   : > { %v928_v41 = vmul.f32 %v896_v39, %v6355_v28  ;;  %5465 = vtanh.f32 %v959_v37  ;;  %v712_v42 = vpop.permute.xlu1 %711 }
  0xc8   : > { %v705_v43 = vpop.permute.xlu0 %704  ;;  %v962_v44 = vmul.f32 0.5, %v930_v40  ;;  %v900_v46 = vsub.f32 %v712_v42, %v6350_v27 }
  0xc9   : > { %v960_v45 = vmul.f32 0.5, %v928_v41  ;;  %v899_v47 = vsub.f32 %v705_v43, %v6350_v27 }
  0xca   : > { %5467 = vtanh.f32 %v962_v44  ;;  %v932_v48 = vmul.f32 %v900_v46, %v6355_v28 }
  0xcb   : > { %v931_v49 = vmul.f32 %v899_v47, %v6355_v28  ;;  %5469 = vtanh.f32 %v960_v45  ;;  %v726_v50 = vpop.permute.xlu1 %725 }
  0xcc   : > { %v719_v51 = vpop.permute.xlu0 %718  ;;  %v964_v52 = vmul.f32 0.5, %v932_v48  ;;  %v902_v53 = vsub.f32 %v726_v50, %v6350_v27 }
  0xcd   : > { %v901_v54 = vsub.f32 %v719_v51, %v6350_v27  ;;  %v963_v55 = vmul.f32 0.5, %v931_v49 }
  0xce   : > { %5471 = vtanh.f32 %v964_v52  ;;  %v934_v56 = vmul.f32 %v902_v53, %v6355_v28 }
  0xcf   : > { %v933_v57 = vmul.f32 %v901_v54, %v6355_v28  ;;  %v740_v58 = vpop.permute.xlu1 %739  ;;  %5473 = vtanh.f32 %v963_v55 }
  0xd0   : > { %v733_v59 = vpop.permute.xlu0 %732  ;;  %v966_v60 = vmul.f32 0.5, %v934_v56  ;;  %v904_v61 = vsub.f32 %v740_v58, %v6350_v27 }
  0xd1   : > { %v903_v62 = vsub.f32 %v733_v59, %v6350_v27  ;;  %v965_v63 = vmul.f32 0.5, %v933_v57 }
  0xd2   : > { %v936_v0 = vmul.f32 %v904_v61, %v6355_v28  ;;  %5475 = vtanh.f32 %v966_v60 }
  0xd3   : > { %v935_v3 = vmul.f32 %v903_v62, %v6355_v28  ;;  %v5464_v4 = vpop.eup %5463  ;;  %v754_v5 = vpop.permute.xlu1 %753  ;;  %5477 = vtanh.f32 %v965_v63 }
  0xd4   : > { %v747_v6 = vpop.permute.xlu0 %746  ;;  %v5466_v7 = vpop.eup %5465  ;;  %v1025_v9 = vadd.f32 1.0, %v5464_v4  ;;  %v968_v10 = vmul.f32 0.5, %v936_v0  ;;  %v906_v14 = vsub.f32 %v754_v5, %v6350_v27 }
  0xd5   : > { %v967_v12 = vmul.f32 0.5, %v935_v3  ;;  %v1023_v16 = vadd.f32 1.0, %v5466_v7  ;;  %v905_v17 = vsub.f32 %v747_v6, %v6350_v27 }
  0xd6   : > { %v1057_v18 = vmul.f32 0.5, %v1025_v9  ;;  %5479 = vtanh.f32 %v968_v10  ;;  %v938_v19 = vmul.f32 %v906_v14, %v6355_v28 }
  0xd7   : > { %v5468_v20 = vpop.eup %5467  ;;  %v1055_v22 = vmul.f32 0.5, %v1023_v16  ;;  %5481 = vtanh.f32 %v967_v12  ;;  %v937_v23 = vmul.f32 %v905_v17, %v6355_v28  ;;  %v6391_v24 = vpop.permute.xlu1 %767 }
  0xd8   : > { %v6393_v25 = vpop.permute.xlu0 %760  ;;  %v5470_v1 = vpop.eup %5469  ;;  %v1089_v26 = vmul.f32 %v1057_v18, %v6381_v15  ;;  %v1026_v29 = vadd.f32 1.0, %v5468_v20  ;;  %v970_v2 = vmul.f32 0.5, %v938_v19  ;;  %v908_v30 = vsub.f32 %v6391_v24, %v6350_v27 }
  0xd9   : > { %v1087_v31 = vmul.f32 %v1055_v22, %v6381_v15  ;;  %v1024_v32 = vadd.f32 1.0, %v5470_v1  ;;  %v6399_v33 = vmul.f32 0.5, %v937_v23  ;;  %v907_v34 = vsub.f32 %v6393_v25, %v6350_v27 }
  0xda   : > { %v1121_v35 = vmul.f32 %v1089_v26, %v6388_v21  ;;  %v1471_v36 = vsel %vm1151_vm0, %v1089_v26, 0.0  ;;  %v1058_v37 = vmul.f32 0.5, %v1026_v29  ;;  %5483 = vtanh.f32 %v970_v2 }
  0xdb   : > { %v5472_v38 = vpop.eup %5471  ;;  %v1472_v39 = vrot.slane %v1471_v36, 4  ;;  %v1119_v40 = vmul.f32 %v1087_v31, %v6388_v21  ;;  %v1457_v41 = vsel %vm1151_vm0, %v1087_v31, 0.0  ;;  %v1056_v42 = vmul.f32 0.5, %v1024_v32 }
  0xdc   : > { %v1166_v43 = vsel %vm1151_vm0, %v1121_v35, 0.0  ;;  %v1458_v44 = vrot.slane %v1457_v41, 4  ;;  %v1090_v45 = vmul.f32 %v1058_v37, %v6381_v15  ;;  %v1028_v46 = vadd.f32 1.0, %v5472_v38  ;;  %v5474_v55 = vpop.eup %5473 }
  0xdd   : > { %v1167_v47 = vrot.slane %v1166_v43, 4  ;;  %v1473_v48 = vadd.f32 %v1472_v39, %v1471_v36  ;;  %v1152_v49 = vsel %vm1151_vm0, %v1119_v40, 0.0  ;;  %v1088_v50 = vmul.f32 %v1056_v42, %v6381_v15 }
  0xde   : > { %v1153_v51 = vrot.slane %v1152_v49, 4  ;;  %v1459_v52 = vadd.f32 %v1458_v44, %v1457_v41  ;;  %v1122_v53 = vmul.f32 %v1090_v45, %v6388_v21  ;;  %v1478_v54 = vsel %vm1151_vm0, %v1090_v45, 0.0 }
  0xdf   : > { %v1168_v56 = vadd.f32 %v1167_v47, %v1166_v43  ;;  %v1474_v57 = vrot.slane %v1473_v48, 2  ;;  %v1479_v58 = vrot.slane %v1478_v54, 4  ;;  %v1120_v59 = vmul.f32 %v1088_v50, %v6388_v21  ;;  %v5476_v60 = vpop.eup %5475 }
  0xe0   : > { %v1154_v61 = vadd.f32 %v1153_v51, %v1152_v49  ;;  %v1460_v62 = vrot.slane %v1459_v52, 2  ;;  %v1173_v63 = vsel %vm1151_vm0, %v1122_v53, 0.0  ;;  %v1464_v0 = vsel %vm1151_vm0, %v1088_v50, 0.0  ;;  %v5478_v7 = vpop.eup %5477 }
  0xe1   : > { %v1169_v3 = vrot.slane %v1168_v56, 2  ;;  %v1475_v4 = vadd.f32 %v1474_v57, %v1473_v48  ;;  %v1174_v5 = vrot.slane %v1173_v63, 4  ;;  %v1480_v6 = vadd.f32 %v1479_v58, %v1478_v54 }
  0xe2   : > { %v1155_v9 = vrot.slane %v1154_v61, 2  ;;  %v1461_v10 = vadd.f32 %v1460_v62, %v1459_v52  ;;  %v1159_v12 = vsel %vm1151_vm0, %v1120_v59, 0.0  ;;  %v1465_v14 = vrot.slane %v1464_v0, 4 }
  0xe3   : > { %v6417_v16 = vpop.eup %5479  ;;  %v1170_v17 = vadd.f32 %v1169_v3, %v1168_v56  ;;  %v1476_v18 = vrot.slane %v1475_v4, 1  ;;  %v1175_v19 = vadd.f32 %v1174_v5, %v1173_v63  ;;  %v1481_v20 = vrot.slane %v1480_v6, 2 }
  0xe4   : > { %v6419_v22 = vpop.eup %5481  ;;  %v1156_v23 = vadd.f32 %v1155_v9, %v1154_v61  ;;  %v1462_v1 = vrot.slane %v1461_v10, 1  ;;  %v1160_v26 = vrot.slane %v1159_v12, 4  ;;  %v1466_v29 = vadd.f32 %v1465_v14, %v1464_v0 }
  0xe5   : > { %v1171_v2 = vrot.slane %v1170_v17, 1  ;;  %v1477_v31 = vadd.f32 %v1476_v18, %v1475_v4  ;;  %v1176_v32 = vrot.slane %v1175_v19, 2  ;;  %v1482_v35 = vadd.f32 %v1481_v20, %v1480_v6 }
  0xe6   : > { %v1157_v36 = vrot.slane %v1156_v23, 1  ;;  %v1463_v37 = vadd.f32 %v1462_v1, %v1461_v10  ;;  %v1161_v38 = vadd.f32 %v1160_v26, %v1159_v12  ;;  %v1467_v39 = vrot.slane %v1466_v29, 2 }
  0xe7   : > { %v6421_v40 = vpop.eup %5483  ;;  %v1172_v41 = vadd.f32 %v1171_v2, %v1170_v17  ;;  %v1177_v42 = vadd.f32 %v1176_v32, %v1175_v19  ;;  %v1483_v43 = vrot.slane %v1482_v35, 1  ;;  %v1060_v44 = vmul.f32 0.5, %v1028_v46 }
  0xe8   : > { %v1158_v45 = vadd.f32 %v1157_v36, %v1156_v23  ;;  %v1162_v47 = vrot.slane %v1161_v38, 2  ;;  %v1468_v48 = vadd.f32 %v1467_v39, %v1466_v29  ;;  %v1027_v49 = vadd.f32 1.0, %v5474_v55 }
  0xe9   : > { %v1178_v50 = vrot.slane %v1177_v42, 1  ;;  %v1484_v51 = vadd.f32 %v1483_v43, %v1482_v35  ;;  %v1092_v52 = vmul.f32 %v1060_v44, %v6381_v15  ;;  %v1030_v53 = vadd.f32 1.0, %v5476_v60 }
  0xea   : > { %v1163_v54 = vadd.f32 %v1162_v47, %v1161_v38  ;;  %v1469_v56 = vrot.slane %v1468_v48, 1  ;;  %v1059_v57 = vmul.f32 0.5, %v1027_v49  ;;  %v1029_v58 = vadd.f32 1.0, %v5478_v7  ;;  %v6443_v49 = vpop.permute.xlu1 %781 }
  0xeb   : > { %v1179_v59 = vadd.f32 %v1178_v50, %v1177_v42  ;;  %v1714_v61 = vsel %vm1408_vm1, %v1484_v51, %v1477_v31  ;;  %v1124_v62 = vmul.f32 %v1092_v52, %v6388_v21  ;;  %v1492_v46 = vsel %vm1151_vm0, %v1092_v52, 0.0 }
  0xec   : > { %1746 = vst [vmem:[#allocation5 + $0x2] sm:$0x3] %v1714_v61  ;;  %v1164_v63 = vrot.slane %v1163_v54, 1  ;;  %v1470_v0 = vadd.f32 %v1469_v56, %v1468_v48  ;;  %v1493_v55 = vrot.slane %v1492_v46, 4  ;;  %v1091_v3 = vmul.f32 %v1059_v57, %v6381_v15 }
  0xed   : > { %v1410_v4 = vsel %vm1408_vm1, %v1179_v59, %v1172_v41  ;;  %v1187_v60 = vsel %vm1151_vm0, %v1124_v62, 0.0  ;;  %v1062_v5 = vmul.f32 0.5, %v1030_v53  ;;  %v1061_v6 = vmul.f32 0.5, %v1029_v58 }
  0xee   : > { %1442 = vst [vmem:[#allocation4 + $0x2] sm:$0x3] %v1410_v4  ;;  %v1165_v7 = vadd.f32 %v1164_v63, %v1163_v54  ;;  %v1713_v9 = vsel %vm1408_vm1, %v1470_v0, %v1463_v37  ;;  %v1188_v10 = vrot.slane %v1187_v60, 4  ;;  %v1494_v12 = vadd.f32 %v1493_v55, %v1492_v46 }
  0xef   : > { %1745 = vst [vmem:[#allocation5] sm:$0x3] %v1713_v9  ;;  %v1123_v14 = vmul.f32 %v1091_v3, %v6388_v21  ;;  %v1485_v17 = vsel %vm1151_vm0, %v1091_v3, 0.0  ;;  %v1094_v18 = vmul.f32 %v1062_v5, %v6381_v15  ;;  %v1093_v19 = vmul.f32 %v1061_v6, %v6381_v15 }
  0xf0   : > { %v1409_v20 = vsel %vm1408_vm1, %v1165_v7, %v1158_v45  ;;  %v1189_v23 = vadd.f32 %v1188_v10, %v1187_v60  ;;  %v1495_v1 = vrot.slane %v1494_v12, 2  ;;  %v1486_v26 = vrot.slane %v1485_v17, 4 }
  0xf1   : > { %1441 = vst [vmem:[#allocation4] sm:$0x3] %v1409_v20  ;;  %v1180_v29 = vsel %vm1151_vm0, %v1123_v14, 0.0  ;;  %v1126_v2 = vmul.f32 %v1094_v18, %v6388_v21  ;;  %v1506_v31 = vsel %vm1151_vm0, %v1094_v18, 0.0  ;;  %v1125_v32 = vmul.f32 %v1093_v19, %v6388_v21  ;;  %v6447_v14 = vpop.permute.xlu0 %774 }
  0xf2   : > { %v1190_v35 = vrot.slane %v1189_v23, 2  ;;  %v1496_v36 = vadd.f32 %v1495_v1, %v1494_v12  ;;  %v1181_v37 = vrot.slane %v1180_v29, 4  ;;  %v1487_v38 = vadd.f32 %v1486_v26, %v1485_v17  ;;  %v6449_v17 = vpop.permute.xlu1 %795 }
  0xf3   : > { %v1201_v39 = vsel %vm1151_vm0, %v1126_v2, 0.0  ;;  %v1507_v41 = vrot.slane %v1506_v31, 4  ;;  %v1194_v42 = vsel %vm1151_vm0, %v1125_v32, 0.0  ;;  %v1499_v43 = vsel %vm1151_vm0, %v1093_v19, 0.0 }
  0xf4   : > { %v1191_v44 = vadd.f32 %v1190_v35, %v1189_v23  ;;  %v1497_v45 = vrot.slane %v1496_v36, 1  ;;  %v1182_v47 = vadd.f32 %v1181_v37, %v1180_v29  ;;  %v1488_v48 = vrot.slane %v1487_v38, 2 }
  0xf5   : > { %v1202_v50 = vrot.slane %v1201_v39, 4  ;;  %v1508_v51 = vadd.f32 %v1507_v41, %v1506_v31  ;;  %v1195_v52 = vrot.slane %v1194_v42, 4  ;;  %v1500_v53 = vrot.slane %v1499_v43, 4 }
  0xf6   : > { %v1192_v54 = vrot.slane %v1191_v44, 1  ;;  %v1498_v56 = vadd.f32 %v1497_v45, %v1496_v36  ;;  %v1183_v57 = vrot.slane %v1182_v47, 2  ;;  %v1489_v58 = vadd.f32 %v1488_v48, %v1487_v38 }
  0xf7   : > { %v1203_v59 = vadd.f32 %v1202_v50, %v1201_v39  ;;  %v1509_v61 = vrot.slane %v1508_v51, 2  ;;  %v1196_v62 = vadd.f32 %v1195_v52, %v1194_v42  ;;  %v1501_v46 = vadd.f32 %v1500_v53, %v1499_v43  ;;  %v6461_v50 = vpop.permute.xlu0 %788 }
  0xf8   : > { %v1193_v63 = vadd.f32 %v1192_v54, %v1191_v44  ;;  %v1184_v0 = vadd.f32 %v1183_v57, %v1182_v47  ;;  %v1490_v55 = vrot.slane %v1489_v58, 1  ;;  %v1032_v3 = vadd.f32 1.0, %v6417_v16 }
  0xf9   : > { %v1204_v4 = vrot.slane %v1203_v59, 2  ;;  %v1510_v60 = vadd.f32 %v1509_v61, %v1508_v51  ;;  %v1197_v5 = vrot.slane %v1196_v62, 2  ;;  %v1502_v6 = vrot.slane %v1501_v46, 2  ;;  %v6463_v51 = vpop.permute.xlu1 %809 }
  0xfa   : > { %v1185_v7 = vrot.slane %v1184_v0, 1  ;;  %v1491_v9 = vadd.f32 %v1490_v55, %v1489_v58  ;;  %v1064_v10 = vmul.f32 0.5, %v1032_v3  ;;  %v1031_v12 = vadd.f32 1.0, %v6419_v22 }
  0xfb   : > { %v1205_v18 = vadd.f32 %v1204_v4, %v1203_v59  ;;  %v1511_v19 = vrot.slane %v1510_v60, 1  ;;  %v1198_v20 = vadd.f32 %v1197_v5, %v1196_v62  ;;  %v1503_v23 = vadd.f32 %v1502_v6, %v1501_v46 }
  0xfc   : > { %v1186_v1 = vadd.f32 %v1185_v7, %v1184_v0  ;;  %v1715_v16 = vsel %vm1408_vm1, %v1498_v56, %v1491_v9  ;;  %v1096_v26 = vmul.f32 %v1064_v10, %v6381_v15  ;;  %v1063_v29 = vmul.f32 0.5, %v1031_v12  ;;  %v6482_v9 = vpop.permute.xlu0 %802 }
  0xfd   : > { %1747 = vst [vmem:[#allocation5 + $0x4] sm:$0x3] %v1715_v16  ;;  %v1206_v2 = vrot.slane %v1205_v18, 1  ;;  %v1512_v31 = vadd.f32 %v1511_v19, %v1510_v60  ;;  %v1199_v32 = vrot.slane %v1198_v20, 1  ;;  %v1504_v35 = vrot.slane %v1503_v23, 1  ;;  %v6484_v10 = vpop.permute.xlu1 %823 }
  0xfe   : > { %v1411_v22 = vsel %vm1408_vm1, %v1193_v63, %v1186_v1  ;;  %v1128_v36 = vmul.f32 %v1096_v26, %v6388_v21  ;;  %v1520_v37 = vsel %vm1151_vm0, %v1096_v26, 0.0  ;;  %v1095_v38 = vmul.f32 %v1063_v29, %v6381_v15 }
  0xff   : > { %1443 = vst [vmem:[#allocation4 + $0x4] sm:$0x3] %v1411_v22  ;;  %v1207_v39 = vadd.f32 %v1206_v2, %v1205_v18  ;;  %v1200_v41 = vadd.f32 %v1199_v32, %v1198_v20  ;;  %v1505_v42 = vadd.f32 %v1504_v35, %v1503_v23  ;;  %v1521_v43 = vrot.slane %v1520_v37, 4 }
 0x100   : > { %v1215_v44 = vsel %vm1151_vm0, %v1128_v36, 0.0  ;;  %v1127_v45 = vmul.f32 %v1095_v38, %v6388_v21  ;;  %v1513_v47 = vsel %vm1151_vm0, %v1095_v38, 0.0  ;;  %v1034_v48 = vadd.f32 1.0, %v6421_v40 }
 0x101   : > { %v1412_v52 = vsel %vm1408_vm1, %v1207_v39, %v1200_v41  ;;  %v1716_v53 = vsel %vm1408_vm1, %v1512_v31, %v1505_v42  ;;  %v1216_v54 = vrot.slane %v1215_v44, 4  ;;  %v1522_v56 = vadd.f32 %v1521_v43, %v1520_v37  ;;  %v6492_v41 = vpop.permute.xlu0 %816  ;;  %v6494_v42 = vpop.permute.xlu1 %837 }
 0x102   : > { %1444 = vst [vmem:[#allocation4 + $0x6] sm:$0x3] %v1412_v52  ;;  %1748 = vst [vmem:[#allocation5 + $0x6] sm:$0x3] %v1716_v53  ;;  %v1208_v57 = vsel %vm1151_vm0, %v1127_v45, 0.0  ;;  %v1514_v58 = vrot.slane %v1513_v47, 4  ;;  %5485 = vtanh.f32 %v6399_v33  ;;  %v940_v46 = vmul.f32 %v908_v30, %v6355_v28 }
 0x103   : > { %v1066_v59 = vmul.f32 0.5, %v1034_v48  ;;  %v1217_v61 = vadd.f32 %v1216_v54, %v1215_v44  ;;  %v1523_v40 = vrot.slane %v1522_v56, 2  ;;  %v1209_v62 = vrot.slane %v1208_v57, 4 }
 0x104   : > { %v1515_v63 = vadd.f32 %v1514_v58, %v1513_v47  ;;  %v939_v55 = vmul.f32 %v907_v34, %v6355_v28  ;;  %v910_v3 = vsub.f32 %v6443_v49, %v6350_v27  ;;  %v972_v5 = vmul.f32 0.5, %v940_v46 }
 0x105   : > { %v1098_v0 = vmul.f32 %v1066_v59, %v6381_v15  ;;  %v1218_v33 = vrot.slane %v1217_v61, 2  ;;  %v1524_v4 = vadd.f32 %v1523_v40, %v1522_v56  ;;  %v1210_v60 = vadd.f32 %v1209_v62, %v1208_v57 }
 0x106   : > { %v1516_v6 = vrot.slane %v1515_v63, 2  ;;  %v971_v30 = vmul.f32 0.5, %v939_v55  ;;  %5487 = vtanh.f32 %v972_v5  ;;  %v942_v20 = vmul.f32 %v910_v3, %v6355_v28  ;;  %v6521_v55 = vld [vmem:[%s7982_s7 + $0x10] sm:$0xff]  ;;  %v6527_v5 = vpop.permute.xlu1 %851 }
 0x107   : > { %v1130_v7 = vmul.f32 %v1098_v0, %v6388_v21  ;;  %v1534_v24 = vsel %vm1151_vm0, %v1098_v0, 0.0  ;;  %v1219_v12 = vadd.f32 %v1218_v33, %v1217_v61  ;;  %v1525_v25 = vrot.slane %v1524_v4, 1  ;;  %v6516_v0 = vld [vmem:[%s7982_s7 + $0x8] sm:$0xff]  ;;  %8298 = vst [vmem:[#allocation18_spill] sm:$0xff] %v6521_v55 }
 0x108   : > { %v1211_v34 = vrot.slane %v1210_v60, 2  ;;  %v1535_v18 = vrot.slane %v1534_v24, 4  ;;  %v1517_v19 = vadd.f32 %v1516_v6, %v1515_v63  ;;  %5489 = vtanh.f32 %v971_v30  ;;  %v6511_v63 = vld [vmem:[%s7982_s7] sm:$0xff]  ;;  %8297 = vst [vmem:[#allocation17_spill] sm:$0xff] %v6516_v0  ;;  %v6532_v6 = vld [vmem:[%s7982_s7 + $0x18] sm:$0xff] }
 0x109   : > { %v1229_v49 = vsel %vm1151_vm0, %v1130_v7, 0.0  ;;  %v1220_v23 = vrot.slane %v1219_v12, 1  ;;  %v1526_v1 = vadd.f32 %v1525_v25, %v1524_v4  ;;  %v974_v31 = vmul.f32 0.5, %v942_v20  ;;  %8296 = vst [vmem:[#allocation16_spill] sm:$0xff] %v6511_v63  ;;  %8299 = vst [vmem:[#allocation19_spill] sm:$0xff] %v6532_v6  ;;  %v6537_v7 = vld [vmem:[%s7982_s7 + $0x20] sm:$0xff] }
 0x10a   : > { %v1212_v16 = vadd.f32 %v1211_v34, %v1210_v60  ;;  %v1230_v26 = vrot.slane %v1229_v49, 4  ;;  %v1518_v29 = vrot.slane %v1517_v19, 1  ;;  %v1536_v2 = vadd.f32 %v1535_v18, %v1534_v24  ;;  %v6525_v60 = vpop.permute.xlu0 %830  ;;  %8300 = vst [vmem:[#allocation20_spill] sm:$0xff] %v6537_v7  ;;  %v6542_v24 = vld [vmem:[%s7982_s7 + $0x28] sm:$0xff]  ;;  %v6552_v25 = vld [vmem:[%s7982_s7 + $0x30] sm:$0xff]  ;;  %v6557_v34 = vld [vmem:[%s7982_s7 + $0x38] sm:$0xff] }
 0x10b   : > { %v1221_v32 = vadd.f32 %v1220_v23, %v1219_v12  ;;  %v909_v36 = vsub.f32 %v6447_v14, %v6350_v27  ;;  %5491 = vtanh.f32 %v974_v31  ;;  %v912_v39 = vsub.f32 %v6449_v17, %v6350_v27  ;;  %8301 = vst [vmem:[#allocation21_spill] sm:$0xff] %v6542_v24  ;;  %8302 = vst [vmem:[#allocation22_spill] sm:$0xff] %v6552_v25  ;;  %v6562_v18 = vld [vmem:[%s7982_s7 + $0x40] sm:$0xff]  ;;  %v6572_v20 = vld [vmem:[%s7982_s7 + $0x48] sm:$0xff] }
 0x10c   : > { %v1213_v35 = vrot.slane %v1212_v16, 1  ;;  %v1231_v22 = vadd.f32 %v1230_v26, %v1229_v49  ;;  %v1519_v37 = vadd.f32 %v1518_v29, %v1517_v19  ;;  %v1537_v38 = vrot.slane %v1536_v2, 2  ;;  %8303 = vst [vmem:[#allocation23_spill] sm:$0xff] %v6557_v34  ;;  %8304 = vst [vmem:[#allocation24_spill] sm:$0xff] %v6562_v18  ;;  %v6577_v23 = vld [vmem:[%s7982_s7 + $0x50] sm:$0xff] }
 0x10d   : > { %v941_v45 = vmul.f32 %v909_v36, %v6355_v28  ;;  %v911_v47 = vsub.f32 %v6461_v50, %v6350_v27  ;;  %v944_v52 = vmul.f32 %v912_v39, %v6355_v28  ;;  %v914_v53 = vsub.f32 %v6463_v51, %v6350_v27  ;;  %8305 = vst [vmem:[#allocation25_spill] sm:$0xff] %v6572_v20 }
 0x10e   : > { %v1214_v43 = vadd.f32 %v1213_v35, %v1212_v16  ;;  %v1232_v44 = vrot.slane %v1231_v22, 2  ;;  %v1717_v48 = vsel %vm1408_vm1, %v1526_v1, %v1519_v37  ;;  %v1538_v14 = vadd.f32 %v1537_v38, %v1536_v2  ;;  %8306 = vst [vmem:[#allocation26_spill] sm:$0xff] %v6577_v23  ;;  %v6582_v1 = vld [vmem:[%s7982_s7 + $0x58] sm:$0xff]  ;;  %v6597_v35 = vld [vmem:[%s7982_s7 + $0x68] sm:$0xff] }
 0x10f   : > { %v5486_v17 = vpop.eup %5485  ;;  %1749 = vst [vmem:[#allocation5 + $0x8] sm:$0x3] %v1717_v48  ;;  %v973_v57 = vmul.f32 0.5, %v941_v45  ;;  %v943_v58 = vmul.f32 %v911_v47, %v6355_v28  ;;  %v976_v50 = vmul.f32 0.5, %v944_v52  ;;  %v946_v40 = vmul.f32 %v914_v53, %v6355_v28  ;;  %8307 = vst [vmem:[#allocation27_spill] sm:$0xff] %v6582_v1  ;;  %v6619_v52 = vld [vmem:[#allocation6 + $0x18] sm:$0xff] }
 0x110   : > { %v1413_v54 = vsel %vm1408_vm1, %v1221_v32, %v1214_v43  ;;  %v1233_v56 = vadd.f32 %v1232_v44, %v1231_v22  ;;  %v1539_v59 = vrot.slane %v1538_v14, 1  ;;  %v1033_v61 = vadd.f32 1.0, %v5486_v17  ;;  %v6592_v32 = vld [vmem:[%s7982_s7 + $0x60] sm:$0xff]  ;;  %8309 = vst [vmem:[#allocation29_spill] sm:$0xff] %v6597_v35  ;;  %v6602_v22 = vld [vmem:[%s7982_s7 + $0x70] sm:$0xff]  ;;  %8315 = vst [vmem:[#allocation35_spill] sm:$0xff] %v6619_v52 }
 0x111   : > { %1445 = vst [vmem:[#allocation4 + $0x8] sm:$0x3] %v1413_v54  ;;  %5493 = vtanh.f32 %v973_v57  ;;  %v975_v46 = vmul.f32 0.5, %v943_v58  ;;  %v913_v51 = vsub.f32 %v6482_v9, %v6350_v27  ;;  %v978_v4 = vmul.f32 0.5, %v946_v40  ;;  %8308 = vst [vmem:[#allocation28_spill] sm:$0xff] %v6592_v32  ;;  %v6614_v43 = vld [vmem:[#allocation6 + $0x8] sm:$0xff] }
 0x112   : > { %v1234_v62 = vrot.slane %v1233_v56, 1  ;;  %v6523_v3 = vadd.f32 %v1539_v59, %v1538_v14  ;;  %v1065_v33 = vmul.f32 0.5, %v1033_v61  ;;  %5495 = vtanh.f32 %v976_v50  ;;  %8310 = vst [vmem:[#allocation30_spill] sm:$0xff] %v6602_v22  ;;  %8313 = vst [vmem:[#allocation33_spill] sm:$0xff] %v6614_v43  ;;  %v6617_v14 = vld [vmem:[#allocation6 + $0x10] sm:$0xff]  ;;  %v6621_v53 = vld [vmem:[#allocation6 + $0x20] sm:$0xff] }
 0x113   : > { %5497 = vtanh.f32 %v975_v46  ;;  %v945_v9 = vmul.f32 %v913_v51, %v6355_v28  ;;  %v916_v12 = vsub.f32 %v6484_v10, %v6350_v27  ;;  %v915_v10 = vsub.f32 %v6492_v41, %v6350_v27  ;;  %v5488_v16 = vpop.eup %5487  ;;  %v6610_v41 = vld [vmem:[%s7982_s7 + $0x78] sm:$0xff]  ;;  %8314 = vst [vmem:[#allocation34_spill] sm:$0xff] %v6617_v14  ;;  %8316 = vst [vmem:[#allocation36_spill] sm:$0xff] %v6621_v53  ;;  %v6624_v58 = vld [vmem:[#allocation6 + $0x28] sm:$0xff] }
 0x114   : > { %v6544_v30 = vadd.f32 %v1234_v62, %v1233_v56  ;;  %v1097_v19 = vmul.f32 %v1065_v33, %v6381_v15  ;;  %5499 = vtanh.f32 %v978_v4  ;;  %v918_v49 = vsub.f32 %v6494_v42, %v6350_v27  ;;  %8311 = vst [vmem:[#allocation31_spill] sm:$0xff] %v6610_v41  ;;  %v6612_v42 = vld [vmem:[#allocation6] sm:$0xff]  ;;  %8317 = vst [vmem:[#allocation37_spill] sm:$0xff] %v6624_v58  ;;  %v6626_v59 = vld [vmem:[#allocation6 + $0x30] sm:$0xff] }
 0x115   : > { %v977_v26 = vmul.f32 0.5, %v945_v9  ;;  %v948_v29 = vmul.f32 %v916_v12, %v6355_v28  ;;  %v917_v2 = vsub.f32 %v6525_v60, %v6350_v27  ;;  %v1036_v38 = vadd.f32 1.0, %v5488_v16  ;;  %8312 = vst [vmem:[#allocation32_spill] sm:$0xff] %v6612_v42  ;;  %v5490_v44 = vpop.eup %5489  ;;  %8318 = vst [vmem:[#allocation38_spill] sm:$0xff] %v6626_v59  ;;  %v6628_v46 = vld [vmem:[#allocation6 + $0x38] sm:$0xff]  ;;  %v6630_v51 = vld [vmem:[#allocation6 + $0x40] sm:$0xff] }
 0x116   : > { %v1129_v36 = vmul.f32 %v1097_v19, %v6388_v21  ;;  %v1527_v37 = vsel %vm1151_vm0, %v1097_v19, 0.0  ;;  %v947_v39 = vmul.f32 %v915_v10, %v6355_v28  ;;  %v950_v48 = vmul.f32 %v918_v49, %v6355_v28  ;;  %8319 = vst [vmem:[#allocation39_spill] sm:$0xff] %v6628_v46  ;;  %8320 = vst [vmem:[#allocation40_spill] sm:$0xff] %v6630_v51  ;;  %v6632_v33 = vld [vmem:[#allocation6 + $0x48] sm:$0xff]  ;;  %v6635_v12 = vld [vmem:[#allocation6 + $0x50] sm:$0xff] }
 0x117   : > { %v1528_v45 = vrot.slane %v1527_v37, 4  ;;  %5501 = vtanh.f32 %v977_v26  ;;  %v980_v47 = vmul.f32 0.5, %v948_v29  ;;  %v1068_v54 = vmul.f32 0.5, %v1036_v38  ;;  %8321 = vst [vmem:[#allocation41_spill] sm:$0xff] %v6632_v33  ;;  %8322 = vst [vmem:[#allocation42_spill] sm:$0xff] %v6635_v12  ;;  %v6637_v19 = vld [vmem:[#allocation6 + $0x58] sm:$0xff] }
 0x118   : > { %v1222_v17 = vsel %vm1151_vm0, %v1129_v36, 0.0  ;;  %v1035_v56 = vadd.f32 1.0, %v5490_v44  ;;  %v979_v57 = vmul.f32 0.5, %v947_v39  ;;  %v5492_v61 = vpop.eup %5491  ;;  %v982_v62 = vmul.f32 0.5, %v950_v48  ;;  %8323 = vst [vmem:[#allocation43_spill] sm:$0xff] %v6637_v19  ;;  %v6639_v10 = vld [vmem:[#allocation6 + $0x60] sm:$0xff] }
 0x119   : > { %v1223_v50 = vrot.slane %v1222_v17, 4  ;;  %v1529_v40 = vadd.f32 %v1528_v45, %v1527_v37  ;;  %5503 = vtanh.f32 %v980_v47  ;;  %v1100_v4 = vmul.f32 %v1068_v54, %v6381_v15  ;;  %8324 = vst [vmem:[#allocation44_spill] sm:$0xff] %v6639_v10  ;;  %v6642_v29 = vld [vmem:[#allocation6 + $0x68] sm:$0xff]  ;;  %v6644_v36 = vld [vmem:[#allocation6 + $0x70] sm:$0xff]  ;;  %v6646_v37 = vld [vmem:[#allocation6 + $0x78] sm:$0xff] }
 0x11a   : > { %v1067_v60 = vmul.f32 0.5, %v1035_v56  ;;  %v1038_v9 = vadd.f32 1.0, %v5492_v61  ;;  %5505 = vtanh.f32 %v979_v57  ;;  %v949_v26 = vmul.f32 %v917_v2, %v6355_v28  ;;  %8325 = vst [vmem:[#allocation45_spill] sm:$0xff] %v6642_v29  ;;  %8326 = vst [vmem:[#allocation46_spill] sm:$0xff] %v6644_v36  ;;  %v6651_v47 = vld [vmem:[#allocation8] sm:$0xff]  ;;  %v6653_v48 = vld [vmem:[#allocation8 + $0x8] sm:$0xff] }
 0x11b   : > { %v1224_v49 = vadd.f32 %v1223_v50, %v1222_v17  ;;  %v1530_v16 = vrot.slane %v1529_v40, 2  ;;  %5507 = vtanh.f32 %v982_v62  ;;  %8327 = vst [vmem:[#allocation47_spill] sm:$0xff] %v6646_v37  ;;  %v1132_v38 = vmul.f32 %v1100_v4, %v6388_v21  ;;  %8328 = vst [vmem:[#allocation48_spill] sm:$0xff] %v6651_v47  ;;  %v6655_v17 = vld [vmem:[#allocation8 + $0x10] sm:$0xff]  ;;  %v6659_v57 = vld [vmem:[#allocation8 + $0x18] sm:$0xff] }
 0x11c   : > { %v1548_v39 = vsel %vm1151_vm0, %v1100_v4, 0.0  ;;  %v1099_v44 = vmul.f32 %v1067_v60, %v6381_v15  ;;  %v1070_v45 = vmul.f32 0.5, %v1038_v9  ;;  %8329 = vst [vmem:[#allocation49_spill] sm:$0xff] %v6653_v48  ;;  %8330 = vst [vmem:[#allocation50_spill] sm:$0xff] %v6655_v17  ;;  %v6657_v56 = vmul.f32 0.5, %v949_v26  ;;  %v6661_v61 = vld [vmem:[#allocation8 + $0x20] sm:$0xff] }
 0x11d   : > { %v1225_v28 = vrot.slane %v1224_v49, 2  ;;  %v1531_v2 = vadd.f32 %v1530_v16, %v1529_v40  ;;  %v1549_v54 = vrot.slane %v1548_v39, 4  ;;  %8331 = vst [vmem:[#allocation51_spill] sm:$0xff] %v6659_v57  ;;  %8332 = vst [vmem:[#allocation52_spill] sm:$0xff] %v6661_v61  ;;  %v6663_v50 = vld [vmem:[#allocation8 + $0x28] sm:$0xff]  ;;  %v1243_v4 = vsel %vm1151_vm0, %v1132_v38, 0.0 }
 0x11e   : > { %8333 = vst [vmem:[#allocation53_spill] sm:$0xff] %v6663_v50  ;;  %v5494_v62 = vpop.eup %5493  ;;  %v1131_v60 = vmul.f32 %v1099_v44, %v6388_v21  ;;  %v1541_v9 = vsel %vm1151_vm0, %v1099_v44, 0.0  ;;  %v1102_v31 = vmul.f32 %v1070_v45, %v6381_v15  ;;  %v6671_v40 = vld [vmem:[#allocation8 + $0x38] sm:$0xff]  ;;  %v6673_v16 = vld [vmem:[#allocation8 + $0x40] sm:$0xff]  ;;  %v1244_v36 = vrot.slane %v1243_v4, 4  ;;  %v6677_v29 = vld [vmem:[#allocation8 + $0x48] sm:$0xff] }
 0x11f   : > { %8335 = vst [vmem:[#allocation55_spill] sm:$0xff] %v6671_v40  ;;  %8336 = vst [vmem:[#allocation56_spill] sm:$0xff] %v6673_v16  ;;  %v6675_v26 = vpop.eup %5495  ;;  %v1226_v37 = vadd.f32 %v1225_v28, %v1224_v49  ;;  %v1532_v41 = vrot.slane %v1531_v2, 1  ;;  %v1550_v22 = vadd.f32 %v1549_v54, %v1548_v39  ;;  %v6679_v38 = vld [vmem:[#allocation8 + $0x50] sm:$0xff]  ;;  %v6681_v35 = vld [vmem:[#allocation8 + $0x58] sm:$0xff]  ;;  %v1542_v10 = vrot.slane %v1541_v9, 4 }
 0x120   : > { %8337 = vst [vmem:[#allocation57_spill] sm:$0xff] %v6677_v29  ;;  %8338 = vst [vmem:[#allocation58_spill] sm:$0xff] %v6679_v38  ;;  %v6683_v44 = vpop.eup %5497  ;;  %v1236_v45 = vsel %vm1151_vm0, %v1131_v60, 0.0  ;;  %v1134_v40 = vmul.f32 %v1102_v31, %v6388_v21  ;;  %v1562_v16 = vsel %vm1151_vm0, %v1102_v31, 0.0  ;;  %v6688_v19 = vld [vmem:[#allocation8 + $0x60] sm:$0xff]  ;;  %v6690_v49 = vld [vmem:[#allocation8 + $0x68] sm:$0xff]  ;;  %5509 = vtanh.f32 %v6657_v56 }
 0x121   : > { %8339 = vst [vmem:[#allocation59_spill] sm:$0xff] %v6681_v35  ;;  %8340 = vst [vmem:[#allocation60_spill] sm:$0xff] %v6688_v19  ;;  %v6692_v39 = vld [vmem:[#allocation8 + $0x70] sm:$0xff]  ;;  %v6694_v28 = vpop.eup %5499  ;;  %v1227_v54 = vrot.slane %v1226_v37, 1  ;;  %v1533_v38 = vadd.f32 %v1532_v41, %v1531_v2  ;;  %v1245_v35 = vadd.f32 %v1244_v36, %v1243_v4  ;;  %v1551_v29 = vrot.slane %v1550_v22, 2  ;;  %v6696_v32 = vld [vmem:[#allocation8 + $0x78] sm:$0xff] }
 0x122   : > { %8341 = vst [vmem:[#allocation61_spill] sm:$0xff] %v6690_v49  ;;  %8342 = vst [vmem:[#allocation62_spill] sm:$0xff] %v6692_v39  ;;  %v6698_v60 = vld [vmem:[#allocation10] sm:$0xff]  ;;  %v1237_v1 = vrot.slane %v1236_v45, 4  ;;  %v1543_v31 = vadd.f32 %v1542_v10, %v1541_v9  ;;  %v1257_v19 = vsel %vm1151_vm0, %v1134_v40, 0.0  ;;  %v1563_v12 = vrot.slane %v1562_v16, 4 }
 0x123   : > { %8343 = vst [vmem:[#allocation63_spill] sm:$0xff] %v6696_v32  ;;  %8344 = vst [vmem:[#allocation64_spill] sm:$0xff] %v6698_v60  ;;  %v6703_v49 = vld [vmem:[#allocation10 + $0x10] sm:$0xff]  ;;  %v6705_v39 = vld [vmem:[#allocation10 + $0x18] sm:$0xff]  ;;  %v1228_v41 = vadd.f32 %v1227_v54, %v1226_v37  ;;  %v1718_v36 = vsel %vm1408_vm1, %v6523_v3, %v1533_v38  ;;  %v1246_v2 = vrot.slane %v1245_v35, 2  ;;  %v1552_v4 = vadd.f32 %v1551_v29, %v1550_v22 }
 0x124   : > { %8346 = vst [vmem:[#allocation66_spill] sm:$0xff] %v6703_v49  ;;  %8347 = vst [vmem:[#allocation67_spill] sm:$0xff] %v6705_v39  ;;  %v6707_v50 = vld [vmem:[#allocation10 + $0x20] sm:$0xff]  ;;  %v6711_v32 = vld [vmem:[#allocation10 + $0x28] sm:$0xff]  ;;  %v6717_v9 = vpop.eup %5501  ;;  %v1238_v40 = vadd.f32 %v1237_v1, %v1236_v45  ;;  %v1544_v33 = vrot.slane %v1543_v31, 2  ;;  %v1258_v20 = vrot.slane %v1257_v19, 4  ;;  %v1564_v39 = vadd.f32 %v1563_v12, %v1562_v16 }
 0x125   : > { %8348 = vst [vmem:[#allocation68_spill] sm:$0xff] %v6707_v50  ;;  %8349 = vst [vmem:[#allocation69_spill] sm:$0xff] %v6711_v32  ;;  %v6713_v23 = vld [vmem:[#allocation10 + $0x30] sm:$0xff]  ;;  %v6715_v10 = vld [vmem:[#allocation10 + $0x38] sm:$0xff]  ;;  %v1414_v22 = vsel %vm1408_vm1, %v6544_v30, %v1228_v41  ;;  %v1247_v29 = vadd.f32 %v1246_v2, %v1245_v35  ;;  %v1553_v38 = vrot.slane %v1552_v4, 1  ;;  %v1037_v54 = vadd.f32 1.0, %v5494_v62 }
 0x126   : > { %8350 = vst [vmem:[#allocation70_spill] sm:$0xff] %v6713_v23  ;;  %8351 = vst [vmem:[#allocation71_spill] sm:$0xff] %v6715_v10  ;;  %v6719_v50 = vld [vmem:[#allocation10 + $0x40] sm:$0xff]  ;;  %v6721_v37 = vld [vmem:[#allocation10 + $0x48] sm:$0xff]  ;;  %v6733_v45 = vpop.eup %5503  ;;  %v1239_v12 = vrot.slane %v1238_v40, 2  ;;  %v1545_v16 = vadd.f32 %v1544_v33, %v1543_v31  ;;  %v1040_v2 = vadd.f32 1.0, %v6675_v26 }
 0x127   : > { %1750 = vst [vmem:[#allocation5 + $0xa] sm:$0x3] %v1718_v36  ;;  %8352 = vst [vmem:[#allocation72_spill] sm:$0xff] %v6719_v50  ;;  %v6723_v3 = vld [vmem:[#allocation10 + $0x50] sm:$0xff]  ;;  %v6727_v10 = vld [vmem:[#allocation10 + $0x58] sm:$0xff]  ;;  %v1259_v36 = vadd.f32 %v1258_v20, %v1257_v19  ;;  %v6739_v30 = vpop.eup %5505  ;;  %v1248_v35 = vrot.slane %v1247_v29, 1  ;;  %v1554_v62 = vadd.f32 %v1553_v38, %v1552_v4 }
 0x128   : > { %8353 = vst [vmem:[#allocation73_spill] sm:$0xff] %v6721_v37  ;;  %8354 = vst [vmem:[#allocation74_spill] sm:$0xff] %v6723_v3  ;;  %v6729_v23 = vld [vmem:[#allocation10 + $0x60] sm:$0xff]  ;;  %v6731_v1 = vld [vmem:[#allocation10 + $0x68] sm:$0xff]  ;;  %v1565_v37 = vrot.slane %v1564_v39, 2  ;;  %v1069_v41 = vmul.f32 0.5, %v1037_v54 }
 0x129   : > { %8355 = vst [vmem:[#allocation75_spill] sm:$0xff] %v6727_v10  ;;  %8356 = vst [vmem:[#allocation76_spill] sm:$0xff] %v6729_v23  ;;  %v6735_v3 = vld [vmem:[#allocation10 + $0x70] sm:$0xff]  ;;  %v6737_v50 = vld [vmem:[#allocation10 + $0x78] sm:$0xff]  ;;  %v6742_v23 = vpop.eup %5507  ;;  %v1546_v10 = vrot.slane %v1545_v16, 1  ;;  %v1249_v20 = vadd.f32 %v1248_v35, %v1247_v29  ;;  %v1072_v31 = vmul.f32 0.5, %v1040_v2 }
 0x12a   : > { %8357 = vst [vmem:[#allocation77_spill] sm:$0xff] %v6731_v1  ;;  %1446 = vst [vmem:[#allocation4 + $0xa] sm:$0x3] %v1414_v22  ;;  %v1240_v1 = vadd.f32 %v1239_v12, %v1238_v40  ;;  %v1260_v22 = vrot.slane %v1259_v36, 2  ;;  %v1566_v32 = vadd.f32 %v1565_v37, %v1564_v39  ;;  %v6744_v33 = vld [vmem:[#allocation2] sm:$0x3]   ;;  %v1101_v19 = vmul.f32 %v1069_v41, %v6381_v15 }
 0x12b   : > { %8358 = vst [vmem:[#allocation78_spill] sm:$0xff] %v6735_v3  ;;  %8359 = vst [vmem:[#allocation79_spill] sm:$0xff] %v6737_v50  ;;  %v1039_v50 = vadd.f32 1.0, %v6683_v44  ;;  %v1547_v61 = vadd.f32 %v1546_v10, %v1545_v16  ;;  %v1104_v40 = vmul.f32 %v1072_v31, %v6381_v15 }
 0x12c   : > { %v1241_v3 = vrot.slane %v1240_v1, 1  ;;  %v1261_v4 = vadd.f32 %v1260_v22, %v1259_v36  ;;  %v1567_v38 = vrot.slane %v1566_v32, 1  ;;  %v1133_v26 = vmul.f32 %v1101_v19, %v6388_v21 }
 0x12d   : > { %v1555_v54 = vsel %vm1151_vm0, %v1101_v19, 0.0  ;;  %v1071_v12 = vmul.f32 0.5, %v1039_v50  ;;  %v1719_v37 = vsel %vm1408_vm1, %v1554_v62, %v1547_v61  ;;  %v1136_v10 = vmul.f32 %v1104_v40, %v6388_v21 }
 0x12e   : > { %v1242_v39 = vadd.f32 %v1241_v3, %v1240_v1  ;;  %v1262_v29 = vrot.slane %v1261_v4, 1  ;;  %v1568_v35 = vadd.f32 %v1567_v38, %v1566_v32  ;;  %1751 = vst [vmem:[#allocation5 + $0xc] sm:$0x3] %v1719_v37  ;;  %v1250_v41 = vsel %vm1151_vm0, %v1133_v26, 0.0 }
 0x12f   : > { %v1556_v44 = vrot.slane %v1555_v54, 4  ;;  %v1576_v16 = vsel %vm1151_vm0, %v1104_v40, 0.0  ;;  %v1251_v22 = vrot.slane %v1250_v41, 4  ;;  %v1271_v3 = vsel %vm1151_vm0, %v1136_v10, 0.0 }
 0x130   : > { %v1415_v36 = vsel %vm1408_vm1, %v1249_v20, %v1242_v39  ;;  %v1263_v2 = vadd.f32 %v1262_v29, %v1261_v4  ;;  %v1577_v19 = vrot.slane %v1576_v16, 4  ;;  %v1103_v61 = vmul.f32 %v1071_v12, %v6381_v15 }
 0x131   : > { %1447 = vst [vmem:[#allocation4 + $0xc] sm:$0x3] %v1415_v36  ;;  %v1557_v50 = vadd.f32 %v1556_v44, %v1555_v54  ;;  %v1042_v32 = vadd.f32 1.0, %v6694_v28  ;;  %v1252_v1 = vadd.f32 %v1251_v22, %v1250_v41  ;;  %v1272_v62 = vrot.slane %v1271_v3, 4 }
 0x132   : > { %v1578_v31 = vadd.f32 %v1577_v19, %v1576_v16  ;;  %v1041_v38 = vadd.f32 1.0, %v6717_v9  ;;  %v1135_v40 = vmul.f32 %v1103_v61, %v6388_v21  ;;  %v1569_v20 = vsel %vm1151_vm0, %v1103_v61, 0.0 }
 0x133   : > { %v1558_v26 = vrot.slane %v1557_v50, 2  ;;  %v1074_v4 = vmul.f32 0.5, %v1042_v32  ;;  %v1253_v39 = vrot.slane %v1252_v1, 2  ;;  %v1273_v37 = vadd.f32 %v1272_v62, %v1271_v3 }
 0x134   : > { %v1579_v54 = vrot.slane %v1578_v31, 2  ;;  %v1570_v29 = vrot.slane %v1569_v20, 4  ;;  %v1264_v12 = vsel %vm1151_vm0, %v1135_v40, 0.0  ;;  %v1073_v41 = vmul.f32 0.5, %v1041_v38 }
 0x135   : > { %v1559_v44 = vadd.f32 %v1558_v26, %v1557_v50  ;;  %v1106_v28 = vmul.f32 %v1074_v4, %v6381_v15  ;;  %v1254_v10 = vadd.f32 %v1253_v39, %v1252_v1  ;;  %v1274_v16 = vrot.slane %v1273_v37, 2 }
 0x136   : > { %v1580_v36 = vadd.f32 %v1579_v54, %v1578_v31  ;;  %v1265_v9 = vrot.slane %v1264_v12, 4  ;;  %v1571_v19 = vadd.f32 %v1570_v29, %v1569_v20 }
 0x137   : > { %v1560_v22 = vrot.slane %v1559_v44, 1  ;;  %v1138_v51 = vmul.f32 %v1106_v28, %v6388_v21  ;;  %v1590_v61 = vsel %vm1151_vm0, %v1106_v28, 0.0  ;;  %v1255_v32 = vrot.slane %v1254_v10, 1 }
 0x138   : > { %v1275_v3 = vadd.f32 %v1274_v16, %v1273_v37  ;;  %v1581_v62 = vrot.slane %v1580_v36, 1  ;;  %v1266_v57 = vadd.f32 %v1265_v9, %v1264_v12  ;;  %v1572_v26 = vrot.slane %v1571_v19, 2 }
 0x139   : > { %v1561_v50 = vadd.f32 %v1560_v22, %v1559_v44  ;;  %v1285_v40 = vsel %vm1151_vm0, %v1138_v51, 0.0  ;;  %v1591_v15 = vrot.slane %v1590_v61, 4  ;;  %v1256_v38 = vadd.f32 %v1255_v32, %v1254_v10  ;;  %v6772_v44 = vld [vmem:[%s7980_s5] sm:$0xf] }
 0x13a   : > { %v1276_v1 = vrot.slane %v1275_v3, 1  ;;  %v1582_v4 = vadd.f32 %v1581_v62, %v1580_v36  ;;  %v1267_v31 = vrot.slane %v1266_v57, 2  ;;  %v1573_v20 = vadd.f32 %v1572_v26, %v1571_v19 }
 0x13b   : > { %v1720_v39 = vsel %vm1408_vm1, %v1568_v35, %v1561_v50  ;;  %v1286_v54 = vrot.slane %v1285_v40, 4  ;;  %v1592_v21 = vadd.f32 %v1591_v15, %v1590_v61  ;;  %v1416_v29 = vsel %vm1408_vm1, %v1263_v2, %v1256_v38  ;;  %v6779_v2 = vld [vmem:[%s7981_s6] sm:$0xf] }
 0x13c   : > { %1752 = vst [vmem:[#allocation5 + $0xe] sm:$0x3] %v1720_v39  ;;  %v1277_v37 = vadd.f32 %v1276_v1, %v1275_v3  ;;  %v1268_v28 = vadd.f32 %v1267_v31, %v1266_v57  ;;  %v1105_v51 = vmul.f32 %v6772_v44, %v1073_v41  ;;  %1448 = vst [vmem:[#allocation4 + $0xe] sm:$0x3] %v1416_v29  ;;  %v1574_v12 = vrot.slane %v1573_v20, 1 }
 0x13d   : > { %v1287_v10 = vadd.f32 %v1286_v54, %v1285_v40  ;;  %v1593_v16 = vrot.slane %v1592_v21, 2  ;;  %v1044_v35 = vadd.f32 1.0, %v6733_v45  ;;  %v1043_v22 = vadd.f32 1.0, %v6739_v30 }
 0x13e   : > { %v1269_v36 = vrot.slane %v1268_v28, 1  ;;  %v1137_v57 = vmul.f32 %v6779_v2, %v1105_v51  ;;  %v1583_v9 = vsel %vm1151_vm0, %v1105_v51, 0.0  ;;  %v1575_v19 = vadd.f32 %v1574_v12, %v1573_v20 }
 0x13f   : > { %v1288_v41 = vrot.slane %v1287_v10, 2  ;;  %v1594_v61 = vadd.f32 %v1593_v16, %v1592_v21  ;;  %v1584_v32 = vrot.slane %v1583_v9, 4  ;;  %v1076_v45 = vmul.f32 0.5, %v1044_v35 }
 0x140   : > { %v1270_v3 = vadd.f32 %v1269_v36, %v1268_v28  ;;  %v1278_v62 = vsel %vm1151_vm0, %v1137_v57, 0.0  ;;  %v1075_v50 = vmul.f32 0.5, %v1043_v22  ;;  %v1721_v26 = vsel %vm1408_vm1, %v1582_v4, %v1575_v19  ;;  %v845_v36 = vpop.permute.xlu0 %844 }
 0x141   : > { %v1289_v40 = vadd.f32 %v1288_v41, %v1287_v10  ;;  %v1595_v15 = vrot.slane %v1594_v61, 1  ;;  %v1279_v38 = vrot.slane %v1278_v62, 4  ;;  %1753 = vst [vmem:[#allocation5 + $0x10] sm:$0x3] %v1721_v26  ;;  %v1585_v31 = vadd.f32 %v1584_v32, %v1583_v9 }
 0x142   : > { %v1417_v1 = vsel %vm1408_vm1, %v1277_v37, %v1270_v3  ;;  %v1108_v30 = vmul.f32 %v6772_v44, %v1076_v45  ;;  %v1107_v39 = vmul.f32 %v6772_v44, %v1075_v50  ;;  %v1046_v29 = vadd.f32 1.0, %v6742_v23 }
 0x143   : > { %1449 = vst [vmem:[#allocation4 + $0x10] sm:$0x3] %v1417_v1  ;;  %v1290_v20 = vrot.slane %v1289_v40, 1  ;;  %v1596_v54 = vadd.f32 %v1595_v15, %v1594_v61  ;;  %v1280_v21 = vadd.f32 %v1279_v38, %v1278_v62  ;;  %v1586_v28 = vrot.slane %v1585_v31, 2  ;;  %v866_v38 = vpop.permute.xlu1 %865 }
 0x144   : > { %v1140_v4 = vmul.f32 %v6779_v2, %v1108_v30  ;;  %v1604_v51 = vsel %vm1151_vm0, %v1108_v30, 0.0  ;;  %v1139_v12 = vmul.f32 %v6779_v2, %v1107_v39  ;;  %v1597_v35 = vsel %vm1151_vm0, %v1107_v39, 0.0  ;;  %v6801_v39 = vld [vmem:[%s7979_s4] sm:$0xf] }
 0x145   : > { %v1291_v37 = vadd.f32 %v1290_v20, %v1289_v40  ;;  %v1281_v10 = vrot.slane %v1280_v21, 2  ;;  %v1605_v16 = vrot.slane %v1604_v51, 4  ;;  %v1587_v57 = vadd.f32 %v1586_v28, %v1585_v31 }
 0x146   : > { %v1299_v9 = vsel %vm1151_vm0, %v1140_v4, 0.0  ;;  %v1292_v22 = vsel %vm1151_vm0, %v1139_v12, 0.0  ;;  %v1598_v19 = vrot.slane %v1597_v35, 4  ;;  %v1078_v45 = vmul.f32 0.5, %v1046_v29 }
 0x147   : > { %v1282_v23 = vadd.f32 %v1281_v10, %v1280_v21  ;;  %v1300_v41 = vrot.slane %v1299_v9, 4  ;;  %v1606_v61 = vadd.f32 %v1605_v16, %v1604_v51  ;;  %v1293_v32 = vrot.slane %v1292_v22, 4  ;;  %v859_v51 = vpop.permute.xlu0 %858 }
 0x148   : > { %v1588_v3 = vrot.slane %v1587_v57, 1  ;;  %v1599_v62 = vadd.f32 %v1598_v19, %v1597_v35  ;;  %v1110_v30 = vmul.f32 %v6772_v44, %v1078_v45  ;;  %v8360_v20 = vsub.f32 %v6527_v5, %v6350_v27 }
 0x149   : > { %v1283_v50 = vrot.slane %v1282_v23, 1  ;;  %v1301_v26 = vadd.f32 %v1300_v41, %v1299_v9  ;;  %v1607_v40 = vrot.slane %v1606_v61, 2  ;;  %v1294_v15 = vadd.f32 %v1293_v32, %v1292_v22 }
 0x14a   : > { %v1589_v1 = vadd.f32 %v1588_v3, %v1587_v57  ;;  %v1600_v31 = vrot.slane %v1599_v62, 2  ;;  %v952_v21 = vmul.f32 %v6801_v39, %v8360_v20  ;;  %v1142_v16 = vmul.f32 %v6779_v2, %v1110_v30 }
 0x14b   : > { %v1284_v56 = vadd.f32 %v1283_v50, %v1282_v23  ;;  %v1302_v29 = vrot.slane %v1301_v26, 2  ;;  %v1608_v28 = vadd.f32 %v1607_v40, %v1606_v61  ;;  %v1295_v4 = vrot.slane %v1294_v15, 2 }
 0x14c   : > { %v1722_v12 = vsel %vm1408_vm1, %v1596_v54, %v1589_v1  ;;  %v1601_v10 = vadd.f32 %v1600_v31, %v1599_v62  ;;  %v1618_v35 = vsel %vm1151_vm0, %v1110_v30, 0.0  ;;  %v1313_v19 = vsel %vm1151_vm0, %v1142_v16, 0.0  ;;  %v880_v62 = vpop.permute.xlu1 %879  ;;  %v873_v31 = vpop.permute.xlu0 %872 }
 0x14d   : > { %v1418_v57 = vsel %vm1408_vm1, %v1291_v37, %v1284_v56  ;;  %1754 = vst [vmem:[#allocation5 + $0x12] sm:$0x3] %v1722_v12  ;;  %v1303_v9 = vadd.f32 %v1302_v29, %v1301_v26  ;;  %v1609_v22 = vrot.slane %v1608_v28, 1  ;;  %v1296_v27 = vadd.f32 %v1295_v4, %v1294_v15  ;;  %v5530_v37 = vld [vmem:[%s7978_s3] sm:$0xf] }
 0x14e   : > { %1450 = vst [vmem:[#allocation4 + $0x12] sm:$0x3] %v1418_v57  ;;  %v1602_v5 = vrot.slane %v1601_v10, 1  ;;  %v1619_v23 = vrot.slane %v1618_v35, 4  ;;  %v984_v41 = vmul.f32 0.5, %v952_v21  ;;  %v1314_v3 = vrot.slane %v1313_v19, 4 }
 0x14f   : > { %v1304_v61 = vrot.slane %v1303_v9, 1  ;;  %v1610_v32 = vadd.f32 %v1609_v22, %v1608_v28  ;;  %v1297_v54 = vrot.slane %v1296_v27, 1  ;;  %v919_v50 = vsub.f32 %v845_v36, %v5530_v37  ;;  %v1825_v22 = vld [vmem:[%s7986_s11] sm:$0x1] }
 0x150   : > { %v1603_v45 = vadd.f32 %v1602_v5, %v1601_v10  ;;  %5511 = vtanh.f32 %v984_v41  ;;  %v1620_v15 = vadd.f32 %v1619_v23, %v1618_v35  ;;  %v922_v1 = vsub.f32 %v866_v38, %v5530_v37  ;;  %v5510_v10 = vpop.eup %5509  ;;  %v894_v57 = vpop.permute.xlu1 %893  ;;  %v1826_v41 = vld [vmem:[%s7987_s12] sm:$0x1] }
 0x151   : > { %v1305_v26 = vadd.f32 %v1304_v61, %v1303_v9  ;;  %v1298_v40 = vadd.f32 %v1297_v54, %v1296_v27  ;;  %v951_v20 = vmul.f32 %v6801_v39, %v919_v50  ;;  %v921_v21 = vsub.f32 %v859_v51, %v5530_v37  ;;  %v887_v23 = vpop.permute.xlu0 %886  ;;  %v6830_v61 = vld [vmem:[%s7988_s13] sm:$0x1] }
 0x152   : > { %v1723_v30 = vsel %vm1408_vm1, %v1610_v32, %v1603_v45  ;;  %v1315_v29 = vadd.f32 %v1314_v3, %v1313_v19  ;;  %v954_v28 = vmul.f32 %v6801_v39, %v922_v1  ;;  %v924_v4 = vsub.f32 %v880_v62, %v5530_v37  ;;  %8361 = vst [vmem:[#allocation80_spill] sm:$0xff] %v6830_v61 }
 0x153   : > { %v1419_v56 = vsel %vm1408_vm1, %v1305_v26, %v1298_v40  ;;  %1755 = vst [vmem:[#allocation5 + $0x14] sm:$0x3] %v1723_v30  ;;  %v983_v12 = vmul.f32 0.5, %v951_v20  ;;  %v953_v36 = vmul.f32 %v6801_v39, %v921_v21  ;;  %v1621_v16 = vrot.slane %v1620_v15, 2 }
 0x154   : > { %1451 = vst [vmem:[#allocation4 + $0x14] sm:$0x3] %v1419_v56  ;;  %v986_v38 = vmul.f32 0.5, %v954_v28  ;;  %v956_v35 = vmul.f32 %v6801_v39, %v924_v4  ;;  %v1045_v9 = vadd.f32 1.0, %v5510_v10  ;;  %v1316_v27 = vrot.slane %v1315_v29, 2 }
 0x155   : > { %5513 = vtanh.f32 %v983_v12  ;;  %v985_v51 = vmul.f32 0.5, %v953_v36  ;;  %v923_v19 = vsub.f32 %v873_v31, %v5530_v37  ;;  %v926_v54 = vsub.f32 %v894_v57, %v5530_v37 }
 0x156   : > { %5515 = vtanh.f32 %v986_v38  ;;  %v988_v5 = vmul.f32 0.5, %v956_v35  ;;  %v1077_v32 = vmul.f32 0.5, %v1045_v9  ;;  %v1622_v3 = vadd.f32 %v1621_v16, %v1620_v15 }
 0x157   : > { %5517 = vtanh.f32 %v985_v51  ;;  %v925_v45 = vsub.f32 %v887_v23, %v5530_v37  ;;  %v6833_v50 = vmul.f32 %v1826_v41, %v1825_v22  ;;  %v6836_v26 = vadd.f32 %v6830_v61, %v1826_v41 }
 0x158   : > { %5519 = vtanh.f32 %v988_v5  ;;  %v1109_v62 = vmul.f32 %v6772_v44, %v1077_v32  ;;  %v1317_v40 = vadd.f32 %v1316_v27, %v1315_v29  ;;  %v955_v1 = vmul.f32 %v6801_v39, %v923_v19 }
 0x159   : > { %8362 = vst [vmem:[#allocation81_spill] sm:$0xff] %v6833_v50  ;;  %8363 = vst [vmem:[#allocation82_spill] sm:$0xff] %v6836_v26  ;;  %v958_v20 = vmul.f32 %v6801_v39, %v926_v54  ;;  %v1623_v56 = vrot.slane %v1622_v3, 1  ;;  %v957_v4 = vmul.f32 %v6801_v39, %v925_v45 }
 0x15a   : > { %v1141_v31 = vmul.f32 %v6779_v2, %v1109_v62  ;;  %v1611_v30 = vsel %vm1151_vm0, %v1109_v62, 0.0  ;;  %v1318_v12 = vrot.slane %v1317_v40, 1  ;;  %v987_v29 = vmul.f32 0.5, %v955_v1 }
 0x15b   : > { %v1612_v15 = vrot.slane %v1611_v30, 4  ;;  %v990_v38 = vmul.f32 0.5, %v958_v20  ;;  %v1624_v9 = vadd.f32 %v1623_v56, %v1622_v3  ;;  %v989_v22 = vmul.f32 0.5, %v957_v4 }
 0x15c   : > { %v1306_v28 = vsel %vm1151_vm0, %v1141_v31, 0.0  ;;  %v1319_v5 = vadd.f32 %v1318_v12, %v1317_v40  ;;  %5521 = vtanh.f32 %v987_v29 }
 0x15d   : > { %v5512_v21 = vpop.eup %5511  ;;  %v1307_v36 = vrot.slane %v1306_v28, 4  ;;  %v1613_v10 = vadd.f32 %v1612_v15, %v1611_v30  ;;  %5523 = vtanh.f32 %v990_v38 }
 0x15e   : > { %v1048_v37 = vadd.f32 1.0, %v5512_v21  ;;  %5525 = vtanh.f32 %v989_v22 }
 0x15f   : > { %v1308_v35 = vadd.f32 %v1307_v36, %v1306_v28  ;;  %v1614_v57 = vrot.slane %v1613_v10, 2 }
 0x160   : > { %v1080_v16 = vmul.f32 0.5, %v1048_v37 }
 0x161   : > { %v1309_v19 = vrot.slane %v1308_v35, 2  ;;  %v1615_v23 = vadd.f32 %v1614_v57, %v1613_v10 }
 0x162   : > { %v1112_v51 = vmul.f32 %v6772_v44, %v1080_v16  ;;  %v5514_v27 = vpop.eup %5513 }
 0x163   : > { %v5516_v41 = vpop.eup %5515  ;;  %v1047_v54 = vadd.f32 1.0, %v5514_v27  ;;  %v1310_v45 = vadd.f32 %v1309_v19, %v1308_v35  ;;  %v1616_v1 = vrot.slane %v1615_v23, 1 }
 0x164   : > { %v1144_v39 = vmul.f32 %v6779_v2, %v1112_v51  ;;  %v1632_v32 = vsel %vm1151_vm0, %v1112_v51, 0.0  ;;  %v5518_v62 = vpop.eup %5517  ;;  %v1050_v3 = vadd.f32 1.0, %v5516_v41 }
 0x165   : > { %v1633_v31 = vrot.slane %v1632_v32, 4  ;;  %v5520_v30 = vpop.eup %5519  ;;  %v1079_v21 = vmul.f32 0.5, %v1047_v54  ;;  %v1049_v40 = vadd.f32 1.0, %v5518_v62  ;;  %v1311_v15 = vrot.slane %v1310_v45, 1 }
 0x166   : > { %v1327_v20 = vsel %vm1151_vm0, %v1144_v39, 0.0  ;;  %v1617_v56 = vadd.f32 %v1616_v1, %v1615_v23  ;;  %v1082_v12 = vmul.f32 0.5, %v1050_v3  ;;  %v1052_v10 = vadd.f32 1.0, %v5520_v30 }
 0x167   : > { %v1328_v28 = vrot.slane %v1327_v20, 4  ;;  %v1634_v37 = vadd.f32 %v1633_v31, %v1632_v32  ;;  %v1111_v4 = vmul.f32 %v6772_v44, %v1079_v21  ;;  %v1081_v36 = vmul.f32 0.5, %v1049_v40 }
 0x168   : > { %v1312_v29 = vadd.f32 %v1311_v15, %v1310_v45  ;;  %v1724_v16 = vsel %vm1408_vm1, %v1624_v9, %v1617_v56  ;;  %v1114_v22 = vmul.f32 %v6772_v44, %v1082_v12 }
 0x169   : > { %v1329_v38 = vadd.f32 %v1328_v28, %v1327_v20  ;;  %v1635_v35 = vrot.slane %v1634_v37, 2  ;;  %1756 = vst [vmem:[#allocation5 + $0x16] sm:$0x3] %v1724_v16  ;;  %v1143_v57 = vmul.f32 %v6779_v2, %v1111_v4  ;;  %v1625_v51 = vsel %vm1151_vm0, %v1111_v4, 0.0 }
 0x16a   : > { %v1113_v27 = vmul.f32 %v6772_v44, %v1081_v36  ;;  %v1420_v19 = vsel %vm1408_vm1, %v1319_v5, %v1312_v29  ;;  %v1626_v39 = vrot.slane %v1625_v51, 4  ;;  %v1146_v9 = vmul.f32 %v6779_v2, %v1114_v22 }
 0x16b   : > { %v1330_v23 = vrot.slane %v1329_v38, 2  ;;  %v1636_v41 = vadd.f32 %v1635_v35, %v1634_v37  ;;  %1452 = vst [vmem:[#allocation4 + $0x16] sm:$0x3] %v1420_v19  ;;  %v1320_v32 = vsel %vm1151_vm0, %v1143_v57, 0.0  ;;  %v1646_v54 = vsel %vm1151_vm0, %v1114_v22, 0.0  ;;  %v5522_v37 = vpop.eup %5521 }
 0x16c   : > { %v1145_v62 = vmul.f32 %v6779_v2, %v1113_v27  ;;  %v1321_v31 = vrot.slane %v1320_v32, 4  ;;  %v1627_v3 = vadd.f32 %v1626_v39, %v1625_v51  ;;  %v1341_v30 = vsel %vm1151_vm0, %v1146_v9, 0.0  ;;  %v5524_v16 = vpop.eup %5523 }
 0x16d   : > { %v1331_v45 = vadd.f32 %v1330_v23, %v1329_v38  ;;  %v1637_v1 = vrot.slane %v1636_v41, 1  ;;  %v1647_v20 = vrot.slane %v1646_v54, 4  ;;  %v1639_v21 = vsel %vm1151_vm0, %v1113_v27, 0.0  ;;  %v5526_v9 = vpop.eup %5525 }
 0x16e   : > { %v1334_v5 = vsel %vm1151_vm0, %v1145_v62, 0.0  ;;  %v1322_v56 = vadd.f32 %v1321_v31, %v1320_v32  ;;  %v1628_v28 = vrot.slane %v1627_v3, 2  ;;  %v1342_v4 = vrot.slane %v1341_v30, 4 }
 0x16f   : > { %v1332_v40 = vrot.slane %v1331_v45, 1  ;;  %v1638_v15 = vadd.f32 %v1637_v1, %v1636_v41  ;;  %v1648_v12 = vadd.f32 %v1647_v20, %v1646_v54  ;;  %v1335_v36 = vrot.slane %v1334_v5, 4 }
 0x170   : > { %v1640_v29 = vrot.slane %v1639_v21, 4  ;;  %v1323_v35 = vrot.slane %v1322_v56, 2  ;;  %v1629_v57 = vadd.f32 %v1628_v28, %v1627_v3  ;;  %v1084_v51 = vmul.f32 0.5, %v1052_v10 }
 0x171   : > { %v1333_v38 = vadd.f32 %v1332_v40, %v1331_v45  ;;  %v1343_v22 = vadd.f32 %v1342_v4, %v1341_v30  ;;  %v1649_v19 = vrot.slane %v1648_v12, 2  ;;  %v1336_v23 = vadd.f32 %v1335_v36, %v1334_v5 }
 0x172   : > { %v1641_v39 = vadd.f32 %v1640_v29, %v1639_v21  ;;  %v1324_v27 = vadd.f32 %v1323_v35, %v1322_v56  ;;  %v1630_v62 = vrot.slane %v1629_v57, 1  ;;  %v1116_v41 = vmul.f32 %v6772_v44, %v1084_v51 }
 0x173   : > { %v1051_v32 = vadd.f32 1.0, %v5522_v37  ;;  %v1344_v1 = vrot.slane %v1343_v22, 2  ;;  %v1650_v31 = vadd.f32 %v1649_v19, %v1648_v12  ;;  %v1337_v54 = vrot.slane %v1336_v23, 2 }
 0x174   : > { %v1642_v20 = vrot.slane %v1641_v39, 2  ;;  %v1325_v50 = vrot.slane %v1324_v27, 1  ;;  %v1631_v61 = vadd.f32 %v1630_v62, %v1629_v57  ;;  %v1148_v45 = vmul.f32 %v6779_v2, %v1116_v41 }
 0x175   : > { %v1660_v10 = vsel %vm1151_vm0, %v1116_v41, 0.0  ;;  %v1345_v3 = vadd.f32 %v1344_v1, %v1343_v22  ;;  %v1651_v30 = vrot.slane %v1650_v31, 1  ;;  %v1338_v5 = vadd.f32 %v1337_v54, %v1336_v23 }
 0x176   : > { %v1643_v21 = vadd.f32 %v1642_v20, %v1641_v39  ;;  %v1326_v40 = vadd.f32 %v1325_v50, %v1324_v27  ;;  %v1725_v56 = vsel %vm1408_vm1, %v1638_v15, %v1631_v61  ;;  %v1355_v28 = vsel %vm1151_vm0, %v1148_v45, 0.0 }
 0x177   : > { %v1661_v37 = vrot.slane %v1660_v10, 4  ;;  %1757 = vst [vmem:[#allocation5 + $0x18] sm:$0x3] %v1725_v56  ;;  %v1346_v4 = vrot.slane %v1345_v3, 1  ;;  %v1652_v12 = vadd.f32 %v1651_v30, %v1650_v31  ;;  %v1339_v36 = vrot.slane %v1338_v5, 1 }
 0x178   : > { %v1644_v29 = vrot.slane %v1643_v21, 1  ;;  %v1421_v35 = vsel %vm1408_vm1, %v1333_v38, %v1326_v40  ;;  %v1356_v57 = vrot.slane %v1355_v28, 4  ;;  %v1083_v19 = vmul.f32 0.5, %v1051_v32 }
 0x179   : > { %v1662_v51 = vadd.f32 %v1661_v37, %v1660_v10  ;;  %1453 = vst [vmem:[#allocation4 + $0x18] sm:$0x3] %v1421_v35  ;;  %v1347_v22 = vadd.f32 %v1346_v4, %v1345_v3  ;;  %v1340_v23 = vadd.f32 %v1339_v36, %v1338_v5  ;;  %v1054_v50 = vadd.f32 1.0, %v5524_v16 }
 0x17a   : > { %v1645_v39 = vadd.f32 %v1644_v29, %v1643_v21  ;;  %v1357_v27 = vadd.f32 %v1356_v57, %v1355_v28  ;;  %v1115_v15 = vmul.f32 %v6772_v44, %v1083_v19  ;;  %v1053_v62 = vadd.f32 1.0, %v5526_v9 }
 0x17b   : > { %v1663_v61 = vrot.slane %v1662_v51, 2  ;;  %v1422_v41 = vsel %vm1408_vm1, %v1347_v22, %v1340_v23  ;;  %v1086_v31 = vmul.f32 0.5, %v1054_v50 }
 0x17c   : > { %v1726_v1 = vsel %vm1408_vm1, %v1652_v12, %v1645_v39  ;;  %1454 = vst [vmem:[#allocation4 + $0x1a] sm:$0x3] %v1422_v41  ;;  %v1358_v38 = vrot.slane %v1357_v27, 2  ;;  %v1147_v32 = vmul.f32 %v6779_v2, %v1115_v15  ;;  %v1653_v54 = vsel %vm1151_vm0, %v1115_v15, 0.0 }
 0x17d   : > { %1758 = vst [vmem:[#allocation5 + $0x1a] sm:$0x3] %v1726_v1  ;;  %v1664_v20 = vadd.f32 %v1663_v61, %v1662_v51  ;;  %v1654_v45 = vrot.slane %v1653_v54, 4  ;;  %v1118_v16 = vmul.f32 %v6772_v44, %v1086_v31  ;;  %v1085_v10 = vmul.f32 0.5, %v1053_v62 }
 0x17e   : > { %v1359_v3 = vadd.f32 %v1358_v38, %v1357_v27  ;;  %v1348_v9 = vsel %vm1151_vm0, %v1147_v32, 0.0 }
 0x17f   : > { %v1349_v30 = vrot.slane %v1348_v9, 4  ;;  %v1655_v5 = vadd.f32 %v1654_v45, %v1653_v54  ;;  %v1150_v21 = vmul.f32 %v6779_v2, %v1118_v16  ;;  %v1674_v40 = vsel %vm1151_vm0, %v1118_v16, 0.0 }
 0x180   : > { %v1675_v56 = vrot.slane %v1674_v40, 4  ;;  %v1117_v28 = vmul.f32 %v6772_v44, %v1085_v10  ;;  %v1665_v37 = vrot.slane %v1664_v20, 1  ;;  %v1360_v51 = vrot.slane %v1359_v3, 1 }
 0x181   : > { %v1350_v4 = vadd.f32 %v1349_v30, %v1348_v9  ;;  %v1656_v12 = vrot.slane %v1655_v5, 2  ;;  %v1369_v36 = vsel %vm1151_vm0, %v1150_v21, 0.0 }
 0x182   : > { %v1370_v29 = vrot.slane %v1369_v36, 4  ;;  %v1676_v35 = vadd.f32 %v1675_v56, %v1674_v40  ;;  %v1149_v57 = vmul.f32 %v6779_v2, %v1117_v28  ;;  %v1667_v23 = vsel %vm1151_vm0, %v1117_v28, 0.0 }
 0x183   : > { %v1351_v19 = vrot.slane %v1350_v4, 2  ;;  %v1657_v22 = vadd.f32 %v1656_v12, %v1655_v5  ;;  %v1668_v61 = vrot.slane %v1667_v23, 4  ;;  %v1666_v44 = vadd.f32 %v1665_v37, %v1664_v20 }
 0x184   : > { %v1371_v39 = vadd.f32 %v1370_v29, %v1369_v36  ;;  %v1677_v50 = vrot.slane %v1676_v35, 2  ;;  %v1362_v27 = vsel %vm1151_vm0, %v1149_v57, 0.0  ;;  %v1361_v32 = vadd.f32 %v1360_v51, %v1359_v3 }
 0x185   : > { %v1352_v15 = vadd.f32 %v1351_v19, %v1350_v4  ;;  %v1658_v62 = vrot.slane %v1657_v22, 1  ;;  %v1363_v41 = vrot.slane %v1362_v27, 4  ;;  %v1669_v38 = vadd.f32 %v1668_v61, %v1667_v23 }
 0x186   : > { %v1372_v1 = vrot.slane %v1371_v39, 2  ;;  %v1678_v31 = vadd.f32 %v1677_v50, %v1676_v35 }
 0x187   : > { %v1353_v54 = vrot.slane %v1352_v15, 1  ;;  %v1659_v2 = vadd.f32 %v1658_v62, %v1657_v22  ;;  %v1364_v45 = vadd.f32 %v1363_v41, %v1362_v27  ;;  %v1670_v9 = vrot.slane %v1669_v38, 2 }
 0x188   : > { %v1373_v16 = vadd.f32 %v1372_v1, %v1371_v39  ;;  %v1679_v10 = vrot.slane %v1678_v31, 1 }
 0x189   : > { %v1354_v30 = vadd.f32 %v1353_v54, %v1352_v15  ;;  %v1727_v5 = vsel %vm1408_vm1, %v1666_v44, %v1659_v2  ;;  %v1365_v21 = vrot.slane %v1364_v45, 2  ;;  %v1671_v20 = vadd.f32 %v1670_v9, %v1669_v38 }
 0x18a   : > { %1759 = vst [vmem:[#allocation5 + $0x1c] sm:$0x3] %v1727_v5  ;;  %v1374_v40 = vrot.slane %v1373_v16, 1  ;;  %v1680_v37 = vadd.f32 %v1679_v10, %v1678_v31 }
 0x18b   : > { %v1423_v56 = vsel %vm1408_vm1, %v1361_v32, %v1354_v30  ;;  %v1366_v28 = vadd.f32 %v1365_v21, %v1364_v45  ;;  %v1672_v4 = vrot.slane %v1671_v20, 1 }
 0x18c   : > { %1455 = vst [vmem:[#allocation4 + $0x1c] sm:$0x3] %v1423_v56  ;;  %v1375_v3 = vadd.f32 %v1374_v40, %v1373_v16 }
 0x18d   : > { %v1367_v12 = vrot.slane %v1366_v28, 1  ;;  %v1673_v36 = vadd.f32 %v1672_v4, %v1671_v20 }
 0x18f   : > { %v1368_v29 = vadd.f32 %v1367_v12, %v1366_v28  ;;  %v1728_v35 = vsel %vm1408_vm1, %v1680_v37, %v1673_v36 }
 0x190   : > { %1760 = vst [vmem:[#allocation5 + $0x1e] sm:$0x3] %v1728_v35 }
 0x191   : > { %v1424_v57 = vsel %vm1408_vm1, %v1375_v3, %v1368_v29 }
 0x192   : > { %1456 = vst [vmem:[#allocation4 + $0x1e] sm:$0x3] %v1424_v57 }
 0x193 LB: >> { %v8364_v13 = vld [vmem:[#allocation15_spill] sm:$0xff]  ;;  %v8365_v11 = vld [vmem:[#allocation14_spill] sm:$0xff]  ;;  %v8366_v0 = vld [vmem:[#allocation17_spill] sm:$0xff]  ;;  %s7039_s27 = sshll.u32 %s6055_s0, 1  ;;  %s1836_s0 = sadd.s32 1, %s6055_s0   ;;  %v6051_v33 = vphi %v6744_v33, %v8662_v33   ;;  %s6055_s0 = sphi %s6889_s0, %s1836_s0  }
 0x194   : >> { %v8367_v63 = vld [vmem:[#allocation16_spill] sm:$0xff]  ;;  %v8368_v43 = vld [vmem:[#allocation33_spill] sm:$0xff]  ;;  %v8370_v55 = vld [vmem:[#allocation18_spill] sm:$0xff]  ;;  %v1913_v51 = vrot.slane %v6051_v33, %v8364_v13  ;;  %v1846_v19 = vrot.slane %v6051_v33, %v8365_v11  ;;  %s7042_s25 = scalar_lea.vmem [#allocation5], %s7039_s27  ;;  %s7052_s18 = scalar_lea.vmem [#allocation4], %s7039_s27 }
 0x195   : >> { %v8369_v42 = vld [vmem:[#allocation32_spill] sm:$0xff]  ;;  %v8371_v8 = vld [vmem:[#allocation65_spill] sm:$0xff]  ;;  %v8372_v14 = vld [vmem:[#allocation34_spill] sm:$0xff]  ;;  %s4833_s19 = scalar_lea.vmem [#allocation3], %s7039_s27  ;;  %p1833_p2 = scmp.ge.s32.totalorder %s1836_s0, 16  }
 0x196   : >> { %v8373_v6 = vld [vmem:[#allocation19_spill] sm:$0xff]  ;;  %v8375_v7 = vld [vmem:[#allocation20_spill] sm:$0xff]  ;;  %v8376_v48 = vld [vmem:[#allocation49_spill] sm:$0xff]  ;;  %1915 = vbcast.lane.b32.xlu0 %v1913_v51, 256  ;;  %1848 = vbcast.lane.b32.xlu1 %v1846_v19, 256  ;;  %vm5136_vm2 = vcmask (%p1833_p2), 58368  }
 0x197   : >> { %v8374_v52 = vld [vmem:[#allocation35_spill] sm:$0xff]  ;;  %v8377_v47 = vld [vmem:[#allocation48_spill] sm:$0xff]  ;;  %v8379_v59 = vld [vmem:[#allocation38_spill] sm:$0xff] }
 0x198   : >> { %v8378_v34 = vld [vmem:[#allocation23_spill] sm:$0xff]  ;;  %v8380_v53 = vld [vmem:[#allocation36_spill] sm:$0xff]  ;;  %v8381_v24 = vld [vmem:[#allocation21_spill] sm:$0xff] }
 0x199   : >> { %v8382_v58 = vld [vmem:[#allocation37_spill] sm:$0xff]  ;;  %v8383_v25 = vld [vmem:[#allocation22_spill] sm:$0xff]  ;;  %v8384_v60 = vld [vmem:[#allocation64_spill] sm:$0xff] }
 0x19a   : >> { %v8385_v46 = vld [vmem:[#allocation39_spill] sm:$0xff]  ;;  %v8386_v17 = vld [vmem:[#allocation50_spill] sm:$0xff]  ;;  %v8387_v18 = vld [vmem:[#allocation24_spill] sm:$0xff]  ;;  %1919 = vbcast.lane.b32.xlu0 %v1913_v51, 264  ;;  %1852 = vbcast.lane.b32.xlu1 %v1846_v19, 264 }
 0x19b   : >> { %v8388_v49 = vld [vmem:[#allocation66_spill] sm:$0xff] }
 0x19c   : >> { %v8431_v26 = vld [vmem:[#allocation82_spill] sm:$0xff] }
 0x19e   : >> { %1923 = vbcast.lane.b32.xlu0 %v1913_v51, 272  ;;  %1856 = vbcast.lane.b32.xlu1 %v1846_v19, 272 }
 0x1a2   : >> { %1927 = vbcast.lane.b32.xlu0 %v1913_v51, 280  ;;  %1860 = vbcast.lane.b32.xlu1 %v1846_v19, 280 }
 0x1a6   : >> { %1931 = vbcast.lane.b32.xlu0 %v1913_v51, 288  ;;  %1864 = vbcast.lane.b32.xlu1 %v1846_v19, 288 }
 0x1aa   : >> { %1935 = vbcast.lane.b32.xlu0 %v1913_v51, 296  ;;  %1868 = vbcast.lane.b32.xlu1 %v1846_v19, 296 }
 0x1ae   : >> { %1939 = vbcast.lane.b32.xlu0 %v1913_v51, 304  ;;  %1872 = vbcast.lane.b32.xlu1 %v1846_v19, 304 }
 0x1b2   : >> { %1943 = vbcast.lane.b32.xlu0 %v1913_v51, 312  ;;  %1876 = vbcast.lane.b32.xlu1 %v1846_v19, 312 }
 0x1b6   : >> { %1947 = vbcast.lane.b32.xlu0 %v1913_v51, 320  ;;  %1880 = vbcast.lane.b32.xlu1 %v1846_v19, 320 }
 0x1ba   : >> { %1951 = vbcast.lane.b32.xlu0 %v1913_v51, 328  ;;  %1884 = vbcast.lane.b32.xlu1 %v1846_v19, 328 }
 0x1be   : >> { %1955 = vbcast.lane.b32.xlu0 %v1913_v51, 336  ;;  %1888 = vbcast.lane.b32.xlu1 %v1846_v19, 336 }
 0x1c2   : >> { %1959 = vbcast.lane.b32.xlu0 %v1913_v51, 344  ;;  %1892 = vbcast.lane.b32.xlu1 %v1846_v19, 344 }
 0x1c6   : >> { %1963 = vbcast.lane.b32.xlu0 %v1913_v51, 352  ;;  %1896 = vbcast.lane.b32.xlu1 %v1846_v19, 352 }
 0x1ca   : >> { %1967 = vbcast.lane.b32.xlu0 %v1913_v51, 360  ;;  %1900 = vbcast.lane.b32.xlu1 %v1846_v19, 360 }
 0x1ce   : >> { %1971 = vbcast.lane.b32.xlu0 %v1913_v51, 368  ;;  %1904 = vbcast.lane.b32.xlu1 %v1846_v19, 368 }
 0x1d2   : >> { %1975 = vbcast.lane.b32.xlu0 %v1913_v51, 376  ;;  %1908 = vbcast.lane.b32.xlu1 %v1846_v19, 376 }
 0x208   : >> { %v1916_v22 = vpop.permute.xlu0 %1915  ;;  %v1849_v23 = vpop.permute.xlu1 %1848 }
 0x209   : >> { %v1993_v39 = vsub.f32 %v1916_v22, %v8367_v63  ;;  %v1977_v50 = vsub.f32 %v1849_v23, %v8367_v63 }
 0x20b   : >> { %v2025_v27 = vmul.f32 %v1993_v39, %v8369_v42  ;;  %v2009_v61 = vmul.f32 %v1977_v50, %v8369_v42 }
 0x20c   : >> { %v1920_v44 = vpop.permute.xlu0 %1919  ;;  %v1853_v15 = vpop.permute.xlu1 %1852 }
 0x20d   : >> { %v2057_v62 = vmul.f32 0.5, %v2025_v27  ;;  %v1994_v41 = vsub.f32 %v1920_v44, %v8366_v0  ;;  %v1978_v1 = vsub.f32 %v1853_v15, %v8366_v0  ;;  %v2041_v31 = vmul.f32 0.5, %v2009_v61 }
 0x20f   : >> { %v2026_v38 = vmul.f32 %v1994_v41, %v8368_v43  ;;  %v2010_v32 = vmul.f32 %v1978_v1, %v8368_v43  ;;  %5531 = vtanh.f32 %v2057_v62 }
 0x210   : >> { %v1924_v54 = vpop.permute.xlu0 %1923  ;;  %v1857_v2 = vpop.permute.xlu1 %1856  ;;  %5533 = vtanh.f32 %v2041_v31 }
 0x211   : >> { %v2058_v45 = vmul.f32 0.5, %v2026_v38  ;;  %v2042_v16 = vmul.f32 0.5, %v2010_v32  ;;  %v1995_v10 = vsub.f32 %v1924_v54, %v8370_v55  ;;  %v1979_v9 = vsub.f32 %v1857_v2, %v8370_v55 }
 0x213   : >> { %5535 = vtanh.f32 %v2058_v45  ;;  %v2027_v30 = vmul.f32 %v1995_v10, %v8372_v14  ;;  %v2011_v5 = vmul.f32 %v1979_v9, %v8372_v14 }
 0x214   : >> { %5537 = vtanh.f32 %v2042_v16  ;;  %v1928_v21 = vpop.permute.xlu0 %1927  ;;  %v1861_v40 = vpop.permute.xlu1 %1860 }
 0x215   : >> { %v2059_v20 = vmul.f32 0.5, %v2027_v30  ;;  %v2043_v56 = vmul.f32 0.5, %v2011_v5  ;;  %v1996_v28 = vsub.f32 %v1928_v21, %v8373_v6  ;;  %v1980_v37 = vsub.f32 %v1861_v40, %v8373_v6 }
 0x217   : >> { %5539 = vtanh.f32 %v2059_v20  ;;  %v2028_v4 = vmul.f32 %v1996_v28, %v8374_v52  ;;  %v2012_v3 = vmul.f32 %v1980_v37, %v8374_v52 }
 0x218   : >> { %5541 = vtanh.f32 %v2043_v56  ;;  %v1932_v12 = vpop.permute.xlu0 %1931  ;;  %v1865_v36 = vpop.permute.xlu1 %1864 }
 0x219   : >> { %v2060_v29 = vmul.f32 0.5, %v2028_v4  ;;  %v2044_v35 = vmul.f32 0.5, %v2012_v3  ;;  %v1997_v57 = vsub.f32 %v1932_v12, %v8375_v7  ;;  %v1981_v51 = vsub.f32 %v1865_v36, %v8375_v7 }
 0x21b   : >> { %5543 = vtanh.f32 %v2060_v29  ;;  %v2029_v19 = vmul.f32 %v1997_v57, %v8380_v53  ;;  %v2013_v22 = vmul.f32 %v1981_v51, %v8380_v53 }
 0x21c   : >> { %5545 = vtanh.f32 %v2044_v35  ;;  %v1936_v23 = vpop.permute.xlu0 %1935  ;;  %v1869_v39 = vpop.permute.xlu1 %1868 }
 0x21d   : >> { %v5532_v50 = vpop.eup %5531  ;;  %v2061_v27 = vmul.f32 0.5, %v2029_v19  ;;  %v2045_v61 = vmul.f32 0.5, %v2013_v22  ;;  %v1998_v44 = vsub.f32 %v1936_v23, %v8381_v24  ;;  %v1982_v15 = vsub.f32 %v1869_v39, %v8381_v24 }
 0x21e   : >> { %v5534_v62 = vpop.eup %5533  ;;  %v2121_v2 = vadd.f32 1.0, %v5532_v50 }
 0x21f   : >> { %5547 = vtanh.f32 %v2061_v27  ;;  %v2030_v41 = vmul.f32 %v1998_v44, %v8382_v58  ;;  %v2014_v31 = vmul.f32 %v1982_v15, %v8382_v58  ;;  %v2105_v10 = vadd.f32 1.0, %v5534_v62 }
 0x220   : >> { %v5536_v1 = vpop.eup %5535  ;;  %5549 = vtanh.f32 %v2045_v61  ;;  %v1940_v38 = vpop.permute.xlu0 %1939  ;;  %v2153_v3 = vmul.f32 0.5, %v2121_v2 }
 0x221   : >> { %v1873_v32 = vpop.permute.xlu1 %1872  ;;  %v5538_v54 = vpop.eup %5537  ;;  %v2062_v45 = vmul.f32 0.5, %v2030_v41  ;;  %v1999_v16 = vsub.f32 %v1940_v38, %v8383_v25  ;;  %v2122_v9 = vadd.f32 1.0, %v5536_v1  ;;  %v2046_v30 = vmul.f32 0.5, %v2014_v31 }
 0x222   : >> { %v1983_v5 = vsub.f32 %v1873_v32, %v8383_v25  ;;  %v2106_v21 = vadd.f32 1.0, %v5538_v54  ;;  %v2137_v35 = vmul.f32 0.5, %v2105_v10  ;;  %v2185_v62 = vmul.f32 %v2153_v3, %v8377_v47 }
 0x223   : >> { %5551 = vtanh.f32 %v2062_v45  ;;  %v2031_v40 = vmul.f32 %v1999_v16, %v8379_v59  ;;  %v2154_v57 = vmul.f32 0.5, %v2122_v9 }
 0x224   : >> { %v5540_v20 = vpop.eup %5539  ;;  %5553 = vtanh.f32 %v2046_v30  ;;  %v2015_v56 = vmul.f32 %v1983_v5, %v8379_v59  ;;  %v1944_v28 = vpop.permute.xlu0 %1943  ;;  %v2138_v22 = vmul.f32 0.5, %v2106_v21  ;;  %v2169_v31 = vmul.f32 %v2137_v35, %v8377_v47 }
 0x225   : >> { %v1877_v37 = vpop.permute.xlu1 %1876  ;;  %v5542_v4 = vpop.eup %5541  ;;  %v2123_v12 = vadd.f32 1.0, %v5540_v20  ;;  %v2063_v36 = vmul.f32 0.5, %v2031_v40  ;;  %v2000_v29 = vsub.f32 %v1944_v28, %v8378_v34  ;;  %v2186_v38 = vmul.f32 %v2154_v57, %v8376_v48 }
 0x226   : >> { %v2107_v51 = vadd.f32 1.0, %v5542_v4  ;;  %v1984_v19 = vsub.f32 %v1877_v37, %v8378_v34  ;;  %v2047_v23 = vmul.f32 0.5, %v2015_v56  ;;  %v2170_v54 = vmul.f32 %v2138_v22, %v8376_v48  ;;  %v8389_v22 = vld [vmem:[#allocation51_spill] sm:$0xff] }
 0x227   : >> { %v2155_v50 = vmul.f32 0.5, %v2123_v12  ;;  %5555 = vtanh.f32 %v2063_v36  ;;  %v2032_v1 = vmul.f32 %v2000_v29, %v8385_v46  ;;  %v2217_v40 = vmul.f32 %v2185_v62, %v8384_v60 }
 0x228   : >> { %v5544_v39 = vpop.eup %5543  ;;  %v2139_v27 = vmul.f32 0.5, %v2107_v51  ;;  %v1948_v61 = vpop.permute.xlu0 %1947  ;;  %v2016_v32 = vmul.f32 %v1984_v19, %v8385_v46  ;;  %5557 = vtanh.f32 %v2047_v23  ;;  %v2201_v28 = vmul.f32 %v2169_v31, %v8384_v60 }
 0x229   : >> { %v1881_v44 = vpop.permute.xlu1 %1880  ;;  %v5546_v15 = vpop.eup %5545  ;;  %v2124_v41 = vadd.f32 1.0, %v5544_v39  ;;  %v2187_v16 = vmul.f32 %v2155_v50, %v8386_v17  ;;  %v2064_v56 = vmul.f32 0.5, %v2032_v1  ;;  %v2218_v37 = vmul.f32 %v2186_v38, %v8371_v8  ;;  %v8390_v1 = vld [vmem:[#allocation40_spill] sm:$0xff] }
 0x22a   : >> { %v2108_v2 = vadd.f32 1.0, %v5546_v15  ;;  %v2171_v10 = vmul.f32 %v2139_v27, %v8386_v17  ;;  %v2048_v3 = vmul.f32 0.5, %v2016_v32  ;;  %v2302_v12 = vadd.f32 %v2186_v38, %v2185_v62 }
 0x22b   : >> { %v2156_v9 = vmul.f32 0.5, %v2124_v41  ;;  %v2202_v36 = vmul.f32 %v2170_v54, %v8371_v8  ;;  %v2001_v35 = vsub.f32 %v1948_v61, %v8387_v18  ;;  %v2219_v51 = vmul.f32 %v2187_v16, %v8388_v49 }
 0x22c   : >> { %v5548_v45 = vpop.eup %5547  ;;  %v1952_v30 = vpop.permute.xlu0 %1951  ;;  %v2140_v29 = vmul.f32 0.5, %v2108_v2  ;;  %v2203_v19 = vmul.f32 %v2171_v10, %v8388_v49  ;;  %v1985_v39 = vsub.f32 %v1881_v44, %v8387_v18  ;;  %5559 = vtanh.f32 %v2064_v56 }
 0x22d   : >> { %v6939_v5 = vpop.permute.xlu1 %1884  ;;  %v5550_v21 = vpop.eup %5549  ;;  %v2125_v20 = vadd.f32 1.0, %v5548_v45  ;;  %v2188_v23 = vmul.f32 %v2156_v9, %v8389_v22  ;;  %v2033_v38 = vmul.f32 %v2001_v35, %v8390_v1  ;;  %5561 = vtanh.f32 %v2048_v3  ;;  %v8391_v35 = vld [vmem:[#allocation52_spill] sm:$0xff] }
 0x22e   : >> { %v2109_v4 = vadd.f32 1.0, %v5550_v21  ;;  %v2017_v2 = vmul.f32 %v1985_v39, %v8390_v1  ;;  %v2254_v45 = vadd.f32 %v2218_v37, %v2217_v40  ;;  %v2281_v21 = vadd.f32 %v2170_v54, %v2169_v31  ;;  %v8392_v39 = vld [vmem:[#allocation67_spill] sm:$0xff] }
 0x22f   : >> { %v2157_v41 = vmul.f32 0.5, %v2125_v20  ;;  %v2172_v9 = vmul.f32 %v2140_v29, %v8389_v22  ;;  %v2065_v49 = vmul.f32 0.5, %v2033_v38  ;;  %v2233_v44 = vadd.f32 %v2202_v36, %v2201_v28 }
 0x230   : >> { %v5552_v57 = vpop.eup %5551  ;;  %v1956_v50 = vpop.permute.xlu0 %1955  ;;  %v2141_v62 = vmul.f32 0.5, %v2109_v4  ;;  %v2303_v18 = vadd.f32 %v2302_v12, %v2187_v16  ;;  %v2049_v17 = vmul.f32 0.5, %v2017_v2  ;;  %v2255_v56 = vadd.f32 %v2254_v45, %v2219_v51  ;;  %v8393_v16 = vld [vmem:[#allocation25_spill] sm:$0xff] }
 0x231   : >> { %v6950_v27 = vpop.permute.xlu1 %1888  ;;  %v5554_v15 = vpop.eup %5553  ;;  %v2126_v32 = vadd.f32 1.0, %v5552_v57  ;;  %v2282_v4 = vadd.f32 %v2281_v21, %v2171_v10  ;;  %v2189_v57 = vmul.f32 %v2157_v41, %v8391_v35  ;;  %v2220_v40 = vmul.f32 %v2188_v23, %v8392_v39 }
 0x232   : >> { %v2110_v61 = vadd.f32 1.0, %v5554_v15  ;;  %v2173_v3 = vmul.f32 %v2141_v62, %v8391_v35  ;;  %v2234_v15 = vadd.f32 %v2233_v44, %v2203_v19  ;;  %v2304_v37 = vadd.f32 %v2303_v18, %v2188_v23  ;;  %v8394_v19 = vld [vmem:[#allocation68_spill] sm:$0xff]  ;;  %v8396_v23 = vld [vmem:[#allocation26_spill] sm:$0xff] }
 0x233   : >> { %v2158_v31 = vmul.f32 0.5, %v2126_v32  ;;  %v2204_v28 = vmul.f32 %v2172_v9, %v8392_v39  ;;  %5563 = vtanh.f32 %v2065_v49  ;;  %v2002_v12 = vsub.f32 %v1952_v30, %v8393_v16  ;;  %v8397_v49 = vld [vmem:[#allocation53_spill] sm:$0xff] }
 0x234   : >> { %v1960_v46 = vpop.permute.xlu0 %1959  ;;  %v5556_v20 = vpop.eup %5555  ;;  %v2142_v54 = vmul.f32 0.5, %v2110_v61  ;;  %v2283_v29 = vadd.f32 %v2282_v4, %v2172_v9  ;;  %5565 = vtanh.f32 %v2049_v17  ;;  %v1986_v10 = vsub.f32 %v6939_v5, %v8393_v16  ;;  %v8395_v61 = vld [vmem:[#allocation41_spill] sm:$0xff] }
 0x235   : >> { %v6955_v60 = vpop.permute.xlu1 %1892  ;;  %v5558_v36 = vpop.eup %5557  ;;  %v2127_v38 = vadd.f32 1.0, %v5556_v20  ;;  %v2221_v62 = vmul.f32 %v2189_v57, %v8394_v19  ;;  %v2205_v32 = vmul.f32 %v2173_v3, %v8394_v19  ;;  %v2034_v18 = vmul.f32 %v2002_v12, %v8395_v61 }
 0x236   : >> { %v2003_v2 = vsub.f32 %v1956_v50, %v8396_v23  ;;  %v2190_v45 = vmul.f32 %v2158_v31, %v8397_v49  ;;  %v2174_v30 = vmul.f32 %v2142_v54, %v8397_v49  ;;  %v2018_v21 = vmul.f32 %v1986_v10, %v8395_v61  ;;  %v8398_v50 = vld [vmem:[#allocation42_spill] sm:$0xff]  ;;  %v8399_v54 = vld [vmem:[#allocation69_spill] sm:$0xff] }
 0x237   : >> { %v1987_v17 = vsub.f32 %v6950_v27, %v8396_v23  ;;  %v2256_v5 = vadd.f32 %v2255_v56, %v2220_v40  ;;  %v2235_v9 = vadd.f32 %v2234_v15, %v2204_v28  ;;  %v2111_v44 = vadd.f32 1.0, %v5558_v36 }
 0x238   : >> { %v1964_v51 = vpop.permute.xlu0 %1963  ;;  %v2066_v20 = vmul.f32 0.5, %v2034_v18  ;;  %v2305_v4 = vadd.f32 %v2304_v37, %v2189_v57  ;;  %v2284_v35 = vadd.f32 %v2283_v29, %v2173_v3  ;;  %v2159_v19 = vmul.f32 0.5, %v2127_v38  ;;  %v8400_v37 = vld [vmem:[#allocation27_spill] sm:$0xff]  ;;  %v8401_v29 = vld [vmem:[#allocation54_spill] sm:$0xff] }
 0x239   : >> { %v1897_v41 = vpop.permute.xlu1 %1896  ;;  %v2050_v39 = vmul.f32 0.5, %v2018_v21  ;;  %v2257_v12 = vadd.f32 %v2256_v5, %v2221_v62  ;;  %v2236_v16 = vadd.f32 %v2235_v9, %v2205_v32  ;;  %v2035_v31 = vmul.f32 %v2003_v2, %v8398_v50  ;;  %v5560_v22 = vpop.eup %5559  ;;  %v8402_v32 = vld [vmem:[#allocation28_spill] sm:$0xff] }
 0x23a   : >> { %5567 = vtanh.f32 %v2066_v20  ;;  %v2222_v49 = vmul.f32 %v2190_v45, %v8399_v54  ;;  %v2206_v10 = vmul.f32 %v2174_v30, %v8399_v54  ;;  %v2019_v27 = vmul.f32 %v1987_v17, %v8398_v50  ;;  %v5562_v40 = vpop.eup %5561  ;;  %v8403_v17 = vld [vmem:[#allocation43_spill] sm:$0xff]  ;;  %v8405_v54 = vld [vmem:[#allocation70_spill] sm:$0xff] }
 0x23b   : >> { %5569 = vtanh.f32 %v2050_v39  ;;  %v2143_v57 = vmul.f32 0.5, %v2111_v44  ;;  %v2067_v3 = vmul.f32 0.5, %v2035_v31  ;;  %v2004_v28 = vsub.f32 %v1960_v46, %v8400_v37 }
 0x23c   : >> { %v1968_v56 = vpop.permute.xlu0 %1967  ;;  %v1988_v36 = vsub.f32 %v6955_v60, %v8400_v37  ;;  %v2191_v38 = vmul.f32 %v2159_v19, %v8401_v29  ;;  %v2051_v62 = vmul.f32 0.5, %v2019_v27  ;;  %v2005_v18 = vsub.f32 %v1964_v51, %v8402_v32  ;;  %v8404_v37 = vld [vmem:[#allocation44_spill] sm:$0xff] }
 0x23d   : >> { %v1901_v15 = vpop.permute.xlu1 %1900  ;;  %v1989_v2 = vsub.f32 %v1897_v41, %v8402_v32  ;;  %v2306_v39 = vadd.f32 %v2305_v4, %v2190_v45  ;;  %v2128_v21 = vadd.f32 1.0, %v5560_v22  ;;  %5571 = vtanh.f32 %v2067_v3 }
 0x23e   : >> { %v2036_v5 = vmul.f32 %v2004_v28, %v8403_v17  ;;  %v2285_v9 = vadd.f32 %v2284_v35, %v2174_v30  ;;  %v2112_v44 = vadd.f32 1.0, %v5562_v40  ;;  %5573 = vtanh.f32 %v2051_v62  ;;  %v8406_v28 = vld [vmem:[#allocation29_spill] sm:$0xff] }
 0x23f   : >> { %v2020_v46 = vmul.f32 %v1988_v36, %v8403_v17  ;;  %v2258_v20 = vadd.f32 %v2257_v12, %v2222_v49  ;;  %v2237_v31 = vadd.f32 %v2236_v16, %v2206_v10  ;;  %v2037_v19 = vmul.f32 %v2005_v18, %v8404_v37  ;;  %v8407_v62 = vld [vmem:[#allocation45_spill] sm:$0xff]  ;;  %v8408_v18 = vld [vmem:[#allocation30_spill] sm:$0xff] }
 0x240   : >> { %v2068_v60 = vmul.f32 0.5, %v2036_v5  ;;  %v5564_v27 = vpop.eup %5563  ;;  %v2223_v51 = vmul.f32 %v2191_v38, %v8405_v54  ;;  %v2175_v41 = vmul.f32 %v2143_v57, %v8401_v29  ;;  %v2021_v22 = vmul.f32 %v1989_v2, %v8404_v37  ;;  %v1972_v4 = vpop.permute.xlu0 %1971 }
 0x241   : >> { %v2052_v45 = vmul.f32 0.5, %v2020_v46  ;;  %v1905_v3 = vpop.permute.xlu1 %1904  ;;  %v5566_v35 = vpop.eup %5565  ;;  %v2160_v30 = vmul.f32 0.5, %v2128_v21  ;;  %v2069_v40 = vmul.f32 0.5, %v2037_v19  ;;  %v2006_v49 = vsub.f32 %v1968_v56, %v8406_v28  ;;  %v8409_v19 = vld [vmem:[#allocation46_spill] sm:$0xff] }
 0x242   : >> { %5575 = vtanh.f32 %v2068_v60  ;;  %v2144_v16 = vmul.f32 0.5, %v2112_v44  ;;  %v2053_v12 = vmul.f32 0.5, %v2021_v22  ;;  %v1990_v10 = vsub.f32 %v1901_v15, %v8406_v28  ;;  %v8410_v15 = vld [vmem:[#allocation55_spill] sm:$0xff] }
 0x243   : >> { %5577 = vtanh.f32 %v2052_v45  ;;  %v2129_v36 = vadd.f32 1.0, %v5564_v27  ;;  %v2038_v57 = vmul.f32 %v2006_v49, %v8407_v62  ;;  %v2007_v5 = vsub.f32 %v1972_v4, %v8408_v18 }
 0x244   : >> { %5579 = vtanh.f32 %v2069_v40  ;;  %v2113_v2 = vadd.f32 1.0, %v5566_v35  ;;  %v2022_v46 = vmul.f32 %v1990_v10, %v8407_v62  ;;  %v1991_v21 = vsub.f32 %v1905_v3, %v8408_v18  ;;  %v1976_v35 = vpop.permute.xlu0 %1975 }
 0x245   : >> { %5581 = vtanh.f32 %v2053_v12  ;;  %v2307_v60 = vadd.f32 %v2306_v39, %v2191_v38  ;;  %v2207_v56 = vmul.f32 %v2175_v41, %v8405_v54  ;;  %v2070_v44 = vmul.f32 0.5, %v2038_v57  ;;  %v1909_v12 = vpop.permute.xlu1 %1908  ;;  %v8411_v54 = vld [vmem:[#allocation31_spill] sm:$0xff] }
 0x246   : >> { %v2039_v45 = vmul.f32 %v2007_v5, %v8409_v19  ;;  %v2192_v27 = vmul.f32 %v2160_v30, %v8410_v15  ;;  %v2176_v40 = vmul.f32 %v2144_v16, %v8410_v15  ;;  %v2054_v49 = vmul.f32 0.5, %v2022_v46 }
 0x247   : >> { %v5568_v22 = vpop.eup %5567  ;;  %v2023_v4 = vmul.f32 %v1991_v21, %v8409_v19  ;;  %v2161_v10 = vmul.f32 0.5, %v2129_v36  ;;  %5583 = vtanh.f32 %v2070_v44  ;;  %v2145_v39 = vmul.f32 0.5, %v2113_v2  ;;  %v8412_v19 = vld [vmem:[#allocation71_spill] sm:$0xff] }
 0x248   : >> { %v5570_v29 = vpop.eup %5569  ;;  %v2130_v62 = vadd.f32 1.0, %v5568_v22  ;;  %v2071_v38 = vmul.f32 0.5, %v2039_v45  ;;  %5585 = vtanh.f32 %v2054_v49  ;;  %v2008_v30 = vsub.f32 %v1976_v35, %v8411_v54  ;;  %v8413_v45 = vld [vmem:[#allocation47_spill] sm:$0xff] }
 0x249   : >> { %v2114_v3 = vadd.f32 1.0, %v5570_v29  ;;  %v2055_v57 = vmul.f32 0.5, %v2023_v4  ;;  %v1992_v16 = vsub.f32 %v1909_v12, %v8411_v54  ;;  %v2259_v15 = vadd.f32 %v2258_v20, %v2223_v51  ;;  %v8414_v4 = vld [vmem:[#allocation56_spill] sm:$0xff] }
 0x24a   : >> { %v2162_v5 = vmul.f32 0.5, %v2130_v62  ;;  %5587 = vtanh.f32 %v2071_v38  ;;  %v5572_v46 = vpop.eup %5571  ;;  %v2286_v21 = vadd.f32 %v2285_v9, %v2175_v41  ;;  %v2224_v18 = vmul.f32 %v2192_v27, %v8412_v19  ;;  %v8415_v9 = vld [vmem:[#allocation57_spill] sm:$0xff] }
 0x24b   : >> { %5589 = vtanh.f32 %v2055_v57  ;;  %v5574_v36 = vpop.eup %5573  ;;  %v2146_v22 = vmul.f32 0.5, %v2114_v3  ;;  %v2131_v44 = vadd.f32 1.0, %v5572_v46  ;;  %v2040_v2 = vmul.f32 %v2008_v30, %v8413_v45 }
 0x24c   : >> { %v2024_v29 = vmul.f32 %v1992_v16, %v8413_v45  ;;  %v2238_v49 = vadd.f32 %v2237_v31, %v2207_v56  ;;  %v2208_v62 = vmul.f32 %v2176_v40, %v8412_v19  ;;  %v2193_v35 = vmul.f32 %v2161_v10, %v8414_v4 }
 0x24d   : >> { %v2115_v38 = vadd.f32 1.0, %v5574_v36  ;;  %v2308_v12 = vadd.f32 %v2307_v60, %v2192_v27  ;;  %v2177_v20 = vmul.f32 %v2145_v39, %v8414_v4  ;;  %v2194_v51 = vmul.f32 %v2162_v5, %v8415_v9  ;;  %v8416_v36 = vld [vmem:[#allocation72_spill] sm:$0xff] }
 0x24e   : >> { %v2072_v41 = vmul.f32 0.5, %v2040_v2  ;;  %v2287_v54 = vadd.f32 %v2286_v21, %v2176_v40  ;;  %v2163_v3 = vmul.f32 0.5, %v2131_v44  ;;  %v2056_v28 = vmul.f32 0.5, %v2024_v29  ;;  %v8417_v2 = vld [vmem:[#allocation73_spill] sm:$0xff]  ;;  %v8418_v29 = vld [vmem:[#allocation58_spill] sm:$0xff] }
 0x24f   : >> { %v5576_v57 = vpop.eup %5575  ;;  %v2147_v46 = vmul.f32 0.5, %v2115_v38  ;;  %v2260_v37 = vadd.f32 %v2259_v15, %v2224_v18  ;;  %v2178_v31 = vmul.f32 %v2146_v22, %v8415_v9  ;;  %v2239_v10 = vadd.f32 %v2238_v49, %v2208_v62  ;;  %v8419_v9 = vld [vmem:[#allocation59_spill] sm:$0xff] }
 0x250   : >> { %v5578_v30 = vpop.eup %5577  ;;  %v2132_v56 = vadd.f32 1.0, %v5576_v57  ;;  %5591 = vtanh.f32 %v2072_v41  ;;  %v2225_v60 = vmul.f32 %v2193_v35, %v8416_v36  ;;  %v2209_v5 = vmul.f32 %v2177_v20, %v8416_v36 }
 0x251   : >> { %v5580_v16 = vpop.eup %5579  ;;  %v2116_v27 = vadd.f32 1.0, %v5578_v30  ;;  %5593 = vtanh.f32 %v2056_v28  ;;  %v2226_v40 = vmul.f32 %v2194_v51, %v8417_v2  ;;  %v2195_v38 = vmul.f32 %v2163_v3, %v8418_v29 }
 0x252   : >> { %v5582_v39 = vpop.eup %5581  ;;  %v2164_v21 = vmul.f32 0.5, %v2132_v56  ;;  %v2133_v44 = vadd.f32 1.0, %v5580_v16  ;;  %v2179_v18 = vmul.f32 %v2147_v46, %v8418_v29  ;;  %v2309_v41 = vadd.f32 %v2308_v12, %v2193_v35 }
 0x253   : >> { %v2148_v15 = vmul.f32 0.5, %v2116_v27  ;;  %v2117_v22 = vadd.f32 1.0, %v5582_v39  ;;  %v2288_v57 = vadd.f32 %v2287_v54, %v2177_v20  ;;  %v2210_v49 = vmul.f32 %v2178_v31, %v8417_v2  ;;  %v8420_v39 = vld [vmem:[#allocation74_spill] sm:$0xff] }
 0x254   : >> { %v2165_v62 = vmul.f32 0.5, %v2133_v44  ;;  %v5584_v30 = vpop.eup %5583  ;;  %v2261_v28 = vadd.f32 %v2260_v37, %v2225_v60  ;;  %v2196_v4 = vmul.f32 %v2164_v21, %v8419_v9  ;;  %v2240_v16 = vadd.f32 %v2239_v10, %v2209_v5  ;;  %v8421_v37 = vld [vmem:[#allocation60_spill] sm:$0xff] }
 0x255   : >> { %v2180_v36 = vmul.f32 %v2148_v15, %v8419_v9  ;;  %v2149_v19 = vmul.f32 0.5, %v2117_v22  ;;  %v5586_v56 = vpop.eup %5585  ;;  %v2310_v45 = vadd.f32 %v2309_v41, %v2194_v51  ;;  %v2289_v3 = vadd.f32 %v2288_v57, %v2178_v31  ;;  %v8422_v9 = vld [vmem:[#allocation75_spill] sm:$0xff] }
 0x256   : >> { %v2134_v32 = vadd.f32 1.0, %v5584_v30  ;;  %v2262_v27 = vadd.f32 %v2261_v28, %v2226_v40  ;;  %v2227_v35 = vmul.f32 %v2195_v38, %v8420_v39  ;;  %v2211_v54 = vmul.f32 %v2179_v18, %v8420_v39  ;;  %v8423_v40 = vld [vmem:[#allocation61_spill] sm:$0xff] }
 0x257   : >> { %v5588_v46 = vpop.eup %5587  ;;  %v2118_v12 = vadd.f32 1.0, %v5586_v56  ;;  %v2241_v44 = vadd.f32 %v2240_v16, %v2210_v49  ;;  %v2197_v60 = vmul.f32 %v2165_v62, %v8421_v37  ;;  %v2181_v21 = vmul.f32 %v2149_v19, %v8421_v37  ;;  %v8424_v62 = vld [vmem:[#allocation76_spill] sm:$0xff] }
 0x258   : >> { %v5590_v20 = vpop.eup %5589  ;;  %v2166_v15 = vmul.f32 0.5, %v2134_v32  ;;  %v2311_v22 = vadd.f32 %v2310_v45, %v2195_v38  ;;  %v2228_v10 = vmul.f32 %v2196_v4, %v8422_v9  ;;  %v2212_v51 = vmul.f32 %v2180_v36, %v8422_v9 }
 0x259   : >> { %v2150_v31 = vmul.f32 0.5, %v2118_v12  ;;  %v2290_v5 = vadd.f32 %v2289_v3, %v2179_v18  ;;  %v2135_v57 = vadd.f32 1.0, %v5588_v46  ;;  %v2119_v30 = vadd.f32 1.0, %v5590_v20  ;;  %v8425_v18 = vld [vmem:[#allocation77_spill] sm:$0xff] }
 0x25a   : >> { %v2198_v41 = vmul.f32 %v2166_v15, %v8423_v40  ;;  %v2263_v28 = vadd.f32 %v2262_v27, %v2227_v35  ;;  %v2242_v56 = vadd.f32 %v2241_v44, %v2211_v54  ;;  %v2312_v39 = vadd.f32 %v2311_v22, %v2196_v4  ;;  %v8426_v27 = vld [vmem:[#allocation62_spill] sm:$0xff] }
 0x25b   : >> { %v2182_v49 = vmul.f32 %v2150_v31, %v8423_v40  ;;  %v2229_v16 = vmul.f32 %v2197_v60, %v8424_v62  ;;  %v2213_v32 = vmul.f32 %v2181_v21, %v8424_v62  ;;  %v2167_v19 = vmul.f32 0.5, %v2135_v57 }
 0x25c   : >> { %v2151_v45 = vmul.f32 0.5, %v2119_v30  ;;  %v2264_v37 = vadd.f32 %v2263_v28, %v2228_v10  ;;  %v2243_v9 = vadd.f32 %v2242_v56, %v2212_v51  ;;  %v2291_v12 = vadd.f32 %v2290_v5, %v2180_v36  ;;  %v8427_v30 = vld [vmem:[#allocation78_spill] sm:$0xff] }
 0x25d   : >> { %v5592_v38 = vpop.eup %5591  ;;  %v2230_v3 = vmul.f32 %v2198_v41, %v8425_v18  ;;  %v2214_v46 = vmul.f32 %v2182_v49, %v8425_v18  ;;  %v2199_v35 = vmul.f32 %v2167_v19, %v8426_v27  ;;  %v2313_v20 = vadd.f32 %v2312_v39, %v2197_v60 }
 0x25e   : >> { %v5594_v15 = vpop.eup %5593  ;;  %v2183_v4 = vmul.f32 %v2151_v45, %v8426_v27  ;;  %v2136_v54 = vadd.f32 1.0, %v5592_v38  ;;  %v2292_v44 = vadd.f32 %v2291_v12, %v2181_v21  ;;  %v2265_v31 = vadd.f32 %v2264_v37, %v2229_v16  ;;  %v8428_v45 = vld [vmem:[#allocation63_spill] sm:$0xff] }
 0x25f   : >> { %v2120_v22 = vadd.f32 1.0, %v5594_v15  ;;  %v2244_v57 = vadd.f32 %v2243_v9, %v2213_v32  ;;  %v2231_v62 = vmul.f32 %v2199_v35, %v8427_v30  ;;  %v2314_v36 = vadd.f32 %v2313_v20, %v2198_v41  ;;  %v8429_v9 = vld [vmem:[#allocation79_spill] sm:$0xff] }
 0x260   : >> { %v2215_v10 = vmul.f32 %v2183_v4, %v8427_v30  ;;  %v2293_v51 = vadd.f32 %v2292_v44, %v2182_v49  ;;  %v2168_v5 = vmul.f32 0.5, %v2136_v54  ;;  %v2266_v56 = vadd.f32 %v2265_v31, %v2230_v3  ;;  %v7045_v44 = vld [vmem:[%s7042_s25] sm:$0x3] }
 0x261   : >> { %v2152_v28 = vmul.f32 0.5, %v2120_v22  ;;  %v2245_v18 = vadd.f32 %v2244_v57, %v2214_v46  ;;  %v2315_v19 = vadd.f32 %v2314_v36, %v2199_v35 }
 0x262   : >> { %v2294_v40 = vadd.f32 %v2293_v51, %v2183_v4  ;;  %v2200_v38 = vmul.f32 %v2168_v5, %v8428_v45  ;;  %v2267_v60 = vadd.f32 %v2266_v56, %v2231_v62 }
 0x263   : >> { %v2184_v39 = vmul.f32 %v2152_v28, %v8428_v45  ;;  %v2246_v37 = vadd.f32 %v2245_v18, %v2215_v10  ;;  %v7048_v10 = vrot.slane %v7045_v44, 1 }
 0x264   : >> { %v2232_v21 = vmul.f32 %v2200_v38, %v8429_v9  ;;  %v2316_v16 = vadd.f32 %v2315_v19, %v2200_v38 }
 0x265   : >> { %v2216_v32 = vmul.f32 %v2184_v39, %v8429_v9  ;;  %v2295_v41 = vadd.f32 %v2294_v40, %v2184_v39  ;;  %8430 = vst [vmem:[#allocation83_spill] sm:$0xff] %v7048_v10 }
 0x266   : >> { %v2268_v49 = vadd.f32 %v2267_v60, %v2232_v21  ;;  %v2317_v12 = vrot.slane %v2316_v16, 4  ;;  %v7055_v60 = vld [vmem:[%s7052_s18] sm:$0x3] }
 0x267   : >> { %v2247_v3 = vadd.f32 %v2246_v37, %v2216_v32  ;;  %v2296_v15 = vrot.slane %v2295_v41, 4  ;;  %v7059_v37 = vrot.slane %v8431_v26, %v8365_v11 }
 0x268   : >> { %v2269_v46 = vrot.slane %v2268_v49, 4  ;;  %v2318_v35 = vadd.f32 %v2317_v12, %v2316_v16 }
 0x269   : >> { %v2248_v4 = vrot.slane %v2247_v3, 4  ;;  %v2297_v54 = vadd.f32 %v2296_v15, %v2295_v41  ;;  %8432 = vst [vmem:[#allocation84_spill] sm:$0xff] %v7059_v37  ;;  %v7063_v41 = vrot.slane %v7055_v60, 1 }
 0x26a   : >> { %v2270_v20 = vadd.f32 %v2269_v46, %v2268_v49  ;;  %v2319_v62 = vrot.slane %v2318_v35, 2  ;;  %v8434_v46 = vld [vmem:[#allocation80_spill] sm:$0xff] }
 0x26b   : >> { %v2298_v18 = vrot.slane %v2297_v54, 2  ;;  %v2249_v31 = vadd.f32 %v2248_v4, %v2247_v3  ;;  %8433 = vst [vmem:[#allocation85_spill] sm:$0xff] %v7063_v41 }
 0x26c   : >> { %v2271_v40 = vrot.slane %v2270_v20, 2  ;;  %v2320_v22 = vadd.f32 %v2319_v62, %v2318_v35  ;;  %v7069_v35 = vrot.slane %v8434_v46, %v8365_v11  ;;  %v8436_v62 = vld [vmem:[#allocation81_spill] sm:$0xff] }
 0x26d   : >> { %v2299_v57 = vadd.f32 %v2298_v18, %v2297_v54  ;;  %v2250_v56 = vrot.slane %v2249_v31, 2  ;;  %v7076_v18 = vrot.slane %v8436_v62, %v8365_v11 }
 0x26e   : >> { %v2272_v36 = vadd.f32 %v2271_v40, %v2270_v20  ;;  %v2321_v51 = vrot.slane %v2320_v22, 1  ;;  %8435 = vst [vmem:[#allocation86_spill] sm:$0xff] %v7069_v35  ;;  %v2335_v20 = vmul.f32 %v6051_v33, %v7069_v35 }
 0x26f   : >> { %v2300_v5 = vrot.slane %v2299_v57, 1  ;;  %v2251_v16 = vadd.f32 %v2250_v56, %v2249_v31  ;;  %8437 = vst [vmem:[#allocation87_spill] sm:$0xff] %v7076_v18 }
 0x270   : >> { %v2322_v28 = vadd.f32 %v2321_v51, %v2320_v22  ;;  %v2273_v38 = vrot.slane %v2272_v36, 1  ;;  %v2342_v31 = vadd.f32 %v7076_v18, %v2335_v20 }
 0x271   : >> { %v2301_v19 = vadd.f32 %v2300_v5, %v2299_v57  ;;  %v2252_v15 = vrot.slane %v2251_v16, 1 }
 0x272   : >> { %v2328_v39 = vadd.f32 %v7048_v10, %v2322_v28  ;;  %v2274_v49 = vadd.f32 %v2273_v38, %v2272_v36 }
 0x273   : >> { %v2327_v32 = vadd.f32 %v2301_v19, %v7045_v44  ;;  %v2253_v54 = vadd.f32 %v2252_v15, %v2251_v16 }
 0x274   : >> { %v2357_v21 = vrot.slane %v2328_v39, 7  ;;  %v2280_v4 = vadd.f32 %v7063_v41, %v2274_v49 }
 0x275   : >> { %v2279_v22 = vadd.f32 %v2253_v54, %v7055_v60 }
 0x276   : >> { %v2358_v12 = vsel %vm1408_vm1, %v2357_v21, %v2327_v32  ;;  %v2345_v40 = vrot.slane %v2280_v4, 7 }
 0x277   : >> { %v2360_v3 = vadd.f32 %v2358_v12, %v7059_v37 }
 0x278   : >> { %v2346_v57 = vsel %vm1408_vm1, %v2345_v40, %v2279_v22 }
 0x279   : >> { %5595 = vrcp.f32 %v2360_v3  ;;  %v2348_v36 = vadd.f32 %v2346_v57, %v2342_v31 }
 0x286   : >> { %v5596_v51 = vpop.eup %5595 }
 0x287   : >> { %v7081_v5 = vmul.f32 %v5596_v51, %v2348_v36 }
 0x289   : >> { %v2433_v28 = vrot.slane %v7081_v5, %v8364_v13  ;;  %v2366_v33 = vrot.slane %v7081_v5, %v8365_v11 }
 0x28b   : >> { %2439 = vbcast.lane.b32.xlu1 %v2433_v28, 264  ;;  %2435 = vbcast.lane.b32.xlu0 %v2433_v28, 256 }
 0x28f   : >> { %2372 = vbcast.lane.b32.xlu1 %v2366_v33, 264  ;;  %2368 = vbcast.lane.b32.xlu0 %v2366_v33, 256 }
 0x293   : >> { %2376 = vbcast.lane.b32.xlu1 %v2366_v33, 272  ;;  %2443 = vbcast.lane.b32.xlu0 %v2433_v28, 272 }
 0x297   : >> { %2380 = vbcast.lane.b32.xlu1 %v2366_v33, 280  ;;  %2447 = vbcast.lane.b32.xlu0 %v2433_v28, 280 }
 0x29b   : >> { %2384 = vbcast.lane.b32.xlu1 %v2366_v33, 288  ;;  %2451 = vbcast.lane.b32.xlu0 %v2433_v28, 288 }
 0x29f   : >> { %2388 = vbcast.lane.b32.xlu1 %v2366_v33, 296  ;;  %2455 = vbcast.lane.b32.xlu0 %v2433_v28, 296 }
 0x2a3   : >> { %2392 = vbcast.lane.b32.xlu1 %v2366_v33, 304  ;;  %2459 = vbcast.lane.b32.xlu0 %v2433_v28, 304 }
 0x2a7   : >> { %2396 = vbcast.lane.b32.xlu1 %v2366_v33, 312  ;;  %2463 = vbcast.lane.b32.xlu0 %v2433_v28, 312 }
 0x2ab   : >> { %2400 = vbcast.lane.b32.xlu1 %v2366_v33, 320  ;;  %2467 = vbcast.lane.b32.xlu0 %v2433_v28, 320 }
 0x2af   : >> { %2404 = vbcast.lane.b32.xlu1 %v2366_v33, 328  ;;  %2471 = vbcast.lane.b32.xlu0 %v2433_v28, 328 }
 0x2b3   : >> { %2408 = vbcast.lane.b32.xlu1 %v2366_v33, 336  ;;  %2475 = vbcast.lane.b32.xlu0 %v2433_v28, 336 }
 0x2b7   : >> { %2412 = vbcast.lane.b32.xlu1 %v2366_v33, 344  ;;  %2479 = vbcast.lane.b32.xlu0 %v2433_v28, 344 }
 0x2bb   : >> { %2416 = vbcast.lane.b32.xlu1 %v2366_v33, 352  ;;  %2483 = vbcast.lane.b32.xlu0 %v2433_v28, 352 }
 0x2bf   : >> { %2420 = vbcast.lane.b32.xlu1 %v2366_v33, 360  ;;  %2487 = vbcast.lane.b32.xlu0 %v2433_v28, 360 }
 0x2c3   : >> { %2424 = vbcast.lane.b32.xlu1 %v2366_v33, 368  ;;  %2491 = vbcast.lane.b32.xlu0 %v2433_v28, 368 }
 0x2c7   : >> { %2428 = vbcast.lane.b32.xlu1 %v2366_v33, 376  ;;  %2495 = vbcast.lane.b32.xlu0 %v2433_v28, 376 }
 0x2fd   : >> { %v2440_v56 = vpop.permute.xlu1 %2439  ;;  %v2436_v19 = vpop.permute.xlu0 %2435 }
 0x2fe   : >> { %v2514_v38 = vsub.f32 %v2440_v56, %v8366_v0  ;;  %v2513_v39 = vsub.f32 %v2436_v19, %v8367_v63 }
 0x300   : >> { %v2546_v21 = vmul.f32 %v2514_v38, %v8368_v43  ;;  %v2545_v16 = vmul.f32 %v2513_v39, %v8369_v42 }
 0x301   : >> { %v2373_v32 = vpop.permute.xlu1 %2372  ;;  %v2369_v49 = vpop.permute.xlu0 %2368 }
 0x302   : >> { %v2578_v12 = vmul.f32 0.5, %v2546_v21  ;;  %v2577_v3 = vmul.f32 0.5, %v2545_v16  ;;  %v2498_v15 = vsub.f32 %v2373_v32, %v8366_v0  ;;  %v2497_v46 = vsub.f32 %v2369_v49, %v8367_v63 }
 0x304   : >> { %5597 = vtanh.f32 %v2578_v12  ;;  %v2530_v4 = vmul.f32 %v2498_v15, %v8368_v43  ;;  %v2529_v54 = vmul.f32 %v2497_v46, %v8369_v42 }
 0x305   : >> { %5599 = vtanh.f32 %v2577_v3  ;;  %v2377_v20 = vpop.permute.xlu1 %2376  ;;  %v2444_v62 = vpop.permute.xlu0 %2443 }
 0x306   : >> { %v2562_v40 = vmul.f32 0.5, %v2530_v4  ;;  %v2561_v22 = vmul.f32 0.5, %v2529_v54  ;;  %v2499_v31 = vsub.f32 %v2377_v20, %v8370_v55  ;;  %v2515_v57 = vsub.f32 %v2444_v62, %v8370_v55  ;;  %v8443_v55 = vld [vmem:[#allocation51_spill] sm:$0xff] }
 0x308   : >> { %5601 = vtanh.f32 %v2562_v40  ;;  %v2531_v36 = vmul.f32 %v2499_v31, %v8372_v14  ;;  %v2547_v51 = vmul.f32 %v2515_v57, %v8372_v14 }
 0x309   : >> { %5603 = vtanh.f32 %v2561_v22  ;;  %v2381_v28 = vpop.permute.xlu1 %2380  ;;  %v2448_v33 = vpop.permute.xlu0 %2447 }
 0x30a   : >> { %v2563_v56 = vmul.f32 0.5, %v2531_v36  ;;  %v2579_v19 = vmul.f32 0.5, %v2547_v51  ;;  %v2500_v38 = vsub.f32 %v2381_v28, %v8373_v6  ;;  %v2516_v39 = vsub.f32 %v2448_v33, %v8373_v6 }
 0x30c   : >> { %5605 = vtanh.f32 %v2563_v56  ;;  %v2532_v21 = vmul.f32 %v2500_v38, %v8374_v52  ;;  %v2548_v16 = vmul.f32 %v2516_v39, %v8374_v52 }
 0x30d   : >> { %5607 = vtanh.f32 %v2579_v19  ;;  %v2385_v32 = vpop.permute.xlu1 %2384  ;;  %v2452_v49 = vpop.permute.xlu0 %2451 }
 0x30e   : >> { %v2564_v12 = vmul.f32 0.5, %v2532_v21  ;;  %v2580_v3 = vmul.f32 0.5, %v2548_v16  ;;  %v2501_v15 = vsub.f32 %v2385_v32, %v8375_v7  ;;  %v2517_v46 = vsub.f32 %v2452_v49, %v8375_v7 }
 0x310   : >> { %5609 = vtanh.f32 %v2564_v12  ;;  %v2533_v4 = vmul.f32 %v2501_v15, %v8380_v53  ;;  %v2549_v54 = vmul.f32 %v2517_v46, %v8380_v53 }
 0x311   : >> { %v5598_v20 = vpop.eup %5597  ;;  %v2389_v62 = vpop.permute.xlu1 %2388  ;;  %5611 = vtanh.f32 %v2580_v3 }
 0x312   : >> { %v2456_v40 = vpop.permute.xlu0 %2455  ;;  %v5600_v22 = vpop.eup %5599  ;;  %v2565_v31 = vmul.f32 0.5, %v2533_v4  ;;  %v2581_v57 = vmul.f32 0.5, %v2549_v54  ;;  %v2502_v36 = vsub.f32 %v2389_v62, %v8381_v24  ;;  %v2642_v56 = vadd.f32 1.0, %v5598_v20 }
 0x313   : >> { %v2518_v51 = vsub.f32 %v2456_v40, %v8381_v24  ;;  %v2641_v19 = vadd.f32 1.0, %v5600_v22 }
 0x314   : >> { %5613 = vtanh.f32 %v2565_v31  ;;  %v2534_v28 = vmul.f32 %v2502_v36, %v8382_v58  ;;  %v2674_v4 = vmul.f32 0.5, %v2642_v56 }
 0x315   : >> { %v5602_v33 = vpop.eup %5601  ;;  %5615 = vtanh.f32 %v2581_v57  ;;  %v2550_v38 = vmul.f32 %v2518_v51, %v8382_v58  ;;  %v2393_v39 = vpop.permute.xlu1 %2392  ;;  %v2673_v54 = vmul.f32 0.5, %v2641_v19  ;;  %v8439_v58 = vld [vmem:[#allocation39_spill] sm:$0xff] }
 0x316   : >> { %v2460_v21 = vpop.permute.xlu0 %2459  ;;  %v5604_v16 = vpop.eup %5603  ;;  %v2566_v32 = vmul.f32 0.5, %v2534_v28  ;;  %v2503_v49 = vsub.f32 %v2393_v39, %v8383_v25  ;;  %v2626_v12 = vadd.f32 1.0, %v5602_v33  ;;  %v2706_v33 = vmul.f32 %v2674_v4, %v8376_v48 }
 0x317   : >> { %v2625_v3 = vadd.f32 1.0, %v5604_v16  ;;  %v2582_v15 = vmul.f32 0.5, %v2550_v38  ;;  %v2519_v31 = vsub.f32 %v2460_v21, %v8383_v25  ;;  %v2705_v38 = vmul.f32 %v2673_v54, %v8377_v47 }
 0x318   : >> { %5617 = vtanh.f32 %v2566_v32  ;;  %v2535_v22 = vmul.f32 %v2503_v49, %v8379_v59  ;;  %v2658_v57 = vmul.f32 0.5, %v2626_v12  ;;  %v2738_v54 = vmul.f32 %v2706_v33, %v8371_v8 }
 0x319   : >> { %v5606_v46 = vpop.eup %5605  ;;  %v2397_v62 = vpop.permute.xlu1 %2396  ;;  %v2657_v36 = vmul.f32 0.5, %v2625_v3  ;;  %5619 = vtanh.f32 %v2582_v15  ;;  %v2551_v26 = vmul.f32 %v2519_v31, %v8379_v59  ;;  %v2818_v7 = vadd.f32 %v2706_v33, %v2705_v38 }
 0x31a   : >> { %v2464_v40 = vpop.permute.xlu0 %2463  ;;  %v5608_v20 = vpop.eup %5607  ;;  %v2627_v51 = vadd.f32 1.0, %v5606_v46  ;;  %v2504_v56 = vsub.f32 %v2397_v62, %v8378_v34  ;;  %v2567_v32 = vmul.f32 0.5, %v2535_v22  ;;  %v2690_v12 = vmul.f32 %v2658_v57, %v8376_v48 }
 0x31b   : >> { %v2643_v39 = vadd.f32 1.0, %v5608_v20  ;;  %v2520_v49 = vsub.f32 %v2464_v40, %v8378_v34  ;;  %v2689_v3 = vmul.f32 %v2657_v36, %v8377_v47  ;;  %v8438_v20 = vld [vmem:[#allocation64_spill] sm:$0xff]  ;;  %v2583_v40 = vmul.f32 0.5, %v2551_v26 }
 0x31c   : >> { %v2659_v15 = vmul.f32 0.5, %v2627_v51  ;;  %v2737_v25 = vmul.f32 %v2705_v38, %v8438_v20  ;;  %v2536_v24 = vmul.f32 %v2504_v56, %v8439_v58  ;;  %5621 = vtanh.f32 %v2567_v32  ;;  %v8441_v47 = vld [vmem:[#allocation24_spill] sm:$0xff]  ;;  %v8442_v38 = vld [vmem:[#allocation66_spill] sm:$0xff] }
 0x31d   : >> { %v5610_v28 = vpop.eup %5609  ;;  %v2401_v19 = vpop.permute.xlu1 %2400  ;;  %v2675_v62 = vmul.f32 0.5, %v2643_v39  ;;  %v2552_v57 = vmul.f32 %v2520_v49, %v8439_v58  ;;  %v2722_v36 = vmul.f32 %v2690_v12, %v8371_v8  ;;  %v2721_v51 = vmul.f32 %v2689_v3, %v8438_v20 }
 0x31e   : >> { %v2468_v16 = vpop.permute.xlu0 %2467  ;;  %v5612_v21 = vpop.eup %5611  ;;  %v2628_v46 = vadd.f32 1.0, %v5610_v28  ;;  %v8440_v28 = vld [vmem:[#allocation50_spill] sm:$0xff]  ;;  %v2505_v48 = vsub.f32 %v2401_v19, %v8441_v47  ;;  %5623 = vtanh.f32 %v2583_v40  ;;  %v2774_v8 = vadd.f32 %v2738_v54, %v2737_v25 }
 0x31f   : >> { %v2644_v59 = vadd.f32 1.0, %v5612_v21  ;;  %v2691_v34 = vmul.f32 %v2659_v15, %v8440_v28  ;;  %v2707_v6 = vmul.f32 %v2675_v62, %v8440_v28  ;;  %v2568_v21 = vmul.f32 0.5, %v2536_v24 }
 0x320   : >> { %v2660_v39 = vmul.f32 0.5, %v2628_v46  ;;  %v2537_v26 = vmul.f32 %v2505_v48, %v8390_v1  ;;  %v2584_v20 = vmul.f32 0.5, %v2552_v57  ;;  %v2521_v15 = vsub.f32 %v2468_v16, %v8441_v47 }
 0x321   : >> { %v5614_v4 = vpop.eup %5613  ;;  %v2405_v22 = vpop.permute.xlu1 %2404  ;;  %v2676_v58 = vmul.f32 0.5, %v2644_v59  ;;  %v2753_v19 = vadd.f32 %v2722_v36, %v2721_v51  ;;  %v2797_v33 = vadd.f32 %v2690_v12, %v2689_v3  ;;  %v2723_v46 = vmul.f32 %v2691_v34, %v8442_v38  ;;  %v8444_v36 = vld [vmem:[#allocation25_spill] sm:$0xff] }
 0x322   : >> { %v2472_v53 = vpop.permute.xlu0 %2471  ;;  %v5616_v31 = vpop.eup %5615  ;;  %v2629_v52 = vadd.f32 1.0, %v5614_v4  ;;  %v2692_v62 = vmul.f32 %v2660_v39, %v8443_v55  ;;  %v2553_v48 = vmul.f32 %v2521_v15, %v8390_v1  ;;  %v2739_v28 = vmul.f32 %v2707_v6, %v8442_v38  ;;  %v8446_v38 = vld [vmem:[#allocation52_spill] sm:$0xff] }
 0x323   : >> { %v2645_v14 = vadd.f32 1.0, %v5616_v31  ;;  %5625 = vtanh.f32 %v2568_v21  ;;  %v2569_v59 = vmul.f32 0.5, %v2537_v26  ;;  %v2798_v16 = vadd.f32 %v2797_v33, %v2691_v34 }
 0x324   : >> { %v2661_v31 = vmul.f32 0.5, %v2629_v52  ;;  %v2819_v25 = vadd.f32 %v2818_v7, %v2707_v6  ;;  %v2708_v12 = vmul.f32 %v2676_v58, %v8443_v55  ;;  %5627 = vtanh.f32 %v2584_v20 }
 0x325   : >> { %v5618_v56 = vpop.eup %5617  ;;  %v2409_v32 = vpop.permute.xlu1 %2408  ;;  %v2677_v42 = vmul.f32 0.5, %v2645_v14  ;;  %v2585_v54 = vmul.f32 0.5, %v2553_v48  ;;  %v2506_v51 = vsub.f32 %v2405_v22, %v8444_v36  ;;  %v2522_v52 = vsub.f32 %v2472_v53, %v8444_v36 }
 0x326   : >> { %v7131_v49 = vpop.permute.xlu0 %2475  ;;  %v5620_v4 = vpop.eup %5619  ;;  %v2630_v24 = vadd.f32 1.0, %v5618_v56  ;;  %v2754_v39 = vadd.f32 %v2753_v19, %v2723_v46  ;;  %v8445_v56 = vld [vmem:[#allocation67_spill] sm:$0xff]  ;;  %v2693_v14 = vmul.f32 %v2661_v31, %v8446_v38  ;;  %v2775_v26 = vadd.f32 %v2774_v8, %v2739_v28  ;;  %v8447_v28 = vld [vmem:[#allocation68_spill] sm:$0xff]  ;;  %v8448_v31 = vld [vmem:[#allocation53_spill] sm:$0xff] }
 0x327   : >> { %v2646_v3 = vadd.f32 1.0, %v5620_v4  ;;  %v2724_v15 = vmul.f32 %v2692_v62, %v8445_v56  ;;  %v2709_v1 = vmul.f32 %v2677_v42, %v8446_v38  ;;  %5629 = vtanh.f32 %v2569_v59 }
 0x328   : >> { %v2662_v21 = vmul.f32 0.5, %v2630_v24  ;;  %v2538_v6 = vmul.f32 %v2506_v51, %v8395_v61  ;;  %v2799_v58 = vadd.f32 %v2798_v16, %v2692_v62  ;;  %v2740_v20 = vmul.f32 %v2708_v12, %v8445_v56 }
 0x329   : >> { %v2413_v40 = vpop.permute.xlu1 %2412  ;;  %v2820_v22 = vadd.f32 %v2819_v25, %v2708_v12  ;;  %v2554_v53 = vmul.f32 %v2522_v52, %v8395_v61  ;;  %v5622_v19 = vpop.eup %5621  ;;  %v2678_v33 = vmul.f32 0.5, %v2646_v3  ;;  %5631 = vtanh.f32 %v2585_v54 }
 0x32a   : >> { %v2480_v57 = vpop.permute.xlu0 %2479  ;;  %v2570_v46 = vmul.f32 0.5, %v2538_v6  ;;  %v2507_v4 = vsub.f32 %v2409_v32, %v8396_v23  ;;  %v2755_v8 = vadd.f32 %v2754_v39, %v2724_v15  ;;  %v2725_v42 = vmul.f32 %v2693_v14, %v8447_v28 }
 0x32b   : >> { %v2694_v24 = vmul.f32 %v2662_v21, %v8448_v31  ;;  %v2586_v48 = vmul.f32 0.5, %v2554_v53  ;;  %v2741_v59 = vmul.f32 %v2709_v1, %v8447_v28  ;;  %v2523_v16 = vsub.f32 %v7131_v49, %v8396_v23  ;;  %v5624_v52 = vpop.eup %5623  ;;  %v8449_v53 = vld [vmem:[#allocation69_spill] sm:$0xff] }
 0x32c   : >> { %5633 = vtanh.f32 %v2570_v46  ;;  %v2539_v62 = vmul.f32 %v2507_v4, %v8398_v50  ;;  %v2776_v3 = vadd.f32 %v2775_v26, %v2740_v20  ;;  %v2800_v54 = vadd.f32 %v2799_v58, %v2693_v14  ;;  %v8450_v4 = vld [vmem:[#allocation27_spill] sm:$0xff] }
 0x32d   : >> { %v2417_v7 = vpop.permute.xlu1 %2416  ;;  %v2821_v51 = vadd.f32 %v2820_v22, %v2709_v1  ;;  %v2631_v32 = vadd.f32 1.0, %v5622_v19  ;;  %v2710_v39 = vmul.f32 %v2678_v33, %v8448_v31  ;;  %5635 = vtanh.f32 %v2586_v48  ;;  %v8451_v22 = vld [vmem:[#allocation28_spill] sm:$0xff] }
 0x32e   : >> { %v2484_v34 = vpop.permute.xlu0 %2483  ;;  %v2571_v15 = vmul.f32 0.5, %v2539_v62  ;;  %v2555_v21 = vmul.f32 %v2523_v16, %v8398_v50  ;;  %v2756_v6 = vadd.f32 %v2755_v8, %v2725_v42  ;;  %v2726_v46 = vmul.f32 %v2694_v24, %v8449_v53 }
 0x32f   : >> { %v2508_v28 = vsub.f32 %v2413_v40, %v8450_v4  ;;  %v2524_v49 = vsub.f32 %v2480_v57, %v8450_v4  ;;  %v2777_v23 = vadd.f32 %v2776_v3, %v2741_v59  ;;  %v7159_v61 = vadd.f32 %v2800_v54, %v2694_v24 }
 0x330   : >> { %5637 = vtanh.f32 %v2571_v15  ;;  %v2587_v1 = vmul.f32 0.5, %v2555_v21  ;;  %v5626_v14 = vpop.eup %5625  ;;  %v2647_v26 = vadd.f32 1.0, %v5624_v52  ;;  %v2509_v19 = vsub.f32 %v2417_v7, %v8451_v22  ;;  %v8453_v7 = vld [vmem:[#allocation29_spill] sm:$0xff] }
 0x331   : >> { %v2421_v25 = vpop.permute.xlu1 %2420  ;;  %v2540_v58 = vmul.f32 %v2508_v28, %v8403_v17  ;;  %v2556_v20 = vmul.f32 %v2524_v49, %v8403_v17  ;;  %v5628_v33 = vpop.eup %5627  ;;  %v2742_v8 = vmul.f32 %v2710_v39, %v8449_v53  ;;  %v2663_v42 = vmul.f32 0.5, %v2631_v32  ;;  %v8452_v28 = vld [vmem:[#allocation44_spill] sm:$0xff] }
 0x332   : >> { %v2488_v12 = vpop.permute.xlu0 %2487  ;;  %5639 = vtanh.f32 %v2587_v1  ;;  %v2525_v40 = vsub.f32 %v2484_v34, %v8451_v22  ;;  %v2757_v48 = vadd.f32 %v2756_v6, %v2726_v46  ;;  %v7166_v59 = vadd.f32 %v2821_v51, %v2710_v39  ;;  %v8454_v34 = vld [vmem:[#allocation30_spill] sm:$0xff] }
 0x333   : >> { %v2572_v62 = vmul.f32 0.5, %v2540_v58  ;;  %v2588_v16 = vmul.f32 0.5, %v2556_v20  ;;  %v2632_v3 = vadd.f32 1.0, %v5626_v14  ;;  %v2541_v54 = vmul.f32 %v2509_v19, %v8452_v28  ;;  %v8455_v22 = vld [vmem:[#allocation54_spill] sm:$0xff]  ;;  %v8456_v58 = vld [vmem:[#allocation45_spill] sm:$0xff] }
 0x334   : >> { %v2557_v52 = vmul.f32 %v2525_v40, %v8452_v28  ;;  %v2510_v15 = vsub.f32 %v2421_v25, %v8453_v7  ;;  %v5630_v21 = vpop.eup %5629  ;;  %v2679_v49 = vmul.f32 0.5, %v2647_v26  ;;  %v2526_v32 = vsub.f32 %v2488_v12, %v8453_v7  ;;  %v8457_v40 = vld [vmem:[#allocation46_spill] sm:$0xff] }
 0x335   : >> { %v2425_v57 = vpop.permute.xlu1 %2424  ;;  %5641 = vtanh.f32 %v2572_v62  ;;  %v2695_v6 = vmul.f32 %v2663_v42, %v8455_v22  ;;  %v2648_v51 = vadd.f32 1.0, %v5628_v33  ;;  %v2573_v39 = vmul.f32 0.5, %v2541_v54 }
 0x336   : >> { %v2492_v24 = vpop.permute.xlu0 %2491  ;;  %v2511_v1 = vsub.f32 %v2425_v57, %v8454_v34  ;;  %5643 = vtanh.f32 %v2588_v16  ;;  %v5632_v46 = vpop.eup %5631  ;;  %v2589_v14 = vmul.f32 0.5, %v2557_v52  ;;  %v2542_v20 = vmul.f32 %v2510_v15, %v8456_v58 }
 0x337   : >> { %v2558_v19 = vmul.f32 %v2526_v32, %v8456_v58  ;;  %v2778_v28 = vadd.f32 %v2777_v23, %v2742_v8  ;;  %v2664_v26 = vmul.f32 0.5, %v2632_v3  ;;  %v2633_v62 = vadd.f32 1.0, %v5630_v21  ;;  %v8458_v23 = vld [vmem:[#allocation31_spill] sm:$0xff]  ;;  %v8459_v21 = vld [vmem:[#allocation70_spill] sm:$0xff] }
 0x338   : >> { %v2543_v25 = vmul.f32 %v2511_v1, %v8457_v40  ;;  %5645 = vtanh.f32 %v2573_v39  ;;  %v2711_v42 = vmul.f32 %v2679_v49, %v8455_v22  ;;  %v2574_v33 = vmul.f32 0.5, %v2542_v20  ;;  %v8460_v39 = vld [vmem:[#allocation55_spill] sm:$0xff] }
 0x339   : >> { %v2429_v12 = vpop.permute.xlu1 %2428  ;;  %v5634_v57 = vpop.eup %5633  ;;  %5647 = vtanh.f32 %v2589_v14  ;;  %v2590_v16 = vmul.f32 0.5, %v2558_v19  ;;  %v2680_v54 = vmul.f32 0.5, %v2648_v51  ;;  %v2649_v52 = vadd.f32 1.0, %v5632_v46  ;;  %v8461_v46 = vld [vmem:[#allocation47_spill] sm:$0xff] }
 0x33a   : >> { %v2496_v7 = vpop.permute.xlu0 %2495  ;;  %v2575_v17 = vmul.f32 0.5, %v2543_v25  ;;  %v2527_v15 = vsub.f32 %v2492_v24, %v8454_v34  ;;  %v5636_v32 = vpop.eup %5635  ;;  %v2634_v58 = vadd.f32 1.0, %v5634_v57  ;;  %5649 = vtanh.f32 %v2574_v33  ;;  %v8462_v22 = vld [vmem:[#allocation71_spill] sm:$0xff] }
 0x33b   : >> { %v2512_v8 = vsub.f32 %v2429_v12, %v8458_v23  ;;  %v2528_v3 = vsub.f32 %v2496_v7, %v8458_v23  ;;  %v2727_v1 = vmul.f32 %v2695_v6, %v8459_v21  ;;  %v2696_v4 = vmul.f32 %v2664_v26, %v8460_v39 }
 0x33c   : >> { %v2665_v49 = vmul.f32 0.5, %v2633_v62  ;;  %v2650_v14 = vadd.f32 1.0, %v5636_v32  ;;  %5651 = vtanh.f32 %v2590_v16  ;;  %v2559_v51 = vmul.f32 %v2527_v15, %v8457_v40  ;;  %v8463_v40 = vld [vmem:[#allocation56_spill] sm:$0xff] }
 0x33d   : >> { %v5638_v20 = vpop.eup %5637  ;;  %v2544_v19 = vmul.f32 %v2512_v8, %v8461_v46  ;;  %v2560_v24 = vmul.f32 %v2528_v3, %v8461_v46  ;;  %v2743_v25 = vmul.f32 %v2711_v42, %v8459_v21  ;;  %v2712_v12 = vmul.f32 %v2680_v54, %v8460_v39 }
 0x33e   : >> { %v2681_v57 = vmul.f32 0.5, %v2649_v52  ;;  %v2635_v7 = vadd.f32 1.0, %v5638_v20  ;;  %v2666_v23 = vmul.f32 0.5, %v2634_v58  ;;  %5653 = vtanh.f32 %v2575_v17 }
 0x33f   : >> { %v5640_v33 = vpop.eup %5639  ;;  %v2591_v26 = vmul.f32 0.5, %v2559_v51  ;;  %v2576_v62 = vmul.f32 0.5, %v2544_v19  ;;  %v2758_v32 = vadd.f32 %v2757_v48, %v2727_v1  ;;  %v2802_v16 = vadd.f32 %v7159_v61, %v2695_v6  ;;  %v8464_v1 = vld [vmem:[#allocation57_spill] sm:$0xff] }
 0x340   : >> { %v2728_v15 = vmul.f32 %v2696_v4, %v8462_v22  ;;  %v2697_v8 = vmul.f32 %v2665_v49, %v8463_v40  ;;  %v2682_v34 = vmul.f32 0.5, %v2650_v14  ;;  %v2651_v3 = vadd.f32 1.0, %v5640_v33 }
 0x341   : >> { %5655 = vtanh.f32 %v2591_v26  ;;  %v2592_v46 = vmul.f32 0.5, %v2560_v24  ;;  %v2779_v54 = vadd.f32 %v2778_v28, %v2743_v25  ;;  %v2823_v52 = vadd.f32 %v7166_v59, %v2711_v42  ;;  %v8465_v24 = vld [vmem:[#allocation72_spill] sm:$0xff] }
 0x342   : >> { %v5642_v21 = vpop.eup %5641  ;;  %v2713_v58 = vmul.f32 %v2681_v57, %v8463_v40  ;;  %v2667_v17 = vmul.f32 0.5, %v2635_v7  ;;  %v2744_v48 = vmul.f32 %v2712_v12, %v8462_v22  ;;  %v2698_v61 = vmul.f32 %v2666_v23, %v8464_v1 }
 0x343   : >> { %v5644_v20 = vpop.eup %5643  ;;  %v2636_v6 = vadd.f32 1.0, %v5642_v21  ;;  %5657 = vtanh.f32 %v2576_v62  ;;  %v2759_v51 = vadd.f32 %v2758_v32, %v2728_v15  ;;  %v2803_v49 = vadd.f32 %v2802_v16, %v2696_v4 }
 0x344   : >> { %v2683_v14 = vmul.f32 0.5, %v2651_v3  ;;  %v2652_v19 = vadd.f32 1.0, %v5644_v20  ;;  %v2729_v26 = vmul.f32 %v2697_v8, %v8465_v24  ;;  %v2714_v28 = vmul.f32 %v2682_v34, %v8464_v1  ;;  %v8466_v20 = vld [vmem:[#allocation59_spill] sm:$0xff] }
 0x345   : >> { %v5646_v33 = vpop.eup %5645  ;;  %v2668_v59 = vmul.f32 0.5, %v2636_v6  ;;  %5659 = vtanh.f32 %v2592_v46  ;;  %v2745_v25 = vmul.f32 %v2713_v58, %v8465_v24  ;;  %v2699_v57 = vmul.f32 %v2667_v17, %v8418_v29 }
 0x346   : >> { %v5648_v42 = vpop.eup %5647  ;;  %v2684_v7 = vmul.f32 0.5, %v2652_v19  ;;  %v2637_v23 = vadd.f32 1.0, %v5646_v33  ;;  %v2780_v21 = vadd.f32 %v2779_v54, %v2744_v48  ;;  %v2824_v62 = vadd.f32 %v2823_v52, %v2712_v12  ;;  %v8467_v33 = vld [vmem:[#allocation74_spill] sm:$0xff] }
 0x347   : >> { %v2730_v4 = vmul.f32 %v2698_v61, %v8417_v2  ;;  %v2653_v32 = vadd.f32 1.0, %v5648_v42  ;;  %v5650_v16 = vpop.eup %5649  ;;  %v2804_v15 = vadd.f32 %v2803_v49, %v2697_v8  ;;  %v2715_v3 = vmul.f32 %v2683_v14, %v8418_v29  ;;  %v8469_v8 = vld [vmem:[#allocation60_spill] sm:$0xff] }
 0x348   : >> { %v2700_v34 = vmul.f32 %v2668_v59, %v8466_v20  ;;  %v2669_v6 = vmul.f32 0.5, %v2637_v23  ;;  %v2760_v46 = vadd.f32 %v2759_v51, %v2729_v26  ;;  %v2825_v1 = vadd.f32 %v2824_v62, %v2713_v58  ;;  %v8470_v58 = vld [vmem:[#allocation75_spill] sm:$0xff] }
 0x349   : >> { %v2746_v24 = vmul.f32 %v2714_v28, %v8417_v2  ;;  %v2685_v40 = vmul.f32 0.5, %v2653_v32  ;;  %v5652_v17 = vpop.eup %5651  ;;  %v2781_v19 = vadd.f32 %v2780_v21, %v2745_v25  ;;  %v8468_v22 = vmov %v8467_v33 }
 0x34a   : >> { %v2731_v54 = vmul.f32 %v2699_v57, %v8467_v33  ;;  %v2716_v12 = vmul.f32 %v2684_v7, %v8466_v20  ;;  %v2638_v52 = vadd.f32 1.0, %v5650_v16  ;;  %v2761_v48 = vadd.f32 %v2760_v46, %v2730_v4  ;;  %v8471_v4 = vld [vmem:[#allocation61_spill] sm:$0xff] }
 0x34b   : >> { %v2805_v42 = vadd.f32 %v2804_v15, %v2698_v61  ;;  %v2701_v49 = vmul.f32 %v2669_v6, %v8469_v8  ;;  %v2654_v14 = vadd.f32 1.0, %v5652_v17  ;;  %v5654_v29 = vpop.eup %5653  ;;  %v2826_v59 = vadd.f32 %v2825_v1, %v2714_v28  ;;  %v8472_v6 = vld [vmem:[#allocation76_spill] sm:$0xff] }
 0x34c   : >> { %v2747_v51 = vmul.f32 %v2715_v3, %v8468_v22  ;;  %v2732_v26 = vmul.f32 %v2700_v34, %v8470_v58  ;;  %v2670_v23 = vmul.f32 0.5, %v2638_v52  ;;  %v2782_v62 = vadd.f32 %v2781_v19, %v2746_v24 }
 0x34d   : >> { %v2717_v25 = vmul.f32 %v2685_v40, %v8469_v8  ;;  %v2686_v21 = vmul.f32 0.5, %v2654_v14  ;;  %v2639_v32 = vadd.f32 1.0, %v5654_v29  ;;  %v2762_v7 = vadd.f32 %v2761_v48, %v2731_v54  ;;  %v8473_v14 = vld [vmem:[#allocation77_spill] sm:$0xff] }
 0x34e   : >> { %v5656_v33 = vpop.eup %5655  ;;  %v2806_v16 = vadd.f32 %v2805_v42, %v2699_v57  ;;  %v2748_v61 = vmul.f32 %v2716_v12, %v8470_v58  ;;  %v2702_v15 = vmul.f32 %v2670_v23, %v8471_v4  ;;  %v2733_v46 = vmul.f32 %v2701_v49, %v8472_v6 }
 0x34f   : >> { %v2718_v1 = vmul.f32 %v2686_v21, %v8471_v4  ;;  %v2671_v28 = vmul.f32 0.5, %v2639_v32  ;;  %v2655_v17 = vadd.f32 1.0, %v5656_v33  ;;  %v2783_v52 = vadd.f32 %v2782_v62, %v2747_v51 }
 0x350   : >> { %v5658_v22 = vpop.eup %5657  ;;  %v2827_v24 = vadd.f32 %v2826_v59, %v2715_v3  ;;  %v2763_v19 = vadd.f32 %v2762_v7, %v2732_v26  ;;  %v2807_v40 = vadd.f32 %v2806_v16, %v2700_v34  ;;  %v2749_v29 = vmul.f32 %v2717_v25, %v8472_v6 }
 0x351   : >> { %v2734_v54 = vmul.f32 %v2702_v15, %v8473_v14  ;;  %v2703_v57 = vmul.f32 %v2671_v28, %v8426_v27  ;;  %v2687_v48 = vmul.f32 0.5, %v2655_v17  ;;  %v2784_v23 = vadd.f32 %v2783_v52, %v2748_v61 }
 0x352   : >> { %v5660_v42 = vpop.eup %5659  ;;  %v2828_v58 = vadd.f32 %v2827_v24, %v2716_v12  ;;  %v2808_v8 = vadd.f32 %v2807_v40, %v2701_v49  ;;  %v2640_v20 = vadd.f32 1.0, %v5658_v22  ;;  %v2764_v21 = vadd.f32 %v2763_v19, %v2733_v46 }
 0x353   : >> { %v2750_v32 = vmul.f32 %v2718_v1, %v8473_v14  ;;  %v2735_v51 = vmul.f32 %v2703_v57, %v8427_v30  ;;  %v2719_v3 = vmul.f32 %v2687_v48, %v8426_v27  ;;  %v2656_v62 = vadd.f32 1.0, %v5660_v42 }
 0x354   : >> { %v2829_v34 = vadd.f32 %v2828_v58, %v2717_v25  ;;  %v2809_v59 = vadd.f32 %v2808_v8, %v2702_v15  ;;  %v2672_v26 = vmul.f32 0.5, %v2640_v20  ;;  %v2785_v33 = vadd.f32 %v2784_v23, %v2749_v29 }
 0x355   : >> { %v2765_v7 = vadd.f32 %v2764_v21, %v2734_v54  ;;  %v2751_v16 = vmul.f32 %v2719_v3, %v8427_v30  ;;  %v2688_v22 = vmul.f32 0.5, %v2656_v62 }
 0x356   : >> { %v2830_v28 = vadd.f32 %v2829_v34, %v2718_v1  ;;  %v2810_v61 = vadd.f32 %v2809_v59, %v2703_v57  ;;  %v2704_v12 = vmul.f32 %v2672_v26, %v8428_v45  ;;  %v2786_v49 = vadd.f32 %v2785_v33, %v2750_v32 }
 0x357   : >> { %v2766_v46 = vadd.f32 %v2765_v7, %v2735_v51  ;;  %v2720_v58 = vmul.f32 %v2688_v22, %v8428_v45 }
 0x358   : >> { %v2831_v17 = vadd.f32 %v2830_v28, %v2719_v3  ;;  %v2736_v52 = vmul.f32 %v2704_v12, %v8429_v9  ;;  %v2811_v24 = vadd.f32 %v2810_v61, %v2704_v12  ;;  %v2787_v8 = vadd.f32 %v2786_v49, %v2751_v16 }
 0x359   : >> { %v2752_v15 = vmul.f32 %v2720_v58, %v8429_v9 }
 0x35a   : >> { %v2767_v20 = vadd.f32 %v2766_v46, %v2736_v52  ;;  %v2812_v25 = vrot.slane %v2811_v24, 4  ;;  %v2832_v19 = vadd.f32 %v2831_v17, %v2720_v58 }
 0x35b   : >> { %v2788_v1 = vadd.f32 %v2787_v8, %v2752_v15 }
 0x35c   : >> { %v2813_v40 = vadd.f32 %v2812_v25, %v2811_v24  ;;  %v2833_v29 = vrot.slane %v2832_v19, 4  ;;  %v2768_v54 = vrot.slane %v2767_v20, 4  ;;  %v2841_v25 = vmul.f32 %v7081_v5, %v7069_v35 }
 0x35d   : >> { %v2789_v48 = vrot.slane %v2788_v1, 4 }
 0x35e   : >> { %v2814_v57 = vrot.slane %v2813_v40, 2  ;;  %v2834_v42 = vadd.f32 %v2833_v29, %v2832_v19  ;;  %v2769_v51 = vadd.f32 %v2768_v54, %v2767_v20 }
 0x35f   : >> { %v2790_v21 = vadd.f32 %v2789_v48, %v2788_v1 }
 0x360   : >> { %v2815_v23 = vadd.f32 %v2814_v57, %v2813_v40  ;;  %v2835_v32 = vrot.slane %v2834_v42, 2  ;;  %v2770_v33 = vrot.slane %v2769_v51, 2 }
 0x361   : >> { %v2791_v34 = vrot.slane %v2790_v21, 2 }
 0x362   : >> { %v2816_v3 = vrot.slane %v2815_v23, 1  ;;  %v2836_v59 = vadd.f32 %v2835_v32, %v2834_v42  ;;  %v2771_v12 = vadd.f32 %v2770_v33, %v2769_v51 }
 0x363   : >> { %v2792_v26 = vadd.f32 %v2791_v34, %v2790_v21  ;;  %v8474_v21 = vld [vmem:[#allocation32_spill] sm:$0xff] }
 0x364   : >> { %v2837_v62 = vrot.slane %v2836_v59, 1  ;;  %v2817_v7 = vadd.f32 %v2816_v3, %v2815_v23  ;;  %v2772_v24 = vrot.slane %v2771_v12, 1 }
 0x365   : >> { %v2793_v28 = vrot.slane %v2792_v26, 1 }
 0x366   : >> { %v2838_v16 = vadd.f32 %v2837_v62, %v2836_v59  ;;  %v2839_v22 = vadd.f32 %v2817_v7, %v7045_v44  ;;  %v2773_v8 = vadd.f32 %v2772_v24, %v2771_v12  ;;  %v2842_v44 = vadd.f32 %v2841_v25, %v7076_v18 }
 0x367   : >> { %v2794_v46 = vadd.f32 %v2793_v28, %v2792_v26 }
 0x368   : >> { %v2840_v61 = vadd.f32 %v2838_v16, %v7048_v10  ;;  %v2795_v15 = vadd.f32 %v2773_v8, %v7055_v60 }
 0x369   : >> { %v2796_v58 = vadd.f32 %v2794_v46, %v7063_v41 }
 0x36a   : >> { %v2851_v49 = vrot.slane %v2840_v61, 7 }
 0x36b   : >> { %v2845_v20 = vrot.slane %v2796_v58, 7 }
 0x36c   : >> { %v2852_v17 = vsel %vm1408_vm1, %v2851_v49, %v2839_v22  ;;  %v8475_v22 = vld [vmem:[#allocation18_spill] sm:$0xff] }
 0x36d   : >> { %v2854_v52 = vadd.f32 %v2852_v17, %v7059_v37  ;;  %v2846_v19 = vsel %vm1408_vm1, %v2845_v20, %v2795_v15  ;;  %v8476_v17 = vld [vmem:[#allocation34_spill] sm:$0xff]  ;;  %v8477_v15 = vld [vmem:[#allocation19_spill] sm:$0xff] }
 0x36e   : >> { %v2848_v40 = vadd.f32 %v2846_v19, %v2842_v44 }
 0x36f   : >> { %5661 = vrcp.f32 %v2854_v52 }
 0x37c   : >> { %v5662_v1 = vpop.eup %5661 }
 0x37d   : >> { %v7234_v29 = vmul.f32 %v5662_v1, %v2848_v40  ;;  %v8478_v40 = vld [vmem:[#allocation35_spill] sm:$0xff] }
 0x37f   : >> { %v2927_v54 = vrot.slane %v7234_v29, %v8364_v13  ;;  %v2860_v57 = vrot.slane %v7234_v29, %v8365_v11 }
 0x381   : >> { %2933 = vbcast.lane.b32.xlu1 %v2927_v54, 264  ;;  %2929 = vbcast.lane.b32.xlu0 %v2927_v54, 256 }
 0x385   : >> { %2866 = vbcast.lane.b32.xlu1 %v2860_v57, 264  ;;  %2862 = vbcast.lane.b32.xlu0 %v2860_v57, 256 }
 0x389   : >> { %2870 = vbcast.lane.b32.xlu1 %v2860_v57, 272  ;;  %2937 = vbcast.lane.b32.xlu0 %v2927_v54, 272 }
 0x38d   : >> { %2874 = vbcast.lane.b32.xlu1 %v2860_v57, 280  ;;  %2941 = vbcast.lane.b32.xlu0 %v2927_v54, 280 }
 0x391   : >> { %2878 = vbcast.lane.b32.xlu1 %v2860_v57, 288  ;;  %2945 = vbcast.lane.b32.xlu0 %v2927_v54, 288 }
 0x395   : >> { %2882 = vbcast.lane.b32.xlu1 %v2860_v57, 296  ;;  %2949 = vbcast.lane.b32.xlu0 %v2927_v54, 296 }
 0x399   : >> { %2886 = vbcast.lane.b32.xlu1 %v2860_v57, 304  ;;  %2953 = vbcast.lane.b32.xlu0 %v2927_v54, 304 }
 0x39d   : >> { %2890 = vbcast.lane.b32.xlu1 %v2860_v57, 312  ;;  %2957 = vbcast.lane.b32.xlu0 %v2927_v54, 312 }
 0x3a1   : >> { %2894 = vbcast.lane.b32.xlu1 %v2860_v57, 320  ;;  %2961 = vbcast.lane.b32.xlu0 %v2927_v54, 320 }
 0x3a5   : >> { %2898 = vbcast.lane.b32.xlu1 %v2860_v57, 328  ;;  %2965 = vbcast.lane.b32.xlu0 %v2927_v54, 328 }
 0x3a9   : >> { %2902 = vbcast.lane.b32.xlu1 %v2860_v57, 336  ;;  %2969 = vbcast.lane.b32.xlu0 %v2927_v54, 336 }
 0x3ad   : >> { %2906 = vbcast.lane.b32.xlu1 %v2860_v57, 344  ;;  %2973 = vbcast.lane.b32.xlu0 %v2927_v54, 344 }
 0x3b1   : >> { %2910 = vbcast.lane.b32.xlu1 %v2860_v57, 352  ;;  %2977 = vbcast.lane.b32.xlu0 %v2927_v54, 352 }
 0x3b5   : >> { %2914 = vbcast.lane.b32.xlu1 %v2860_v57, 360  ;;  %2981 = vbcast.lane.b32.xlu0 %v2927_v54, 360 }
 0x3b9   : >> { %2918 = vbcast.lane.b32.xlu1 %v2860_v57, 368  ;;  %2985 = vbcast.lane.b32.xlu0 %v2927_v54, 368 }
 0x3bd   : >> { %2922 = vbcast.lane.b32.xlu1 %v2860_v57, 376  ;;  %2989 = vbcast.lane.b32.xlu0 %v2927_v54, 376 }
 0x3f3   : >> { %v2934_v60 = vpop.permute.xlu1 %2933  ;;  %v2930_v5 = vpop.permute.xlu0 %2929 }
 0x3f4   : >> { %v3008_v48 = vsub.f32 %v2934_v60, %v8366_v0  ;;  %v3007_v42 = vsub.f32 %v2930_v5, %v8367_v63 }
 0x3f6   : >> { %v3040_v23 = vmul.f32 %v3008_v48, %v8368_v43  ;;  %v3039_v32 = vmul.f32 %v3007_v42, %v8474_v21  ;;  %v8479_v42 = vld [vmem:[#allocation20_spill] sm:$0xff] }
 0x3f7   : >> { %v2867_v51 = vpop.permute.xlu1 %2866  ;;  %v2863_v3 = vpop.permute.xlu0 %2862 }
 0x3f8   : >> { %v3072_v34 = vmul.f32 0.5, %v3040_v23  ;;  %v3071_v59 = vmul.f32 0.5, %v3039_v32  ;;  %v2992_v26 = vsub.f32 %v2867_v51, %v8366_v0  ;;  %v2991_v62 = vsub.f32 %v2863_v3, %v8367_v63  ;;  %v8480_v51 = vld [vmem:[#allocation36_spill] sm:$0xff] }
 0x3fa   : >> { %5663 = vtanh.f32 %v3072_v34  ;;  %v3024_v33 = vmul.f32 %v2992_v26, %v8368_v43  ;;  %v3023_v7 = vmul.f32 %v2991_v62, %v8474_v21 }
 0x3fb   : >> { %5665 = vtanh.f32 %v3071_v59  ;;  %v2871_v16 = vpop.permute.xlu1 %2870  ;;  %v2938_v28 = vpop.permute.xlu0 %2937 }
 0x3fc   : >> { %v3056_v61 = vmul.f32 0.5, %v3024_v33  ;;  %v3055_v12 = vmul.f32 0.5, %v3023_v7  ;;  %v2993_v49 = vsub.f32 %v2871_v16, %v8475_v22  ;;  %v3009_v46 = vsub.f32 %v2938_v28, %v8475_v22  ;;  %v8481_v28 = vld [vmem:[#allocation21_spill] sm:$0xff] }
 0x3fe   : >> { %5667 = vtanh.f32 %v3056_v61  ;;  %v3025_v52 = vmul.f32 %v2993_v49, %v8476_v17  ;;  %v3041_v24 = vmul.f32 %v3009_v46, %v8476_v17  ;;  %v8482_v49 = vld [vmem:[#allocation37_spill] sm:$0xff] }
 0x3ff   : >> { %5669 = vtanh.f32 %v3055_v12  ;;  %v2875_v58 = vpop.permute.xlu1 %2874  ;;  %v2942_v8 = vpop.permute.xlu0 %2941 }
 0x400   : >> { %v3057_v20 = vmul.f32 0.5, %v3025_v52  ;;  %v3073_v25 = vmul.f32 0.5, %v3041_v24  ;;  %v2994_v19 = vsub.f32 %v2875_v58, %v8477_v15  ;;  %v3010_v44 = vsub.f32 %v2942_v8, %v8477_v15 }
 0x402   : >> { %5671 = vtanh.f32 %v3057_v20  ;;  %v3026_v1 = vmul.f32 %v2994_v19, %v8478_v40  ;;  %v3042_v54 = vmul.f32 %v3010_v44, %v8478_v40  ;;  %v8490_v40 = vld [vmem:[#allocation39_spill] sm:$0xff] }
 0x403   : >> { %5673 = vtanh.f32 %v3073_v25  ;;  %v2879_v57 = vpop.permute.xlu1 %2878  ;;  %v2946_v60 = vpop.permute.xlu0 %2945 }
 0x404   : >> { %v3058_v5 = vmul.f32 0.5, %v3026_v1  ;;  %v3074_v48 = vmul.f32 0.5, %v3042_v54  ;;  %v2995_v23 = vsub.f32 %v2879_v57, %v8479_v42  ;;  %v3011_v32 = vsub.f32 %v2946_v60, %v8479_v42  ;;  %v8483_v1 = vld [vmem:[#allocation22_spill] sm:$0xff] }
 0x406   : >> { %5675 = vtanh.f32 %v3058_v5  ;;  %v3027_v3 = vmul.f32 %v2995_v23, %v8480_v51  ;;  %v3043_v34 = vmul.f32 %v3011_v32, %v8480_v51 }
 0x407   : >> { %v5664_v59 = vpop.eup %5663  ;;  %v2883_v26 = vpop.permute.xlu1 %2882  ;;  %5677 = vtanh.f32 %v3074_v48 }
 0x408   : >> { %v2950_v62 = vpop.permute.xlu0 %2949  ;;  %v5666_v33 = vpop.eup %5665  ;;  %v3059_v7 = vmul.f32 0.5, %v3027_v3  ;;  %v3075_v16 = vmul.f32 0.5, %v3043_v34  ;;  %v2996_v61 = vsub.f32 %v2883_v26, %v8481_v28  ;;  %v3136_v24 = vadd.f32 1.0, %v5664_v59  ;;  %v8484_v26 = vld [vmem:[#allocation38_spill] sm:$0xff] }
 0x409   : >> { %v3012_v12 = vsub.f32 %v2950_v62, %v8481_v28  ;;  %v3135_v58 = vadd.f32 1.0, %v5666_v33 }
 0x40a   : >> { %5679 = vtanh.f32 %v3059_v7  ;;  %v3028_v46 = vmul.f32 %v2996_v61, %v8482_v49  ;;  %v3168_v23 = vmul.f32 0.5, %v3136_v24 }
 0x40b   : >> { %v5668_v52 = vpop.eup %5667  ;;  %5681 = vtanh.f32 %v3075_v16  ;;  %v3044_v8 = vmul.f32 %v3012_v12, %v8482_v49  ;;  %v2887_v20 = vpop.permute.xlu1 %2886  ;;  %v3167_v32 = vmul.f32 0.5, %v3135_v58 }
 0x40c   : >> { %v2954_v25 = vpop.permute.xlu0 %2953  ;;  %v5670_v19 = vpop.eup %5669  ;;  %v3060_v44 = vmul.f32 0.5, %v3028_v46  ;;  %v2997_v54 = vsub.f32 %v2887_v20, %v8483_v1  ;;  %v3120_v57 = vadd.f32 1.0, %v5668_v52  ;;  %v8485_v46 = vld [vmem:[#allocation49_spill] sm:$0xff]  ;;  %v8486_v20 = vld [vmem:[#allocation48_spill] sm:$0xff] }
 0x40d   : >> { %v3119_v60 = vadd.f32 1.0, %v5670_v19  ;;  %v3076_v5 = vmul.f32 0.5, %v3044_v8  ;;  %v3013_v33 = vsub.f32 %v2954_v25, %v8483_v1  ;;  %v3200_v52 = vmul.f32 %v3168_v23, %v8485_v46  ;;  %v8488_v1 = vld [vmem:[#allocation65_spill] sm:$0xff] }
 0x40e   : >> { %5683 = vtanh.f32 %v3060_v44  ;;  %v3029_v62 = vmul.f32 %v2997_v54, %v8484_v26  ;;  %v3152_v7 = vmul.f32 0.5, %v3120_v57  ;;  %v3199_v8 = vmul.f32 %v3167_v32, %v8486_v20  ;;  %v8487_v44 = vld [vmem:[#allocation23_spill] sm:$0xff] }
 0x40f   : >> { %v5672_v48 = vpop.eup %5671  ;;  %v2891_v3 = vpop.permute.xlu1 %2890  ;;  %v3151_v16 = vmul.f32 0.5, %v3119_v60  ;;  %5685 = vtanh.f32 %v3076_v5  ;;  %v3045_v51 = vmul.f32 %v3013_v33, %v8484_v26  ;;  %v3232_v32 = vmul.f32 %v3200_v52, %v8488_v1 }
 0x410   : >> { %v2958_v34 = vpop.permute.xlu0 %2957  ;;  %v5674_v59 = vpop.eup %5673  ;;  %v3121_v61 = vadd.f32 1.0, %v5672_v48  ;;  %v2998_v24 = vsub.f32 %v2891_v3, %v8487_v44  ;;  %v3061_v28 = vmul.f32 0.5, %v3029_v62  ;;  %v3184_v57 = vmul.f32 %v3152_v7, %v8485_v46 }
 0x411   : >> { %v3137_v19 = vadd.f32 1.0, %v5674_v59  ;;  %v3014_v54 = vsub.f32 %v2958_v34, %v8487_v44  ;;  %v3183_v60 = vmul.f32 %v3151_v16, %v8486_v20  ;;  %v8489_v59 = vld [vmem:[#allocation64_spill] sm:$0xff]  ;;  %v3077_v34 = vmul.f32 0.5, %v3045_v51 }
 0x412   : >> { %v3153_v5 = vmul.f32 0.5, %v3121_v61  ;;  %v3231_v42 = vmul.f32 %v3199_v8, %v8489_v59  ;;  %v3030_v15 = vmul.f32 %v2998_v24, %v8490_v40  ;;  %5687 = vtanh.f32 %v3061_v28  ;;  %v8492_v28 = vld [vmem:[#allocation40_spill] sm:$0xff] }
 0x413   : >> { %v5676_v12 = vpop.eup %5675  ;;  %v2895_v58 = vpop.permute.xlu1 %2894  ;;  %v3169_v3 = vmul.f32 0.5, %v3137_v19  ;;  %v3046_v7 = vmul.f32 %v3014_v54, %v8490_v40  ;;  %v3216_v16 = vmul.f32 %v3184_v57, %v8488_v1  ;;  %v3215_v61 = vmul.f32 %v3183_v60, %v8489_v59 }
 0x414   : >> { %v2962_v49 = vpop.permute.xlu0 %2961  ;;  %v5678_v25 = vpop.eup %5677  ;;  %v3122_v48 = vadd.f32 1.0, %v5676_v12  ;;  %v8491_v12 = vld [vmem:[#allocation50_spill] sm:$0xff]  ;;  %v2999_v20 = vsub.f32 %v2895_v58, %v8441_v47  ;;  %v3312_v46 = vadd.f32 %v3200_v52, %v3199_v8  ;;  %5689 = vtanh.f32 %v3077_v34 }
 0x415   : >> { %v3138_v26 = vadd.f32 1.0, %v5678_v25  ;;  %v3185_v44 = vmul.f32 %v3153_v5, %v8491_v12  ;;  %v3201_v21 = vmul.f32 %v3169_v3, %v8491_v12  ;;  %v3062_v25 = vmul.f32 0.5, %v3030_v15  ;;  %v8493_v8 = vld [vmem:[#allocation66_spill] sm:$0xff] }
 0x416   : >> { %v3154_v19 = vmul.f32 0.5, %v3122_v48  ;;  %v3031_v51 = vmul.f32 %v2999_v20, %v8492_v28  ;;  %v3078_v59 = vmul.f32 0.5, %v3046_v7  ;;  %v3015_v5 = vsub.f32 %v2962_v49, %v8441_v47 }
 0x417   : >> { %v5680_v23 = vpop.eup %5679  ;;  %v2899_v62 = vpop.permute.xlu1 %2898  ;;  %v3170_v40 = vmul.f32 0.5, %v3138_v26  ;;  %v3268_v1 = vadd.f32 %v3232_v32, %v3231_v42  ;;  %v3247_v58 = vadd.f32 %v3216_v16, %v3215_v61  ;;  %v3291_v52 = vadd.f32 %v3184_v57, %v3183_v60 }
 0x418   : >> { %v2966_v17 = vpop.permute.xlu0 %2965  ;;  %v5682_v33 = vpop.eup %5681  ;;  %v3123_v22 = vadd.f32 1.0, %v5680_v23  ;;  %v3217_v48 = vmul.f32 %v3185_v44, %v8493_v8  ;;  %v3186_v3 = vmul.f32 %v3154_v19, %v8443_v55  ;;  %v3047_v20 = vmul.f32 %v3015_v5, %v8492_v28 }
 0x419   : >> { %v3139_v43 = vadd.f32 1.0, %v5682_v33  ;;  %v3233_v12 = vmul.f32 %v3201_v21, %v8493_v8  ;;  %5691 = vtanh.f32 %v3062_v25  ;;  %v3063_v26 = vmul.f32 0.5, %v3031_v51 }
 0x41a   : >> { %v3155_v33 = vmul.f32 0.5, %v3123_v22  ;;  %v3292_v49 = vadd.f32 %v3291_v52, %v3185_v44  ;;  %v3313_v42 = vadd.f32 %v3312_v46, %v3201_v21  ;;  %v3202_v57 = vmul.f32 %v3170_v40, %v8443_v55  ;;  %v8494_v21 = vld [vmem:[#allocation41_spill] sm:$0xff] }
 0x41b   : >> { %v5684_v24 = vpop.eup %5683  ;;  %v2903_v63 = vpop.permute.xlu1 %2902  ;;  %v3171_v0 = vmul.f32 0.5, %v3139_v43  ;;  %5693 = vtanh.f32 %v3078_v59  ;;  %v3079_v32 = vmul.f32 0.5, %v3047_v20  ;;  %v3000_v16 = vsub.f32 %v2899_v62, %v8444_v36 }
 0x41c   : >> { %v7284_v54 = vpop.permute.xlu0 %2969  ;;  %v5686_v23 = vpop.eup %5685  ;;  %v3124_v15 = vadd.f32 1.0, %v5684_v24  ;;  %v3016_v22 = vsub.f32 %v2966_v17, %v8444_v36  ;;  %v3248_v61 = vadd.f32 %v3247_v58, %v3217_v48  ;;  %v3218_v19 = vmul.f32 %v3186_v3, %v8445_v56 }
 0x41d   : >> { %v3140_v60 = vadd.f32 1.0, %v5686_v23  ;;  %v3187_v43 = vmul.f32 %v3155_v33, %v8446_v38  ;;  %v3269_v25 = vadd.f32 %v3268_v1, %v3233_v12  ;;  %v3203_v51 = vmul.f32 %v3171_v0, %v8446_v38  ;;  %v8495_v23 = vld [vmem:[#allocation26_spill] sm:$0xff]  ;;  %v8496_v12 = vld [vmem:[#allocation68_spill] sm:$0xff] }
 0x41e   : >> { %v3156_v24 = vmul.f32 0.5, %v3124_v15  ;;  %5695 = vtanh.f32 %v3063_v26  ;;  %v3032_v46 = vmul.f32 %v3000_v16, %v8494_v21  ;;  %v3293_v59 = vadd.f32 %v3292_v49, %v3186_v3 }
 0x41f   : >> { %v2907_v34 = vpop.permute.xlu1 %2906  ;;  %v3234_v5 = vmul.f32 %v3202_v57, %v8445_v56  ;;  %v3314_v62 = vadd.f32 %v3313_v42, %v3202_v57  ;;  %v3048_v17 = vmul.f32 %v3016_v22, %v8494_v21  ;;  %v5688_v58 = vpop.eup %5687  ;;  %v3172_v52 = vmul.f32 0.5, %v3140_v60 }
 0x420   : >> { %v2974_v7 = vpop.permute.xlu0 %2973  ;;  %5697 = vtanh.f32 %v3079_v32  ;;  %v3064_v48 = vmul.f32 0.5, %v3032_v46  ;;  %v3001_v33 = vsub.f32 %v2903_v63, %v8495_v23  ;;  %v3249_v1 = vadd.f32 %v3248_v61, %v3218_v19 }
 0x421   : >> { %v3219_v0 = vmul.f32 %v3187_v43, %v8496_v12  ;;  %v3188_v15 = vmul.f32 %v3156_v24, %v8448_v31  ;;  %v3080_v20 = vmul.f32 0.5, %v3048_v17  ;;  %v3235_v26 = vmul.f32 %v3203_v51, %v8496_v12  ;;  %v5690_v22 = vpop.eup %5689 }
 0x422   : >> { %5699 = vtanh.f32 %v3064_v48  ;;  %v3033_v3 = vmul.f32 %v3001_v33, %v8398_v50  ;;  %v3017_v49 = vsub.f32 %v7284_v54, %v8495_v23  ;;  %v3270_v60 = vadd.f32 %v3269_v25, %v3234_v5  ;;  %v8497_v48 = vld [vmem:[#allocation27_spill] sm:$0xff] }
 0x423   : >> { %v2911_v40 = vpop.permute.xlu1 %2910  ;;  %v3294_v32 = vadd.f32 %v3293_v59, %v3187_v43  ;;  %v3315_v16 = vadd.f32 %v3314_v62, %v3203_v51  ;;  %v3125_v63 = vadd.f32 1.0, %v5688_v58  ;;  %v3204_v61 = vmul.f32 %v3172_v52, %v8448_v31  ;;  %v8498_v59 = vld [vmem:[#allocation43_spill] sm:$0xff]  ;;  %v8499_v58 = vld [vmem:[#allocation28_spill] sm:$0xff] }
 0x424   : >> { %v2978_v44 = vpop.permute.xlu0 %2977  ;;  %5701 = vtanh.f32 %v3080_v20  ;;  %v3065_v19 = vmul.f32 0.5, %v3033_v3  ;;  %v3049_v24 = vmul.f32 %v3017_v49, %v8398_v50  ;;  %v3250_v46 = vadd.f32 %v3249_v1, %v3219_v0 }
 0x425   : >> { %v3220_v17 = vmul.f32 %v3188_v15, %v8449_v53  ;;  %v3002_v33 = vsub.f32 %v2907_v34, %v8497_v48  ;;  %v3018_v54 = vsub.f32 %v2974_v7, %v8497_v48  ;;  %v3271_v12 = vadd.f32 %v3270_v60, %v3235_v26 }
 0x426   : >> { %v7312_v23 = vadd.f32 %v3294_v32, %v3188_v15  ;;  %5703 = vtanh.f32 %v3065_v19  ;;  %v3081_v43 = vmul.f32 0.5, %v3049_v24  ;;  %v5692_v25 = vpop.eup %5691  ;;  %v3141_v51 = vadd.f32 1.0, %v5690_v22  ;;  %v8500_v22 = vld [vmem:[#allocation44_spill] sm:$0xff] }
 0x427   : >> { %v2915_v42 = vpop.permute.xlu1 %2914  ;;  %v3034_v5 = vmul.f32 %v3002_v33, %v8498_v59  ;;  %v3050_v62 = vmul.f32 %v3018_v54, %v8498_v59  ;;  %v3003_v52 = vsub.f32 %v2911_v40, %v8499_v58  ;;  %v3236_v0 = vmul.f32 %v3204_v61, %v8449_v53  ;;  %v8501_v40 = vld [vmem:[#allocation29_spill] sm:$0xff] }
 0x428   : >> { %v2982_v57 = vpop.permute.xlu0 %2981  ;;  %v5694_v1 = vpop.eup %5693  ;;  %v3157_v20 = vmul.f32 0.5, %v3125_v63  ;;  %5705 = vtanh.f32 %v3081_v43  ;;  %v3019_v34 = vsub.f32 %v2978_v44, %v8499_v58  ;;  %v3251_v26 = vadd.f32 %v3250_v46, %v3220_v17  ;;  %v8502_v44 = vld [vmem:[#allocation30_spill] sm:$0xff] }
 0x429   : >> { %v7319_v3 = vadd.f32 %v3315_v16, %v3204_v61  ;;  %v3066_v49 = vmul.f32 0.5, %v3034_v5  ;;  %v3082_v60 = vmul.f32 0.5, %v3050_v62  ;;  %v3126_v32 = vadd.f32 1.0, %v5692_v25  ;;  %v8503_v58 = vld [vmem:[#allocation54_spill] sm:$0xff]  ;;  %v8504_v5 = vld [vmem:[#allocation45_spill] sm:$0xff] }
 0x42a   : >> { %v3035_v19 = vmul.f32 %v3003_v52, %v8500_v22  ;;  %v3051_v24 = vmul.f32 %v3019_v34, %v8500_v22  ;;  %v3004_v33 = vsub.f32 %v2915_v42, %v8501_v40  ;;  %v3173_v59 = vmul.f32 0.5, %v3141_v51  ;;  %v8505_v34 = vld [vmem:[#allocation46_spill] sm:$0xff] }
 0x42b   : >> { %v2919_v7 = vpop.permute.xlu1 %2918  ;;  %v5696_v54 = vpop.eup %5695  ;;  %5707 = vtanh.f32 %v3066_v49  ;;  %v3020_v63 = vsub.f32 %v2982_v57, %v8501_v40  ;;  %v3189_v46 = vmul.f32 %v3157_v20, %v8503_v58  ;;  %v3142_v16 = vadd.f32 1.0, %v5694_v1 }
 0x42c   : >> { %v2986_v15 = vpop.permute.xlu0 %2985  ;;  %v3005_v43 = vsub.f32 %v2919_v7, %v8502_v44  ;;  %5709 = vtanh.f32 %v3082_v60  ;;  %v3067_v61 = vmul.f32 0.5, %v3035_v19  ;;  %v3083_v25 = vmul.f32 0.5, %v3051_v24 }
 0x42d   : >> { %v5698_v17 = vpop.eup %5697  ;;  %v3036_v62 = vmul.f32 %v3004_v33, %v8504_v5  ;;  %v3052_v52 = vmul.f32 %v3020_v63, %v8504_v5  ;;  %v3272_v22 = vadd.f32 %v3271_v12, %v3236_v0  ;;  %v3158_v51 = vmul.f32 0.5, %v3126_v32  ;;  %v8506_v12 = vld [vmem:[#allocation31_spill] sm:$0xff] }
 0x42e   : >> { %v3037_v42 = vmul.f32 %v3005_v43, %v8505_v34  ;;  %v3127_v49 = vadd.f32 1.0, %v5696_v54  ;;  %5711 = vtanh.f32 %v3067_v61  ;;  %v3205_v20 = vmul.f32 %v3173_v59, %v8503_v58  ;;  %v8507_v54 = vld [vmem:[#allocation70_spill] sm:$0xff]  ;;  %v8509_v58 = vld [vmem:[#allocation71_spill] sm:$0xff] }
 0x42f   : >> { %v2923_v57 = vpop.permute.xlu1 %2922  ;;  %v5700_v7 = vpop.eup %5699  ;;  %5713 = vtanh.f32 %v3083_v25  ;;  %v3068_v1 = vmul.f32 0.5, %v3036_v62  ;;  %v3084_v60 = vmul.f32 0.5, %v3052_v52  ;;  %v3174_v19 = vmul.f32 0.5, %v3142_v16 }
 0x430   : >> { %v2990_v40 = vpop.permute.xlu0 %2989  ;;  %v3143_v24 = vadd.f32 1.0, %v5698_v17  ;;  %v3069_v48 = vmul.f32 0.5, %v3037_v42  ;;  %v3021_v33 = vsub.f32 %v2986_v15, %v8502_v44  ;;  %v3128_v5 = vadd.f32 1.0, %v5700_v7  ;;  %v8508_v17 = vld [vmem:[#allocation47_spill] sm:$0xff] }
 0x431   : >> { %v5702_v63 = vpop.eup %5701  ;;  %5715 = vtanh.f32 %v3068_v1  ;;  %v3006_v0 = vsub.f32 %v2923_v57, %v8506_v12  ;;  %v3022_v32 = vsub.f32 %v2990_v40, %v8506_v12  ;;  %v3221_v43 = vmul.f32 %v3189_v46, %v8507_v54 }
 0x432   : >> { %v3190_v61 = vmul.f32 %v3158_v51, %v8460_v39  ;;  %v3159_v59 = vmul.f32 0.5, %v3127_v49  ;;  %v3144_v25 = vadd.f32 1.0, %v5702_v63  ;;  %5717 = vtanh.f32 %v3084_v60 }
 0x433   : >> { %v5704_v62 = vpop.eup %5703  ;;  %v3053_v16 = vmul.f32 %v3021_v33, %v8505_v34  ;;  %v3038_v52 = vmul.f32 %v3006_v0, %v8508_v17  ;;  %v3054_v15 = vmul.f32 %v3022_v32, %v8508_v17  ;;  %v3237_v42 = vmul.f32 %v3205_v20, %v8507_v54  ;;  %v8510_v34 = vld [vmem:[#allocation56_spill] sm:$0xff] }
 0x434   : >> { %v3206_v57 = vmul.f32 %v3174_v19, %v8460_v39  ;;  %v3175_v7 = vmul.f32 0.5, %v3143_v24  ;;  %v3129_v40 = vadd.f32 1.0, %v5704_v62  ;;  %v3160_v12 = vmul.f32 0.5, %v3128_v5 }
 0x435   : >> { %v5706_v1 = vpop.eup %5705  ;;  %5719 = vtanh.f32 %v3069_v48  ;;  %v3085_v51 = vmul.f32 0.5, %v3053_v16  ;;  %v3070_v49 = vmul.f32 0.5, %v3038_v52  ;;  %v3252_v63 = vadd.f32 %v3251_v26, %v3221_v43  ;;  %v8511_v43 = vld [vmem:[#allocation57_spill] sm:$0xff] }
 0x436   : >> { %v3296_v60 = vadd.f32 %v7312_v23, %v3189_v46  ;;  %v3222_v33 = vmul.f32 %v3190_v61, %v8509_v58  ;;  %v3191_v0 = vmul.f32 %v3159_v59, %v8510_v34  ;;  %v3176_v44 = vmul.f32 0.5, %v3144_v25 }
 0x437   : >> { %v3145_v32 = vadd.f32 1.0, %v5706_v1  ;;  %5721 = vtanh.f32 %v3085_v51  ;;  %v3086_v17 = vmul.f32 0.5, %v3054_v15  ;;  %v3273_v19 = vadd.f32 %v3272_v22, %v3237_v42  ;;  %v8512_v15 = vld [vmem:[#allocation72_spill] sm:$0xff] }
 0x438   : >> { %v5708_v54 = vpop.eup %5707  ;;  %v3317_v24 = vadd.f32 %v7319_v3, %v3205_v20  ;;  %v3207_v5 = vmul.f32 %v3175_v7, %v8510_v34  ;;  %v3161_v48 = vmul.f32 0.5, %v3129_v40  ;;  %v3238_v26 = vmul.f32 %v3206_v57, %v8509_v58  ;;  %v8513_v7 = vld [vmem:[#allocation58_spill] sm:$0xff] }
 0x439   : >> { %v5710_v62 = vpop.eup %5709  ;;  %v3192_v23 = vmul.f32 %v3160_v12, %v8511_v43  ;;  %v3130_v46 = vadd.f32 1.0, %v5708_v54  ;;  %5723 = vtanh.f32 %v3070_v49  ;;  %v3253_v16 = vadd.f32 %v3252_v63, %v3222_v33 }
 0x43a   : >> { %v3297_v59 = vadd.f32 %v3296_v60, %v3190_v61  ;;  %v3177_v25 = vmul.f32 0.5, %v3145_v32  ;;  %v3146_v52 = vadd.f32 1.0, %v5710_v62  ;;  %v3223_v51 = vmul.f32 %v3191_v0, %v8512_v15  ;;  %v8514_v62 = vld [vmem:[#allocation59_spill] sm:$0xff] }
 0x43b   : >> { %v5712_v1 = vpop.eup %5711  ;;  %v3208_v22 = vmul.f32 %v3176_v44, %v8511_v43  ;;  %v3162_v3 = vmul.f32 0.5, %v3130_v46  ;;  %5725 = vtanh.f32 %v3086_v17  ;;  %v3239_v42 = vmul.f32 %v3207_v5, %v8512_v15 }
 0x43c   : >> { %v5714_v20 = vpop.eup %5713  ;;  %v3193_v40 = vmul.f32 %v3161_v48, %v8513_v7  ;;  %v3178_v34 = vmul.f32 0.5, %v3146_v52  ;;  %v3131_v12 = vadd.f32 1.0, %v5712_v1  ;;  %v3274_v54 = vadd.f32 %v3273_v19, %v3238_v26  ;;  %v8515_v1 = vld [vmem:[#allocation74_spill] sm:$0xff] }
 0x43d   : >> { %v3318_v49 = vadd.f32 %v3317_v24, %v3206_v57  ;;  %v3224_v61 = vmul.f32 %v3192_v23, %v8417_v2  ;;  %v3147_v63 = vadd.f32 1.0, %v5714_v20  ;;  %v3298_v33 = vadd.f32 %v3297_v59, %v3191_v0  ;;  %v8516_v0 = vld [vmem:[#allocation60_spill] sm:$0xff] }
 0x43e   : >> { %v5716_v60 = vpop.eup %5715  ;;  %v3209_v32 = vmul.f32 %v3177_v25, %v8513_v7  ;;  %v3194_v44 = vmul.f32 %v3162_v3, %v8514_v62  ;;  %v3163_v46 = vmul.f32 0.5, %v3131_v12  ;;  %v3254_v17 = vadd.f32 %v3253_v16, %v3223_v51 }
 0x43f   : >> { %v3319_v43 = vadd.f32 %v3318_v49, %v3207_v5  ;;  %v3240_v15 = vmul.f32 %v3208_v22, %v8417_v2  ;;  %v3179_v58 = vmul.f32 0.5, %v3147_v63  ;;  %v5718_v48 = vpop.eup %5717  ;;  %v3275_v52 = vadd.f32 %v3274_v54, %v3239_v42  ;;  %v8517_v5 = vld [vmem:[#allocation75_spill] sm:$0xff] }
 0x440   : >> { %v3225_v19 = vmul.f32 %v3193_v40, %v8515_v1  ;;  %v3210_v57 = vmul.f32 %v3178_v34, %v8514_v62  ;;  %v3132_v24 = vadd.f32 1.0, %v5716_v60  ;;  %v3255_v26 = vadd.f32 %v3254_v17, %v3224_v61 }
 0x441   : >> { %v3299_v20 = vadd.f32 %v3298_v33, %v3192_v23  ;;  %v3195_v59 = vmul.f32 %v3163_v46, %v8516_v0  ;;  %v3148_v25 = vadd.f32 1.0, %v5718_v48  ;;  %v3320_v3 = vadd.f32 %v3319_v43, %v3208_v22 }
 0x442   : >> { %v5720_v7 = vpop.eup %5719  ;;  %v3241_v16 = vmul.f32 %v3209_v32, %v8515_v1  ;;  %v3226_v51 = vmul.f32 %v3194_v44, %v8517_v5  ;;  %v3164_v12 = vmul.f32 0.5, %v3132_v24  ;;  %v3276_v49 = vadd.f32 %v3275_v52, %v3240_v15 }
 0x443   : >> { %v3211_v42 = vmul.f32 %v3179_v58, %v8516_v0  ;;  %v3180_v54 = vmul.f32 0.5, %v3148_v25  ;;  %v3133_v63 = vadd.f32 1.0, %v5720_v7  ;;  %v3256_v34 = vadd.f32 %v3255_v26, %v3225_v19 }
 0x444   : >> { %v5722_v2 = vpop.eup %5721  ;;  %v3300_v60 = vadd.f32 %v3299_v20, %v3193_v40  ;;  %v3242_v23 = vmul.f32 %v3210_v57, %v8517_v5  ;;  %v3196_v61 = vmul.f32 %v3164_v12, %v8471_v4  ;;  %v3227_v33 = vmul.f32 %v3195_v59, %v8472_v6 }
 0x445   : >> { %v3212_v43 = vmul.f32 %v3180_v54, %v8471_v4  ;;  %v3165_v22 = vmul.f32 0.5, %v3133_v63  ;;  %v3149_v46 = vadd.f32 1.0, %v5722_v2  ;;  %v3277_v48 = vadd.f32 %v3276_v49, %v3241_v16 }
 0x446   : >> { %v5724_v17 = vpop.eup %5723  ;;  %v3321_v15 = vadd.f32 %v3320_v3, %v3209_v32  ;;  %v3257_v52 = vadd.f32 %v3256_v34, %v3226_v51  ;;  %v3301_v58 = vadd.f32 %v3300_v60, %v3194_v44  ;;  %v3243_v7 = vmul.f32 %v3211_v42, %v8472_v6 }
 0x447   : >> { %v3228_v19 = vmul.f32 %v3196_v61, %v8473_v14  ;;  %v3197_v40 = vmul.f32 %v3165_v22, %v8426_v27  ;;  %v3181_v24 = vmul.f32 0.5, %v3149_v46  ;;  %v3278_v20 = vadd.f32 %v3277_v48, %v3242_v23 }
 0x448   : >> { %v5726_v26 = vpop.eup %5725  ;;  %v3322_v25 = vadd.f32 %v3321_v15, %v3210_v57  ;;  %v3302_v12 = vadd.f32 %v3301_v58, %v3195_v59  ;;  %v3134_v5 = vadd.f32 1.0, %v5724_v17  ;;  %v3258_v54 = vadd.f32 %v3257_v52, %v3227_v33 }
 0x449   : >> { %v3244_v2 = vmul.f32 %v3212_v43, %v8473_v14  ;;  %v3229_v16 = vmul.f32 %v3197_v40, %v8427_v30  ;;  %v3213_v32 = vmul.f32 %v3181_v24, %v8426_v27  ;;  %v3150_v49 = vadd.f32 1.0, %v5726_v26 }
 0x44a   : >> { %v3323_v44 = vadd.f32 %v3322_v25, %v3211_v42  ;;  %v3303_v3 = vadd.f32 %v3302_v12, %v3196_v61  ;;  %v3166_v51 = vmul.f32 0.5, %v3134_v5  ;;  %v3279_v63 = vadd.f32 %v3278_v20, %v3243_v7 }
 0x44b   : >> { %v3259_v34 = vadd.f32 %v3258_v54, %v3228_v19  ;;  %v3245_v60 = vmul.f32 %v3213_v32, %v8427_v30  ;;  %v3182_v59 = vmul.f32 0.5, %v3150_v49 }
 0x44c   : >> { %v3324_v22 = vadd.f32 %v3323_v44, %v3212_v43  ;;  %v3304_v23 = vadd.f32 %v3303_v3, %v3197_v40  ;;  %v3198_v57 = vmul.f32 %v3166_v51, %v8428_v45  ;;  %v3280_v33 = vadd.f32 %v3279_v63, %v3244_v2 }
 0x44d   : >> { %v3260_v46 = vadd.f32 %v3259_v34, %v3229_v16  ;;  %v3214_v42 = vmul.f32 %v3182_v59, %v8428_v45  ;;  %v7379_v59 = vld [vmem:[%s7042_s25] sm:$0x3] }
 0x44e   : >> { %v3325_v17 = vadd.f32 %v3324_v22, %v3213_v32  ;;  %v3230_v48 = vmul.f32 %v3198_v57, %v8429_v9  ;;  %v3305_v15 = vadd.f32 %v3304_v23, %v3198_v57  ;;  %v3281_v61 = vadd.f32 %v3280_v33, %v3245_v60 }
 0x44f   : >> { %v3246_v58 = vmul.f32 %v3214_v42, %v8429_v9 }
 0x450   : >> { %v3261_v5 = vadd.f32 %v3260_v46, %v3230_v48  ;;  %v3306_v52 = vrot.slane %v3305_v15, 4  ;;  %v3326_v7 = vadd.f32 %v3325_v17, %v3214_v42 }
 0x451   : >> { %v3282_v43 = vadd.f32 %v3281_v61, %v3246_v58  ;;  %v3335_v58 = vmul.f32 %v7234_v29, %v7069_v35 }
 0x452   : >> { %v3307_v19 = vadd.f32 %v3306_v52, %v3305_v15  ;;  %v3327_v40 = vrot.slane %v3326_v7, 4  ;;  %v3262_v24 = vrot.slane %v3261_v5, 4 }
 0x453   : >> { %v3283_v20 = vrot.slane %v3282_v43, 4 }
 0x454   : >> { %v3308_v26 = vrot.slane %v3307_v19, 2  ;;  %v3328_v25 = vadd.f32 %v3327_v40, %v3326_v7  ;;  %v3263_v16 = vadd.f32 %v3262_v24, %v3261_v5  ;;  %v7388_v7 = vld [vmem:[%s7052_s18] sm:$0x3]  ;;  %v3336_v40 = vadd.f32 %v3335_v58, %v7076_v18 }
 0x455   : >> { %v3284_v54 = vadd.f32 %v3283_v20, %v3282_v43  ;;  %8518 = vst [vmem:[#allocation88_spill] sm:$0xff] %v7388_v7 }
 0x456   : >> { %v3309_v12 = vadd.f32 %v3308_v26, %v3307_v19  ;;  %v3329_v2 = vrot.slane %v3328_v25, 2  ;;  %v3264_v63 = vrot.slane %v3263_v16, 2 }
 0x457   : >> { %v3285_v44 = vrot.slane %v3284_v54, 2 }
 0x458   : >> { %v3310_v32 = vrot.slane %v3309_v12, 1  ;;  %v3330_v3 = vadd.f32 %v3329_v2, %v3328_v25  ;;  %v3265_v57 = vadd.f32 %v3264_v63, %v3263_v16  ;;  %v8520_v2 = vld [vmem:[#allocation17_spill] sm:$0xff] }
 0x459   : >> { %v3286_v51 = vadd.f32 %v3285_v44, %v3284_v54 }
 0x45a   : >> { %v3331_v49 = vrot.slane %v3330_v3, 1  ;;  %v3311_v34 = vadd.f32 %v3310_v32, %v3309_v12  ;;  %v3266_v42 = vrot.slane %v3265_v57, 1  ;;  %v8521_v32 = vld [vmem:[#allocation16_spill] sm:$0xff] }
 0x45b   : >> { %v3287_v22 = vrot.slane %v3286_v51, 1 }
 0x45c   : >> { %v3332_v60 = vadd.f32 %v3331_v49, %v3330_v3  ;;  %v3333_v33 = vadd.f32 %v7379_v59, %v3311_v34  ;;  %v3267_v5 = vadd.f32 %v3266_v42, %v3265_v57  ;;  %v8522_v3 = vld [vmem:[#allocation33_spill] sm:$0xff]  ;;  %v8523_v49 = vld [vmem:[#allocation32_spill] sm:$0xff] }
 0x45d   : >> { %v3288_v17 = vadd.f32 %v3287_v22, %v3286_v51 }
 0x45e   : >> { %v3334_v23 = vadd.f32 %v3332_v60, %v7048_v10  ;;  %v3289_v19 = vadd.f32 %v7388_v7, %v3267_v5  ;;  %v8524_v5 = vld [vmem:[#allocation18_spill] sm:$0xff] }
 0x45f   : >> { %v3290_v61 = vadd.f32 %v3288_v17, %v7063_v41 }
 0x460   : >> { %v3345_v46 = vrot.slane %v3334_v23, 7 }
 0x461   : >> { %v3339_v52 = vrot.slane %v3290_v61, 7 }
 0x462   : >> { %v3346_v48 = vsel %vm1408_vm1, %v3345_v46, %v3333_v33 }
 0x463   : >> { %v3348_v15 = vadd.f32 %v3346_v48, %v7059_v37  ;;  %v3340_v43 = vsel %vm1408_vm1, %v3339_v52, %v3289_v19  ;;  %v8525_v19 = vld [vmem:[#allocation34_spill] sm:$0xff] }
 0x464   : >> { %v3342_v24 = vadd.f32 %v3340_v43, %v3336_v40 }
 0x465   : >> { %5727 = vrcp.f32 %v3348_v15 }
 0x472   : >> { %v5728_v26 = vpop.eup %5727 }
 0x473   : >> { %v7393_v20 = vmul.f32 %v5728_v26, %v3342_v24 }
 0x475   : >> { %8519 = vst [vmem:[#allocation89_spill] sm:$0xff] %v7393_v20  ;;  %v3421_v25 = vrot.slane %v7393_v20, %v8364_v13  ;;  %v3354_v29 = vrot.slane %v7393_v20, %v8365_v11 }
 0x477   : >> { %3427 = vbcast.lane.b32.xlu1 %v3421_v25, 264  ;;  %3423 = vbcast.lane.b32.xlu0 %v3421_v25, 256 }
 0x47b   : >> { %3360 = vbcast.lane.b32.xlu1 %v3354_v29, 264  ;;  %3356 = vbcast.lane.b32.xlu0 %v3354_v29, 256 }
 0x47f   : >> { %3364 = vbcast.lane.b32.xlu1 %v3354_v29, 272  ;;  %3431 = vbcast.lane.b32.xlu0 %v3421_v25, 272 }
 0x483   : >> { %3368 = vbcast.lane.b32.xlu1 %v3354_v29, 280  ;;  %3435 = vbcast.lane.b32.xlu0 %v3421_v25, 280 }
 0x487   : >> { %3372 = vbcast.lane.b32.xlu1 %v3354_v29, 288  ;;  %3439 = vbcast.lane.b32.xlu0 %v3421_v25, 288 }
 0x48b   : >> { %3376 = vbcast.lane.b32.xlu1 %v3354_v29, 296  ;;  %3443 = vbcast.lane.b32.xlu0 %v3421_v25, 296 }
 0x48f   : >> { %3380 = vbcast.lane.b32.xlu1 %v3354_v29, 304  ;;  %3447 = vbcast.lane.b32.xlu0 %v3421_v25, 304 }
 0x493   : >> { %3384 = vbcast.lane.b32.xlu1 %v3354_v29, 312  ;;  %3451 = vbcast.lane.b32.xlu0 %v3421_v25, 312 }
 0x497   : >> { %3388 = vbcast.lane.b32.xlu1 %v3354_v29, 320  ;;  %3455 = vbcast.lane.b32.xlu0 %v3421_v25, 320 }
 0x49b   : >> { %3392 = vbcast.lane.b32.xlu1 %v3354_v29, 328  ;;  %3459 = vbcast.lane.b32.xlu0 %v3421_v25, 328 }
 0x49f   : >> { %3396 = vbcast.lane.b32.xlu1 %v3354_v29, 336  ;;  %3463 = vbcast.lane.b32.xlu0 %v3421_v25, 336 }
 0x4a3   : >> { %3400 = vbcast.lane.b32.xlu1 %v3354_v29, 344  ;;  %3467 = vbcast.lane.b32.xlu0 %v3421_v25, 344 }
 0x4a7   : >> { %3404 = vbcast.lane.b32.xlu1 %v3354_v29, 352  ;;  %3471 = vbcast.lane.b32.xlu0 %v3421_v25, 352 }
 0x4ab   : >> { %3408 = vbcast.lane.b32.xlu1 %v3354_v29, 360  ;;  %3475 = vbcast.lane.b32.xlu0 %v3421_v25, 360 }
 0x4af   : >> { %3412 = vbcast.lane.b32.xlu1 %v3354_v29, 368  ;;  %3479 = vbcast.lane.b32.xlu0 %v3421_v25, 368 }
 0x4b3   : >> { %3416 = vbcast.lane.b32.xlu1 %v3354_v29, 376  ;;  %3483 = vbcast.lane.b32.xlu0 %v3421_v25, 376 }
 0x4e9   : >> { %v3428_v12 = vpop.permute.xlu1 %3427  ;;  %v3424_v54 = vpop.permute.xlu0 %3423 }
 0x4ea   : >> { %v3502_v16 = vsub.f32 %v3428_v12, %v8520_v2  ;;  %v3501_v44 = vsub.f32 %v3424_v54, %v8521_v32  ;;  %v8526_v12 = vld [vmem:[#allocation19_spill] sm:$0xff] }
 0x4ec   : >> { %v3534_v51 = vmul.f32 %v3502_v16, %v8522_v3  ;;  %v3533_v63 = vmul.f32 %v3501_v44, %v8523_v49  ;;  %v8527_v44 = vld [vmem:[#allocation35_spill] sm:$0xff] }
 0x4ed   : >> { %v3361_v34 = vpop.permute.xlu1 %3360  ;;  %v3357_v60 = vpop.permute.xlu0 %3356 }
 0x4ee   : >> { %v3566_v22 = vmul.f32 0.5, %v3534_v51  ;;  %v3565_v23 = vmul.f32 0.5, %v3533_v63  ;;  %v3486_v57 = vsub.f32 %v3361_v34, %v8520_v2  ;;  %v3485_v33 = vsub.f32 %v3357_v60, %v8521_v32  ;;  %v8539_v2 = vld [vmem:[#allocation39_spill] sm:$0xff] }
 0x4f0   : >> { %5729 = vtanh.f32 %v3566_v22  ;;  %v3518_v46 = vmul.f32 %v3486_v57, %v8522_v3  ;;  %v3517_v17 = vmul.f32 %v3485_v33, %v8523_v49  ;;  %v8528_v57 = vld [vmem:[#allocation20_spill] sm:$0xff] }
 0x4f1   : >> { %5731 = vtanh.f32 %v3565_v23  ;;  %v3365_v48 = vpop.permute.xlu1 %3364  ;;  %v3432_v15 = vpop.permute.xlu0 %3431 }
 0x4f2   : >> { %v3550_v42 = vmul.f32 0.5, %v3518_v46  ;;  %v3549_v61 = vmul.f32 0.5, %v3517_v17  ;;  %v3487_v52 = vsub.f32 %v3365_v48, %v8524_v5  ;;  %v3503_v58 = vsub.f32 %v3432_v15, %v8524_v5  ;;  %v8529_v17 = vld [vmem:[#allocation36_spill] sm:$0xff] }
 0x4f4   : >> { %5733 = vtanh.f32 %v3550_v42  ;;  %v3519_v43 = vmul.f32 %v3487_v52, %v8525_v19  ;;  %v3535_v40 = vmul.f32 %v3503_v58, %v8525_v19  ;;  %v8536_v19 = vld [vmem:[#allocation23_spill] sm:$0xff] }
 0x4f5   : >> { %5735 = vtanh.f32 %v3549_v61  ;;  %v3369_v24 = vpop.permute.xlu1 %3368  ;;  %v3436_v26 = vpop.permute.xlu0 %3435 }
 0x4f6   : >> { %v3551_v25 = vmul.f32 0.5, %v3519_v43  ;;  %v3567_v29 = vmul.f32 0.5, %v3535_v40  ;;  %v3488_v54 = vsub.f32 %v3369_v24, %v8526_v12  ;;  %v3504_v16 = vsub.f32 %v3436_v26, %v8526_v12  ;;  %v8530_v24 = vld [vmem:[#allocation21_spill] sm:$0xff] }
 0x4f8   : >> { %5737 = vtanh.f32 %v3551_v25  ;;  %v3520_v51 = vmul.f32 %v3488_v54, %v8527_v44  ;;  %v3536_v63 = vmul.f32 %v3504_v16, %v8527_v44 }
 0x4f9   : >> { %5739 = vtanh.f32 %v3567_v29  ;;  %v3373_v34 = vpop.permute.xlu1 %3372  ;;  %v3440_v60 = vpop.permute.xlu0 %3439  ;;  %v8531_v29 = vld [vmem:[#allocation37_spill] sm:$0xff] }
 0x4fa   : >> { %v3552_v22 = vmul.f32 0.5, %v3520_v51  ;;  %v3568_v23 = vmul.f32 0.5, %v3536_v63  ;;  %v3489_v33 = vsub.f32 %v3373_v34, %v8528_v57  ;;  %v3505_v46 = vsub.f32 %v3440_v60, %v8528_v57 }
 0x4fc   : >> { %5741 = vtanh.f32 %v3552_v22  ;;  %v3521_v48 = vmul.f32 %v3489_v33, %v8529_v17  ;;  %v3537_v15 = vmul.f32 %v3505_v46, %v8529_v17 }
 0x4fd   : >> { %v5730_v42 = vpop.eup %5729  ;;  %v3377_v61 = vpop.permute.xlu1 %3376  ;;  %5743 = vtanh.f32 %v3568_v23  ;;  %v8532_v23 = vld [vmem:[#allocation22_spill] sm:$0xff] }
 0x4fe   : >> { %v3444_v52 = vpop.permute.xlu0 %3443  ;;  %v5732_v58 = vpop.eup %5731  ;;  %v3553_v43 = vmul.f32 0.5, %v3521_v48  ;;  %v3569_v40 = vmul.f32 0.5, %v3537_v15  ;;  %v3490_v26 = vsub.f32 %v3377_v61, %v8530_v24  ;;  %v3630_v51 = vadd.f32 1.0, %v5730_v42 }
 0x4ff   : >> { %v3506_v25 = vsub.f32 %v3444_v52, %v8530_v24  ;;  %v3629_v63 = vadd.f32 1.0, %v5732_v58  ;;  %v8533_v58 = vld [vmem:[#allocation38_spill] sm:$0xff] }
 0x500   : >> { %5745 = vtanh.f32 %v3553_v43  ;;  %v3522_v54 = vmul.f32 %v3490_v26, %v8531_v29  ;;  %v3662_v43 = vmul.f32 0.5, %v3630_v51 }
 0x501   : >> { %v5734_v16 = vpop.eup %5733  ;;  %5747 = vtanh.f32 %v3569_v40  ;;  %v3538_v34 = vmul.f32 %v3506_v25, %v8531_v29  ;;  %v3381_v60 = vpop.permute.xlu1 %3380  ;;  %v3661_v24 = vmul.f32 0.5, %v3629_v63 }
 0x502   : >> { %v3448_v22 = vpop.permute.xlu0 %3447  ;;  %v5736_v33 = vpop.eup %5735  ;;  %v3554_v46 = vmul.f32 0.5, %v3522_v54  ;;  %v3491_v48 = vsub.f32 %v3381_v60, %v8532_v23  ;;  %v3614_v15 = vadd.f32 1.0, %v5734_v16  ;;  %v8534_v60 = vld [vmem:[#allocation49_spill] sm:$0xff] }
 0x503   : >> { %v3613_v17 = vadd.f32 1.0, %v5736_v33  ;;  %v3570_v61 = vmul.f32 0.5, %v3538_v34  ;;  %v3507_v25 = vsub.f32 %v3448_v22, %v8532_v23  ;;  %v3694_v16 = vmul.f32 %v3662_v43, %v8534_v60  ;;  %v8535_v33 = vld [vmem:[#allocation48_spill] sm:$0xff]  ;;  %v8537_v23 = vld [vmem:[#allocation65_spill] sm:$0xff] }
 0x504   : >> { %5749 = vtanh.f32 %v3554_v46  ;;  %v3523_v40 = vmul.f32 %v3491_v48, %v8533_v58  ;;  %v3646_v29 = vmul.f32 0.5, %v3614_v15  ;;  %v3693_v34 = vmul.f32 %v3661_v24, %v8535_v33 }
 0x505   : >> { %v5738_v52 = vpop.eup %5737  ;;  %v3385_v26 = vpop.permute.xlu1 %3384  ;;  %v3645_v44 = vmul.f32 0.5, %v3613_v17  ;;  %5751 = vtanh.f32 %v3570_v61  ;;  %v3539_v3 = vmul.f32 %v3507_v25, %v8533_v58  ;;  %v3726_v24 = vmul.f32 %v3694_v16, %v8537_v23 }
 0x506   : >> { %v3452_v57 = vpop.permute.xlu0 %3451  ;;  %v5740_v42 = vpop.eup %5739  ;;  %v3615_v12 = vadd.f32 1.0, %v5738_v52  ;;  %v3492_v51 = vsub.f32 %v3385_v26, %v8536_v19  ;;  %v3555_v49 = vmul.f32 0.5, %v3523_v40  ;;  %v3678_v17 = vmul.f32 %v3646_v29, %v8534_v60 }
 0x507   : >> { %v3631_v46 = vadd.f32 1.0, %v5740_v42  ;;  %v3508_v48 = vsub.f32 %v3452_v57, %v8536_v19  ;;  %v3677_v15 = vmul.f32 %v3645_v44, %v8535_v33  ;;  %v8538_v42 = vld [vmem:[#allocation64_spill] sm:$0xff]  ;;  %v3571_v57 = vmul.f32 0.5, %v3539_v3 }
 0x508   : >> { %v3647_v61 = vmul.f32 0.5, %v3615_v12  ;;  %v3725_v32 = vmul.f32 %v3693_v34, %v8538_v42  ;;  %v3524_v11 = vmul.f32 %v3492_v51, %v8539_v2  ;;  %5753 = vtanh.f32 %v3555_v49 }
 0x509   : >> { %v5742_v54 = vpop.eup %5741  ;;  %v3389_v63 = vpop.permute.xlu1 %3388  ;;  %v3663_v26 = vmul.f32 0.5, %v3631_v46  ;;  %v3540_v29 = vmul.f32 %v3508_v48, %v8539_v2  ;;  %v3710_v44 = vmul.f32 %v3678_v17, %v8537_v23  ;;  %v3709_v12 = vmul.f32 %v3677_v15, %v8538_v42 }
 0x50a   : >> { %v3456_v5 = vpop.permute.xlu0 %3455  ;;  %v5744_v22 = vpop.eup %5743  ;;  %v3616_v52 = vadd.f32 1.0, %v5742_v54  ;;  %v8540_v54 = vld [vmem:[#allocation50_spill] sm:$0xff]  ;;  %v3493_v33 = vsub.f32 %v3389_v63, %v8441_v47  ;;  %v3806_v60 = vadd.f32 %v3694_v16, %v3693_v34  ;;  %5755 = vtanh.f32 %v3571_v57 }
 0x50b   : >> { %v3632_v58 = vadd.f32 1.0, %v5744_v22  ;;  %v3679_v19 = vmul.f32 %v3647_v61, %v8540_v54  ;;  %v3695_v7 = vmul.f32 %v3663_v26, %v8540_v54  ;;  %v3556_v22 = vmul.f32 0.5, %v3524_v11 }
 0x50c   : >> { %v3648_v46 = vmul.f32 0.5, %v3616_v52  ;;  %v3525_v3 = vmul.f32 %v3493_v33, %v8492_v28  ;;  %v3572_v42 = vmul.f32 0.5, %v3540_v29  ;;  %v3509_v61 = vsub.f32 %v3456_v5, %v8441_v47 }
 0x50d   : >> { %v5746_v43 = vpop.eup %5745  ;;  %v3393_v40 = vpop.permute.xlu1 %3392  ;;  %v3664_v2 = vmul.f32 0.5, %v3632_v58  ;;  %v3762_v23 = vadd.f32 %v3726_v24, %v3725_v32  ;;  %v3741_v63 = vadd.f32 %v3710_v44, %v3709_v12  ;;  %v3785_v16 = vadd.f32 %v3678_v17, %v3677_v15 }
 0x50e   : >> { %v3460_v13 = vpop.permute.xlu0 %3459  ;;  %v5748_v25 = vpop.eup %5747  ;;  %v3617_v18 = vadd.f32 1.0, %v5746_v43  ;;  %v3711_v34 = vmul.f32 %v3679_v19, %v8493_v8  ;;  %v3680_v43 = vmul.f32 %v3648_v46, %v8443_v55  ;;  %v3541_v33 = vmul.f32 %v3509_v61, %v8492_v28 }
 0x50f   : >> { %v3633_v20 = vadd.f32 1.0, %v5748_v25  ;;  %v3727_v25 = vmul.f32 %v3695_v7, %v8493_v8  ;;  %5757 = vtanh.f32 %v3556_v22  ;;  %v3557_v58 = vmul.f32 0.5, %v3525_v3 }
 0x510   : >> { %v3649_v26 = vmul.f32 0.5, %v3617_v18  ;;  %v3786_v5 = vadd.f32 %v3785_v16, %v3679_v19  ;;  %v3807_v32 = vadd.f32 %v3806_v60, %v3695_v7  ;;  %v3696_v17 = vmul.f32 %v3664_v2, %v8443_v55 }
 0x511   : >> { %v5750_v51 = vpop.eup %5749  ;;  %v3397_v49 = vpop.permute.xlu1 %3396  ;;  %v3665_v54 = vmul.f32 0.5, %v3633_v20  ;;  %5759 = vtanh.f32 %v3572_v42  ;;  %v3573_v24 = vmul.f32 0.5, %v3541_v33  ;;  %v3494_v44 = vsub.f32 %v3393_v40, %v8444_v36 }
 0x512   : >> { %v7443_v48 = vpop.permute.xlu0 %3463  ;;  %v5752_v52 = vpop.eup %5751  ;;  %v3618_v11 = vadd.f32 1.0, %v5750_v51  ;;  %v3510_v18 = vsub.f32 %v3460_v13, %v8444_v36  ;;  %v3742_v12 = vadd.f32 %v3741_v63, %v3711_v34  ;;  %v3712_v46 = vmul.f32 %v3680_v43, %v8445_v56  ;;  %v8541_v34 = vld [vmem:[#allocation26_spill] sm:$0xff] }
 0x513   : >> { %v3634_v15 = vadd.f32 1.0, %v5752_v52  ;;  %v3681_v20 = vmul.f32 %v3649_v26, %v8446_v38  ;;  %v3763_v22 = vadd.f32 %v3762_v23, %v3727_v25  ;;  %v3697_v3 = vmul.f32 %v3665_v54, %v8446_v38  ;;  %v8542_v26 = vld [vmem:[#allocation68_spill] sm:$0xff] }
 0x514   : >> { %v3650_v51 = vmul.f32 0.5, %v3618_v11  ;;  %5761 = vtanh.f32 %v3557_v58  ;;  %v3526_v7 = vmul.f32 %v3494_v44, %v8494_v21  ;;  %v3787_v60 = vadd.f32 %v3786_v5, %v3680_v43 }
 0x515   : >> { %v3401_v57 = vpop.permute.xlu1 %3400  ;;  %v3728_v42 = vmul.f32 %v3696_v17, %v8445_v56  ;;  %v3808_v40 = vadd.f32 %v3807_v32, %v3696_v17  ;;  %v3542_v13 = vmul.f32 %v3510_v18, %v8494_v21  ;;  %v5754_v61 = vpop.eup %5753  ;;  %v3666_v63 = vmul.f32 0.5, %v3634_v15 }
 0x516   : >> { %v3468_v29 = vpop.permute.xlu0 %3467  ;;  %5763 = vtanh.f32 %v3573_v24  ;;  %v3558_v16 = vmul.f32 0.5, %v3526_v7  ;;  %v3495_v52 = vsub.f32 %v3397_v49, %v8541_v34  ;;  %v3743_v23 = vadd.f32 %v3742_v12, %v3712_v46 }
 0x517   : >> { %v3713_v54 = vmul.f32 %v3681_v20, %v8542_v26  ;;  %v3682_v11 = vmul.f32 %v3650_v51, %v8448_v31  ;;  %v3574_v33 = vmul.f32 0.5, %v3542_v13  ;;  %v3729_v25 = vmul.f32 %v3697_v3, %v8542_v26  ;;  %v5756_v44 = vpop.eup %5755  ;;  %v8543_v13 = vld [vmem:[#allocation27_spill] sm:$0xff] }
 0x518   : >> { %5765 = vtanh.f32 %v3558_v16  ;;  %v3527_v43 = vmul.f32 %v3495_v52, %v8398_v50  ;;  %v3511_v58 = vsub.f32 %v7443_v48, %v8541_v34  ;;  %v3764_v17 = vadd.f32 %v3763_v22, %v3728_v42 }
 0x519   : >> { %v3405_v2 = vpop.permute.xlu1 %3404  ;;  %v3788_v15 = vadd.f32 %v3787_v60, %v3681_v20  ;;  %v3809_v24 = vadd.f32 %v3808_v40, %v3697_v3  ;;  %v3619_v49 = vadd.f32 1.0, %v5754_v61  ;;  %v3698_v18 = vmul.f32 %v3666_v63, %v8448_v31  ;;  %v8544_v60 = vld [vmem:[#allocation43_spill] sm:$0xff]  ;;  %v8545_v61 = vld [vmem:[#allocation28_spill] sm:$0xff] }
 0x51a   : >> { %v3472_v19 = vpop.permute.xlu0 %3471  ;;  %5767 = vtanh.f32 %v3574_v33  ;;  %v3559_v12 = vmul.f32 0.5, %v3527_v43  ;;  %v3543_v46 = vmul.f32 %v3511_v58, %v8398_v50  ;;  %v3744_v51 = vadd.f32 %v3743_v23, %v3713_v54 }
 0x51b   : >> { %v3714_v7 = vmul.f32 %v3682_v11, %v8449_v53  ;;  %v3496_v16 = vsub.f32 %v3401_v57, %v8543_v13  ;;  %v3512_v48 = vsub.f32 %v3468_v29, %v8543_v13  ;;  %v3765_v52 = vadd.f32 %v3764_v17, %v3729_v25 }
 0x51c   : >> { %v7471_v26 = vadd.f32 %v3788_v15, %v3682_v11  ;;  %5769 = vtanh.f32 %v3559_v12  ;;  %v3575_v20 = vmul.f32 0.5, %v3543_v46  ;;  %v5758_v22 = vpop.eup %5757  ;;  %v3635_v3 = vadd.f32 1.0, %v5756_v44  ;;  %v8546_v44 = vld [vmem:[#allocation44_spill] sm:$0xff] }
 0x51d   : >> { %v3409_v5 = vpop.permute.xlu1 %3408  ;;  %v3528_v42 = vmul.f32 %v3496_v16, %v8544_v60  ;;  %v3544_v40 = vmul.f32 %v3512_v48, %v8544_v60  ;;  %v3497_v63 = vsub.f32 %v3405_v2, %v8545_v61  ;;  %v3730_v54 = vmul.f32 %v3698_v18, %v8449_v53  ;;  %v8547_v2 = vld [vmem:[#allocation29_spill] sm:$0xff] }
 0x51e   : >> { %v3476_v32 = vpop.permute.xlu0 %3475  ;;  %v5760_v23 = vpop.eup %5759  ;;  %v3651_v33 = vmul.f32 0.5, %v3619_v49  ;;  %5771 = vtanh.f32 %v3575_v20  ;;  %v3513_v57 = vsub.f32 %v3472_v19, %v8545_v61  ;;  %v3745_v25 = vadd.f32 %v3744_v51, %v3714_v7  ;;  %v8548_v19 = vld [vmem:[#allocation30_spill] sm:$0xff] }
 0x51f   : >> { %v7478_v43 = vadd.f32 %v3809_v24, %v3698_v18  ;;  %v3560_v58 = vmul.f32 0.5, %v3528_v42  ;;  %v3576_v17 = vmul.f32 0.5, %v3544_v40  ;;  %v3620_v15 = vadd.f32 1.0, %v5758_v22  ;;  %v8549_v61 = vld [vmem:[#allocation54_spill] sm:$0xff]  ;;  %v8550_v42 = vld [vmem:[#allocation45_spill] sm:$0xff] }
 0x520   : >> { %v3529_v12 = vmul.f32 %v3497_v63, %v8546_v44  ;;  %v3545_v46 = vmul.f32 %v3513_v57, %v8546_v44  ;;  %v3498_v16 = vsub.f32 %v3409_v5, %v8547_v2  ;;  %v3667_v60 = vmul.f32 0.5, %v3635_v3  ;;  %v8551_v57 = vld [vmem:[#allocation46_spill] sm:$0xff] }
 0x521   : >> { %v3413_v29 = vpop.permute.xlu1 %3412  ;;  %v5762_v48 = vpop.eup %5761  ;;  %5773 = vtanh.f32 %v3560_v58  ;;  %v3514_v49 = vsub.f32 %v3476_v32, %v8547_v2  ;;  %v3683_v51 = vmul.f32 %v3651_v33, %v8549_v61  ;;  %v3636_v24 = vadd.f32 1.0, %v5760_v23 }
 0x522   : >> { %v3480_v11 = vpop.permute.xlu0 %3479  ;;  %v3499_v20 = vsub.f32 %v3413_v29, %v8548_v19  ;;  %5775 = vtanh.f32 %v3576_v17  ;;  %v3561_v18 = vmul.f32 0.5, %v3529_v12  ;;  %v3577_v22 = vmul.f32 0.5, %v3545_v46 }
 0x523   : >> { %v5764_v7 = vpop.eup %5763  ;;  %v3530_v40 = vmul.f32 %v3498_v16, %v8550_v42  ;;  %v3546_v63 = vmul.f32 %v3514_v49, %v8550_v42  ;;  %v3766_v44 = vadd.f32 %v3765_v52, %v3730_v54  ;;  %v3652_v3 = vmul.f32 0.5, %v3620_v15  ;;  %v8552_v52 = vld [vmem:[#allocation31_spill] sm:$0xff] }
 0x524   : >> { %v3531_v5 = vmul.f32 %v3499_v20, %v8551_v57  ;;  %v3621_v58 = vadd.f32 1.0, %v5762_v48  ;;  %5777 = vtanh.f32 %v3561_v18  ;;  %v3699_v33 = vmul.f32 %v3667_v60, %v8549_v61  ;;  %v8553_v48 = vld [vmem:[#allocation70_spill] sm:$0xff]  ;;  %v8555_v61 = vld [vmem:[#allocation71_spill] sm:$0xff] }
 0x525   : >> { %v3417_v32 = vpop.permute.xlu1 %3416  ;;  %v5766_v29 = vpop.eup %5765  ;;  %5779 = vtanh.f32 %v3577_v22  ;;  %v3562_v23 = vmul.f32 0.5, %v3530_v40  ;;  %v3578_v17 = vmul.f32 0.5, %v3546_v63  ;;  %v3668_v12 = vmul.f32 0.5, %v3636_v24 }
 0x526   : >> { %v3484_v2 = vpop.permute.xlu0 %3483  ;;  %v3637_v46 = vadd.f32 1.0, %v5764_v7  ;;  %v3563_v13 = vmul.f32 0.5, %v3531_v5  ;;  %v3515_v16 = vsub.f32 %v3480_v11, %v8548_v19  ;;  %v3622_v42 = vadd.f32 1.0, %v5766_v29  ;;  %v8554_v7 = vld [vmem:[#allocation47_spill] sm:$0xff] }
 0x527   : >> { %v5768_v49 = vpop.eup %5767  ;;  %5781 = vtanh.f32 %v3562_v23  ;;  %v3500_v54 = vsub.f32 %v3417_v32, %v8552_v52  ;;  %v3516_v15 = vsub.f32 %v3484_v2, %v8552_v52  ;;  %v3715_v20 = vmul.f32 %v3683_v51, %v8553_v48 }
 0x528   : >> { %v3684_v18 = vmul.f32 %v3652_v3, %v8460_v39  ;;  %v3653_v60 = vmul.f32 0.5, %v3621_v58  ;;  %v3638_v22 = vadd.f32 1.0, %v5768_v49  ;;  %5783 = vtanh.f32 %v3578_v17 }
 0x529   : >> { %v5770_v40 = vpop.eup %5769  ;;  %v3547_v24 = vmul.f32 %v3515_v16, %v8551_v57  ;;  %v3532_v63 = vmul.f32 %v3500_v54, %v8554_v7  ;;  %v3548_v11 = vmul.f32 %v3516_v15, %v8554_v7  ;;  %v3731_v5 = vmul.f32 %v3699_v33, %v8553_v48  ;;  %v8556_v57 = vld [vmem:[#allocation56_spill] sm:$0xff] }
 0x52a   : >> { %v3700_v32 = vmul.f32 %v3668_v12, %v8460_v39  ;;  %v3669_v29 = vmul.f32 0.5, %v3637_v46  ;;  %v3623_v2 = vadd.f32 1.0, %v5770_v40  ;;  %v3654_v52 = vmul.f32 0.5, %v3622_v42 }
 0x52b   : >> { %v5772_v23 = vpop.eup %5771  ;;  %5785 = vtanh.f32 %v3563_v13  ;;  %v3579_v3 = vmul.f32 0.5, %v3547_v24  ;;  %v3564_v58 = vmul.f32 0.5, %v3532_v63  ;;  %v3746_v49 = vadd.f32 %v3745_v25, %v3715_v20  ;;  %v8557_v20 = vld [vmem:[#allocation57_spill] sm:$0xff] }
 0x52c   : >> { %v3790_v17 = vadd.f32 %v7471_v26, %v3683_v51  ;;  %v3716_v16 = vmul.f32 %v3684_v18, %v8555_v61  ;;  %v3685_v54 = vmul.f32 %v3653_v60, %v8556_v57  ;;  %v3670_v19 = vmul.f32 0.5, %v3638_v22 }
 0x52d   : >> { %v3639_v15 = vadd.f32 1.0, %v5772_v23  ;;  %5787 = vtanh.f32 %v3579_v3  ;;  %v3580_v7 = vmul.f32 0.5, %v3548_v11  ;;  %v3767_v12 = vadd.f32 %v3766_v44, %v3731_v5  ;;  %v8558_v11 = vld [vmem:[#allocation72_spill] sm:$0xff] }
 0x52e   : >> { %v5774_v48 = vpop.eup %5773  ;;  %v3811_v46 = vadd.f32 %v7478_v43, %v3699_v33  ;;  %v3701_v42 = vmul.f32 %v3669_v29, %v8556_v57  ;;  %v3655_v13 = vmul.f32 0.5, %v3623_v2  ;;  %v3732_v25 = vmul.f32 %v3700_v32, %v8555_v61  ;;  %v8559_v29 = vld [vmem:[#allocation58_spill] sm:$0xff] }
 0x52f   : >> { %v5776_v40 = vpop.eup %5775  ;;  %v3686_v26 = vmul.f32 %v3654_v52, %v8557_v20  ;;  %v3624_v51 = vadd.f32 1.0, %v5774_v48  ;;  %5789 = vtanh.f32 %v3564_v58  ;;  %v3747_v24 = vadd.f32 %v3746_v49, %v3716_v16  ;;  %v8560_v49 = vld [vmem:[#allocation73_spill] sm:$0xff] }
 0x530   : >> { %v3791_v60 = vadd.f32 %v3790_v17, %v3684_v18  ;;  %v3671_v22 = vmul.f32 0.5, %v3639_v15  ;;  %v3640_v63 = vadd.f32 1.0, %v5776_v40  ;;  %v3717_v3 = vmul.f32 %v3685_v54, %v8558_v11 }
 0x531   : >> { %v5778_v23 = vpop.eup %5777  ;;  %v3702_v44 = vmul.f32 %v3670_v19, %v8557_v20  ;;  %v3656_v43 = vmul.f32 0.5, %v3624_v51  ;;  %5791 = vtanh.f32 %v3580_v7  ;;  %v3733_v5 = vmul.f32 %v3701_v42, %v8558_v11 }
 0x532   : >> { %v5780_v33 = vpop.eup %5779  ;;  %v3687_v2 = vmul.f32 %v3655_v13, %v8559_v29  ;;  %v3672_v57 = vmul.f32 0.5, %v3640_v63  ;;  %v3625_v52 = vadd.f32 1.0, %v5778_v23  ;;  %v3768_v48 = vadd.f32 %v3767_v12, %v3732_v25 }
 0x533   : >> { %v3812_v58 = vadd.f32 %v3811_v46, %v3700_v32  ;;  %v3718_v18 = vmul.f32 %v3686_v26, %v8560_v49  ;;  %v3641_v17 = vadd.f32 1.0, %v5780_v33  ;;  %v3792_v15 = vadd.f32 %v3791_v60, %v3685_v54 }
 0x534   : >> { %v5782_v16 = vpop.eup %5781  ;;  %v3703_v40 = vmul.f32 %v3671_v22, %v8559_v29  ;;  %v3688_v19 = vmul.f32 %v3656_v43, %v8514_v62  ;;  %v3657_v51 = vmul.f32 0.5, %v3625_v52  ;;  %v3748_v7 = vadd.f32 %v3747_v24, %v3717_v3 }
 0x535   : >> { %v3813_v20 = vadd.f32 %v3812_v58, %v3701_v42  ;;  %v3734_v11 = vmul.f32 %v3702_v44, %v8560_v49  ;;  %v3673_v61 = vmul.f32 0.5, %v3641_v17  ;;  %v5784_v13 = vpop.eup %5783  ;;  %v3769_v63 = vadd.f32 %v3768_v48, %v3733_v5  ;;  %v8561_v42 = vld [vmem:[#allocation75_spill] sm:$0xff] }
 0x536   : >> { %v3719_v12 = vmul.f32 %v3687_v2, %v8515_v1  ;;  %v3704_v32 = vmul.f32 %v3672_v57, %v8514_v62  ;;  %v3626_v46 = vadd.f32 1.0, %v5782_v16  ;;  %v3749_v25 = vadd.f32 %v3748_v7, %v3718_v18 }
 0x537   : >> { %v3793_v23 = vadd.f32 %v3792_v15, %v3686_v26  ;;  %v3689_v54 = vmul.f32 %v3657_v51, %v8516_v0  ;;  %v3642_v60 = vadd.f32 1.0, %v5784_v13  ;;  %v3814_v43 = vadd.f32 %v3813_v20, %v3702_v44 }
 0x538   : >> { %v5786_v22 = vpop.eup %5785  ;;  %v3735_v24 = vmul.f32 %v3703_v40, %v8515_v1  ;;  %v3720_v3 = vmul.f32 %v3688_v19, %v8561_v42  ;;  %v3658_v33 = vmul.f32 0.5, %v3626_v46  ;;  %v3770_v52 = vadd.f32 %v3769_v63, %v3734_v11 }
 0x539   : >> { %v3705_v5 = vmul.f32 %v3673_v61, %v8516_v0  ;;  %v3674_v48 = vmul.f32 0.5, %v3642_v60  ;;  %v3627_v58 = vadd.f32 1.0, %v5786_v22  ;;  %v3750_v57 = vadd.f32 %v3749_v25, %v3719_v12 }
 0x53a   : >> { %v5788_v17 = vpop.eup %5787  ;;  %v3794_v16 = vadd.f32 %v3793_v23, %v3687_v2  ;;  %v3736_v26 = vmul.f32 %v3704_v32, %v8561_v42  ;;  %v3690_v18 = vmul.f32 %v3658_v33, %v8471_v4  ;;  %v3721_v15 = vmul.f32 %v3689_v54, %v8472_v6 }
 0x53b   : >> { %v3706_v20 = vmul.f32 %v3674_v48, %v8471_v4  ;;  %v3659_v44 = vmul.f32 0.5, %v3627_v58  ;;  %v3643_v51 = vadd.f32 1.0, %v5788_v17  ;;  %v3771_v13 = vadd.f32 %v3770_v52, %v3735_v24 }
 0x53c   : >> { %v5790_v7 = vpop.eup %5789  ;;  %v3815_v11 = vadd.f32 %v3814_v43, %v3703_v40  ;;  %v3751_v63 = vadd.f32 %v3750_v57, %v3720_v3  ;;  %v3795_v61 = vadd.f32 %v3794_v16, %v3688_v19  ;;  %v3737_v46 = vmul.f32 %v3705_v5, %v8472_v6 }
 0x53d   : >> { %v3722_v12 = vmul.f32 %v3690_v18, %v8473_v14  ;;  %v3691_v2 = vmul.f32 %v3659_v44, %v8426_v27  ;;  %v3675_v25 = vmul.f32 0.5, %v3643_v51  ;;  %v3772_v60 = vadd.f32 %v3771_v13, %v3736_v26 }
 0x53e   : >> { %v5792_v23 = vpop.eup %5791  ;;  %v3816_v22 = vadd.f32 %v3815_v11, %v3704_v32  ;;  %v3796_v33 = vadd.f32 %v3795_v61, %v3689_v54  ;;  %v3628_v42 = vadd.f32 1.0, %v5790_v7  ;;  %v3752_v48 = vadd.f32 %v3751_v63, %v3721_v15 }
 0x53f   : >> { %v3738_v58 = vmul.f32 %v3706_v20, %v8473_v14  ;;  %v3723_v24 = vmul.f32 %v3691_v2, %v8427_v30  ;;  %v3707_v40 = vmul.f32 %v3675_v25, %v8426_v27  ;;  %v3644_v52 = vadd.f32 1.0, %v5792_v23 }
 0x540   : >> { %v3817_v19 = vadd.f32 %v3816_v22, %v3705_v5  ;;  %v3797_v43 = vadd.f32 %v3796_v33, %v3690_v18  ;;  %v3660_v3 = vmul.f32 0.5, %v3628_v42  ;;  %v3773_v17 = vadd.f32 %v3772_v60, %v3737_v46 }
 0x541   : >> { %v3753_v57 = vadd.f32 %v3752_v48, %v3722_v12  ;;  %v3739_v16 = vmul.f32 %v3707_v40, %v8427_v30  ;;  %v3676_v54 = vmul.f32 0.5, %v3644_v52 }
 0x542   : >> { %v3818_v44 = vadd.f32 %v3817_v19, %v3706_v20  ;;  %v3798_v26 = vadd.f32 %v3797_v43, %v3691_v2  ;;  %v3692_v32 = vmul.f32 %v3660_v3, %v8428_v45  ;;  %v3774_v15 = vadd.f32 %v3773_v17, %v3738_v58 }
 0x543   : >> { %v3754_v51 = vadd.f32 %v3753_v57, %v3723_v24  ;;  %v3708_v5 = vmul.f32 %v3676_v54, %v8428_v45 }
 0x544   : >> { %v3819_v7 = vadd.f32 %v3818_v44, %v3707_v40  ;;  %v3724_v13 = vmul.f32 %v3692_v32, %v8429_v9  ;;  %v3799_v11 = vadd.f32 %v3798_v26, %v3692_v32  ;;  %v3775_v18 = vadd.f32 %v3774_v15, %v3739_v16 }
 0x545   : >> { %v3740_v61 = vmul.f32 %v3708_v5, %v8429_v9 }
 0x546   : >> { %v3755_v42 = vadd.f32 %v3754_v51, %v3724_v13  ;;  %v3800_v63 = vrot.slane %v3799_v11, 4  ;;  %v3820_v46 = vadd.f32 %v3819_v7, %v3708_v5 }
 0x547   : >> { %v3776_v20 = vadd.f32 %v3775_v18, %v3740_v61 }
 0x548   : >> { %v3801_v12 = vadd.f32 %v3800_v63, %v3799_v11  ;;  %v3821_v2 = vrot.slane %v3820_v46, 4  ;;  %v3756_v25 = vrot.slane %v3755_v42, 4  ;;  %v8562_v63 = vld [vmem:[#allocation89_spill] sm:$0xff] }
 0x549   : >> { %v3777_v60 = vrot.slane %v3776_v20, 4  ;;  %v3829_v61 = vmul.f32 %v8562_v63, %v7069_v35 }
 0x54a   : >> { %v3802_v23 = vrot.slane %v3801_v12, 2  ;;  %v3822_v22 = vadd.f32 %v3821_v2, %v3820_v46  ;;  %v3757_v24 = vadd.f32 %v3756_v25, %v3755_v42  ;;  %v8563_v46 = vld [vmem:[#allocation88_spill] sm:$0xff] }
 0x54b   : >> { %v3778_v48 = vadd.f32 %v3777_v60, %v3776_v20 }
 0x54c   : >> { %v3803_v33 = vadd.f32 %v3802_v23, %v3801_v12  ;;  %v3823_v58 = vrot.slane %v3822_v22, 2  ;;  %v3758_v17 = vrot.slane %v3757_v24, 2 }
 0x54d   : >> { %v3779_v19 = vrot.slane %v3778_v48, 2 }
 0x54e   : >> { %v3804_v40 = vrot.slane %v3803_v33, 1  ;;  %v3824_v43 = vadd.f32 %v3823_v58, %v3822_v22  ;;  %v3759_v32 = vadd.f32 %v3758_v17, %v3757_v24  ;;  %v8566_v22 = vld [vmem:[#allocation15_spill] sm:$0xff]  ;;  %v8570_v17 = vld [vmem:[#allocation33_spill] sm:$0xff] }
 0x54f   : >> { %v3780_v3 = vadd.f32 %v3779_v19, %v3778_v48  ;;  %v8567_v48 = vld [vmem:[#allocation14_spill] sm:$0xff]  ;;  %v8568_v19 = vld [vmem:[#allocation17_spill] sm:$0xff] }
 0x550   : >> { %v3825_v52 = vrot.slane %v3824_v43, 1  ;;  %v3805_v57 = vadd.f32 %v3804_v40, %v3803_v33  ;;  %v3760_v11 = vrot.slane %v3759_v32, 1 }
 0x551   : >> { %v3781_v44 = vrot.slane %v3780_v3, 1 }
 0x552   : >> { %v3826_v16 = vadd.f32 %v3825_v52, %v3824_v43  ;;  %v3827_v54 = vadd.f32 %v7379_v59, %v3805_v57  ;;  %v3761_v18 = vadd.f32 %v3760_v11, %v3759_v32  ;;  %v8564_v59 = vld [vmem:[#allocation87_spill] sm:$0xff] }
 0x553   : >> { %v3782_v51 = vadd.f32 %v3781_v44, %v3780_v3  ;;  %v3830_v2 = vadd.f32 %v3829_v61, %v8564_v59  ;;  %v8569_v3 = vld [vmem:[#allocation16_spill] sm:$0xff]  ;;  %v8572_v61 = vld [vmem:[#allocation18_spill] sm:$0xff] }
 0x554   : >> { %v3828_v26 = vadd.f32 %v3826_v16, %v7048_v10  ;;  %v3783_v12 = vadd.f32 %v8563_v46, %v3761_v18  ;;  %v8571_v16 = vld [vmem:[#allocation32_spill] sm:$0xff] }
 0x555   : >> { %v3784_v5 = vadd.f32 %v3782_v51, %v7063_v41 }
 0x556   : >> { %v3839_v15 = vrot.slane %v3828_v26, 7 }
 0x557   : >> { %v3833_v42 = vrot.slane %v3784_v5, 7 }
 0x558   : >> { %v3840_v7 = vsel %vm1408_vm1, %v3839_v15, %v3827_v54 }
 0x559   : >> { %v3842_v13 = vadd.f32 %v3840_v7, %v7059_v37  ;;  %v3834_v20 = vsel %vm1408_vm1, %v3833_v42, %v3783_v12 }
 0x55a   : >> { %v3836_v25 = vadd.f32 %v3834_v20, %v3830_v2  ;;  %v8573_v20 = vld [vmem:[#allocation34_spill] sm:$0xff] }
 0x55b   : >> { %5793 = vrcp.f32 %v3842_v13 }
 0x568   : >> { %v5794_v23 = vpop.eup %5793 }
 0x569   : >> { %v7546_v60 = vmul.f32 %v5794_v23, %v3836_v25 }
 0x56b   : >> { %8565 = vst [vmem:[#allocation89_spill] sm:$0xff] %v7546_v60  ;;  %v3915_v33 = vrot.slane %v7546_v60, %v8566_v22  ;;  %v3848_v58 = vrot.slane %v7546_v60, %v8567_v48  ;;  %v8587_v48 = vld [vmem:[#allocation39_spill] sm:$0xff] }
 0x56d   : >> { %3921 = vbcast.lane.b32.xlu1 %v3915_v33, 264  ;;  %3917 = vbcast.lane.b32.xlu0 %v3915_v33, 256 }
 0x571   : >> { %3854 = vbcast.lane.b32.xlu1 %v3848_v58, 264  ;;  %3850 = vbcast.lane.b32.xlu0 %v3848_v58, 256 }
 0x575   : >> { %3858 = vbcast.lane.b32.xlu1 %v3848_v58, 272  ;;  %3925 = vbcast.lane.b32.xlu0 %v3915_v33, 272 }
 0x579   : >> { %3862 = vbcast.lane.b32.xlu1 %v3848_v58, 280  ;;  %3929 = vbcast.lane.b32.xlu0 %v3915_v33, 280 }
 0x57d   : >> { %3866 = vbcast.lane.b32.xlu1 %v3848_v58, 288  ;;  %3933 = vbcast.lane.b32.xlu0 %v3915_v33, 288 }
 0x581   : >> { %3870 = vbcast.lane.b32.xlu1 %v3848_v58, 296  ;;  %3937 = vbcast.lane.b32.xlu0 %v3915_v33, 296 }
 0x585   : >> { %3874 = vbcast.lane.b32.xlu1 %v3848_v58, 304  ;;  %3941 = vbcast.lane.b32.xlu0 %v3915_v33, 304 }
 0x589   : >> { %3878 = vbcast.lane.b32.xlu1 %v3848_v58, 312  ;;  %3945 = vbcast.lane.b32.xlu0 %v3915_v33, 312 }
 0x58d   : >> { %3882 = vbcast.lane.b32.xlu1 %v3848_v58, 320  ;;  %3949 = vbcast.lane.b32.xlu0 %v3915_v33, 320 }
 0x591   : >> { %3886 = vbcast.lane.b32.xlu1 %v3848_v58, 328  ;;  %3953 = vbcast.lane.b32.xlu0 %v3915_v33, 328 }
 0x595   : >> { %3890 = vbcast.lane.b32.xlu1 %v3848_v58, 336  ;;  %3957 = vbcast.lane.b32.xlu0 %v3915_v33, 336 }
 0x599   : >> { %3894 = vbcast.lane.b32.xlu1 %v3848_v58, 344  ;;  %3961 = vbcast.lane.b32.xlu0 %v3915_v33, 344 }
 0x59d   : >> { %3898 = vbcast.lane.b32.xlu1 %v3848_v58, 352  ;;  %3965 = vbcast.lane.b32.xlu0 %v3915_v33, 352 }
 0x5a1   : >> { %3902 = vbcast.lane.b32.xlu1 %v3848_v58, 360  ;;  %3969 = vbcast.lane.b32.xlu0 %v3915_v33, 360 }
 0x5a5   : >> { %3906 = vbcast.lane.b32.xlu1 %v3848_v58, 368  ;;  %3973 = vbcast.lane.b32.xlu0 %v3915_v33, 368 }
 0x5a9   : >> { %3910 = vbcast.lane.b32.xlu1 %v3848_v58, 376  ;;  %3977 = vbcast.lane.b32.xlu0 %v3915_v33, 376 }
 0x5df   : >> { %v3922_v24 = vpop.permute.xlu1 %3921  ;;  %v3918_v40 = vpop.permute.xlu0 %3917 }
 0x5e0   : >> { %v3996_v43 = vsub.f32 %v3922_v24, %v8568_v19  ;;  %v3995_v52 = vsub.f32 %v3918_v40, %v8569_v3  ;;  %v8574_v40 = vld [vmem:[#allocation19_spill] sm:$0xff] }
 0x5e2   : >> { %v4028_v57 = vmul.f32 %v3996_v43, %v8570_v17  ;;  %v4027_v44 = vmul.f32 %v3995_v52, %v8571_v16 }
 0x5e3   : >> { %v3855_v26 = vpop.permute.xlu1 %3854  ;;  %v3851_v32 = vpop.permute.xlu0 %3850 }
 0x5e4   : >> { %v4060_v54 = vmul.f32 0.5, %v4028_v57  ;;  %v4059_v15 = vmul.f32 0.5, %v4027_v44  ;;  %v3980_v51 = vsub.f32 %v3855_v26, %v8568_v19  ;;  %v3979_v7 = vsub.f32 %v3851_v32, %v8569_v3  ;;  %v8575_v57 = vld [vmem:[#allocation35_spill] sm:$0xff] }
 0x5e6   : >> { %5795 = vtanh.f32 %v4060_v54  ;;  %v4012_v13 = vmul.f32 %v3980_v51, %v8570_v17  ;;  %v4011_v11 = vmul.f32 %v3979_v7, %v8571_v16  ;;  %v8576_v7 = vld [vmem:[#allocation20_spill] sm:$0xff] }
 0x5e7   : >> { %5797 = vtanh.f32 %v4059_v15  ;;  %v3859_v5 = vpop.permute.xlu1 %3858  ;;  %v3926_v18 = vpop.permute.xlu0 %3925 }
 0x5e8   : >> { %v4044_v42 = vmul.f32 0.5, %v4012_v13  ;;  %v4043_v63 = vmul.f32 0.5, %v4011_v11  ;;  %v3981_v46 = vsub.f32 %v3859_v5, %v8572_v61  ;;  %v3997_v12 = vsub.f32 %v3926_v18, %v8572_v61  ;;  %v8577_v5 = vld [vmem:[#allocation36_spill] sm:$0xff]  ;;  %v8584_v61 = vld [vmem:[#allocation23_spill] sm:$0xff] }
 0x5ea   : >> { %5799 = vtanh.f32 %v4044_v42  ;;  %v4013_v2 = vmul.f32 %v3981_v46, %v8573_v20  ;;  %v4029_v25 = vmul.f32 %v3997_v12, %v8573_v20 }
 0x5eb   : >> { %5801 = vtanh.f32 %v4043_v63  ;;  %v3863_v23 = vpop.permute.xlu1 %3862  ;;  %v3930_v33 = vpop.permute.xlu0 %3929 }
 0x5ec   : >> { %v4045_v58 = vmul.f32 0.5, %v4013_v2  ;;  %v4061_v24 = vmul.f32 0.5, %v4029_v25  ;;  %v3982_v43 = vsub.f32 %v3863_v23, %v8574_v40  ;;  %v3998_v52 = vsub.f32 %v3930_v33, %v8574_v40  ;;  %v8578_v33 = vld [vmem:[#allocation21_spill] sm:$0xff] }
 0x5ee   : >> { %5803 = vtanh.f32 %v4045_v58  ;;  %v4014_v44 = vmul.f32 %v3982_v43, %v8575_v57  ;;  %v4030_v26 = vmul.f32 %v3998_v52, %v8575_v57  ;;  %v8579_v43 = vld [vmem:[#allocation37_spill] sm:$0xff] }
 0x5ef   : >> { %5805 = vtanh.f32 %v4061_v24  ;;  %v3867_v32 = vpop.permute.xlu1 %3866  ;;  %v3934_v54 = vpop.permute.xlu0 %3933 }
 0x5f0   : >> { %v4046_v15 = vmul.f32 0.5, %v4014_v44  ;;  %v4062_v51 = vmul.f32 0.5, %v4030_v26  ;;  %v3983_v13 = vsub.f32 %v3867_v32, %v8576_v7  ;;  %v3999_v11 = vsub.f32 %v3934_v54, %v8576_v7 }
 0x5f2   : >> { %5807 = vtanh.f32 %v4046_v15  ;;  %v4015_v18 = vmul.f32 %v3983_v13, %v8577_v5  ;;  %v4031_v42 = vmul.f32 %v3999_v11, %v8577_v5 }
 0x5f3   : >> { %v5796_v63 = vpop.eup %5795  ;;  %v3871_v46 = vpop.permute.xlu1 %3870  ;;  %5809 = vtanh.f32 %v4062_v51  ;;  %v8580_v51 = vld [vmem:[#allocation22_spill] sm:$0xff] }
 0x5f4   : >> { %v3938_v12 = vpop.permute.xlu0 %3937  ;;  %v5798_v2 = vpop.eup %5797  ;;  %v4047_v25 = vmul.f32 0.5, %v4015_v18  ;;  %v4063_v23 = vmul.f32 0.5, %v4031_v42  ;;  %v3984_v58 = vsub.f32 %v3871_v46, %v8578_v33  ;;  %v4124_v26 = vadd.f32 1.0, %v5796_v63 }
 0x5f5   : >> { %v4000_v24 = vsub.f32 %v3938_v12, %v8578_v33  ;;  %v4123_v32 = vadd.f32 1.0, %v5798_v2  ;;  %v8581_v2 = vld [vmem:[#allocation38_spill] sm:$0xff] }
 0x5f6   : >> { %5811 = vtanh.f32 %v4047_v25  ;;  %v4016_v52 = vmul.f32 %v3984_v58, %v8579_v43  ;;  %v4156_v25 = vmul.f32 0.5, %v4124_v26 }
 0x5f7   : >> { %v5800_v44 = vpop.eup %5799  ;;  %5813 = vtanh.f32 %v4063_v23  ;;  %v4032_v54 = vmul.f32 %v4000_v24, %v8579_v43  ;;  %v3875_v15 = vpop.permute.xlu1 %3874  ;;  %v4155_v33 = vmul.f32 0.5, %v4123_v32 }
 0x5f8   : >> { %v3942_v13 = vpop.permute.xlu0 %3941  ;;  %v5802_v11 = vpop.eup %5801  ;;  %v4048_v5 = vmul.f32 0.5, %v4016_v52  ;;  %v3985_v18 = vsub.f32 %v3875_v15, %v8580_v51  ;;  %v4108_v42 = vadd.f32 1.0, %v5800_v44  ;;  %v8582_v15 = vld [vmem:[#allocation49_spill] sm:$0xff] }
 0x5f9   : >> { %v4107_v7 = vadd.f32 1.0, %v5802_v11  ;;  %v4064_v46 = vmul.f32 0.5, %v4032_v54  ;;  %v4001_v24 = vsub.f32 %v3942_v13, %v8580_v51  ;;  %v4188_v44 = vmul.f32 %v4156_v25, %v8582_v15  ;;  %v8583_v11 = vld [vmem:[#allocation48_spill] sm:$0xff]  ;;  %v8585_v51 = vld [vmem:[#allocation65_spill] sm:$0xff] }
 0x5fa   : >> { %5815 = vtanh.f32 %v4048_v5  ;;  %v4017_v23 = vmul.f32 %v3985_v18, %v8581_v2  ;;  %v4140_v43 = vmul.f32 0.5, %v4108_v42  ;;  %v4187_v54 = vmul.f32 %v4155_v33, %v8583_v11 }
 0x5fb   : >> { %v5804_v12 = vpop.eup %5803  ;;  %v3879_v58 = vpop.permute.xlu1 %3878  ;;  %v4139_v40 = vmul.f32 0.5, %v4107_v7  ;;  %5817 = vtanh.f32 %v4064_v46  ;;  %v4033_v3 = vmul.f32 %v4001_v24, %v8581_v2  ;;  %v4220_v33 = vmul.f32 %v4188_v44, %v8585_v51 }
 0x5fc   : >> { %v3946_v57 = vpop.permute.xlu0 %3945  ;;  %v5806_v63 = vpop.eup %5805  ;;  %v4109_v20 = vadd.f32 1.0, %v5804_v12  ;;  %v3986_v26 = vsub.f32 %v3879_v58, %v8584_v61  ;;  %v4049_v17 = vmul.f32 0.5, %v4017_v23  ;;  %v4172_v7 = vmul.f32 %v4140_v43, %v8582_v15 }
 0x5fd   : >> { %v4125_v5 = vadd.f32 1.0, %v5806_v63  ;;  %v4002_v18 = vsub.f32 %v3946_v57, %v8584_v61  ;;  %v4171_v42 = vmul.f32 %v4139_v40, %v8583_v11  ;;  %v8586_v63 = vld [vmem:[#allocation64_spill] sm:$0xff]  ;;  %v4065_v57 = vmul.f32 0.5, %v4033_v3 }
 0x5fe   : >> { %v4141_v46 = vmul.f32 0.5, %v4109_v20  ;;  %v4219_v19 = vmul.f32 %v4187_v54, %v8586_v63  ;;  %v4018_v22 = vmul.f32 %v3986_v26, %v8587_v48  ;;  %5819 = vtanh.f32 %v4049_v17 }
 0x5ff   : >> { %v5808_v52 = vpop.eup %5807  ;;  %v3883_v32 = vpop.permute.xlu1 %3882  ;;  %v4157_v58 = vmul.f32 0.5, %v4125_v5  ;;  %v4034_v43 = vmul.f32 %v4002_v18, %v8587_v48  ;;  %v4204_v40 = vmul.f32 %v4172_v7, %v8585_v51  ;;  %v4203_v20 = vmul.f32 %v4171_v42, %v8586_v63 }
 0x600   : >> { %v3950_v16 = vpop.permute.xlu0 %3949  ;;  %v5810_v13 = vpop.eup %5809  ;;  %v4110_v12 = vadd.f32 1.0, %v5808_v52  ;;  %v8588_v52 = vld [vmem:[#allocation50_spill] sm:$0xff]  ;;  %v3987_v11 = vsub.f32 %v3883_v32, %v8441_v47  ;;  %v4300_v15 = vadd.f32 %v4188_v44, %v4187_v54  ;;  %5821 = vtanh.f32 %v4065_v57 }
 0x601   : >> { %v4126_v2 = vadd.f32 1.0, %v5810_v13  ;;  %v4173_v61 = vmul.f32 %v4141_v46, %v8588_v52  ;;  %v4189_v35 = vmul.f32 %v4157_v58, %v8588_v52  ;;  %v4050_v13 = vmul.f32 0.5, %v4018_v22 }
 0x602   : >> { %v4142_v5 = vmul.f32 0.5, %v4110_v12  ;;  %v4019_v3 = vmul.f32 %v3987_v11, %v8492_v28  ;;  %v4066_v63 = vmul.f32 0.5, %v4034_v43  ;;  %v4003_v46 = vsub.f32 %v3950_v16, %v8441_v47 }
 0x603   : >> { %v5812_v25 = vpop.eup %5811  ;;  %v3887_v23 = vpop.permute.xlu1 %3886  ;;  %v4158_v48 = vmul.f32 0.5, %v4126_v2  ;;  %v4256_v51 = vadd.f32 %v4220_v33, %v4219_v19  ;;  %v4235_v32 = vadd.f32 %v4204_v40, %v4203_v20  ;;  %v4279_v44 = vadd.f32 %v4172_v7, %v4171_v42 }
 0x604   : >> { %v3954_v59 = vpop.permute.xlu0 %3953  ;;  %v5814_v24 = vpop.eup %5813  ;;  %v4111_v60 = vadd.f32 1.0, %v5812_v25  ;;  %v4205_v54 = vmul.f32 %v4173_v61, %v8493_v8  ;;  %v4174_v25 = vmul.f32 %v4142_v5, %v8443_v55  ;;  %v4035_v11 = vmul.f32 %v4003_v46, %v8492_v28 }
 0x605   : >> { %v4127_v41 = vadd.f32 1.0, %v5814_v24  ;;  %v4221_v24 = vmul.f32 %v4189_v35, %v8493_v8  ;;  %5823 = vtanh.f32 %v4050_v13  ;;  %v4051_v2 = vmul.f32 0.5, %v4019_v3 }
 0x606   : >> { %v4143_v58 = vmul.f32 0.5, %v4111_v60  ;;  %v4280_v16 = vadd.f32 %v4279_v44, %v4173_v61  ;;  %v4301_v19 = vadd.f32 %v4300_v15, %v4189_v35  ;;  %v4190_v7 = vmul.f32 %v4158_v48, %v8443_v55 }
 0x607   : >> { %v5816_v26 = vpop.eup %5815  ;;  %v3891_v17 = vpop.permute.xlu1 %3890  ;;  %v4159_v52 = vmul.f32 0.5, %v4127_v41  ;;  %5825 = vtanh.f32 %v4066_v63  ;;  %v4067_v33 = vmul.f32 0.5, %v4035_v11  ;;  %v3988_v40 = vsub.f32 %v3887_v23, %v8444_v36 }
 0x608   : >> { %v7596_v18 = vpop.permute.xlu0 %3957  ;;  %v5818_v12 = vpop.eup %5817  ;;  %v4112_v22 = vadd.f32 1.0, %v5816_v26  ;;  %v4004_v60 = vsub.f32 %v3954_v59, %v8444_v36  ;;  %v4236_v20 = vadd.f32 %v4235_v32, %v4205_v54  ;;  %v4206_v5 = vmul.f32 %v4174_v25, %v8445_v56 }
 0x609   : >> { %v4128_v42 = vadd.f32 1.0, %v5818_v12  ;;  %v4175_v41 = vmul.f32 %v4143_v58, %v8446_v38  ;;  %v4257_v13 = vadd.f32 %v4256_v51, %v4221_v24  ;;  %v4191_v3 = vmul.f32 %v4159_v52, %v8446_v38  ;;  %v8589_v12 = vld [vmem:[#allocation68_spill] sm:$0xff] }
 0x60a   : >> { %v4144_v26 = vmul.f32 0.5, %v4112_v22  ;;  %5827 = vtanh.f32 %v4051_v2  ;;  %v4020_v35 = vmul.f32 %v3988_v40, %v8494_v21  ;;  %v4281_v15 = vadd.f32 %v4280_v16, %v4174_v25 }
 0x60b   : >> { %v3895_v57 = vpop.permute.xlu1 %3894  ;;  %v4222_v63 = vmul.f32 %v4190_v7, %v8445_v56  ;;  %v4302_v23 = vadd.f32 %v4301_v19, %v4190_v7  ;;  %v4036_v59 = vmul.f32 %v4004_v60, %v8494_v21  ;;  %v5820_v46 = vpop.eup %5819  ;;  %v4160_v32 = vmul.f32 0.5, %v4128_v42 }
 0x60c   : >> { %v3962_v43 = vpop.permute.xlu0 %3961  ;;  %5829 = vtanh.f32 %v4067_v33  ;;  %v4052_v44 = vmul.f32 0.5, %v4020_v35  ;;  %v3989_v54 = vsub.f32 %v3891_v17, %v8541_v34  ;;  %v4237_v51 = vadd.f32 %v4236_v20, %v4206_v5  ;;  %v8590_v35 = vld [vmem:[#allocation27_spill] sm:$0xff] }
 0x60d   : >> { %v4207_v52 = vmul.f32 %v4175_v41, %v8589_v12  ;;  %v4176_v58 = vmul.f32 %v4144_v26, %v8448_v31  ;;  %v4068_v22 = vmul.f32 0.5, %v4036_v59  ;;  %v4223_v11 = vmul.f32 %v4191_v3, %v8589_v12  ;;  %v5822_v33 = vpop.eup %5821 }
 0x60e   : >> { %5831 = vtanh.f32 %v4052_v44  ;;  %v4021_v25 = vmul.f32 %v3989_v54, %v8398_v50  ;;  %v4005_v24 = vsub.f32 %v7596_v18, %v8541_v34  ;;  %v4258_v19 = vadd.f32 %v4257_v13, %v4222_v63 }
 0x60f   : >> { %v3899_v48 = vpop.permute.xlu1 %3898  ;;  %v4282_v7 = vadd.f32 %v4281_v15, %v4175_v41  ;;  %v4303_v42 = vadd.f32 %v4302_v23, %v4191_v3  ;;  %v4113_v17 = vadd.f32 1.0, %v5820_v46  ;;  %v4192_v40 = vmul.f32 %v4160_v32, %v8448_v31  ;;  %v8591_v15 = vld [vmem:[#allocation43_spill] sm:$0xff]  ;;  %v8592_v46 = vld [vmem:[#allocation28_spill] sm:$0xff] }
 0x610   : >> { %v3966_v61 = vpop.permute.xlu0 %3965  ;;  %5833 = vtanh.f32 %v4068_v22  ;;  %v4053_v60 = vmul.f32 0.5, %v4021_v25  ;;  %v4037_v20 = vmul.f32 %v4005_v24, %v8398_v50  ;;  %v4238_v5 = vadd.f32 %v4237_v51, %v4207_v52 }
 0x611   : >> { %v4208_v26 = vmul.f32 %v4176_v58, %v8449_v53  ;;  %v3990_v59 = vsub.f32 %v3895_v57, %v8590_v35  ;;  %v4006_v18 = vsub.f32 %v3962_v43, %v8590_v35  ;;  %v4259_v44 = vadd.f32 %v4258_v19, %v4223_v11 }
 0x612   : >> { %v7624_v54 = vadd.f32 %v4282_v7, %v4176_v58  ;;  %5835 = vtanh.f32 %v4053_v60  ;;  %v4069_v41 = vmul.f32 0.5, %v4037_v20  ;;  %v5824_v13 = vpop.eup %5823  ;;  %v4129_v3 = vadd.f32 1.0, %v5822_v33  ;;  %v8593_v33 = vld [vmem:[#allocation44_spill] sm:$0xff] }
 0x613   : >> { %v3903_v2 = vpop.permute.xlu1 %3902  ;;  %v4022_v63 = vmul.f32 %v3990_v59, %v8591_v15  ;;  %v4038_v23 = vmul.f32 %v4006_v18, %v8591_v15  ;;  %v3991_v32 = vsub.f32 %v3899_v48, %v8592_v46  ;;  %v4224_v52 = vmul.f32 %v4192_v40, %v8449_v53  ;;  %v8595_v48 = vld [vmem:[#allocation29_spill] sm:$0xff] }
 0x614   : >> { %v3970_v16 = vpop.permute.xlu0 %3969  ;;  %v5826_v51 = vpop.eup %5825  ;;  %v4145_v22 = vmul.f32 0.5, %v4113_v17  ;;  %5837 = vtanh.f32 %v4069_v41  ;;  %v4007_v57 = vsub.f32 %v3966_v61, %v8592_v46  ;;  %v4239_v11 = vadd.f32 %v4238_v5, %v4208_v26  ;;  %v8596_v61 = vld [vmem:[#allocation30_spill] sm:$0xff] }
 0x615   : >> { %v7631_v25 = vadd.f32 %v4303_v42, %v4192_v40  ;;  %v4054_v24 = vmul.f32 0.5, %v4022_v63  ;;  %v4070_v19 = vmul.f32 0.5, %v4038_v23  ;;  %v4114_v7 = vadd.f32 1.0, %v5824_v13  ;;  %v8597_v46 = vld [vmem:[#allocation54_spill] sm:$0xff]  ;;  %v8598_v63 = vld [vmem:[#allocation45_spill] sm:$0xff] }
 0x616   : >> { %v8594_v60 = vmov %v8593_v33  ;;  %v4023_v20 = vmul.f32 %v3991_v32, %v8593_v33  ;;  %v3992_v18 = vsub.f32 %v3903_v2, %v8595_v48  ;;  %v4161_v35 = vmul.f32 0.5, %v4129_v3 }
 0x617   : >> { %v3907_v43 = vpop.permute.xlu1 %3906  ;;  %v4039_v59 = vmul.f32 %v4007_v57, %v8594_v60  ;;  %v5828_v15 = vpop.eup %5827  ;;  %5839 = vtanh.f32 %v4054_v24  ;;  %v4008_v17 = vsub.f32 %v3970_v16, %v8595_v48  ;;  %v4177_v5 = vmul.f32 %v4145_v22, %v8597_v46  ;;  %v8599_v57 = vld [vmem:[#allocation46_spill] sm:$0xff] }
 0x618   : >> { %v3974_v58 = vpop.permute.xlu0 %3973  ;;  %v3993_v41 = vsub.f32 %v3907_v43, %v8596_v61  ;;  %v4130_v42 = vadd.f32 1.0, %v5826_v51  ;;  %5841 = vtanh.f32 %v4070_v19  ;;  %v4055_v40 = vmul.f32 0.5, %v4023_v20 }
 0x619   : >> { %v5830_v26 = vpop.eup %5829  ;;  %v4071_v13 = vmul.f32 0.5, %v4039_v59  ;;  %v4024_v23 = vmul.f32 %v3992_v18, %v8598_v63  ;;  %v4040_v32 = vmul.f32 %v4008_v17, %v8598_v63  ;;  %v4260_v33 = vadd.f32 %v4259_v44, %v4224_v52  ;;  %v8600_v44 = vld [vmem:[#allocation31_spill] sm:$0xff] }
 0x61a   : >> { %v4025_v2 = vmul.f32 %v3993_v41, %v8599_v57  ;;  %v4146_v3 = vmul.f32 0.5, %v4114_v7  ;;  %v4115_v24 = vadd.f32 1.0, %v5828_v15  ;;  %5843 = vtanh.f32 %v4055_v40  ;;  %v8601_v7 = vld [vmem:[#allocation70_spill] sm:$0xff] }
 0x61b   : >> { %v3911_v16 = vpop.permute.xlu1 %3910  ;;  %v5832_v43 = vpop.eup %5831  ;;  %v4193_v22 = vmul.f32 %v4161_v35, %v8597_v46  ;;  %5845 = vtanh.f32 %v4071_v13  ;;  %v4056_v51 = vmul.f32 0.5, %v4024_v23  ;;  %v4072_v19 = vmul.f32 0.5, %v4040_v32  ;;  %v8603_v46 = vld [vmem:[#allocation71_spill] sm:$0xff] }
 0x61c   : >> { %v3978_v48 = vpop.permute.xlu0 %3977  ;;  %v4162_v20 = vmul.f32 0.5, %v4130_v42  ;;  %v4131_v59 = vadd.f32 1.0, %v5830_v26  ;;  %v4057_v60 = vmul.f32 0.5, %v4025_v2  ;;  %v4009_v18 = vsub.f32 %v3974_v58, %v8596_v61  ;;  %v8602_v26 = vld [vmem:[#allocation47_spill] sm:$0xff] }
 0x61d   : >> { %v5834_v17 = vpop.eup %5833  ;;  %v4116_v63 = vadd.f32 1.0, %v5832_v43  ;;  %5847 = vtanh.f32 %v4056_v51  ;;  %v3994_v52 = vsub.f32 %v3911_v16, %v8600_v44  ;;  %v4010_v15 = vsub.f32 %v3978_v48, %v8600_v44 }
 0x61e   : >> { %v4209_v41 = vmul.f32 %v4177_v5, %v8601_v7  ;;  %v4178_v40 = vmul.f32 %v4146_v3, %v8460_v39  ;;  %v4147_v35 = vmul.f32 0.5, %v4115_v24  ;;  %v4132_v13 = vadd.f32 1.0, %v5834_v17 }
 0x61f   : >> { %v5836_v23 = vpop.eup %5835  ;;  %5849 = vtanh.f32 %v4072_v19  ;;  %v4041_v42 = vmul.f32 %v4009_v18, %v8599_v57  ;;  %v4026_v32 = vmul.f32 %v3994_v52, %v8602_v26  ;;  %v4042_v58 = vmul.f32 %v4010_v15, %v8602_v26  ;;  %v8604_v57 = vld [vmem:[#allocation56_spill] sm:$0xff] }
 0x620   : >> { %v4225_v2 = vmul.f32 %v4193_v22, %v8601_v7  ;;  %v4194_v16 = vmul.f32 %v4162_v20, %v8460_v39  ;;  %v4163_v43 = vmul.f32 0.5, %v4131_v59  ;;  %v4117_v48 = vadd.f32 1.0, %v5836_v23 }
 0x621   : >> { %v5838_v51 = vpop.eup %5837  ;;  %v4148_v44 = vmul.f32 0.5, %v4116_v63  ;;  %5851 = vtanh.f32 %v4057_v60  ;;  %v4073_v3 = vmul.f32 0.5, %v4041_v42  ;;  %v4058_v24 = vmul.f32 0.5, %v4026_v32 }
 0x622   : >> { %v4240_v17 = vadd.f32 %v4239_v11, %v4209_v41  ;;  %v4284_v19 = vadd.f32 %v7624_v54, %v4177_v5  ;;  %v4210_v18 = vmul.f32 %v4178_v40, %v8603_v46  ;;  %v4179_v52 = vmul.f32 %v4147_v35, %v8604_v57  ;;  %v8605_v41 = vld [vmem:[#allocation57_spill] sm:$0xff] }
 0x623   : >> { %v4164_v61 = vmul.f32 0.5, %v4132_v13  ;;  %v4133_v15 = vadd.f32 1.0, %v5838_v51  ;;  %5853 = vtanh.f32 %v4073_v3  ;;  %v4074_v26 = vmul.f32 0.5, %v4042_v58  ;;  %v8606_v58 = vld [vmem:[#allocation72_spill] sm:$0xff] }
 0x624   : >> { %v5840_v7 = vpop.eup %5839  ;;  %v4261_v20 = vadd.f32 %v4260_v33, %v4225_v2  ;;  %v4305_v59 = vadd.f32 %v7631_v25, %v4193_v22  ;;  %v4195_v63 = vmul.f32 %v4163_v43, %v8604_v57  ;;  %v4149_v60 = vmul.f32 0.5, %v4117_v48 }
 0x625   : >> { %v5842_v23 = vpop.eup %5841  ;;  %v4226_v11 = vmul.f32 %v4194_v16, %v8603_v46  ;;  %v4180_v54 = vmul.f32 %v4148_v44, %v8605_v41  ;;  %v4118_v5 = vadd.f32 1.0, %v5840_v7  ;;  %5855 = vtanh.f32 %v4058_v24 }
 0x626   : >> { %v4241_v42 = vadd.f32 %v4240_v17, %v4210_v18  ;;  %v4285_v35 = vadd.f32 %v4284_v19, %v4178_v40  ;;  %v4165_v13 = vmul.f32 0.5, %v4133_v15  ;;  %v4134_v32 = vadd.f32 1.0, %v5842_v23 }
 0x627   : >> { %v5844_v51 = vpop.eup %5843  ;;  %v4211_v3 = vmul.f32 %v4179_v52, %v8606_v58  ;;  %v4196_v33 = vmul.f32 %v4164_v61, %v8605_v41  ;;  %v4150_v25 = vmul.f32 0.5, %v4118_v5  ;;  %5857 = vtanh.f32 %v4074_v26 }
 0x628   : >> { %v5846_v22 = vpop.eup %5845  ;;  %v4227_v2 = vmul.f32 %v4195_v63, %v8606_v58  ;;  %v4181_v43 = vmul.f32 %v4149_v60, %v8559_v29  ;;  %v4166_v48 = vmul.f32 0.5, %v4134_v32  ;;  %v4119_v44 = vadd.f32 1.0, %v5844_v51 }
 0x629   : >> { %v4262_v7 = vadd.f32 %v4261_v20, %v4226_v11  ;;  %v4306_v24 = vadd.f32 %v4305_v59, %v4194_v16  ;;  %v4212_v40 = vmul.f32 %v4180_v54, %v8560_v49  ;;  %v4135_v17 = vadd.f32 1.0, %v5846_v22 }
 0x62a   : >> { %v5848_v19 = vpop.eup %5847  ;;  %v4286_v18 = vadd.f32 %v4285_v35, %v4179_v52  ;;  %v4197_v15 = vmul.f32 %v4165_v13, %v8559_v29  ;;  %v4182_v61 = vmul.f32 %v4150_v25, %v8514_v62  ;;  %v4151_v23 = vmul.f32 0.5, %v4119_v44 }
 0x62b   : >> { %v4242_v26 = vadd.f32 %v4241_v42, %v4211_v3  ;;  %v4307_v5 = vadd.f32 %v4306_v24, %v4195_v63  ;;  %v4228_v58 = vmul.f32 %v4196_v33, %v8560_v49  ;;  %v4167_v41 = vmul.f32 0.5, %v4135_v17  ;;  %v8607_v63 = vld [vmem:[#allocation75_spill] sm:$0xff] }
 0x62c   : >> { %v5850_v60 = vpop.eup %5849  ;;  %v4263_v32 = vadd.f32 %v4262_v7, %v4227_v2  ;;  %v4213_v20 = vmul.f32 %v4181_v43, %v8515_v1  ;;  %v4198_v16 = vmul.f32 %v4166_v48, %v8514_v62  ;;  %v4120_v59 = vadd.f32 1.0, %v5848_v19 }
 0x62d   : >> { %v4243_v11 = vadd.f32 %v4242_v26, %v4212_v40  ;;  %v4287_v51 = vadd.f32 %v4286_v18, %v4180_v54  ;;  %v4183_v52 = vmul.f32 %v4151_v23, %v8516_v0  ;;  %v4136_v35 = vadd.f32 1.0, %v5850_v60 }
 0x62e   : >> { %v5852_v13 = vpop.eup %5851  ;;  %v4308_v25 = vadd.f32 %v4307_v5, %v4196_v33  ;;  %v4229_v42 = vmul.f32 %v4197_v15, %v8515_v1  ;;  %v4214_v3 = vmul.f32 %v4182_v61, %v8607_v63  ;;  %v4152_v22 = vmul.f32 0.5, %v4120_v59 }
 0x62f   : >> { %v4264_v44 = vadd.f32 %v4263_v32, %v4228_v58  ;;  %v4199_v2 = vmul.f32 %v4167_v41, %v8516_v0  ;;  %v4168_v7 = vmul.f32 0.5, %v4136_v35  ;;  %v4121_v24 = vadd.f32 1.0, %v5852_v13 }
 0x630   : >> { %v5854_v17 = vpop.eup %5853  ;;  %v4244_v48 = vadd.f32 %v4243_v11, %v4213_v20  ;;  %v4288_v19 = vadd.f32 %v4287_v51, %v4181_v43  ;;  %v4230_v54 = vmul.f32 %v4198_v16, %v8607_v63  ;;  %v4184_v40 = vmul.f32 %v4152_v22, %v8471_v4 }
 0x631   : >> { %v4215_v18 = vmul.f32 %v4183_v52, %v8472_v6  ;;  %v4200_v33 = vmul.f32 %v4168_v7, %v8471_v4  ;;  %v4153_v23 = vmul.f32 0.5, %v4121_v24  ;;  %v4137_v26 = vadd.f32 1.0, %v5854_v17 }
 0x632   : >> { %v5856_v5 = vpop.eup %5855  ;;  %v4265_v60 = vadd.f32 %v4264_v44, %v4229_v42  ;;  %v4309_v58 = vadd.f32 %v4308_v25, %v4197_v15  ;;  %v4245_v32 = vadd.f32 %v4244_v48, %v4214_v3  ;;  %v4289_v41 = vadd.f32 %v4288_v19, %v4182_v61 }
 0x633   : >> { %v4231_v59 = vmul.f32 %v4199_v2, %v8472_v6  ;;  %v4216_v20 = vmul.f32 %v4184_v40, %v8473_v14  ;;  %v4185_v43 = vmul.f32 %v4153_v23, %v8426_v27  ;;  %v4169_v11 = vmul.f32 0.5, %v4137_v26 }
 0x634   : >> { %v5858_v51 = vpop.eup %5857  ;;  %v4266_v35 = vadd.f32 %v4265_v60, %v4230_v54  ;;  %v4310_v13 = vadd.f32 %v4309_v58, %v4198_v16  ;;  %v4290_v22 = vadd.f32 %v4289_v41, %v4183_v52  ;;  %v4122_v63 = vadd.f32 1.0, %v5856_v5 }
 0x635   : >> { %v4246_v7 = vadd.f32 %v4245_v32, %v4215_v18  ;;  %v4232_v24 = vmul.f32 %v4200_v33, %v8473_v14  ;;  %v4217_v42 = vmul.f32 %v4185_v43, %v8427_v30  ;;  %v4201_v15 = vmul.f32 %v4169_v11, %v8426_v27 }
 0x636   : >> { %v4311_v61 = vadd.f32 %v4310_v13, %v4199_v2  ;;  %v4291_v25 = vadd.f32 %v4290_v22, %v4184_v40  ;;  %v4154_v3 = vmul.f32 0.5, %v4122_v63  ;;  %v4138_v44 = vadd.f32 1.0, %v5858_v51 }
 0x637   : >> { %v4267_v17 = vadd.f32 %v4266_v35, %v4231_v59  ;;  %v4247_v48 = vadd.f32 %v4246_v7, %v4216_v20  ;;  %v4233_v19 = vmul.f32 %v4201_v15, %v8427_v30 }
 0x638   : >> { %v4312_v23 = vadd.f32 %v4311_v61, %v4200_v33  ;;  %v4292_v54 = vadd.f32 %v4291_v25, %v4185_v43  ;;  %v4186_v16 = vmul.f32 %v4154_v3, %v8428_v45  ;;  %v4170_v52 = vmul.f32 0.5, %v4138_v44 }
 0x639   : >> { %v4268_v18 = vadd.f32 %v4267_v17, %v4232_v24  ;;  %v4248_v26 = vadd.f32 %v4247_v48, %v4217_v42 }
 0x63a   : >> { %v4313_v5 = vadd.f32 %v4312_v23, %v4201_v15  ;;  %v4218_v60 = vmul.f32 %v4186_v16, %v8429_v9  ;;  %v4293_v58 = vadd.f32 %v4292_v54, %v4186_v16  ;;  %v4202_v2 = vmul.f32 %v4170_v52, %v8428_v45  ;;  %v7691_v52 = vld [vmem:[%s7042_s25] sm:$0x3] }
 0x63b   : >> { %v4269_v40 = vadd.f32 %v4268_v18, %v4233_v19  ;;  %8608 = vst [vmem:[#allocation88_spill] sm:$0xff] %v7691_v52 }
 0x63c   : >> { %v4249_v63 = vadd.f32 %v4248_v26, %v4218_v60  ;;  %v4294_v32 = vrot.slane %v4293_v58, 4  ;;  %v4234_v41 = vmul.f32 %v4202_v2, %v8429_v9  ;;  %v4314_v59 = vadd.f32 %v4313_v5, %v4202_v2 }
 0x63e   : >> { %v4295_v20 = vadd.f32 %v4294_v32, %v4293_v58  ;;  %v4270_v33 = vadd.f32 %v4269_v40, %v4234_v41  ;;  %v4315_v43 = vrot.slane %v4314_v59, 4  ;;  %v4250_v11 = vrot.slane %v4249_v63, 4  ;;  %v8609_v40 = vld [vmem:[#allocation85_spill] sm:$0xff] }
 0x640   : >> { %v4296_v51 = vrot.slane %v4295_v20, 2  ;;  %v4271_v35 = vrot.slane %v4270_v33, 4  ;;  %v4316_v13 = vadd.f32 %v4315_v43, %v4314_v59  ;;  %v4251_v42 = vadd.f32 %v4250_v11, %v4249_v63  ;;  %v8610_v59 = vld [vmem:[#allocation86_spill] sm:$0xff]  ;;  %v7700_v43 = vld [vmem:[%s7052_s18] sm:$0x3] }
 0x642   : >> { %v4297_v22 = vadd.f32 %v4296_v51, %v4295_v20  ;;  %v4272_v7 = vadd.f32 %v4271_v35, %v4270_v33  ;;  %v4317_v24 = vrot.slane %v4316_v13, 2  ;;  %v4252_v17 = vrot.slane %v4251_v42, 2  ;;  %v8611_v20 = vld [vmem:[#allocation89_spill] sm:$0xff]  ;;  %v8613_v35 = vld [vmem:[#allocation87_spill] sm:$0xff] }
 0x643   : >> { %v4323_v33 = vmul.f32 %v8611_v20, %v8610_v59  ;;  %8612 = vst [vmem:[#allocation89_spill] sm:$0xff] %v7700_v43  ;;  %v8636_v59 = vld [vmem:[#allocation39_spill] sm:$0xff] }
 0x644   : >> { %v4298_v15 = vrot.slane %v4297_v22, 1  ;;  %v4273_v61 = vrot.slane %v4272_v7, 2  ;;  %v4318_v25 = vadd.f32 %v4317_v24, %v4316_v13  ;;  %v4253_v16 = vadd.f32 %v4252_v17, %v4251_v42  ;;  %v8615_v42 = vld [vmem:[#allocation15_spill] sm:$0xff]  ;;  %v8617_v17 = vld [vmem:[#allocation17_spill] sm:$0xff] }
 0x645   : >> { %v4324_v13 = vadd.f32 %v4323_v33, %v8613_v35 }
 0x646   : >> { %v4274_v3 = vadd.f32 %v4273_v61, %v4272_v7  ;;  %v4319_v44 = vrot.slane %v4318_v25, 1  ;;  %v4299_v48 = vadd.f32 %v4298_v15, %v4297_v22  ;;  %v4254_v2 = vrot.slane %v4253_v16, 1  ;;  %v8616_v61 = vld [vmem:[#allocation14_spill] sm:$0xff] }
 0x648   : >> { %v4320_v19 = vadd.f32 %v4319_v44, %v4318_v25  ;;  %v4275_v23 = vrot.slane %v4274_v3, 1  ;;  %v4321_v18 = vadd.f32 %v7691_v52, %v4299_v48  ;;  %v4255_v32 = vadd.f32 %v4254_v2, %v4253_v16 }
 0x64a   : >> { %v4322_v54 = vadd.f32 %v4320_v19, %v7048_v10  ;;  %v4276_v5 = vadd.f32 %v4275_v23, %v4274_v3  ;;  %v4277_v11 = vadd.f32 %v7700_v43, %v4255_v32  ;;  %v8618_v19 = vld [vmem:[#allocation16_spill] sm:$0xff] }
 0x64c   : >> { %v4333_v26 = vrot.slane %v4322_v54, 7  ;;  %v4278_v63 = vadd.f32 %v4276_v5, %v8609_v40  ;;  %v8619_v54 = vld [vmem:[#allocation33_spill] sm:$0xff] }
 0x64e   : >> { %v4334_v60 = vsel %vm1408_vm1, %v4333_v26, %v4321_v18  ;;  %v4327_v41 = vrot.slane %v4278_v63, 7  ;;  %v8620_v18 = vld [vmem:[#allocation32_spill] sm:$0xff] }
 0x64f   : >> { %v4336_v58 = vadd.f32 %v4334_v60, %v7059_v37 }
 0x650   : >> { %v4328_v51 = vsel %vm1408_vm1, %v4327_v41, %v4277_v11 }
 0x651   : >> { %5859 = vrcp.f32 %v4336_v58  ;;  %v4330_v22 = vadd.f32 %v4328_v51, %v4324_v13 }
 0x65e   : >> { %v5860_v7 = vpop.eup %5859 }
 0x65f   : >> { %v7705_v24 = vmul.f32 %v5860_v7, %v4330_v22  ;;  %v8621_v22 = vld [vmem:[#allocation18_spill] sm:$0xff] }
 0x661   : >> { %8614 = vst [vmem:[#allocation90_spill] sm:$0xff] %v7705_v24  ;;  %v4409_v15 = vrot.slane %v7705_v24, %v8615_v42  ;;  %v4342_v25 = vrot.slane %v7705_v24, %v8616_v61 }
 0x663   : >> { %4415 = vbcast.lane.b32.xlu1 %v4409_v15, 264  ;;  %4411 = vbcast.lane.b32.xlu0 %v4409_v15, 256 }
 0x667   : >> { %4348 = vbcast.lane.b32.xlu1 %v4342_v25, 264  ;;  %4344 = vbcast.lane.b32.xlu0 %v4342_v25, 256 }
 0x66b   : >> { %4352 = vbcast.lane.b32.xlu1 %v4342_v25, 272  ;;  %4419 = vbcast.lane.b32.xlu0 %v4409_v15, 272 }
 0x66f   : >> { %4356 = vbcast.lane.b32.xlu1 %v4342_v25, 280  ;;  %4423 = vbcast.lane.b32.xlu0 %v4409_v15, 280 }
 0x673   : >> { %4360 = vbcast.lane.b32.xlu1 %v4342_v25, 288  ;;  %4427 = vbcast.lane.b32.xlu0 %v4409_v15, 288 }
 0x677   : >> { %4364 = vbcast.lane.b32.xlu1 %v4342_v25, 296  ;;  %4431 = vbcast.lane.b32.xlu0 %v4409_v15, 296 }
 0x67b   : >> { %4368 = vbcast.lane.b32.xlu1 %v4342_v25, 304  ;;  %4435 = vbcast.lane.b32.xlu0 %v4409_v15, 304 }
 0x67f   : >> { %4372 = vbcast.lane.b32.xlu1 %v4342_v25, 312  ;;  %4439 = vbcast.lane.b32.xlu0 %v4409_v15, 312 }
 0x683   : >> { %4376 = vbcast.lane.b32.xlu1 %v4342_v25, 320  ;;  %4443 = vbcast.lane.b32.xlu0 %v4409_v15, 320 }
 0x687   : >> { %4380 = vbcast.lane.b32.xlu1 %v4342_v25, 328  ;;  %4447 = vbcast.lane.b32.xlu0 %v4409_v15, 328 }
 0x68b   : >> { %4384 = vbcast.lane.b32.xlu1 %v4342_v25, 336  ;;  %4451 = vbcast.lane.b32.xlu0 %v4409_v15, 336 }
 0x68f   : >> { %4388 = vbcast.lane.b32.xlu1 %v4342_v25, 344  ;;  %4455 = vbcast.lane.b32.xlu0 %v4409_v15, 344 }
 0x693   : >> { %4392 = vbcast.lane.b32.xlu1 %v4342_v25, 352  ;;  %4459 = vbcast.lane.b32.xlu0 %v4409_v15, 352 }
 0x697   : >> { %4396 = vbcast.lane.b32.xlu1 %v4342_v25, 360  ;;  %4463 = vbcast.lane.b32.xlu0 %v4409_v15, 360 }
 0x69b   : >> { %4400 = vbcast.lane.b32.xlu1 %v4342_v25, 368  ;;  %4467 = vbcast.lane.b32.xlu0 %v4409_v15, 368 }
 0x69f   : >> { %4404 = vbcast.lane.b32.xlu1 %v4342_v25, 376  ;;  %4471 = vbcast.lane.b32.xlu0 %v4409_v15, 376  ;;  %v8622_v15 = vld [vmem:[#allocation34_spill] sm:$0xff] }
 0x6d5   : >> { %v4416_v3 = vpop.permute.xlu1 %4415  ;;  %v4412_v44 = vpop.permute.xlu0 %4411 }
 0x6d6   : >> { %v4490_v48 = vsub.f32 %v4416_v3, %v8617_v17  ;;  %v4489_v23 = vsub.f32 %v4412_v44, %v8618_v19 }
 0x6d8   : >> { %v4522_v16 = vmul.f32 %v4490_v48, %v8619_v54  ;;  %v4521_v26 = vmul.f32 %v4489_v23, %v8620_v18 }
 0x6d9   : >> { %v4349_v5 = vpop.permute.xlu1 %4348  ;;  %v4345_v60 = vpop.permute.xlu0 %4344 }
 0x6da   : >> { %v4554_v58 = vmul.f32 0.5, %v4522_v16  ;;  %v4553_v2 = vmul.f32 0.5, %v4521_v26  ;;  %v4474_v63 = vsub.f32 %v4349_v5, %v8617_v17  ;;  %v4473_v32 = vsub.f32 %v4345_v60, %v8618_v19  ;;  %v8623_v19 = vld [vmem:[#allocation19_spill] sm:$0xff] }
 0x6db   : >> { %v8624_v16 = vld [vmem:[#allocation35_spill] sm:$0xff] }
 0x6dc   : >> { %5861 = vtanh.f32 %v4554_v58  ;;  %v4506_v41 = vmul.f32 %v4474_v63, %v8619_v54  ;;  %v4505_v20 = vmul.f32 %v4473_v32, %v8620_v18  ;;  %v8625_v63 = vld [vmem:[#allocation20_spill] sm:$0xff] }
 0x6dd   : >> { %5863 = vtanh.f32 %v4553_v2  ;;  %v4353_v33 = vpop.permute.xlu1 %4352  ;;  %v4420_v11 = vpop.permute.xlu0 %4419 }
 0x6de   : >> { %v4538_v51 = vmul.f32 0.5, %v4506_v41  ;;  %v4537_v13 = vmul.f32 0.5, %v4505_v20  ;;  %v4475_v7 = vsub.f32 %v4353_v33, %v8621_v22  ;;  %v4491_v42 = vsub.f32 %v4420_v11, %v8621_v22  ;;  %v8626_v20 = vld [vmem:[#allocation36_spill] sm:$0xff] }
 0x6e0   : >> { %5865 = vtanh.f32 %v4538_v51  ;;  %v4507_v61 = vmul.f32 %v4475_v7, %v8622_v15  ;;  %v4523_v25 = vmul.f32 %v4491_v42, %v8622_v15 }
 0x6e1   : >> { %5867 = vtanh.f32 %v4537_v13  ;;  %v4357_v3 = vpop.permute.xlu1 %4356  ;;  %v4424_v44 = vpop.permute.xlu0 %4423 }
 0x6e2   : >> { %v4539_v17 = vmul.f32 0.5, %v4507_v61  ;;  %v4555_v48 = vmul.f32 0.5, %v4523_v25  ;;  %v4476_v23 = vsub.f32 %v4357_v3, %v8623_v19  ;;  %v4492_v54 = vsub.f32 %v4424_v44, %v8623_v19  ;;  %v8627_v61 = vld [vmem:[#allocation21_spill] sm:$0xff] }
 0x6e3   : >> { %v8628_v44 = vld [vmem:[#allocation37_spill] sm:$0xff] }
 0x6e4   : >> { %5869 = vtanh.f32 %v4539_v17  ;;  %v4508_v18 = vmul.f32 %v4476_v23, %v8624_v16  ;;  %v4524_v26 = vmul.f32 %v4492_v54, %v8624_v16 }
 0x6e5   : >> { %5871 = vtanh.f32 %v4555_v48  ;;  %v4361_v5 = vpop.permute.xlu1 %4360  ;;  %v4428_v60 = vpop.permute.xlu0 %4427 }
 0x6e6   : >> { %v4540_v58 = vmul.f32 0.5, %v4508_v18  ;;  %v4556_v2 = vmul.f32 0.5, %v4524_v26  ;;  %v4477_v32 = vsub.f32 %v4361_v5, %v8625_v63  ;;  %v4493_v41 = vsub.f32 %v4428_v60, %v8625_v63  ;;  %v8629_v60 = vld [vmem:[#allocation22_spill] sm:$0xff] }
 0x6e8   : >> { %5873 = vtanh.f32 %v4540_v58  ;;  %v4509_v33 = vmul.f32 %v4477_v32, %v8626_v20  ;;  %v4525_v11 = vmul.f32 %v4493_v41, %v8626_v20 }
 0x6e9   : >> { %v5862_v51 = vpop.eup %5861  ;;  %v4365_v13 = vpop.permute.xlu1 %4364  ;;  %5875 = vtanh.f32 %v4556_v2 }
 0x6ea   : >> { %v4432_v22 = vpop.permute.xlu0 %4431  ;;  %v5864_v7 = vpop.eup %5863  ;;  %v4541_v42 = vmul.f32 0.5, %v4509_v33  ;;  %v4557_v15 = vmul.f32 0.5, %v4525_v11  ;;  %v4478_v25 = vsub.f32 %v4365_v13, %v8627_v61  ;;  %v4618_v19 = vadd.f32 1.0, %v5862_v51 }
 0x6eb   : >> { %v4494_v3 = vsub.f32 %v4432_v22, %v8627_v61  ;;  %v4617_v23 = vadd.f32 1.0, %v5864_v7  ;;  %v8630_v22 = vld [vmem:[#allocation38_spill] sm:$0xff] }
 0x6ec   : >> { %5877 = vtanh.f32 %v4541_v42  ;;  %v4510_v17 = vmul.f32 %v4478_v25, %v8628_v44  ;;  %v4650_v20 = vmul.f32 0.5, %v4618_v19 }
 0x6ed   : >> { %v5866_v48 = vpop.eup %5865  ;;  %5879 = vtanh.f32 %v4557_v15  ;;  %v4526_v54 = vmul.f32 %v4494_v3, %v8628_v44  ;;  %v4369_v16 = vpop.permute.xlu1 %4368  ;;  %v4649_v33 = vmul.f32 0.5, %v4617_v23  ;;  %v8631_v44 = vld [vmem:[#allocation49_spill] sm:$0xff] }
 0x6ee   : >> { %v4436_v18 = vpop.permute.xlu0 %4435  ;;  %v5868_v26 = vpop.eup %5867  ;;  %v4542_v5 = vmul.f32 0.5, %v4510_v17  ;;  %v4479_v58 = vsub.f32 %v4369_v16, %v8629_v60  ;;  %v4602_v2 = vadd.f32 1.0, %v5866_v48  ;;  %v4682_v17 = vmul.f32 %v4650_v20, %v8631_v44  ;;  %v8632_v48 = vld [vmem:[#allocation48_spill] sm:$0xff]  ;;  %v8634_v20 = vld [vmem:[#allocation65_spill] sm:$0xff] }
 0x6ef   : >> { %v4601_v63 = vadd.f32 1.0, %v5868_v26  ;;  %v4558_v32 = vmul.f32 0.5, %v4526_v54  ;;  %v4495_v42 = vsub.f32 %v4436_v18, %v8629_v60  ;;  %v4681_v54 = vmul.f32 %v4649_v33, %v8632_v48  ;;  %v8633_v26 = vld [vmem:[#allocation23_spill] sm:$0xff] }
 0x6f0   : >> { %5881 = vtanh.f32 %v4542_v5  ;;  %v4511_v7 = vmul.f32 %v4479_v58, %v8630_v22  ;;  %v4634_v15 = vmul.f32 0.5, %v4602_v2  ;;  %v4714_v33 = vmul.f32 %v4682_v17, %v8634_v20 }
 0x6f1   : >> { %v5870_v41 = vpop.eup %5869  ;;  %v4373_v11 = vpop.permute.xlu1 %4372  ;;  %v4633_v61 = vmul.f32 0.5, %v4601_v63  ;;  %5883 = vtanh.f32 %v4558_v32  ;;  %v4527_v43 = vmul.f32 %v4495_v42, %v8630_v22 }
 0x6f2   : >> { %v4440_v13 = vpop.permute.xlu0 %4439  ;;  %v5872_v51 = vpop.eup %5871  ;;  %v4603_v25 = vadd.f32 1.0, %v5870_v41  ;;  %v4480_v19 = vsub.f32 %v4373_v11, %v8633_v26  ;;  %v4543_v35 = vmul.f32 0.5, %v4511_v7  ;;  %v4666_v60 = vmul.f32 %v4634_v15, %v8631_v44 }
 0x6f3   : >> { %v4619_v16 = vadd.f32 1.0, %v5872_v51  ;;  %v4496_v58 = vsub.f32 %v4440_v13, %v8633_v26  ;;  %v4665_v2 = vmul.f32 %v4633_v61, %v8632_v48  ;;  %v8635_v51 = vld [vmem:[#allocation64_spill] sm:$0xff]  ;;  %v4559_v13 = vmul.f32 0.5, %v4527_v43 }
 0x6f4   : >> { %v4635_v63 = vmul.f32 0.5, %v4603_v25  ;;  %v4713_v24 = vmul.f32 %v4681_v54, %v8635_v51  ;;  %v4512_v40 = vmul.f32 %v4480_v19, %v8636_v59  ;;  %5885 = vtanh.f32 %v4543_v35 }
 0x6f5   : >> { %v5874_v3 = vpop.eup %5873  ;;  %v4377_v23 = vpop.permute.xlu1 %4376  ;;  %v4651_v11 = vmul.f32 0.5, %v4619_v16  ;;  %v4528_v15 = vmul.f32 %v4496_v58, %v8636_v59  ;;  %v4698_v61 = vmul.f32 %v4666_v60, %v8634_v20  ;;  %v4697_v25 = vmul.f32 %v4665_v2, %v8635_v51 }
 0x6f6   : >> { %v4444_v5 = vpop.permute.xlu0 %4443  ;;  %v5876_v18 = vpop.eup %5875  ;;  %v4604_v32 = vadd.f32 1.0, %v5874_v3  ;;  %v8637_v3 = vld [vmem:[#allocation50_spill] sm:$0xff]  ;;  %v4481_v48 = vsub.f32 %v4377_v23, %v8441_v47  ;;  %v4794_v26 = vadd.f32 %v4682_v17, %v4681_v54  ;;  %5887 = vtanh.f32 %v4559_v13 }
 0x6f7   : >> { %v4620_v42 = vadd.f32 1.0, %v5876_v18  ;;  %v4667_v44 = vmul.f32 %v4635_v63, %v8637_v3  ;;  %v4683_v10 = vmul.f32 %v4651_v11, %v8637_v3  ;;  %v4544_v18 = vmul.f32 0.5, %v4512_v40 }
 0x6f8   : >> { %v4636_v16 = vmul.f32 0.5, %v4604_v32  ;;  %v4513_v43 = vmul.f32 %v4481_v48, %v8492_v28  ;;  %v4560_v20 = vmul.f32 0.5, %v4528_v15  ;;  %v4497_v63 = vsub.f32 %v4444_v5, %v8441_v47 }
 0x6f9   : >> { %v5878_v41 = vpop.eup %5877  ;;  %v4381_v7 = vpop.permute.xlu1 %4380  ;;  %v4652_v58 = vmul.f32 0.5, %v4620_v42  ;;  %v4750_v51 = vadd.f32 %v4714_v33, %v4713_v24  ;;  %v4729_v23 = vadd.f32 %v4698_v61, %v4697_v25  ;;  %v4773_v17 = vadd.f32 %v4666_v60, %v4665_v2 }
 0x6fa   : >> { %v4448_v37 = vpop.permute.xlu0 %4447  ;;  %v5880_v22 = vpop.eup %5879  ;;  %v4605_v52 = vadd.f32 1.0, %v5878_v41  ;;  %v4699_v54 = vmul.f32 %v4667_v44, %v8493_v8  ;;  %v4668_v41 = vmul.f32 %v4636_v16, %v8443_v55  ;;  %v4715_v3 = vmul.f32 %v4683_v10, %v8493_v8 }
 0x6fb   : >> { %v4621_v9 = vadd.f32 1.0, %v5880_v22  ;;  %v4529_v22 = vmul.f32 %v4497_v63, %v8492_v28  ;;  %5889 = vtanh.f32 %v4544_v18  ;;  %v4545_v42 = vmul.f32 0.5, %v4513_v43 }
 0x6fc   : >> { %v4637_v11 = vmul.f32 0.5, %v4605_v52  ;;  %v4774_v47 = vadd.f32 %v4773_v17, %v4667_v44  ;;  %v4795_v24 = vadd.f32 %v4794_v26, %v4683_v10  ;;  %v4684_v5 = vmul.f32 %v4652_v58, %v8443_v55  ;;  %v4848_v55 = vld [vmem:[%s7989_s14 + $0x60] sm:$0xff] (%p1833_p2) }
 0x6fd   : >> { %v5882_v19 = vpop.eup %5881  ;;  %v4385_v35 = vpop.permute.xlu1 %4384  ;;  %v4653_v48 = vmul.f32 0.5, %v4621_v9  ;;  %5891 = vtanh.f32 %v4560_v20  ;;  %v4561_v2 = vmul.f32 0.5, %v4529_v22  ;;  %v4482_v33 = vsub.f32 %v4381_v7, %v8444_v36 }
 0x6fe   : >> { %v7755_v59 = vpop.permute.xlu0 %4451  ;;  %v5884_v32 = vpop.eup %5883  ;;  %v4606_v40 = vadd.f32 1.0, %v5882_v19  ;;  %v4498_v52 = vsub.f32 %v4448_v37, %v8444_v36  ;;  %v4730_v61 = vadd.f32 %v4729_v23, %v4699_v54  ;;  %v4700_v25 = vmul.f32 %v4668_v41, %v8445_v56 }
 0x6ff   : >> { %v4622_v60 = vadd.f32 1.0, %v5884_v32  ;;  %v4669_v9 = vmul.f32 %v4637_v11, %v8446_v38  ;;  %v4751_v16 = vadd.f32 %v4750_v51, %v4715_v3  ;;  %v4685_v19 = vmul.f32 %v4653_v48, %v8446_v38 }
 0x700   : >> { %v4638_v8 = vmul.f32 0.5, %v4606_v40  ;;  %5893 = vtanh.f32 %v4545_v42  ;;  %v4514_v10 = vmul.f32 %v4482_v33, %v8494_v21  ;;  %v4775_v18 = vadd.f32 %v4774_v47, %v4668_v41 }
 0x701   : >> { %v4389_v13 = vpop.permute.xlu1 %4388  ;;  %v4716_v43 = vmul.f32 %v4684_v5, %v8445_v56  ;;  %v4796_v7 = vadd.f32 %v4795_v24, %v4684_v5  ;;  %v4530_v37 = vmul.f32 %v4498_v52, %v8494_v21  ;;  %v5886_v58 = vpop.eup %5885  ;;  %v4654_v20 = vmul.f32 0.5, %v4622_v60  ;;  %v4843_v56 = vld [vmem:[%s7989_s14 + $0x38] sm:$0xff] (%p1833_p2) }
 0x702   : >> { %v4456_v15 = vpop.permute.xlu0 %4455  ;;  %5895 = vtanh.f32 %v4561_v2  ;;  %v4546_v63 = vmul.f32 0.5, %v4514_v10  ;;  %v4483_v23 = vsub.f32 %v4385_v35, %v8541_v34  ;;  %v4731_v51 = vadd.f32 %v4730_v61, %v4700_v25  ;;  %v8638_v61 = vld [vmem:[#allocation27_spill] sm:$0xff] }
 0x703   : >> { %v4701_v17 = vmul.f32 %v4669_v9, %v8589_v12  ;;  %v4670_v54 = vmul.f32 %v4638_v8, %v8448_v31  ;;  %v4562_v32 = vmul.f32 0.5, %v4530_v37  ;;  %v4717_v11 = vmul.f32 %v4685_v19, %v8589_v12  ;;  %v5888_v24 = vpop.eup %5887  ;;  %v8640_v37 = vld [vmem:[#allocation28_spill] sm:$0xff] }
 0x704   : >> { %5897 = vtanh.f32 %v4546_v63  ;;  %v4515_v41 = vmul.f32 %v4483_v23, %v8398_v50  ;;  %v4499_v40 = vsub.f32 %v7755_v59, %v8541_v34  ;;  %v4752_v48 = vadd.f32 %v4751_v16, %v4716_v43 }
 0x705   : >> { %v4393_v44 = vpop.permute.xlu1 %4392  ;;  %v4776_v42 = vadd.f32 %v4775_v18, %v4669_v9  ;;  %v4797_v47 = vadd.f32 %v4796_v7, %v4685_v19  ;;  %v4607_v35 = vadd.f32 1.0, %v5886_v58  ;;  %v4686_v5 = vmul.f32 %v4654_v20, %v8448_v31  ;;  %v8639_v18 = vld [vmem:[#allocation43_spill] sm:$0xff] }
 0x706   : >> { %v4460_v26 = vpop.permute.xlu0 %4459  ;;  %5899 = vtanh.f32 %v4562_v32  ;;  %v4547_v60 = vmul.f32 0.5, %v4515_v41  ;;  %v4531_v2 = vmul.f32 %v4499_v40, %v8398_v50  ;;  %v4732_v33 = vadd.f32 %v4731_v51, %v4701_v17  ;;  %v8641_v40 = vld [vmem:[#allocation44_spill] sm:$0xff] }
 0x707   : >> { %v4702_v52 = vmul.f32 %v4670_v54, %v8449_v53  ;;  %v4484_v25 = vsub.f32 %v4389_v13, %v8638_v61  ;;  %v4500_v59 = vsub.f32 %v4456_v15, %v8638_v61  ;;  %v4753_v8 = vadd.f32 %v4752_v48, %v4717_v11  ;;  %v4847_v50 = vld [vmem:[%s7989_s14 + $0x58] sm:$0xff] (%p1833_p2) }
 0x708   : >> { %v7783_v10 = vadd.f32 %v4776_v42, %v4670_v54  ;;  %5901 = vtanh.f32 %v4547_v60  ;;  %v4563_v9 = vmul.f32 0.5, %v4531_v2  ;;  %v5890_v16 = vpop.eup %5889  ;;  %v4623_v19 = vadd.f32 1.0, %v5888_v24 }
 0x709   : >> { %v4397_v22 = vpop.permute.xlu1 %4396  ;;  %v4516_v43 = vmul.f32 %v4484_v25, %v8639_v18  ;;  %v4532_v7 = vmul.f32 %v4500_v59, %v8639_v18  ;;  %v4485_v58 = vsub.f32 %v4393_v44, %v8640_v37  ;;  %v4718_v63 = vmul.f32 %v4686_v5, %v8449_v53  ;;  %v8642_v44 = vld [vmem:[#allocation29_spill] sm:$0xff]  ;;  %v8644_v59 = vld [vmem:[#allocation54_spill] sm:$0xff] }
 0x70a   : >> { %v4464_v3 = vpop.permute.xlu0 %4463  ;;  %v5892_v20 = vpop.eup %5891  ;;  %v4639_v23 = vmul.f32 0.5, %v4607_v35  ;;  %5903 = vtanh.f32 %v4563_v9  ;;  %v4501_v13 = vsub.f32 %v4460_v26, %v8640_v37  ;;  %v4733_v17 = vadd.f32 %v4732_v33, %v4702_v52  ;;  %v8643_v26 = vld [vmem:[#allocation30_spill] sm:$0xff] }
 0x70b   : >> { %v7790_v54 = vadd.f32 %v4797_v47, %v4686_v5  ;;  %v4548_v32 = vmul.f32 0.5, %v4516_v43  ;;  %v4564_v11 = vmul.f32 0.5, %v4532_v7  ;;  %v4608_v41 = vadd.f32 1.0, %v5890_v16  ;;  %v8645_v16 = vld [vmem:[#allocation45_spill] sm:$0xff]  ;;  %v4842_v53 = vld [vmem:[%s7989_s14 + $0x30] sm:$0xff] (%p1833_p2) }
 0x70c   : >> { %v4517_v48 = vmul.f32 %v4485_v58, %v8641_v40  ;;  %v4533_v42 = vmul.f32 %v4501_v13, %v8641_v40  ;;  %v4486_v24 = vsub.f32 %v4397_v22, %v8642_v44  ;;  %v4655_v2 = vmul.f32 0.5, %v4623_v19  ;;  %v8646_v58 = vld [vmem:[#allocation46_spill] sm:$0xff] }
 0x70d   : >> { %v4401_v15 = vpop.permute.xlu1 %4400  ;;  %v5894_v60 = vpop.eup %5893  ;;  %5905 = vtanh.f32 %v4548_v32  ;;  %v4502_v35 = vsub.f32 %v4464_v3, %v8642_v44  ;;  %v4671_v33 = vmul.f32 %v4639_v23, %v8644_v59  ;;  %v4624_v47 = vadd.f32 1.0, %v5892_v20 }
 0x70e   : >> { %v4468_v51 = vpop.permute.xlu0 %4467  ;;  %v4487_v25 = vsub.f32 %v4401_v15, %v8643_v26  ;;  %5907 = vtanh.f32 %v4564_v11  ;;  %v4549_v5 = vmul.f32 0.5, %v4517_v48  ;;  %v4565_v9 = vmul.f32 0.5, %v4533_v42 }
 0x70f   : >> { %v5896_v52 = vpop.eup %5895  ;;  %v4518_v43 = vmul.f32 %v4486_v24, %v8645_v16  ;;  %v4534_v7 = vmul.f32 %v4502_v35, %v8645_v16  ;;  %v4754_v13 = vadd.f32 %v4753_v8, %v4718_v63  ;;  %v4640_v19 = vmul.f32 0.5, %v4608_v41  ;;  %v8647_v8 = vld [vmem:[#allocation31_spill] sm:$0xff] }
 0x710   : >> { %v4519_v22 = vmul.f32 %v4487_v25, %v8646_v58  ;;  %v4609_v32 = vadd.f32 1.0, %v5894_v60  ;;  %5909 = vtanh.f32 %v4549_v5  ;;  %v4687_v23 = vmul.f32 %v4655_v2, %v8644_v59  ;;  %v8648_v60 = vld [vmem:[#allocation70_spill] sm:$0xff] }
 0x711   : >> { %v4405_v3 = vpop.permute.xlu1 %4404  ;;  %v5898_v15 = vpop.eup %5897  ;;  %5911 = vtanh.f32 %v4565_v9  ;;  %v4550_v20 = vmul.f32 0.5, %v4518_v43  ;;  %v4566_v11 = vmul.f32 0.5, %v4534_v7  ;;  %v4656_v48 = vmul.f32 0.5, %v4624_v47 }
 0x712   : >> { %v4472_v12 = vpop.permute.xlu0 %4471  ;;  %v4625_v42 = vadd.f32 1.0, %v5896_v52  ;;  %v4551_v18 = vmul.f32 0.5, %v4519_v22  ;;  %v4503_v24 = vsub.f32 %v4468_v51, %v8643_v26  ;;  %v4610_v16 = vadd.f32 1.0, %v5898_v15  ;;  %v8649_v52 = vld [vmem:[#allocation47_spill] sm:$0xff] }
 0x713   : >> { %v5900_v35 = vpop.eup %5899  ;;  %5913 = vtanh.f32 %v4550_v20  ;;  %v4488_v63 = vsub.f32 %v4405_v3, %v8647_v8  ;;  %v4504_v41 = vsub.f32 %v4472_v12, %v8647_v8  ;;  %v4703_v25 = vmul.f32 %v4671_v33, %v8648_v60 }
 0x714   : >> { %v4672_v5 = vmul.f32 %v4640_v19, %v8460_v39  ;;  %v4641_v2 = vmul.f32 0.5, %v4609_v32  ;;  %v4626_v9 = vadd.f32 1.0, %v5900_v35  ;;  %5915 = vtanh.f32 %v4566_v11 }
 0x715   : >> { %v5902_v43 = vpop.eup %5901  ;;  %v4535_v47 = vmul.f32 %v4503_v24, %v8646_v58  ;;  %v4520_v7 = vmul.f32 %v4488_v63, %v8649_v52  ;;  %v4536_v51 = vmul.f32 %v4504_v41, %v8649_v52  ;;  %v4719_v22 = vmul.f32 %v4687_v23, %v8648_v60  ;;  %v4840_v52 = vld [vmem:[%s7989_s14 + $0x20] sm:$0xff] (%p1833_p2) }
 0x716   : >> { %v4688_v3 = vmul.f32 %v4656_v48, %v8460_v39  ;;  %v4657_v15 = vmul.f32 0.5, %v4625_v42  ;;  %v4611_v12 = vadd.f32 1.0, %v5902_v43  ;;  %v4642_v8 = vmul.f32 0.5, %v4610_v16 }
 0x717   : >> { %v5904_v20 = vpop.eup %5903  ;;  %5917 = vtanh.f32 %v4551_v18  ;;  %v4567_v19 = vmul.f32 0.5, %v4535_v47  ;;  %v4552_v32 = vmul.f32 0.5, %v4520_v7  ;;  %v4734_v35 = vadd.f32 %v4733_v17, %v4703_v25  ;;  %v8650_v25 = vld [vmem:[#allocation57_spill] sm:$0xff] }
 0x718   : >> { %v4778_v11 = vadd.f32 %v7783_v10, %v4671_v33  ;;  %v4704_v24 = vmul.f32 %v4672_v5, %v8603_v46  ;;  %v4673_v63 = vmul.f32 %v4641_v2, %v8604_v57  ;;  %v4658_v21 = vmul.f32 0.5, %v4626_v9 }
 0x719   : >> { %v4627_v41 = vadd.f32 1.0, %v5904_v20  ;;  %5919 = vtanh.f32 %v4567_v19  ;;  %v4568_v26 = vmul.f32 0.5, %v4536_v51  ;;  %v4755_v48 = vadd.f32 %v4754_v13, %v4719_v22  ;;  %v8651_v51 = vld [vmem:[#allocation72_spill] sm:$0xff] }
 0x71a   : >> { %v5906_v28 = vpop.eup %5905  ;;  %v4799_v42 = vadd.f32 %v7790_v54, %v4687_v23  ;;  %v4689_v16 = vmul.f32 %v4657_v15, %v8604_v57  ;;  %v4643_v18 = vmul.f32 0.5, %v4611_v12  ;;  %v4720_v17 = vmul.f32 %v4688_v3, %v8603_v46 }
 0x71b   : >> { %v5908_v43 = vpop.eup %5907  ;;  %v4674_v10 = vmul.f32 %v4642_v8, %v8650_v25  ;;  %v4612_v33 = vadd.f32 1.0, %v5906_v28  ;;  %5921 = vtanh.f32 %v4552_v32  ;;  %v4735_v47 = vadd.f32 %v4734_v35, %v4704_v24 }
 0x71c   : >> { %v4779_v2 = vadd.f32 %v4778_v11, %v4672_v5  ;;  %v4659_v9 = vmul.f32 0.5, %v4627_v41  ;;  %v4628_v7 = vadd.f32 1.0, %v5908_v43  ;;  %v4705_v19 = vmul.f32 %v4673_v63, %v8651_v51 }
 0x71d   : >> { %v5910_v20 = vpop.eup %5909  ;;  %v4690_v13 = vmul.f32 %v4658_v21, %v8650_v25  ;;  %v4644_v54 = vmul.f32 0.5, %v4612_v33  ;;  %5923 = vtanh.f32 %v4568_v26  ;;  %v4721_v22 = vmul.f32 %v4689_v16, %v8651_v51 }
 0x71e   : >> { %v5912_v23 = vpop.eup %5911  ;;  %v4675_v15 = vmul.f32 %v4643_v18, %v8559_v29  ;;  %v4660_v12 = vmul.f32 0.5, %v4628_v7  ;;  %v4613_v8 = vadd.f32 1.0, %v5910_v20  ;;  %v4756_v28 = vadd.f32 %v4755_v48, %v4720_v17 }
 0x71f   : >> { %v4800_v32 = vadd.f32 %v4799_v42, %v4688_v3  ;;  %v4706_v5 = vmul.f32 %v4674_v10, %v8560_v49  ;;  %v4629_v35 = vadd.f32 1.0, %v5912_v23  ;;  %v4780_v24 = vadd.f32 %v4779_v2, %v4673_v63 }
 0x720   : >> { %v5914_v11 = vpop.eup %5913  ;;  %v4691_v41 = vmul.f32 %v4659_v9, %v8559_v29  ;;  %v4676_v21 = vmul.f32 %v4644_v54, %v8514_v62  ;;  %v4645_v43 = vmul.f32 0.5, %v4613_v8  ;;  %v4736_v26 = vadd.f32 %v4735_v47, %v4705_v19 }
 0x721   : >> { %v4801_v33 = vadd.f32 %v4800_v32, %v4689_v16  ;;  %v4722_v25 = vmul.f32 %v4690_v13, %v8560_v49  ;;  %v4661_v31 = vmul.f32 0.5, %v4629_v35  ;;  %v5916_v18 = vpop.eup %5915  ;;  %v4757_v7 = vadd.f32 %v4756_v28, %v4721_v22  ;;  %v8652_v16 = vld [vmem:[#allocation75_spill] sm:$0xff] }
 0x722   : >> { %v4707_v48 = vmul.f32 %v4675_v15, %v8515_v1  ;;  %v4692_v3 = vmul.f32 %v4660_v12, %v8514_v62  ;;  %v4614_v42 = vadd.f32 1.0, %v5914_v11  ;;  %v4737_v17 = vadd.f32 %v4736_v26, %v4706_v5  ;;  %v4841_v62 = vld [vmem:[%s7989_s14 + $0x28] sm:$0xff] (%p1833_p2) }
 0x723   : >> { %v4781_v20 = vadd.f32 %v4780_v24, %v4674_v10  ;;  %v4677_v63 = vmul.f32 %v4645_v43, %v8516_v0  ;;  %v4630_v2 = vadd.f32 1.0, %v5916_v18  ;;  %v4802_v54 = vadd.f32 %v4801_v33, %v4690_v13 }
 0x724   : >> { %v5918_v9 = vpop.eup %5917  ;;  %v4723_v47 = vmul.f32 %v4691_v41, %v8515_v1  ;;  %v4708_v19 = vmul.f32 %v4676_v21, %v8652_v16  ;;  %v4646_v23 = vmul.f32 0.5, %v4614_v42  ;;  %v4758_v8 = vadd.f32 %v4757_v7, %v4722_v25 }
 0x725   : >> { %v4693_v22 = vmul.f32 %v4661_v31, %v8516_v0  ;;  %v4662_v28 = vmul.f32 0.5, %v4630_v2  ;;  %v4615_v32 = vadd.f32 1.0, %v5918_v9  ;;  %v4738_v12 = vadd.f32 %v4737_v17, %v4707_v48 }
 0x726   : >> { %v5920_v35 = vpop.eup %5919  ;;  %v4782_v11 = vadd.f32 %v4781_v20, %v4675_v15  ;;  %v4724_v10 = vmul.f32 %v4692_v3, %v8652_v16  ;;  %v4678_v5 = vmul.f32 %v4646_v23, %v8471_v4  ;;  %v4709_v24 = vmul.f32 %v4677_v63, %v8472_v6 }
 0x727   : >> { %v4694_v13 = vmul.f32 %v4662_v28, %v8471_v4  ;;  %v4647_v43 = vmul.f32 0.5, %v4615_v32  ;;  %v4631_v26 = vadd.f32 1.0, %v5920_v35  ;;  %v4759_v18 = vadd.f32 %v4758_v8, %v4723_v47 }
 0x728   : >> { %v5922_v33 = vpop.eup %5921  ;;  %v4803_v25 = vadd.f32 %v4802_v54, %v4691_v41  ;;  %v4739_v7 = vadd.f32 %v4738_v12, %v4708_v19  ;;  %v4783_v31 = vadd.f32 %v4782_v11, %v4676_v21  ;;  %v4725_v42 = vmul.f32 %v4693_v22, %v8472_v6 }
 0x729   : >> { %v4710_v48 = vmul.f32 %v4678_v5, %v8473_v14  ;;  %v4679_v15 = vmul.f32 %v4647_v43, %v8426_v27  ;;  %v4663_v17 = vmul.f32 0.5, %v4631_v26  ;;  %v4760_v2 = vadd.f32 %v4759_v18, %v4724_v10  ;;  %v8653_v18 = vld [vmem:[#allocation79_spill] sm:$0xff] }
 0x72a   : >> { %v5924_v20 = vpop.eup %5923  ;;  %v4804_v9 = vadd.f32 %v4803_v25, %v4692_v3  ;;  %v4784_v23 = vadd.f32 %v4783_v31, %v4677_v63  ;;  %v4616_v0 = vadd.f32 1.0, %v5922_v33  ;;  %v4740_v28 = vadd.f32 %v4739_v7, %v4709_v24 }
 0x72b   : >> { %v4726_v32 = vmul.f32 %v4694_v13, %v8473_v14  ;;  %v4711_v47 = vmul.f32 %v4679_v15, %v8427_v30  ;;  %v4695_v41 = vmul.f32 %v4663_v17, %v8426_v27  ;;  %v4632_v8 = vadd.f32 1.0, %v5924_v20  ;;  %v4846_v27 = vld [vmem:[%s7989_s14 + $0x50] sm:$0xff] (%p1833_p2) }
 0x72c   : >> { %v4805_v21 = vadd.f32 %v4804_v9, %v4693_v22  ;;  %v4785_v54 = vadd.f32 %v4784_v23, %v4678_v5  ;;  %v4648_v19 = vmul.f32 0.5, %v4616_v0  ;;  %v4761_v35 = vadd.f32 %v4760_v2, %v4725_v42 }
 0x72d   : >> { %v4741_v12 = vadd.f32 %v4740_v28, %v4710_v48  ;;  %v4727_v11 = vmul.f32 %v4695_v41, %v8427_v30  ;;  %v4664_v63 = vmul.f32 0.5, %v4632_v8  ;;  %v4845_v30 = vld [vmem:[%s7989_s14 + $0x48] sm:$0xff] (%p1833_p2)  ;;  %v6063_v38 = vmov (%p1833_p2), 1983009808  }
 0x72e   : >> { %v4806_v43 = vadd.f32 %v4805_v21, %v4694_v13  ;;  %v4786_v10 = vadd.f32 %v4785_v54, %v4679_v15  ;;  %v4680_v3 = vmul.f32 %v4648_v19, %v8428_v45  ;;  %v4762_v24 = vadd.f32 %v4761_v35, %v4726_v32 }
 0x72f   : >> { %v4742_v26 = vadd.f32 %v4741_v12, %v4711_v47  ;;  %v4696_v22 = vmul.f32 %v4664_v63, %v8428_v45  ;;  %v4844_v45 = vld [vmem:[%s7989_s14 + $0x40] sm:$0xff] (%p1833_p2)  ;;  %v4894_v36 = vunpack.c.l.s4 (%p1833_p2), %v6063_v38 }
 0x730   : >> { %v4807_v33 = vadd.f32 %v4806_v43, %v4695_v41  ;;  %v4712_v25 = vmul.f32 %v4680_v3, %v8653_v18  ;;  %v4787_v7 = vadd.f32 %v4786_v10, %v4680_v3  ;;  %v4763_v5 = vadd.f32 %v4762_v24, %v4727_v11  ;;  %v8654_v3 = vld [vmem:[#allocation83_spill] sm:$0xff] }
 0x731   : >> { %v4728_v42 = vmul.f32 %v4696_v22, %v8653_v18  ;;  %v4895_v1 = vunpack.c.0.s8 (%p1833_p2), %v4894_v36  ;;  %v8663_v18 = vld [vmem:[#allocation13_spill] sm:$0xff] (%p1833_p2) }
 0x732   : >> { %v4743_v0 = vadd.f32 %v4742_v26, %v4712_v25  ;;  %v4788_v31 = vrot.slane %v4787_v7, 4  ;;  %v4808_v48 = vadd.f32 %v4807_v33, %v4696_v22  ;;  %v8655_v26 = vld [vmem:[#allocation88_spill] sm:$0xff] }
 0x733   : >> { %v4764_v13 = vadd.f32 %v4763_v5, %v4728_v42  ;;  %v8656_v5 = vld [vmem:[#allocation84_spill] sm:$0xff]  ;;  %v8657_v42 = vld [vmem:[#allocation85_spill] sm:$0xff] }
 0x734   : >> { %v4789_v17 = vadd.f32 %v4788_v31, %v4787_v7  ;;  %v4809_v15 = vrot.slane %v4808_v48, 4  ;;  %v4744_v20 = vrot.slane %v4743_v0, 4 }
 0x735   : >> { %v4765_v9 = vrot.slane %v4764_v13, 4 }
 0x736   : >> { %v4790_v2 = vrot.slane %v4789_v17, 2  ;;  %v4810_v23 = vadd.f32 %v4809_v15, %v4808_v48  ;;  %v4745_v41 = vadd.f32 %v4744_v20, %v4743_v0  ;;  %v8658_v15 = vld [vmem:[#allocation86_spill] sm:$0xff] }
 0x737   : >> { %v4766_v32 = vadd.f32 %v4765_v9, %v4764_v13  ;;  %v8659_v20 = vld [vmem:[#allocation90_spill] sm:$0xff]  ;;  %v8660_v9 = vld [vmem:[#allocation89_spill] sm:$0xff] }
 0x738   : >> { %v4791_v28 = vadd.f32 %v4790_v2, %v4789_v17  ;;  %v4811_v47 = vrot.slane %v4810_v23, 2  ;;  %v4746_v12 = vrot.slane %v4745_v41, 2  ;;  %v4817_v2 = vmul.f32 %v8659_v20, %v8658_v15 }
 0x739   : >> { %v4767_v54 = vrot.slane %v4766_v32, 2 }
 0x73a   : >> { %v4792_v21 = vrot.slane %v4791_v28, 1  ;;  %v4812_v19 = vadd.f32 %v4811_v47, %v4810_v23  ;;  %v4747_v24 = vadd.f32 %v4746_v12, %v4745_v41  ;;  %v7901_v12 = vsub.s32 (%p1833_p2), %v4895_v1, %v8663_v18 }
 0x73b   : >> { %v4768_v8 = vadd.f32 %v4767_v54, %v4766_v32  ;;  %v8661_v32 = vld [vmem:[#allocation87_spill] sm:$0xff] }
 0x73c   : >> { %v4813_v35 = vrot.slane %v4812_v19, 1  ;;  %v4793_v11 = vadd.f32 %v4792_v21, %v4791_v28  ;;  %v4748_v31 = vrot.slane %v4747_v24, 1  ;;  %v4818_v47 = vadd.f32 %v4817_v2, %v8661_v32 }
 0x73d   : >> { %v4769_v10 = vrot.slane %v4768_v8, 1 }
 0x73e   : >> { %v4814_v43 = vadd.f32 %v4813_v35, %v4812_v19  ;;  %v4815_v33 = vadd.f32 %v8655_v26, %v4793_v11  ;;  %v4749_v17 = vadd.f32 %v4748_v31, %v4747_v24  ;;  %v4851_v19 = vld [vmem:[%s7989_s14 + $0x78] sm:$0xff] (%p1833_p2)  ;;  %v4849_v35 = vld [vmem:[%s7989_s14 + $0x68] sm:$0xff] (%p1833_p2) }
 0x73f   : >> { %v4770_v7 = vadd.f32 %v4769_v10, %v4768_v8  ;;  %v4850_v8 = vld [vmem:[%s7989_s14 + $0x70] sm:$0xff] (%p1833_p2)  ;;  %5318 = vmatprep.subr.mxu0 (%p1833_p2), %v4851_v19  ;;  %5356 = vmatprep.subr.mxu1 (%p1833_p2), %v4851_v19  ;;  %v4837_v31 = vld [vmem:[%s7989_s14 + $0x8] sm:$0xff] (%p1833_p2) }
 0x740   : >> { %v4816_v63 = vadd.f32 %v4814_v43, %v8654_v3  ;;  %v4771_v23 = vadd.f32 %v8660_v9, %v4749_v17  ;;  %5319 = vmatpush3.msra.mxu0 (%p1833_p2), %v4851_v19  ;;  %5372 = vmatpush3.msra.mxu1 (%p1833_p2), %v4851_v19  ;;  %v4839_v3 = vld [vmem:[%s7989_s14 + $0x18] sm:$0xff] (%p1833_p2) }
 0x741   : >> { %v4772_v48 = vadd.f32 %v4770_v7, %v8657_v42  ;;  %5320 = vmatprep.subr.mxu0 (%p1833_p2), %v4850_v8  ;;  %5357 = vmatprep.subr.mxu1 (%p1833_p2), %v4850_v8 }
 0x742   : >> { %v4827_v25 = vrot.slane %v4816_v63, 7  ;;  %5321 = vmatpush3.msra.mxu0 (%p1833_p2), %v4850_v8  ;;  %5373 = vmatpush3.msra.mxu1 (%p1833_p2), %v4850_v8 }
 0x743   : >> { %v4821_v13 = vrot.slane %v4772_v48, 7  ;;  %5322 = vmatprep.subr.mxu0 (%p1833_p2), %v4849_v35  ;;  %5358 = vmatprep.subr.mxu1 (%p1833_p2), %v4849_v35 }
 0x744   : >> { %v4828_v22 = vsel %vm1408_vm1, %v4827_v25, %v4815_v33  ;;  %5323 = vmatpush3.msra.mxu0 (%p1833_p2), %v4849_v35  ;;  %5374 = vmatpush3.msra.mxu1 (%p1833_p2), %v4849_v35 }
 0x745   : >> { %v4830_v0 = vadd.f32 %v4828_v22, %v8656_v5  ;;  %v4822_v28 = vsel %vm1408_vm1, %v4821_v13, %v4771_v23  ;;  %5324 = vmatprep.subr.mxu0 (%p1833_p2), %v4848_v55  ;;  %5359 = vmatprep.subr.mxu1 (%p1833_p2), %v4848_v55  ;;  %v4836_v13 = vld [vmem:[%s7989_s14] sm:$0xff] (%p1833_p2) }
 0x746   : >> { %v4824_v41 = vadd.f32 %v4822_v28, %v4818_v47  ;;  %5325 = vmatpush3.msra.mxu0 (%p1833_p2), %v4848_v55  ;;  %5375 = vmatpush3.msra.mxu1 (%p1833_p2), %v4848_v55  ;;  %v5295_v23 = vld [vmem:[%s7990_s15] ss:$0 sm:$0xff] (%p1833_p2) }
 0x747   : >> { %5925 = vrcp.f32 %v4830_v0  ;;  %5326 = vmatprep.subr.mxu0 (%p1833_p2), %v4847_v50  ;;  %5360 = vmatprep.subr.mxu1 (%p1833_p2), %v4847_v50 }
 0x748   : > { %5327 = vmatpush3.msra.mxu0 (%p1833_p2), %v4847_v50  ;;  %5376 = vmatpush3.msra.mxu1 (%p1833_p2), %v4847_v50 }
 0x749   : > { %5328 = vmatprep.subr.mxu0 (%p1833_p2), %v4846_v27  ;;  %5361 = vmatprep.subr.mxu1 (%p1833_p2), %v4846_v27 }
 0x74a   : > { %5329 = vmatpush3.msra.mxu0 (%p1833_p2), %v4846_v27  ;;  %5377 = vmatpush3.msra.mxu1 (%p1833_p2), %v4846_v27 }
 0x74b   : > { %5330 = vmatprep.subr.mxu0 (%p1833_p2), %v4845_v30  ;;  %5362 = vmatprep.subr.mxu1 (%p1833_p2), %v4845_v30 }
 0x74c   : > { %5331 = vmatpush3.msra.mxu0 (%p1833_p2), %v4845_v30  ;;  %5378 = vmatpush3.msra.mxu1 (%p1833_p2), %v4845_v30 }
 0x74d   : > { %5332 = vmatprep.subr.mxu0 (%p1833_p2), %v4844_v45  ;;  %5363 = vmatprep.subr.mxu1 (%p1833_p2), %v4844_v45 }
 0x74e   : > { %5333 = vmatpush3.msra.mxu0 (%p1833_p2), %v4844_v45  ;;  %5379 = vmatpush3.msra.mxu1 (%p1833_p2), %v4844_v45 }
 0x74f   : > { %5334 = vmatprep.subr.mxu0 (%p1833_p2), %v4843_v56  ;;  %5364 = vmatprep.subr.mxu1 (%p1833_p2), %v4843_v56 }
 0x750   : > { %5335 = vmatpush3.msra.mxu0 (%p1833_p2), %v4843_v56  ;;  %5380 = vmatpush3.msra.mxu1 (%p1833_p2), %v4843_v56 }
 0x751   : > { %5336 = vmatprep.subr.mxu0 (%p1833_p2), %v4842_v53  ;;  %5365 = vmatprep.subr.mxu1 (%p1833_p2), %v4842_v53 }
 0x752   : > { %5337 = vmatpush3.msra.mxu0 (%p1833_p2), %v4842_v53  ;;  %5381 = vmatpush3.msra.mxu1 (%p1833_p2), %v4842_v53 }
 0x753   : > { %1835 = sbr.rel (!%p1833_p2) target bundleno = 403 (0x193), region = 141  ;;  %5338 = vmatprep.subr.mxu0 (%p1833_p2), %v4841_v62  ;;  %5366 = vmatprep.subr.mxu1 (%p1833_p2), %v4841_v62 }
 0x754   : >> { %v5926_v21 = vpop.eup %5925  ;;  %5339 = vmatpush3.msra.mxu0 (%p1833_p2), %v4841_v62  ;;  %5382 = vmatpush3.msra.mxu1 (%p1833_p2), %v4841_v62 }
 0x755   : >> { %v4832_v54 = vmul.f32 %v5926_v21, %v4824_v41   ;;  %5340 = vmatprep.subr.mxu0 (%p1833_p2), %v4840_v52  ;;  %5367 = vmatprep.subr.mxu1 (%p1833_p2), %v4840_v52 }
 0x756   : > { %5341 = vmatpush3.msra.mxu0 (%p1833_p2), %v4840_v52  ;;  %5383 = vmatpush3.msra.mxu1 (%p1833_p2), %v4840_v52 }
 0x757   : >> { %4834 = vst [vmem:[%s4833_s19] sm:$0x3] %v4832_v54  ;;  %v8662_v33 = vmov %v4832_v54  ;;  %4835 = vst [vmem:[#allocation2] sm:$0x3] (%p1833_p2), %v4832_v54  ;;  %5342 = vmatprep.subr.mxu0 (%p1833_p2), %v4839_v3  ;;  %5368 = vmatprep.subr.mxu1 (%p1833_p2), %v4839_v3 }
 0x758   : > { %v4838_v33 = vld [vmem:[%s7989_s14 + $0x10] sm:$0xff]  ;;  %5343 = vmatpush3.msra.mxu0 %v4839_v3  ;;  %5384 = vmatpush3.msra.mxu1 %v4839_v3 }
 0x759   : > { %5344 = vmatprep.subr.mxu0 %v4838_v33  ;;  %5369 = vmatprep.subr.mxu1 %v4838_v33 }
 0x75a   : > { %5345 = vmatpush3.msra.mxu0 %v4838_v33  ;;  %5385 = vmatpush3.msra.mxu1 %v4838_v33 }
 0x75b   : > { %5346 = vmatprep.subr.mxu0 %v4837_v31  ;;  %5370 = vmatprep.subr.mxu1 %v4837_v31 }
 0x75c   : > { %5347 = vmatpush3.msra.mxu0 %v4837_v31  ;;  %5386 = vmatpush3.msra.mxu1 %v4837_v31 }
 0x75d   : > { %5348 = vmatprep.subr.mxu0 %v4836_v13  ;;  %5371 = vmatprep.subr.mxu1 %v4836_v13 }
 0x75e   : > { %v4853_v39 = vld [vmem:[#allocation3] sm:$0x3]  ;;  %v4854_v4 = vld [vmem:[#allocation3 + $0x2] sm:$0x3]  ;;  %v4855_v6 = vld [vmem:[#allocation3 + $0x4] sm:$0x3]  ;;  %5349 = vmatpush3.msra.mxu0 %v4836_v13  ;;  %5387 = vmatpush3.msra.mxu1 %v4836_v13 }
 0x75f   : > { %v4856_v14 = vld [vmem:[#allocation3 + $0x6] sm:$0x3]  ;;  %v4861_v34 = vld [vmem:[#allocation3 + $0x10] sm:$0x3]  ;;  %v4862_v29 = vld [vmem:[#allocation3 + $0x12] sm:$0x3]  ;;  %v4891_v51 = vcombine.low %v4853_v39, %v4854_v4 }
 0x760   : > { %v4863_v49 = vld [vmem:[#allocation3 + $0x14] sm:$0x3]  ;;  %v4864_v46 = vld [vmem:[#allocation3 + $0x16] sm:$0x3]  ;;  %v4857_v57 = vld [vmem:[#allocation3 + $0x8] sm:$0x3]  ;;  %v4892_v16 = vcombine.low %v4855_v6, %v4856_v14  ;;  %v4925_v11 = vcombine.low %v4861_v34, %v4862_v29 }
 0x761   : > { %v4858_v61 = vld [vmem:[#allocation3 + $0xa] sm:$0x3]  ;;  %v4859_v37 = vld [vmem:[#allocation3 + $0xc] sm:$0x3]  ;;  %v4860_v40 = vld [vmem:[#allocation3 + $0xe] sm:$0x3]  ;;  %v4926_v43 = vcombine.low %v4863_v49, %v4864_v46  ;;  %v4899_v25 = vrot.slane %v4891_v51, %v7901_v12 }
 0x762   : > { %v4865_v44 = vld [vmem:[#allocation3 + $0x18] sm:$0x3]  ;;  %v4866_v59 = vld [vmem:[#allocation3 + $0x1a] sm:$0x3]  ;;  %v4867_v58 = vld [vmem:[#allocation3 + $0x1c] sm:$0x3]  ;;  %v4908_v10 = vcombine.low %v4857_v57, %v4858_v61  ;;  %v4909_v63 = vcombine.low %v4859_v37, %v4860_v40  ;;  %v4906_v7 = vrot.slane %v4892_v16, %v7901_v12  ;;  %v4933_v22 = vrot.slane %v4925_v11, %v7901_v12 }
 0x763   : > { %v4868_v60 = vld [vmem:[#allocation3 + $0x1e] sm:$0x3]  ;;  %v4942_v24 = vcombine.low %v4865_v44, %v4866_v59  ;;  %v4940_v5 = vrot.slane %v4926_v43, %v7901_v12 }
 0x764   : > { %v4943_v26 = vcombine.low %v4867_v58, %v4868_v60  ;;  %v4916_v0 = vrot.slane %v4908_v10, %v7901_v12  ;;  %v4923_v42 = vrot.slane %v4909_v63, %v7901_v12  ;;  %v4907_v15 = vcombine.low %v4899_v25, %v4906_v7 }
 0x765   : > { %v4950_v48 = vrot.slane %v4942_v24, %v7901_v12  ;;  %v4941_v20 = vcombine.low %v4933_v22, %v4940_v5 }
 0x766   : > { %v4957_v17 = vrot.slane %v4943_v26, %v7901_v12  ;;  %v4924_v2 = vcombine.low %v4916_v0, %v4923_v42  ;;  %5350 = vmatprep.mubr.f32.mxu0 %v4907_v15 }
 0x767   : > { %5353 = vmatprep.mubr.f32.mxu1 %v4941_v20 }
 0x768   : > { %v4958_v9 = vcombine.low %v4950_v48, %v4957_v17  ;;  %5351 = vmatmul.mubr.f32.vlgmr.msra.gmra.mxu0 %v4924_v2 }
 0x76a   : > { %5354 = vmatmul.mubr.f32.vlgmr.msra.gmra.mxu1 %v4958_v9 }
 0x828   : > { %v5352_v28 = vpop.f32.mrf.mxu0 }
 0x829   : > { %v5035_v47 = vadd.f32 %v5352_v28, %v5295_v23 }
 0x82a   : > { %v5355_v32 = vpop.f32.mrf.mxu1  ;;  %v5029_v21 = vpop.f32.mrf.mxu0 }
 0x82b   : > { %v5045_v41 = vadd.f32 %v5355_v32, %v5295_v23  ;;  %v5069_v19 = vcombine.high %v5035_v47, %v5035_v47  ;;  %v5076_v8 = vrot.slane %v5035_v47, %v7901_v12  ;;  %v5030_v50 = vadd.f32 %v5295_v23, %v5029_v21 }
 0x82c   : > { %v5039_v54 = vpop.f32.mrf.mxu1 }
 0x82d   : > { %v5103_v35 = vcombine.high %v5045_v41, %v5045_v41  ;;  %v5110_v55 = vrot.slane %v5045_v41, %v7901_v12  ;;  %v5040_v27 = vadd.f32 %v5295_v23, %v5039_v54  ;;  %v5083_v30 = vrot.slane %v5069_v19, %v7901_v12  ;;  %5141 = vst.msk [vmem:[%s6246_s17 + $0x8] sm:$0x3] %vm5136_vm2, %v5076_v8 }
 0x82e   : > { %v5084_v45 = vcombine.high %v5076_v8, %v5076_v8  ;;  %v5052_v56 = vcombine.high %v5030_v50, %v5030_v50  ;;  %v5059_v53 = vrot.slane %v5030_v50, %v7901_v12 }
 0x82f   : > { %v5117_v38 = vrot.slane %v5103_v35, %v7901_v12  ;;  %v5118_v36 = vcombine.high %v5110_v55, %v5110_v55  ;;  %5149 = vst.msk [vmem:[%s6246_s17 + $0x18] sm:$0x3] %vm5136_vm2, %v5110_v55  ;;  %v5086_v39 = vcombine.high %v5040_v27, %v5040_v27  ;;  %v5093_v4 = vrot.slane %v5040_v27, %v7901_v12 }
 0x830   : > { %v5085_v6 = vcombine.high %v5083_v30, %v5083_v30  ;;  %5142 = vst.msk [vmem:[%s6246_s17 + $0xa] sm:$0x3] %vm5136_vm2, %v5084_v45  ;;  %5143 = vst.msk [vmem:[%s6246_s17 + $0xc] sm:$0x3] %vm5136_vm2, %v5083_v30  ;;  %v5066_v62 = vrot.slane %v5052_v56, %v7901_v12  ;;  %v5067_v1 = vcombine.high %v5059_v53, %v5059_v53 }
 0x831   : > { %v5119_v14 = vcombine.high %v5117_v38, %v5117_v38  ;;  %5150 = vst.msk [vmem:[%s6246_s17 + $0x1a] sm:$0x3] %vm5136_vm2, %v5118_v36  ;;  %5151 = vst.msk [vmem:[%s6246_s17 + $0x1c] sm:$0x3] %vm5136_vm2, %v5117_v38  ;;  %v5100_v34 = vrot.slane %v5086_v39, %v7901_v12  ;;  %v5101_v29 = vcombine.high %v5093_v4, %v5093_v4 }
 0x832   : > { %5137 = vst.msk [vmem:[%s6246_s17] sm:$0x3] %vm5136_vm2, %v5059_v53  ;;  %5145 = vst.msk [vmem:[%s6246_s17 + $0x10] sm:$0x3] %vm5136_vm2, %v5093_v4  ;;  %v5068_v49 = vcombine.high %v5066_v62, %v5066_v62 }
 0x833   : > { %5144 = vst.msk [vmem:[%s6246_s17 + $0xe] sm:$0x3] %vm5136_vm2, %v5085_v6  ;;  %5152 = vst.msk [vmem:[%s6246_s17 + $0x1e] sm:$0x3] %vm5136_vm2, %v5119_v14  ;;  %v5102_v46 = vcombine.high %v5100_v34, %v5100_v34 }
 0x834   : > { %5138 = vst.msk [vmem:[%s6246_s17 + $0x2] sm:$0x3] %vm5136_vm2, %v5067_v1  ;;  %5139 = vst.msk [vmem:[%s6246_s17 + $0x4] sm:$0x3] %vm5136_vm2, %v5066_v62 }
 0x835   : > { %5146 = vst.msk [vmem:[%s6246_s17 + $0x12] sm:$0x3] %vm5136_vm2, %v5101_v29  ;;  %5147 = vst.msk [vmem:[%s6246_s17 + $0x14] sm:$0x3] %vm5136_vm2, %v5100_v34 }
 0x836   : > { %5140 = vst.msk [vmem:[%s6246_s17 + $0x6] sm:$0x3] %vm5136_vm2, %v5068_v49  ;;  %5148 = vst.msk [vmem:[%s6246_s17 + $0x16] sm:$0x3] %vm5136_vm2, %v5102_v46 }
 0x837 PF: > { %s28_s23 = sadd.s32 1, %s6047_s23   ;;  %s8664_s21 = smov %s6043_s22 }
 0x838   : > { %p25_p5 = scmp.ge.s32.totalorder %s28_s23, 4   ;;  %s8665_s22 = smov %s8667_s30 }
 0x83a   :  { %27 = sbr.rel (!%p25_p5) target bundleno = 6 (0x6), region = 152 }
 0x83f   :  { %5181 = vsyncpa [#allocation7], 1 }
 0x840   :  { %5183 = vsyncpa [#allocation7 + $0x1], 1 }
 0x841   :  { %5184 = vsyncpa [#allocation9], 1 }

</bundles_post_ra>
